<compile_context>
chip_gen: v7x
topology: tpu7x:2x2x1
jax: 0.10.0
libtpu: 0.0.40
codegen_flags: <defaults>
</compile_context>

<pallas_src>
import functools

import jax
import jax.numpy as jnp
from jax import lax
from jax.experimental import pallas as pl
from jax.experimental.pallas import tpu as pltpu

LANES = 128
BN_EPS = 1e-5
VMEM_LIMIT = 48 * 1024 * 1024  # explicit scoped-VMEM cap; fits v5e/v6e/v7x


def _round_up(x, m):
    return (x + m - 1) // m * m


# ------------------------ fused per-layer Pallas kernel --------------------- #

def _conv_bn_relu_pool_kernel(p_ref, w_ref, b_ref, g_ref, bt_ref, o_ref, *,
                              inv_count, c_out):
    """Conv (im2col matmul) + bias + BatchNorm(batch stats) + ReLU + MaxPool2d(2).

    p_ref : (4, Q, Kp) bf16  im2col patches, leading axis = 2x2 pool position
    w_ref : (Kp, 128) bf16   conv weight, rows ordered (kh, kw, cin), cols padded
    b/g/bt: (1, 128)  f32    bias / BN gamma / BN beta (zero-padded lanes)
    o_ref : (Q, c_out) bf16  pooled activation, rows ordered (n, ph, pw)
    """
    # Conv matmul per pool position (bf16 MXU, f32 accumulation).
    xs = [jnp.dot(p_ref[i], w_ref[...], preferred_element_type=jnp.float32)
          + b_ref[...]
          for i in range(4)]

    # Exact batch statistics over all N*H*W positions (all four pool slabs).
    mean = (jnp.sum(xs[0], axis=0, keepdims=True)
            + jnp.sum(xs[1], axis=0, keepdims=True)
            + jnp.sum(xs[2], axis=0, keepdims=True)
            + jnp.sum(xs[3], axis=0, keepdims=True)) * inv_count
    var = (jnp.sum((xs[0] - mean) ** 2, axis=0, keepdims=True)
           + jnp.sum((xs[1] - mean) ** 2, axis=0, keepdims=True)
           + jnp.sum((xs[2] - mean) ** 2, axis=0, keepdims=True)
           + jnp.sum((xs[3] - mean) ** 2, axis=0, keepdims=True)) * inv_count
    scale = g_ref[...] * lax.rsqrt(var + BN_EPS)
    shift = bt_ref[...] - mean * scale

    # BN + ReLU (Dropout p=0 -> identity) + 2x2 max-pool over the leading axis.
    ys = [jnp.maximum(x * scale + shift, 0.0) for x in xs]
    pooled = jnp.maximum(jnp.maximum(ys[0], ys[1]), jnp.maximum(ys[2], ys[3]))
    o_ref[...] = pooled[:, :c_out].astype(o_ref.dtype)


def conv_bn_relu_pool(patches4, w, b, g, bt, *, count, c_out):
    _, Q, Kp = patches4.shape
    kernel = functools.partial(_conv_bn_relu_pool_kernel,
                               inv_count=1.0 / float(count), c_out=c_out)
    return pl.pallas_call(
        kernel,
        out_shape=jax.ShapeDtypeStruct((Q, c_out), jnp.bfloat16),
        grid=(1,),
        in_specs=[
            pl.BlockSpec((4, Q, Kp), lambda i: (0, 0, 0)),
            pl.BlockSpec((Kp, LANES), lambda i: (0, 0)),
            pl.BlockSpec((1, LANES), lambda i: (0, 0)),
            pl.BlockSpec((1, LANES), lambda i: (0, 0)),
            pl.BlockSpec((1, LANES), lambda i: (0, 0)),
        ],
        out_specs=pl.BlockSpec((Q, c_out), lambda i: (0, 0)),
        compiler_params=pltpu.CompilerParams(
            dimension_semantics=("arbitrary",),
            vmem_limit_bytes=VMEM_LIMIT),
    )(patches4, w, b, g, bt)


# --------------------------------- fc kernel -------------------------------- #

def _linear_kernel(x_ref, w_ref, b_ref, o_ref):
    o_ref[...] = (jnp.dot(x_ref[...], w_ref[...],
                          preferred_element_type=jnp.float32) + b_ref[...])


def linear(x, w, b):
    N, K = x.shape
    Cp = w.shape[1]
    return pl.pallas_call(
        _linear_kernel,
        out_shape=jax.ShapeDtypeStruct((N, Cp), jnp.float32),
        grid=(1,),
        in_specs=[
            pl.BlockSpec((N, K), lambda i: (0, 0)),
            pl.BlockSpec((K, Cp), lambda i: (0, 0)),
            pl.BlockSpec((1, Cp), lambda i: (0, 0)),
        ],
        out_specs=pl.BlockSpec((N, Cp), lambda i: (0, 0)),
        compiler_params=pltpu.CompilerParams(
            dimension_semantics=("arbitrary",),
            vmem_limit_bytes=VMEM_LIMIT),
    )(x, w, b)


# ------------------------------ JAX-side glue ------------------------------- #

def im2col_pool_major(x, k, pad):
    """NHWC x -> im2col patches for a stride-1 'same' kxk conv, grouped by 2x2
    pool-window position.  Returns (patches (4, N*(H//2)*(W//2), K_pad) bf16,
    PH, PW); K is ordered (kh, kw, cin); rows of each slab are (n, ph, pw)."""
    N, H, W, C = x.shape
    xp = jnp.pad(x, ((0, 0), (pad, pad), (pad, pad), (0, 0)))
    cols = [xp[:, i:i + H, j:j + W, :] for i in range(k) for j in range(k)]
    K = k * k * C
    patches = jnp.stack(cols, axis=3).reshape(N, H, W, K)
    PH, PW = H // 2, W // 2
    p = patches.reshape(N, PH, 2, PW, 2, K).transpose(2, 4, 0, 1, 3, 5)
    p = p.reshape(4, N * PH * PW, K)
    Kp = _round_up(K, LANES)
    if Kp != K:
        p = jnp.pad(p, ((0, 0), (0, 0), (0, Kp - K)))
    return p.astype(jnp.bfloat16), PH, PW


def init_params(key):
    ks = jax.random.split(key, 6)

    def conv_prep(w, b, cin, cout, k):
        K = k * k * cin
        Kp = _round_up(K, LANES)
        wr = jnp.transpose(w, (2, 3, 1, 0)).reshape(K, cout)   # (kh,kw,cin) x cout
        wp = jnp.zeros((Kp, LANES), jnp.float32).at[:K, :cout].set(wr)
        bp = jnp.zeros((1, LANES), jnp.float32).at[0, :cout].set(b)
        return wp.astype(jnp.bfloat16), bp

    def bn_prep(c):
        g = jnp.zeros((1, LANES), jnp.float32).at[0, :c].set(1.0)
        bt = jnp.zeros((1, LANES), jnp.float32)
        return g, bt

    # Conv2d(1, 16, 5, padding=2)
    f1 = 1 * 5 * 5
    w1 = jax.random.uniform(ks[0], (16, 1, 5, 5), jnp.float32, -f1 ** -0.5, f1 ** -0.5)
    b1 = jax.random.uniform(ks[1], (16,), jnp.float32, -f1 ** -0.5, f1 ** -0.5)
    # Conv2d(16, 32, 5, padding=2)
    f2 = 16 * 5 * 5
    w2 = jax.random.uniform(ks[2], (32, 16, 5, 5), jnp.float32, -f2 ** -0.5, f2 ** -0.5)
    b2 = jax.random.uniform(ks[3], (32,), jnp.float32, -f2 ** -0.5, f2 ** -0.5)
    # Linear(7*7*32, 10)
    f3 = 7 * 7 * 32
    wfc = jax.random.uniform(ks[4], (10, f3), jnp.float32, -f3 ** -0.5, f3 ** -0.5)
    bfc = jax.random.uniform(ks[5], (10,), jnp.float32, -f3 ** -0.5, f3 ** -0.5)

    w1p, b1p = conv_prep(w1, b1, 1, 16, 5)
    w2p, b2p = conv_prep(w2, b2, 16, 32, 5)
    g1, bt1 = bn_prep(16)
    g2, bt2 = bn_prep(32)

    # fc weight reordered ONCE from PyTorch's NCHW flatten (c*49 + h*7 + w) to the
    # (h, w, c) order of the channel-compact layer-2 output, K = 49*32 = 1568 real
    # features only (no zero-lane inflation); output lanes padded to 128.
    w_hwc = wfc.reshape(10, 32, 7, 7).transpose(2, 3, 1, 0).reshape(7 * 7 * 32, 10)
    wfc_p = jnp.zeros((7 * 7 * 32, LANES), jnp.float32).at[:, :10].set(w_hwc)
    wfc_p = wfc_p.astype(jnp.bfloat16)
    bfc_p = jnp.zeros((1, LANES), jnp.float32).at[0, :10].set(bfc)

    return {"w1": w1p, "b1": b1p, "g1": g1, "bt1": bt1,
            "w2": w2p, "b2": b2p, "g2": g2, "bt2": bt2,
            "wfc": wfc_p, "bfc": bfc_p}


def simple_convnet_forward(x_nchw, params):
    N = x_nchw.shape[0]
    x = jnp.transpose(x_nchw, (0, 2, 3, 1))                      # NHWC once, at the boundary

    # layer1: Conv(1->16, k5, p2) + BN + ReLU + MaxPool(2), one fused kernel.
    p1, ph1, pw1 = im2col_pool_major(x, 5, 2)                    # (4, N*14*14, 128) bf16
    a1 = conv_bn_relu_pool(p1, params["w1"], params["b1"], params["g1"], params["bt1"],
                           count=N * 28 * 28, c_out=16)          # (N*14*14, 16) bf16
    a1 = a1.reshape(N, ph1, pw1, 16)                             # free reshape -> NHWC

    # layer2: Conv(16->32, k5, p2) + BN + ReLU + MaxPool(2), one fused kernel.
    p2, ph2, pw2 = im2col_pool_major(a1, 5, 2)                   # (4, N*7*7, 512) bf16
    a2 = conv_bn_relu_pool(p2, params["w2"], params["b2"], params["g2"], params["bt2"],
                           count=N * 14 * 14, c_out=32)          # (N*7*7, 32) bf16

    # fc: compact K = 49*32 = 1568 real features (weight reordered at init to match),
    # lane-padded 128-wide output, sliced back to 10 classes.
    flat = a2.reshape(N, ph2 * pw2 * 32)                         # free contiguous reshape
    logits = linear(flat, params["wfc"], params["bfc"])
    return logits[:, :10]


if __name__ == "__main__":
    key = jax.random.PRNGKey(0)
    kx, kp = jax.random.split(key)
    # MNIST-like input: 1 channel, 28x28, so the flatten matches fc's 7*7*32.
    x = jax.random.normal(kx, (2, 1, 28, 28), dtype=jnp.float32)
    params = init_params(kp)

    fwd = jax.jit(simple_convnet_forward)
    out = jax.block_until_ready(fwd(x, params))
    assert out.shape == (2, 10) and out.dtype == jnp.float32
    print("KERNEL_OK")
</pallas_src>

<mosaic_0001>
module attributes {stable_mosaic.version = 11 : i64} {
  func.func @_conv_bn_relu_pool_kernel(%arg0: i32, %arg1: memref<4x392x128xbf16, #tpu.memory_space<vmem>>, %arg2: memref<128x128xbf16, #tpu.memory_space<vmem>>, %arg3: memref<1x128xf32, #tpu.memory_space<vmem>>, %arg4: memref<1x128xf32, #tpu.memory_space<vmem>>, %arg5: memref<1x128xf32, #tpu.memory_space<vmem>>, %arg6: memref<392x16xbf16, #tpu.memory_space<vmem>>) attributes {dimension_semantics = [#tpu.dimension_semantics<arbitrary>], iteration_bounds = array<i64: 1>, scalar_prefetch = 0 : i64, scratch_operands = 0 : i64, tpu.core_type = #tpu.core_type<tc>, window_params = [{pipeline_mode = #tpu.pipeline_mode<synchronous>, transform_indices = @transform_0, window_bounds = array<i64: 4, 392, 128>}, {pipeline_mode = #tpu.pipeline_mode<synchronous>, transform_indices = @transform_1, window_bounds = array<i64: 128, 128>}, {pipeline_mode = #tpu.pipeline_mode<synchronous>, transform_indices = @transform_2, window_bounds = array<i64: 1, 128>}, {pipeline_mode = #tpu.pipeline_mode<synchronous>, transform_indices = @transform_3, window_bounds = array<i64: 1, 128>}, {pipeline_mode = #tpu.pipeline_mode<synchronous>, transform_indices = @transform_4, window_bounds = array<i64: 1, 128>}, {pipeline_mode = #tpu.pipeline_mode<synchronous>, transform_indices = @transform_5, window_bounds = array<i64: 392, 16>}]} {
    %c0 = arith.constant 0 : index
    %c0_0 = arith.constant 0 : index
    %c0_1 = arith.constant 0 : index
    %0 = vector.load %arg1[%c0, %c0_0, %c0_1] : memref<4x392x128xbf16, #tpu.memory_space<vmem>>, vector<1x392x128xbf16>
    %1 = vector.shape_cast %0 : vector<1x392x128xbf16> to vector<392x128xbf16>
    %c0_2 = arith.constant 0 : index
    %c0_3 = arith.constant 0 : index
    %2 = vector.load %arg2[%c0_2, %c0_3] : memref<128x128xbf16, #tpu.memory_space<vmem>>, vector<128x128xbf16>
    %cst = arith.constant dense<0.000000e+00> : vector<392x128xf32>
    %3 = tpu.matmul %1, %2, %cst {dimension_numbers = #tpu.dot_dimension_numbers<[1], [0], [0], [1], [0, 0, 1, 1], [], []>} : vector<392x128xbf16>, vector<128x128xbf16>, vector<392x128xf32> -> vector<392x128xf32>
    %c0_4 = arith.constant 0 : index
    %c0_5 = arith.constant 0 : index
    %4 = vector.load %arg3[%c0_4, %c0_5] : memref<1x128xf32, #tpu.memory_space<vmem>>, vector<1x128xf32>
    %5 = vector.broadcast %4 : vector<1x128xf32> to vector<392x128xf32>
    %6 = arith.addf %3, %5 : vector<392x128xf32>
    %c1 = arith.constant 1 : index
    %c0_6 = arith.constant 0 : index
    %c0_7 = arith.constant 0 : index
    %7 = vector.load %arg1[%c1, %c0_6, %c0_7] : memref<4x392x128xbf16, #tpu.memory_space<vmem>>, vector<1x392x128xbf16>
    %8 = vector.shape_cast %7 : vector<1x392x128xbf16> to vector<392x128xbf16>
    %c0_8 = arith.constant 0 : index
    %c0_9 = arith.constant 0 : index
    %9 = vector.load %arg2[%c0_8, %c0_9] : memref<128x128xbf16, #tpu.memory_space<vmem>>, vector<128x128xbf16>
    %cst_10 = arith.constant dense<0.000000e+00> : vector<392x128xf32>
    %10 = tpu.matmul %8, %9, %cst_10 {dimension_numbers = #tpu.dot_dimension_numbers<[1], [0], [0], [1], [0, 0, 1, 1], [], []>} : vector<392x128xbf16>, vector<128x128xbf16>, vector<392x128xf32> -> vector<392x128xf32>
    %c0_11 = arith.constant 0 : index
    %c0_12 = arith.constant 0 : index
    %11 = vector.load %arg3[%c0_11, %c0_12] : memref<1x128xf32, #tpu.memory_space<vmem>>, vector<1x128xf32>
    %12 = vector.broadcast %11 : vector<1x128xf32> to vector<392x128xf32>
    %13 = arith.addf %10, %12 : vector<392x128xf32>
    %c2 = arith.constant 2 : index
    %c0_13 = arith.constant 0 : index
    %c0_14 = arith.constant 0 : index
    %14 = vector.load %arg1[%c2, %c0_13, %c0_14] : memref<4x392x128xbf16, #tpu.memory_space<vmem>>, vector<1x392x128xbf16>
    %15 = vector.shape_cast %14 : vector<1x392x128xbf16> to vector<392x128xbf16>
    %c0_15 = arith.constant 0 : index
    %c0_16 = arith.constant 0 : index
    %16 = vector.load %arg2[%c0_15, %c0_16] : memref<128x128xbf16, #tpu.memory_space<vmem>>, vector<128x128xbf16>
    %cst_17 = arith.constant dense<0.000000e+00> : vector<392x128xf32>
    %17 = tpu.matmul %15, %16, %cst_17 {dimension_numbers = #tpu.dot_dimension_numbers<[1], [0], [0], [1], [0, 0, 1, 1], [], []>} : vector<392x128xbf16>, vector<128x128xbf16>, vector<392x128xf32> -> vector<392x128xf32>
    %c0_18 = arith.constant 0 : index
    %c0_19 = arith.constant 0 : index
    %18 = vector.load %arg3[%c0_18, %c0_19] : memref<1x128xf32, #tpu.memory_space<vmem>>, vector<1x128xf32>
    %19 = vector.broadcast %18 : vector<1x128xf32> to vector<392x128xf32>
    %20 = arith.addf %17, %19 : vector<392x128xf32>
    %c3 = arith.constant 3 : index
    %c0_20 = arith.constant 0 : index
    %c0_21 = arith.constant 0 : index
    %21 = vector.load %arg1[%c3, %c0_20, %c0_21] : memref<4x392x128xbf16, #tpu.memory_space<vmem>>, vector<1x392x128xbf16>
    %22 = vector.shape_cast %21 : vector<1x392x128xbf16> to vector<392x128xbf16>
    %c0_22 = arith.constant 0 : index
    %c0_23 = arith.constant 0 : index
    %23 = vector.load %arg2[%c0_22, %c0_23] : memref<128x128xbf16, #tpu.memory_space<vmem>>, vector<128x128xbf16>
    %cst_24 = arith.constant dense<0.000000e+00> : vector<392x128xf32>
    %24 = tpu.matmul %22, %23, %cst_24 {dimension_numbers = #tpu.dot_dimension_numbers<[1], [0], [0], [1], [0, 0, 1, 1], [], []>} : vector<392x128xbf16>, vector<128x128xbf16>, vector<392x128xf32> -> vector<392x128xf32>
    %c0_25 = arith.constant 0 : index
    %c0_26 = arith.constant 0 : index
    %25 = vector.load %arg3[%c0_25, %c0_26] : memref<1x128xf32, #tpu.memory_space<vmem>>, vector<1x128xf32>
    %26 = vector.broadcast %25 : vector<1x128xf32> to vector<392x128xf32>
    %27 = arith.addf %24, %26 : vector<392x128xf32>
    %cst_27 = arith.constant dense<0.000000e+00> : vector<128xf32>
    %28 = vector.multi_reduction <add>, %6, %cst_27 [0] : vector<392x128xf32> to vector<128xf32>
    %29 = vector.shape_cast %28 : vector<128xf32> to vector<1x128xf32>
    %cst_28 = arith.constant dense<0.000000e+00> : vector<128xf32>
    %30 = vector.multi_reduction <add>, %13, %cst_28 [0] : vector<392x128xf32> to vector<128xf32>
    %31 = vector.shape_cast %30 : vector<128xf32> to vector<1x128xf32>
    %32 = arith.addf %29, %31 : vector<1x128xf32>
    %cst_29 = arith.constant dense<0.000000e+00> : vector<128xf32>
    %33 = vector.multi_reduction <add>, %20, %cst_29 [0] : vector<392x128xf32> to vector<128xf32>
    %34 = vector.shape_cast %33 : vector<128xf32> to vector<1x128xf32>
    %35 = arith.addf %32, %34 : vector<1x128xf32>
    %cst_30 = arith.constant dense<0.000000e+00> : vector<128xf32>
    %36 = vector.multi_reduction <add>, %27, %cst_30 [0] : vector<392x128xf32> to vector<128xf32>
    %37 = vector.shape_cast %36 : vector<128xf32> to vector<1x128xf32>
    %38 = arith.addf %35, %37 : vector<1x128xf32>
    %cst_31 = arith.constant 6.37755089E-4 : f32
    %39 = vector.broadcast %cst_31 : f32 to vector<1x128xf32>
    %40 = arith.mulf %38, %39 : vector<1x128xf32>
    %41 = vector.broadcast %40 : vector<1x128xf32> to vector<392x128xf32>
    %42 = arith.subf %6, %41 : vector<392x128xf32>
    %43 = arith.mulf %42, %42 : vector<392x128xf32>
    %cst_32 = arith.constant dense<0.000000e+00> : vector<128xf32>
    %44 = vector.multi_reduction <add>, %43, %cst_32 [0] : vector<392x128xf32> to vector<128xf32>
    %45 = vector.shape_cast %44 : vector<128xf32> to vector<1x128xf32>
    %46 = vector.broadcast %40 : vector<1x128xf32> to vector<392x128xf32>
    %47 = arith.subf %13, %46 : vector<392x128xf32>
    %48 = arith.mulf %47, %47 : vector<392x128xf32>
    %cst_33 = arith.constant dense<0.000000e+00> : vector<128xf32>
    %49 = vector.multi_reduction <add>, %48, %cst_33 [0] : vector<392x128xf32> to vector<128xf32>
    %50 = vector.shape_cast %49 : vector<128xf32> to vector<1x128xf32>
    %51 = arith.addf %45, %50 : vector<1x128xf32>
    %52 = vector.broadcast %40 : vector<1x128xf32> to vector<392x128xf32>
    %53 = arith.subf %20, %52 : vector<392x128xf32>
    %54 = arith.mulf %53, %53 : vector<392x128xf32>
    %cst_34 = arith.constant dense<0.000000e+00> : vector<128xf32>
    %55 = vector.multi_reduction <add>, %54, %cst_34 [0] : vector<392x128xf32> to vector<128xf32>
    %56 = vector.shape_cast %55 : vector<128xf32> to vector<1x128xf32>
    %57 = arith.addf %51, %56 : vector<1x128xf32>
    %58 = vector.broadcast %40 : vector<1x128xf32> to vector<392x128xf32>
    %59 = arith.subf %27, %58 : vector<392x128xf32>
    %60 = arith.mulf %59, %59 : vector<392x128xf32>
    %cst_35 = arith.constant dense<0.000000e+00> : vector<128xf32>
    %61 = vector.multi_reduction <add>, %60, %cst_35 [0] : vector<392x128xf32> to vector<128xf32>
    %62 = vector.shape_cast %61 : vector<128xf32> to vector<1x128xf32>
    %63 = arith.addf %57, %62 : vector<1x128xf32>
    %cst_36 = arith.constant 6.37755089E-4 : f32
    %64 = vector.broadcast %cst_36 : f32 to vector<1x128xf32>
    %65 = arith.mulf %63, %64 : vector<1x128xf32>
    %c0_37 = arith.constant 0 : index
    %c0_38 = arith.constant 0 : index
    %66 = vector.load %arg4[%c0_37, %c0_38] : memref<1x128xf32, #tpu.memory_space<vmem>>, vector<1x128xf32>
    %cst_39 = arith.constant 9.99999974E-6 : f32
    %67 = vector.broadcast %cst_39 : f32 to vector<1x128xf32>
    %68 = arith.addf %65, %67 : vector<1x128xf32>
    %69 = math.rsqrt %68 : vector<1x128xf32>
    %70 = arith.mulf %66, %69 : vector<1x128xf32>
    %c0_40 = arith.constant 0 : index
    %c0_41 = arith.constant 0 : index
    %71 = vector.load %arg5[%c0_40, %c0_41] : memref<1x128xf32, #tpu.memory_space<vmem>>, vector<1x128xf32>
    %72 = arith.mulf %40, %70 : vector<1x128xf32>
    %73 = arith.subf %71, %72 : vector<1x128xf32>
    %74 = vector.broadcast %70 : vector<1x128xf32> to vector<392x128xf32>
    %75 = arith.mulf %6, %74 : vector<392x128xf32>
    %76 = vector.broadcast %73 : vector<1x128xf32> to vector<392x128xf32>
    %77 = arith.addf %75, %76 : vector<392x128xf32>
    %cst_42 = arith.constant 0.000000e+00 : f32
    %78 = vector.broadcast %cst_42 : f32 to vector<392x128xf32>
    %79 = arith.maximumf %77, %78 : vector<392x128xf32>
    %80 = vector.broadcast %70 : vector<1x128xf32> to vector<392x128xf32>
    %81 = arith.mulf %13, %80 : vector<392x128xf32>
    %82 = vector.broadcast %73 : vector<1x128xf32> to vector<392x128xf32>
    %83 = arith.addf %81, %82 : vector<392x128xf32>
    %cst_43 = arith.constant 0.000000e+00 : f32
    %84 = vector.broadcast %cst_43 : f32 to vector<392x128xf32>
    %85 = arith.maximumf %83, %84 : vector<392x128xf32>
    %86 = vector.broadcast %70 : vector<1x128xf32> to vector<392x128xf32>
    %87 = arith.mulf %20, %86 : vector<392x128xf32>
    %88 = vector.broadcast %73 : vector<1x128xf32> to vector<392x128xf32>
    %89 = arith.addf %87, %88 : vector<392x128xf32>
    %cst_44 = arith.constant 0.000000e+00 : f32
    %90 = vector.broadcast %cst_44 : f32 to vector<392x128xf32>
    %91 = arith.maximumf %89, %90 : vector<392x128xf32>
    %92 = vector.broadcast %70 : vector<1x128xf32> to vector<392x128xf32>
    %93 = arith.mulf %27, %92 : vector<392x128xf32>
    %94 = vector.broadcast %73 : vector<1x128xf32> to vector<392x128xf32>
    %95 = arith.addf %93, %94 : vector<392x128xf32>
    %cst_45 = arith.constant 0.000000e+00 : f32
    %96 = vector.broadcast %cst_45 : f32 to vector<392x128xf32>
    %97 = arith.maximumf %95, %96 : vector<392x128xf32>
    %98 = arith.maximumf %79, %85 : vector<392x128xf32>
    %99 = arith.maximumf %91, %97 : vector<392x128xf32>
    %100 = arith.maximumf %98, %99 : vector<392x128xf32>
    %101 = vector.extract_strided_slice %100 {offsets = [0, 0], sizes = [392, 16], strides = [1, 1]} : vector<392x128xf32> to vector<392x16xf32>
    %102 = arith.truncf %101 : vector<392x16xf32> to vector<392x16xbf16>
    %c0_46 = arith.constant 0 : index
    %c0_47 = arith.constant 0 : index
    %103 = vector.load %arg6[%c0_46, %c0_47] : memref<392x16xbf16, #tpu.memory_space<vmem>>, vector<392x16xbf16>
    tpu.vector_store %arg6[%c0_46, %c0_47], %102 {strides = array<i32>} : memref<392x16xbf16, #tpu.memory_space<vmem>>, vector<392x16xbf16>,
    return
  }
  func.func @transform_0(%arg0: i32) -> (i32, i32, i32) {
    %c0_i32 = arith.constant 0 : i32
    %c0_i32_0 = arith.constant 0 : i32
    %c0_i32_1 = arith.constant 0 : i32
    %c0_i32_2 = arith.constant 0 : i32
    return %c0_i32, %c0_i32_0, %c0_i32_1 : i32, i32, i32
  }
  func.func @transform_1(%arg0: i32) -> (i32, i32) {
    %c0_i32 = arith.constant 0 : i32
    %c0_i32_0 = arith.constant 0 : i32
    %c0_i32_1 = arith.constant 0 : i32
    return %c0_i32, %c0_i32_0 : i32, i32
  }
  func.func @transform_2(%arg0: i32) -> (i32, i32) {
    %c0_i32 = arith.constant 0 : i32
    %c0_i32_0 = arith.constant 0 : i32
    %c0_i32_1 = arith.constant 0 : i32
    return %c0_i32, %c0_i32_0 : i32, i32
  }
  func.func @transform_3(%arg0: i32) -> (i32, i32) {
    %c0_i32 = arith.constant 0 : i32
    %c0_i32_0 = arith.constant 0 : i32
    %c0_i32_1 = arith.constant 0 : i32
    return %c0_i32, %c0_i32_0 : i32, i32
  }
  func.func @transform_4(%arg0: i32) -> (i32, i32) {
    %c0_i32 = arith.constant 0 : i32
    %c0_i32_0 = arith.constant 0 : i32
    %c0_i32_1 = arith.constant 0 : i32
    return %c0_i32, %c0_i32_0 : i32, i32
  }
  func.func @transform_5(%arg0: i32) -> (i32, i32) {
    %c0_i32 = arith.constant 0 : i32
    %c0_i32_0 = arith.constant 0 : i32
    %c0_i32_1 = arith.constant 0 : i32
    return %c0_i32, %c0_i32_0 : i32, i32
  }
}

module attributes {stable_mosaic.version = 11 : i64} {
  func.func @_conv_bn_relu_pool_kernel(%arg0: i32, %arg1: memref<4x98x512xbf16, #tpu.memory_space<vmem>>, %arg2: memref<512x128xbf16, #tpu.memory_space<vmem>>, %arg3: memref<1x128xf32, #tpu.memory_space<vmem>>, %arg4: memref<1x128xf32, #tpu.memory_space<vmem>>, %arg5: memref<1x128xf32, #tpu.memory_space<vmem>>, %arg6: memref<98x32xbf16, #tpu.memory_space<vmem>>) attributes {dimension_semantics = [#tpu.dimension_semantics<arbitrary>], iteration_bounds = array<i64: 1>, scalar_prefetch = 0 : i64, scratch_operands = 0 : i64, tpu.core_type = #tpu.core_type<tc>, window_params = [{pipeline_mode = #tpu.pipeline_mode<synchronous>, transform_indices = @transform_0, window_bounds = array<i64: 4, 98, 512>}, {pipeline_mode = #tpu.pipeline_mode<synchronous>, transform_indices = @transform_1, window_bounds = array<i64: 512, 128>}, {pipeline_mode = #tpu.pipeline_mode<synchronous>, transform_indices = @transform_2, window_bounds = array<i64: 1, 128>}, {pipeline_mode = #tpu.pipeline_mode<synchronous>, transform_indices = @transform_3, window_bounds = array<i64: 1, 128>}, {pipeline_mode = #tpu.pipeline_mode<synchronous>, transform_indices = @transform_4, window_bounds = array<i64: 1, 128>}, {pipeline_mode = #tpu.pipeline_mode<synchronous>, transform_indices = @transform_5, window_bounds = array<i64: 98, 32>}]} {
    %c0 = arith.constant 0 : index
    %c0_0 = arith.constant 0 : index
    %c0_1 = arith.constant 0 : index
    %0 = vector.load %arg1[%c0, %c0_0, %c0_1] : memref<4x98x512xbf16, #tpu.memory_space<vmem>>, vector<1x98x512xbf16>
    %1 = vector.shape_cast %0 : vector<1x98x512xbf16> to vector<98x512xbf16>
    %c0_2 = arith.constant 0 : index
    %c0_3 = arith.constant 0 : index
    %2 = vector.load %arg2[%c0_2, %c0_3] : memref<512x128xbf16, #tpu.memory_space<vmem>>, vector<512x128xbf16>
    %cst = arith.constant dense<0.000000e+00> : vector<98x128xf32>
    %3 = tpu.matmul %1, %2, %cst {dimension_numbers = #tpu.dot_dimension_numbers<[1], [0], [0], [1], [0, 0, 1, 1], [], []>} : vector<98x512xbf16>, vector<512x128xbf16>, vector<98x128xf32> -> vector<98x128xf32>
    %c0_4 = arith.constant 0 : index
    %c0_5 = arith.constant 0 : index
    %4 = vector.load %arg3[%c0_4, %c0_5] : memref<1x128xf32, #tpu.memory_space<vmem>>, vector<1x128xf32>
    %5 = vector.broadcast %4 : vector<1x128xf32> to vector<98x128xf32>
    %6 = arith.addf %3, %5 : vector<98x128xf32>
    %c1 = arith.constant 1 : index
    %c0_6 = arith.constant 0 : index
    %c0_7 = arith.constant 0 : index
    %7 = vector.load %arg1[%c1, %c0_6, %c0_7] : memref<4x98x512xbf16, #tpu.memory_space<vmem>>, vector<1x98x512xbf16>
    %8 = vector.shape_cast %7 : vector<1x98x512xbf16> to vector<98x512xbf16>
    %c0_8 = arith.constant 0 : index
    %c0_9 = arith.constant 0 : index
    %9 = vector.load %arg2[%c0_8, %c0_9] : memref<512x128xbf16, #tpu.memory_space<vmem>>, vector<512x128xbf16>
    %cst_10 = arith.constant dense<0.000000e+00> : vector<98x128xf32>
    %10 = tpu.matmul %8, %9, %cst_10 {dimension_numbers = #tpu.dot_dimension_numbers<[1], [0], [0], [1], [0, 0, 1, 1], [], []>} : vector<98x512xbf16>, vector<512x128xbf16>, vector<98x128xf32> -> vector<98x128xf32>
    %c0_11 = arith.constant 0 : index
    %c0_12 = arith.constant 0 : index
    %11 = vector.load %arg3[%c0_11, %c0_12] : memref<1x128xf32, #tpu.memory_space<vmem>>, vector<1x128xf32>
    %12 = vector.broadcast %11 : vector<1x128xf32> to vector<98x128xf32>
    %13 = arith.addf %10, %12 : vector<98x128xf32>
    %c2 = arith.constant 2 : index
    %c0_13 = arith.constant 0 : index
    %c0_14 = arith.constant 0 : index
    %14 = vector.load %arg1[%c2, %c0_13, %c0_14] : memref<4x98x512xbf16, #tpu.memory_space<vmem>>, vector<1x98x512xbf16>
    %15 = vector.shape_cast %14 : vector<1x98x512xbf16> to vector<98x512xbf16>
    %c0_15 = arith.constant 0 : index
    %c0_16 = arith.constant 0 : index
    %16 = vector.load %arg2[%c0_15, %c0_16] : memref<512x128xbf16, #tpu.memory_space<vmem>>, vector<512x128xbf16>
    %cst_17 = arith.constant dense<0.000000e+00> : vector<98x128xf32>
    %17 = tpu.matmul %15, %16, %cst_17 {dimension_numbers = #tpu.dot_dimension_numbers<[1], [0], [0], [1], [0, 0, 1, 1], [], []>} : vector<98x512xbf16>, vector<512x128xbf16>, vector<98x128xf32> -> vector<98x128xf32>
    %c0_18 = arith.constant 0 : index
    %c0_19 = arith.constant 0 : index
    %18 = vector.load %arg3[%c0_18, %c0_19] : memref<1x128xf32, #tpu.memory_space<vmem>>, vector<1x128xf32>
    %19 = vector.broadcast %18 : vector<1x128xf32> to vector<98x128xf32>
    %20 = arith.addf %17, %19 : vector<98x128xf32>
    %c3 = arith.constant 3 : index
    %c0_20 = arith.constant 0 : index
    %c0_21 = arith.constant 0 : index
    %21 = vector.load %arg1[%c3, %c0_20, %c0_21] : memref<4x98x512xbf16, #tpu.memory_space<vmem>>, vector<1x98x512xbf16>
    %22 = vector.shape_cast %21 : vector<1x98x512xbf16> to vector<98x512xbf16>
    %c0_22 = arith.constant 0 : index
    %c0_23 = arith.constant 0 : index
    %23 = vector.load %arg2[%c0_22, %c0_23] : memref<512x128xbf16, #tpu.memory_space<vmem>>, vector<512x128xbf16>
    %cst_24 = arith.constant dense<0.000000e+00> : vector<98x128xf32>
    %24 = tpu.matmul %22, %23, %cst_24 {dimension_numbers = #tpu.dot_dimension_numbers<[1], [0], [0], [1], [0, 0, 1, 1], [], []>} : vector<98x512xbf16>, vector<512x128xbf16>, vector<98x128xf32> -> vector<98x128xf32>
    %c0_25 = arith.constant 0 : index
    %c0_26 = arith.constant 0 : index
    %25 = vector.load %arg3[%c0_25, %c0_26] : memref<1x128xf32, #tpu.memory_space<vmem>>, vector<1x128xf32>
    %26 = vector.broadcast %25 : vector<1x128xf32> to vector<98x128xf32>
    %27 = arith.addf %24, %26 : vector<98x128xf32>
    %cst_27 = arith.constant dense<0.000000e+00> : vector<128xf32>
    %28 = vector.multi_reduction <add>, %6, %cst_27 [0] : vector<98x128xf32> to vector<128xf32>
    %29 = vector.shape_cast %28 : vector<128xf32> to vector<1x128xf32>
    %cst_28 = arith.constant dense<0.000000e+00> : vector<128xf32>
    %30 = vector.multi_reduction <add>, %13, %cst_28 [0] : vector<98x128xf32> to vector<128xf32>
    %31 = vector.shape_cast %30 : vector<128xf32> to vector<1x128xf32>
    %32 = arith.addf %29, %31 : vector<1x128xf32>
    %cst_29 = arith.constant dense<0.000000e+00> : vector<128xf32>
    %33 = vector.multi_reduction <add>, %20, %cst_29 [0] : vector<98x128xf32> to vector<128xf32>
    %34 = vector.shape_cast %33 : vector<128xf32> to vector<1x128xf32>
    %35 = arith.addf %32, %34 : vector<1x128xf32>
    %cst_30 = arith.constant dense<0.000000e+00> : vector<128xf32>
    %36 = vector.multi_reduction <add>, %27, %cst_30 [0] : vector<98x128xf32> to vector<128xf32>
    %37 = vector.shape_cast %36 : vector<128xf32> to vector<1x128xf32>
    %38 = arith.addf %35, %37 : vector<1x128xf32>
    %cst_31 = arith.constant 0.00255102036 : f32
    %39 = vector.broadcast %cst_31 : f32 to vector<1x128xf32>
    %40 = arith.mulf %38, %39 : vector<1x128xf32>
    %41 = vector.broadcast %40 : vector<1x128xf32> to vector<98x128xf32>
    %42 = arith.subf %6, %41 : vector<98x128xf32>
    %43 = arith.mulf %42, %42 : vector<98x128xf32>
    %cst_32 = arith.constant dense<0.000000e+00> : vector<128xf32>
    %44 = vector.multi_reduction <add>, %43, %cst_32 [0] : vector<98x128xf32> to vector<128xf32>
    %45 = vector.shape_cast %44 : vector<128xf32> to vector<1x128xf32>
    %46 = vector.broadcast %40 : vector<1x128xf32> to vector<98x128xf32>
    %47 = arith.subf %13, %46 : vector<98x128xf32>
    %48 = arith.mulf %47, %47 : vector<98x128xf32>
    %cst_33 = arith.constant dense<0.000000e+00> : vector<128xf32>
    %49 = vector.multi_reduction <add>, %48, %cst_33 [0] : vector<98x128xf32> to vector<128xf32>
    %50 = vector.shape_cast %49 : vector<128xf32> to vector<1x128xf32>
    %51 = arith.addf %45, %50 : vector<1x128xf32>
    %52 = vector.broadcast %40 : vector<1x128xf32> to vector<98x128xf32>
    %53 = arith.subf %20, %52 : vector<98x128xf32>
    %54 = arith.mulf %53, %53 : vector<98x128xf32>
    %cst_34 = arith.constant dense<0.000000e+00> : vector<128xf32>
    %55 = vector.multi_reduction <add>, %54, %cst_34 [0] : vector<98x128xf32> to vector<128xf32>
    %56 = vector.shape_cast %55 : vector<128xf32> to vector<1x128xf32>
    %57 = arith.addf %51, %56 : vector<1x128xf32>
    %58 = vector.broadcast %40 : vector<1x128xf32> to vector<98x128xf32>
    %59 = arith.subf %27, %58 : vector<98x128xf32>
    %60 = arith.mulf %59, %59 : vector<98x128xf32>
    %cst_35 = arith.constant dense<0.000000e+00> : vector<128xf32>
    %61 = vector.multi_reduction <add>, %60, %cst_35 [0] : vector<98x128xf32> to vector<128xf32>
    %62 = vector.shape_cast %61 : vector<128xf32> to vector<1x128xf32>
    %63 = arith.addf %57, %62 : vector<1x128xf32>
    %cst_36 = arith.constant 0.00255102036 : f32
    %64 = vector.broadcast %cst_36 : f32 to vector<1x128xf32>
    %65 = arith.mulf %63, %64 : vector<1x128xf32>
    %c0_37 = arith.constant 0 : index
    %c0_38 = arith.constant 0 : index
    %66 = vector.load %arg4[%c0_37, %c0_38] : memref<1x128xf32, #tpu.memory_space<vmem>>, vector<1x128xf32>
    %cst_39 = arith.constant 9.99999974E-6 : f32
    %67 = vector.broadcast %cst_39 : f32 to vector<1x128xf32>
    %68 = arith.addf %65, %67 : vector<1x128xf32>
    %69 = math.rsqrt %68 : vector<1x128xf32>
    %70 = arith.mulf %66, %69 : vector<1x128xf32>
    %c0_40 = arith.constant 0 : index
    %c0_41 = arith.constant 0 : index
    %71 = vector.load %arg5[%c0_40, %c0_41] : memref<1x128xf32, #tpu.memory_space<vmem>>, vector<1x128xf32>
    %72 = arith.mulf %40, %70 : vector<1x128xf32>
    %73 = arith.subf %71, %72 : vector<1x128xf32>
    %74 = vector.broadcast %70 : vector<1x128xf32> to vector<98x128xf32>
    %75 = arith.mulf %6, %74 : vector<98x128xf32>
    %76 = vector.broadcast %73 : vector<1x128xf32> to vector<98x128xf32>
    %77 = arith.addf %75, %76 : vector<98x128xf32>
    %cst_42 = arith.constant 0.000000e+00 : f32
    %78 = vector.broadcast %cst_42 : f32 to vector<98x128xf32>
    %79 = arith.maximumf %77, %78 : vector<98x128xf32>
    %80 = vector.broadcast %70 : vector<1x128xf32> to vector<98x128xf32>
    %81 = arith.mulf %13, %80 : vector<98x128xf32>
    %82 = vector.broadcast %73 : vector<1x128xf32> to vector<98x128xf32>
    %83 = arith.addf %81, %82 : vector<98x128xf32>
    %cst_43 = arith.constant 0.000000e+00 : f32
    %84 = vector.broadcast %cst_43 : f32 to vector<98x128xf32>
    %85 = arith.maximumf %83, %84 : vector<98x128xf32>
    %86 = vector.broadcast %70 : vector<1x128xf32> to vector<98x128xf32>
    %87 = arith.mulf %20, %86 : vector<98x128xf32>
    %88 = vector.broadcast %73 : vector<1x128xf32> to vector<98x128xf32>
    %89 = arith.addf %87, %88 : vector<98x128xf32>
    %cst_44 = arith.constant 0.000000e+00 : f32
    %90 = vector.broadcast %cst_44 : f32 to vector<98x128xf32>
    %91 = arith.maximumf %89, %90 : vector<98x128xf32>
    %92 = vector.broadcast %70 : vector<1x128xf32> to vector<98x128xf32>
    %93 = arith.mulf %27, %92 : vector<98x128xf32>
    %94 = vector.broadcast %73 : vector<1x128xf32> to vector<98x128xf32>
    %95 = arith.addf %93, %94 : vector<98x128xf32>
    %cst_45 = arith.constant 0.000000e+00 : f32
    %96 = vector.broadcast %cst_45 : f32 to vector<98x128xf32>
    %97 = arith.maximumf %95, %96 : vector<98x128xf32>
    %98 = arith.maximumf %79, %85 : vector<98x128xf32>
    %99 = arith.maximumf %91, %97 : vector<98x128xf32>
    %100 = arith.maximumf %98, %99 : vector<98x128xf32>
    %101 = vector.extract_strided_slice %100 {offsets = [0, 0], sizes = [98, 32], strides = [1, 1]} : vector<98x128xf32> to vector<98x32xf32>
    %102 = arith.truncf %101 : vector<98x32xf32> to vector<98x32xbf16>
    %c0_46 = arith.constant 0 : index
    %c0_47 = arith.constant 0 : index
    %103 = vector.load %arg6[%c0_46, %c0_47] : memref<98x32xbf16, #tpu.memory_space<vmem>>, vector<98x32xbf16>
    tpu.vector_store %arg6[%c0_46, %c0_47], %102 {strides = array<i32>} : memref<98x32xbf16, #tpu.memory_space<vmem>>, vector<98x32xbf16>,
    return
  }
  func.func @transform_0(%arg0: i32) -> (i32, i32, i32) {
    %c0_i32 = arith.constant 0 : i32
    %c0_i32_0 = arith.constant 0 : i32
    %c0_i32_1 = arith.constant 0 : i32
    %c0_i32_2 = arith.constant 0 : i32
    return %c0_i32, %c0_i32_0, %c0_i32_1 : i32, i32, i32
  }
  func.func @transform_1(%arg0: i32) -> (i32, i32) {
    %c0_i32 = arith.constant 0 : i32
    %c0_i32_0 = arith.constant 0 : i32
    %c0_i32_1 = arith.constant 0 : i32
    return %c0_i32, %c0_i32_0 : i32, i32
  }
  func.func @transform_2(%arg0: i32) -> (i32, i32) {
    %c0_i32 = arith.constant 0 : i32
    %c0_i32_0 = arith.constant 0 : i32
    %c0_i32_1 = arith.constant 0 : i32
    return %c0_i32, %c0_i32_0 : i32, i32
  }
  func.func @transform_3(%arg0: i32) -> (i32, i32) {
    %c0_i32 = arith.constant 0 : i32
    %c0_i32_0 = arith.constant 0 : i32
    %c0_i32_1 = arith.constant 0 : i32
    return %c0_i32, %c0_i32_0 : i32, i32
  }
  func.func @transform_4(%arg0: i32) -> (i32, i32) {
    %c0_i32 = arith.constant 0 : i32
    %c0_i32_0 = arith.constant 0 : i32
    %c0_i32_1 = arith.constant 0 : i32
    return %c0_i32, %c0_i32_0 : i32, i32
  }
  func.func @transform_5(%arg0: i32) -> (i32, i32) {
    %c0_i32 = arith.constant 0 : i32
    %c0_i32_0 = arith.constant 0 : i32
    %c0_i32_1 = arith.constant 0 : i32
    return %c0_i32, %c0_i32_0 : i32, i32
  }
}

module attributes {stable_mosaic.version = 11 : i64} {
  func.func @_linear_kernel(%arg0: i32, %arg1: memref<2x1568xbf16, #tpu.memory_space<vmem>>, %arg2: memref<1568x128xbf16, #tpu.memory_space<vmem>>, %arg3: memref<1x128xf32, #tpu.memory_space<vmem>>, %arg4: memref<2x128xf32, #tpu.memory_space<vmem>>) attributes {dimension_semantics = [#tpu.dimension_semantics<arbitrary>], iteration_bounds = array<i64: 1>, scalar_prefetch = 0 : i64, scratch_operands = 0 : i64, tpu.core_type = #tpu.core_type<tc>, window_params = [{pipeline_mode = #tpu.pipeline_mode<synchronous>, transform_indices = @transform_0, window_bounds = array<i64: 2, 1568>}, {pipeline_mode = #tpu.pipeline_mode<synchronous>, transform_indices = @transform_1, window_bounds = array<i64: 1568, 128>}, {pipeline_mode = #tpu.pipeline_mode<synchronous>, transform_indices = @transform_2, window_bounds = array<i64: 1, 128>}, {pipeline_mode = #tpu.pipeline_mode<synchronous>, transform_indices = @transform_3, window_bounds = array<i64: 2, 128>}]} {
    %c0 = arith.constant 0 : index
    %c0_0 = arith.constant 0 : index
    %0 = vector.load %arg1[%c0, %c0_0] : memref<2x1568xbf16, #tpu.memory_space<vmem>>, vector<2x1568xbf16>
    %c0_1 = arith.constant 0 : index
    %c0_2 = arith.constant 0 : index
    %1 = vector.load %arg2[%c0_1, %c0_2] : memref<1568x128xbf16, #tpu.memory_space<vmem>>, vector<1568x128xbf16>
    %cst = arith.constant dense<0.000000e+00> : vector<2x128xf32>
    %2 = tpu.matmul %0, %1, %cst {dimension_numbers = #tpu.dot_dimension_numbers<[1], [0], [0], [1], [0, 0, 1, 1], [], []>} : vector<2x1568xbf16>, vector<1568x128xbf16>, vector<2x128xf32> -> vector<2x128xf32>
    %c0_3 = arith.constant 0 : index
    %c0_4 = arith.constant 0 : index
    %3 = vector.load %arg3[%c0_3, %c0_4] : memref<1x128xf32, #tpu.memory_space<vmem>>, vector<1x128xf32>
    %4 = vector.broadcast %3 : vector<1x128xf32> to vector<2x128xf32>
    %5 = arith.addf %2, %4 : vector<2x128xf32>
    %c0_5 = arith.constant 0 : index
    %c0_6 = arith.constant 0 : index
    %6 = vector.load %arg4[%c0_5, %c0_6] : memref<2x128xf32, #tpu.memory_space<vmem>>, vector<2x128xf32>
    tpu.vector_store %arg4[%c0_5, %c0_6], %5 {strides = array<i32>} : memref<2x128xf32, #tpu.memory_space<vmem>>, vector<2x128xf32>,
    return
  }
  func.func @transform_0(%arg0: i32) -> (i32, i32) {
    %c0_i32 = arith.constant 0 : i32
    %c0_i32_0 = arith.constant 0 : i32
    %c0_i32_1 = arith.constant 0 : i32
    return %c0_i32, %c0_i32_0 : i32, i32
  }
  func.func @transform_1(%arg0: i32) -> (i32, i32) {
    %c0_i32 = arith.constant 0 : i32
    %c0_i32_0 = arith.constant 0 : i32
    %c0_i32_1 = arith.constant 0 : i32
    return %c0_i32, %c0_i32_0 : i32, i32
  }
  func.func @transform_2(%arg0: i32) -> (i32, i32) {
    %c0_i32 = arith.constant 0 : i32
    %c0_i32_0 = arith.constant 0 : i32
    %c0_i32_1 = arith.constant 0 : i32
    return %c0_i32, %c0_i32_0 : i32, i32
  }
  func.func @transform_3(%arg0: i32) -> (i32, i32) {
    %c0_i32 = arith.constant 0 : i32
    %c0_i32_0 = arith.constant 0 : i32
    %c0_i32_1 = arith.constant 0 : i32
    return %c0_i32, %c0_i32_0 : i32, i32
  }
}

</mosaic_0001>

<bundles_post_ra>
// kernel: simple_convnet_forward.3
= control target key start
LH: loop header
LB: loop body
LE: loop exit
PB: predicated region body
PF: predicated region fallthrough
CT: control target
= control target key end

     0   :  { %v9131_v0 = vmov 0.0   ;;  %vm4712_vm0 = vmmov 0   ;;  %vm3594_vm1 = vcmask 125952   ;;  %s9125_s1 = inlined_call_operand.vmem [shape: bf16[128,128], index: 1, kind: input, shape index: {}]   ;;  %s9126_s0 = inlined_call_operand.vmem [shape: bf16[4,392,128], index: 0, kind: input, shape index: {}]   ;;  %s9127_s2 = inlined_call_operand.vmem [shape: f32[1,128], index: 2, kind: input, shape index: {}]   ;;  %s9128_s3 = inlined_call_operand.vmem [shape: f32[1,128], index: 3, kind: input, shape index: {}]   ;;  %s9129_s4 = inlined_call_operand.vmem [shape: f32[1,128], index: 4, kind: input, shape index: {}]   ;;  %s9130_s5 = inlined_call_operand.vmem [shape: bf16[392,16], index: 5, kind: output, shape index: {}]  }
   0x1   :  { %4134 = vmatprep.subr.bf16.mxu0 %v9131_v0  ;;  %4250 = vmatprep.subr.bf16.mxu1 %v9131_v0  ;;  %v4600_v1 = vld [vmem:[%s9125_s1] sm:$0xff]   ;;  %v4601_v2 = vld [vmem:[%s9125_s1 + $0x8] sm:$0xff]   ;;  %v4602_v3 = vld [vmem:[%s9125_s1 + $0x10] sm:$0xff]  }
   0x2   :  { %4150 = vmatprep.mubr.msk.bf16.mxu0 %vm4712_vm0, %v9131_v0  ;;  %4266 = vmatprep.mubr.msk.bf16.mxu1 %vm4712_vm0, %v9131_v0  ;;  %v4603_v4 = vld [vmem:[%s9125_s1 + $0x18] sm:$0xff]   ;;  %v4604_v5 = vld [vmem:[%s9125_s1 + $0x20] sm:$0xff]   ;;  %v4605_v6 = vld [vmem:[%s9125_s1 + $0x28] sm:$0xff]  }
   0x3   :  { %4135 = vmatpush3.bf16.msra.mxu0 %v4600_v1  ;;  %4251 = vmatpush3.bf16.msra.mxu1 %v4600_v1  ;;  %v4606_v7 = vld [vmem:[%s9125_s1 + $0x30] sm:$0xff]   ;;  %v4607_v8 = vld [vmem:[%s9125_s1 + $0x38] sm:$0xff]   ;;  %v4608_v9 = vld [vmem:[%s9126_s0] sm:$0xff]  }
   0x4   :  { %4136 = vmatprep.subr.bf16.mxu0 %v9131_v0  ;;  %4252 = vmatprep.subr.bf16.mxu1 %v9131_v0  ;;  %v4609_v10 = vld [vmem:[%s9126_s0 + $0xc4] sm:$0xff]   ;;  %v4611_v12 = vld [vmem:[%s9126_s0 + $0xcc] sm:$0xff]   ;;  %v4613_v14 = vld [vmem:[%s9126_s0 + $0xd4] sm:$0xff]  }
   0x5   :  { %v4610_v11 = vld [vmem:[%s9126_s0 + $0x8] sm:$0xff]   ;;  %v4612_v13 = vld [vmem:[%s9126_s0 + $0x10] sm:$0xff]   ;;  %v4614_v15 = vld [vmem:[%s9126_s0 + $0x18] sm:$0xff]  }
   0x6   :  { %v4615_v16 = vld [vmem:[%s9126_s0 + $0xdc] sm:$0xff]   ;;  %v4617_v18 = vld [vmem:[%s9126_s0 + $0xe4] sm:$0xff]   ;;  %v4619_v20 = vld [vmem:[%s9126_s0 + $0xec] sm:$0xff]  }
   0x7   :  { %4137 = vmatpush3.bf16.msra.mxu0 %v4601_v2  ;;  %4253 = vmatpush3.bf16.msra.mxu1 %v4601_v2  ;;  %v4616_v17 = vld [vmem:[%s9126_s0 + $0x20] sm:$0xff]   ;;  %v4618_v19 = vld [vmem:[%s9126_s0 + $0x28] sm:$0xff]   ;;  %v4620_v21 = vld [vmem:[%s9126_s0 + $0x30] sm:$0xff]  }
   0x8   :  { %4138 = vmatprep.subr.bf16.mxu0 %v9131_v0  ;;  %4254 = vmatprep.subr.bf16.mxu1 %v9131_v0  ;;  %v4621_v22 = vld [vmem:[%s9126_s0 + $0xf4] sm:$0xff]   ;;  %v4623_v24 = vld [vmem:[%s9126_s0 + $0xfc] sm:$0xff]   ;;  %v4625_v26 = vld [vmem:[%s9126_s0 + $0x104] sm:$0xff]  }
   0x9   :  { %v4622_v23 = vld [vmem:[%s9126_s0 + $0x38] sm:$0xff]   ;;  %v4624_v25 = vld [vmem:[%s9126_s0 + $0x40] sm:$0xff]   ;;  %v4626_v27 = vld [vmem:[%s9126_s0 + $0x48] sm:$0xff]  }
   0xa   :  { %v4627_v28 = vld [vmem:[%s9126_s0 + $0x10c] sm:$0xff]   ;;  %v4629_v30 = vld [vmem:[%s9126_s0 + $0x114] sm:$0xff]   ;;  %v4631_v32 = vld [vmem:[%s9126_s0 + $0x11c] sm:$0xff]  }
   0xb   :  { %4139 = vmatpush3.bf16.msra.mxu0 %v4602_v3  ;;  %4255 = vmatpush3.bf16.msra.mxu1 %v4602_v3  ;;  %v4628_v29 = vld [vmem:[%s9126_s0 + $0x50] sm:$0xff]   ;;  %v4630_v31 = vld [vmem:[%s9126_s0 + $0x58] sm:$0xff]   ;;  %v4632_v33 = vld [vmem:[%s9126_s0 + $0x60] sm:$0xff]  }
   0xc   :  { %4140 = vmatprep.subr.bf16.mxu0 %v9131_v0  ;;  %4256 = vmatprep.subr.bf16.mxu1 %v9131_v0  ;;  %v4633_v34 = vld [vmem:[%s9126_s0 + $0x124] sm:$0xff]   ;;  %v4635_v36 = vld [vmem:[%s9126_s0 + $0x12c] sm:$0xff]   ;;  %v4637_v38 = vld [vmem:[%s9126_s0 + $0x134] sm:$0xff]  }
   0xd   :  { %v4634_v35 = vld [vmem:[%s9126_s0 + $0x68] sm:$0xff]   ;;  %v4636_v37 = vld [vmem:[%s9126_s0 + $0x70] sm:$0xff]   ;;  %v4638_v39 = vld [vmem:[%s9126_s0 + $0x78] sm:$0xff]  }
   0xe   :  { %v4639_v40 = vld [vmem:[%s9126_s0 + $0x13c] sm:$0xff]   ;;  %v4641_v42 = vld [vmem:[%s9126_s0 + $0x144] sm:$0xff]   ;;  %v4643_v44 = vld [vmem:[%s9126_s0 + $0x14c] sm:$0xff]  }
   0xf   :  { %4141 = vmatpush3.bf16.msra.mxu0 %v4603_v4  ;;  %4257 = vmatpush3.bf16.msra.mxu1 %v4603_v4  ;;  %v4640_v41 = vld [vmem:[%s9126_s0 + $0x80] sm:$0xff]   ;;  %v4642_v43 = vld [vmem:[%s9126_s0 + $0x88] sm:$0xff]   ;;  %v4644_v45 = vld [vmem:[%s9126_s0 + $0x90] sm:$0xff]  }
  0x10   :  { %4142 = vmatprep.subr.bf16.mxu0 %v9131_v0  ;;  %4258 = vmatprep.subr.bf16.mxu1 %v9131_v0  ;;  %v4645_v46 = vld [vmem:[%s9126_s0 + $0x154] sm:$0xff]   ;;  %v4647_v48 = vld [vmem:[%s9126_s0 + $0x15c] sm:$0xff]   ;;  %v4649_v50 = vld [vmem:[%s9126_s0 + $0x164] sm:$0xff]  }
  0x11   :  { %v4646_v47 = vld [vmem:[%s9126_s0 + $0x98] sm:$0xff]   ;;  %v4648_v49 = vld [vmem:[%s9126_s0 + $0xa0] sm:$0xff]   ;;  %v4650_v51 = vld [vmem:[%s9126_s0 + $0xa8] sm:$0xff]  }
  0x12   :  { %v4651_v52 = vld [vmem:[%s9126_s0 + $0x16c] sm:$0xff]   ;;  %v4653_v54 = vld [vmem:[%s9126_s0 + $0x174] sm:$0xff]   ;;  %v4655_v56 = vld [vmem:[%s9126_s0 + $0x17c] sm:$0xff]  }
  0x13   :  { %4143 = vmatpush3.bf16.msra.mxu0 %v4604_v5  ;;  %4259 = vmatpush3.bf16.msra.mxu1 %v4604_v5  ;;  %v4652_v53 = vld [vmem:[%s9126_s0 + $0xb0] sm:$0xff]   ;;  %v4654_v55 = vld [vmem:[%s9126_s0 + $0xb8] sm:$0xff]   ;;  %v4656_v57 = vld [vmem:[%s9126_s0 + $0xc0] ss:$0 sps:$4 sm:$0xff]  }
  0x14   :  { %4144 = vmatprep.subr.bf16.mxu0 %v9131_v0  ;;  %4260 = vmatprep.subr.bf16.mxu1 %v9131_v0  ;;  %v4657_v58 = vld [vmem:[%s9126_s0 + $0x184] ss:$0 sps:$4 sm:$0xff]   ;;  %v4658_v59 = vld [vmem:[%s9126_s0 + $0x188] sm:$0xff]   ;;  %v4660_v61 = vld [vmem:[%s9126_s0 + $0x190] sm:$0xff]  }
  0x15   :  { %v4659_v60 = vld [vmem:[%s9126_s0 + $0x24c] sm:$0xff]   ;;  %v4661_v62 = vld [vmem:[%s9126_s0 + $0x254] sm:$0xff]  }
  0x17   :  { %4145 = vmatpush3.bf16.msra.mxu0 %v4605_v6  ;;  %4261 = vmatpush3.bf16.msra.mxu1 %v4605_v6 }
  0x18   :  { %4146 = vmatprep.subr.bf16.mxu0 %v9131_v0  ;;  %4262 = vmatprep.subr.bf16.mxu1 %v9131_v0 }
  0x1b   :  { %4147 = vmatpush3.bf16.msra.mxu0 %v4606_v7  ;;  %4263 = vmatpush3.bf16.msra.mxu1 %v4606_v7 }
  0x1c   :  { %4148 = vmatprep.subr.bf16.mxu0 %v9131_v0  ;;  %4264 = vmatprep.subr.bf16.mxu1 %v9131_v0 }
  0x1f   :  { %4149 = vmatpush3.bf16.msra.mxu0 %v4607_v8  ;;  %4265 = vmatpush3.bf16.msra.mxu1 %v4607_v8 }
  0x20   :  { %4366 = vmatprep.subr.bf16.mxu0 %v9131_v0  ;;  %4482 = vmatprep.subr.bf16.mxu1 %v9131_v0 }
  0x22   :  { %4151 = vmatmul.mubr.bf16.vlgmr.msra.gmra.mrb[0].mxu0 %v4608_v9  ;;  %4267 = vmatmul.mubr.bf16.vlgmr.msra.gmra.mrb[0].mxu1 %v4609_v10 }
  0x23   :  { %4367 = vmatpush3.bf16.msra.mxu0 %v4600_v1  ;;  %4483 = vmatpush3.bf16.msra.mxu1 %v4600_v1 }
  0x24   :  { %4154 = vmatprep.mubr.msk.bf16.mxu0 %vm4712_vm0, %v9131_v0  ;;  %4270 = vmatprep.mubr.msk.bf16.mxu1 %vm4712_vm0, %v9131_v0 }
  0x25   :  { %4368 = vmatprep.subr.bf16.mxu0 %v9131_v0  ;;  %4484 = vmatprep.subr.bf16.mxu1 %v9131_v0 }
  0x27   :  { %4369 = vmatpush3.bf16.msra.mxu0 %v4601_v2  ;;  %4485 = vmatpush3.bf16.msra.mxu1 %v4601_v2 }
  0x28   :  { %4370 = vmatprep.subr.bf16.mxu0 %v9131_v0  ;;  %4486 = vmatprep.subr.bf16.mxu1 %v9131_v0 }
  0x2a   :  { %4155 = vmatmul.mubr.bf16.gmra.mrb[4].mxu0 %v4610_v11  ;;  %4271 = vmatmul.mubr.bf16.gmra.mrb[4].mxu1 %v4611_v12 }
  0x2b   :  { %4158 = vmatprep.mubr.msk.bf16.mxu0 %vm4712_vm0, %v9131_v0  ;;  %4274 = vmatprep.mubr.msk.bf16.mxu1 %vm4712_vm0, %v9131_v0 }
  0x2c   :  { %4371 = vmatpush3.bf16.msra.mxu0 %v4602_v3  ;;  %4487 = vmatpush3.bf16.msra.mxu1 %v4602_v3 }
  0x2d   :  { %4372 = vmatprep.subr.bf16.mxu0 %v9131_v0  ;;  %4488 = vmatprep.subr.bf16.mxu1 %v9131_v0 }
  0x30   :  { %4373 = vmatpush3.bf16.msra.mxu0 %v4603_v4  ;;  %4489 = vmatpush3.bf16.msra.mxu1 %v4603_v4  ;;  %v4662_v4 = vld [vmem:[%s9126_s0 + $0x198] sm:$0xff]  }
  0x31   :  { %4374 = vmatprep.subr.bf16.mxu0 %v9131_v0  ;;  %4490 = vmatprep.subr.bf16.mxu1 %v9131_v0 }
  0x32   :  { %4159 = vmatmul.mubr.bf16.gmra.mrb[8].mxu0 %v4612_v13  ;;  %4275 = vmatmul.mubr.bf16.gmra.mrb[8].mxu1 %v4613_v14  ;;  %v4664_v14 = vld [vmem:[%s9126_s0 + $0x1a0] sm:$0xff]  }
  0x33   :  { %4162 = vmatprep.mubr.msk.bf16.mxu0 %vm4712_vm0, %v9131_v0  ;;  %4278 = vmatprep.mubr.msk.bf16.mxu1 %vm4712_vm0, %v9131_v0 }
  0x34   :  { %4375 = vmatpush3.bf16.msra.mxu0 %v4604_v5  ;;  %4491 = vmatpush3.bf16.msra.mxu1 %v4604_v5  ;;  %v4663_v5 = vld [vmem:[%s9126_s0 + $0x25c] sm:$0xff]  }
  0x35   :  { %4376 = vmatprep.subr.bf16.mxu0 %v9131_v0  ;;  %4492 = vmatprep.subr.bf16.mxu1 %v9131_v0 }
  0x38   :  { %4377 = vmatpush3.bf16.msra.mxu0 %v4605_v6  ;;  %4493 = vmatpush3.bf16.msra.mxu1 %v4605_v6 }
  0x39   :  { %4378 = vmatprep.subr.bf16.mxu0 %v9131_v0  ;;  %4494 = vmatprep.subr.bf16.mxu1 %v9131_v0 }
  0x3a   :  { %4163 = vmatmul.mubr.bf16.gmra.mrb[12].mxu0 %v4614_v15  ;;  %4279 = vmatmul.mubr.bf16.gmra.mrb[12].mxu1 %v4615_v16  ;;  %v4665_v15 = vld [vmem:[%s9126_s0 + $0x264] sm:$0xff]  }
  0x3b   :  { %4166 = vmatprep.mubr.msk.bf16.mxu0 %vm4712_vm0, %v9131_v0  ;;  %4282 = vmatprep.mubr.msk.bf16.mxu1 %vm4712_vm0, %v9131_v0 }
  0x3c   :  { %4379 = vmatpush3.bf16.msra.mxu0 %v4606_v7  ;;  %4495 = vmatpush3.bf16.msra.mxu1 %v4606_v7 }
  0x3d   :  { %4380 = vmatprep.subr.bf16.mxu0 %v9131_v0  ;;  %4496 = vmatprep.subr.bf16.mxu1 %v9131_v0 }
  0x40   :  { %4381 = vmatpush3.bf16.msra.mxu0 %v4607_v8  ;;  %4497 = vmatpush3.bf16.msra.mxu1 %v4607_v8 }
  0x42   :  { %4167 = vmatmul.mubr.bf16.gmra.mrb[16].mxu0 %v4616_v17  ;;  %4283 = vmatmul.mubr.bf16.gmra.mrb[16].mxu1 %v4617_v18 }
  0x43   :  { %4170 = vmatprep.mubr.msk.bf16.mxu0 %vm4712_vm0, %v9131_v0  ;;  %4286 = vmatprep.mubr.msk.bf16.mxu1 %vm4712_vm0, %v9131_v0 }
  0x4a   :  { %4171 = vmatmul.mubr.bf16.gmra.mrb[20].mxu0 %v4618_v19  ;;  %4287 = vmatmul.mubr.bf16.gmra.mrb[20].mxu1 %v4619_v20 }
  0x4b   :  { %4174 = vmatprep.mubr.msk.bf16.mxu0 %vm4712_vm0, %v9131_v0  ;;  %4290 = vmatprep.mubr.msk.bf16.mxu1 %vm4712_vm0, %v9131_v0 }
  0x52   :  { %4175 = vmatmul.mubr.bf16.gmra.mrb[24].mxu0 %v4620_v21  ;;  %4291 = vmatmul.mubr.bf16.gmra.mrb[24].mxu1 %v4621_v22 }
  0x53   :  { %4178 = vmatprep.mubr.msk.bf16.mxu0 %vm4712_vm0, %v9131_v0  ;;  %4294 = vmatprep.mubr.msk.bf16.mxu1 %vm4712_vm0, %v9131_v0 }
  0x5a   :  { %4179 = vmatmul.mubr.bf16.gmra.mrb[28].mxu0 %v4622_v23  ;;  %4295 = vmatmul.mubr.bf16.gmra.mrb[28].mxu1 %v4623_v24  ;;  %v4666_v24 = vld [vmem:[%s9126_s0 + $0x1a8] sm:$0xff]  }
  0x5b   :  { %4182 = vmatprep.mubr.msk.bf16.mxu0 %vm4712_vm0, %v9131_v0  ;;  %4298 = vmatprep.mubr.msk.bf16.mxu1 %vm4712_vm0, %v9131_v0 }
  0x62   :  { %4183 = vmatmul.mubr.bf16.gmra.mrb[32].mxu0 %v4624_v25  ;;  %4299 = vmatmul.mubr.bf16.gmra.mrb[32].mxu1 %v4625_v26  ;;  %v4667_v25 = vld [vmem:[%s9126_s0 + $0x26c] sm:$0xff]  }
  0x63   :  { %4186 = vmatprep.mubr.msk.bf16.mxu0 %vm4712_vm0, %v9131_v0  ;;  %4302 = vmatprep.mubr.msk.bf16.mxu1 %vm4712_vm0, %v9131_v0 }
  0x6a   :  { %4187 = vmatmul.mubr.bf16.gmra.mrb[36].mxu0 %v4626_v27  ;;  %4303 = vmatmul.mubr.bf16.gmra.mrb[36].mxu1 %v4627_v28 }
  0x6b   :  { %4190 = vmatprep.mubr.msk.bf16.mxu0 %vm4712_vm0, %v9131_v0  ;;  %4306 = vmatprep.mubr.msk.bf16.mxu1 %vm4712_vm0, %v9131_v0 }
  0x72   :  { %4191 = vmatmul.mubr.bf16.gmra.mrb[40].mxu0 %v4628_v29  ;;  %4307 = vmatmul.mubr.bf16.gmra.mrb[40].mxu1 %v4629_v30 }
  0x73   :  { %4194 = vmatprep.mubr.msk.bf16.mxu0 %vm4712_vm0, %v9131_v0  ;;  %4310 = vmatprep.mubr.msk.bf16.mxu1 %vm4712_vm0, %v9131_v0 }
  0x7a   :  { %4195 = vmatmul.mubr.bf16.gmra.mrb[44].mxu0 %v4630_v31  ;;  %4311 = vmatmul.mubr.bf16.gmra.mrb[44].mxu1 %v4631_v32 }
  0x7b   :  { %4198 = vmatprep.mubr.msk.bf16.mxu0 %vm4712_vm0, %v9131_v0  ;;  %4314 = vmatprep.mubr.msk.bf16.mxu1 %vm4712_vm0, %v9131_v0 }
  0x82   :  { %4199 = vmatmul.mubr.bf16.gmra.mrb[48].mxu0 %v4632_v33  ;;  %4315 = vmatmul.mubr.bf16.gmra.mrb[48].mxu1 %v4633_v34  ;;  %v4668_v34 = vld [vmem:[%s9126_s0 + $0x1b0] sm:$0xff]  }
  0x83   :  { %4202 = vmatprep.mubr.msk.bf16.mxu0 %vm4712_vm0, %v9131_v0  ;;  %4318 = vmatprep.mubr.msk.bf16.mxu1 %vm4712_vm0, %v9131_v0 }
  0x8a   :  { %4203 = vmatmul.mubr.bf16.gmra.mrb[52].mxu0 %v4634_v35  ;;  %4319 = vmatmul.mubr.bf16.gmra.mrb[52].mxu1 %v4635_v36  ;;  %v4669_v35 = vld [vmem:[%s9126_s0 + $0x274] sm:$0xff]  }
  0x8b   :  { %4206 = vmatprep.mubr.msk.bf16.mxu0 %vm4712_vm0, %v9131_v0  ;;  %4322 = vmatprep.mubr.msk.bf16.mxu1 %vm4712_vm0, %v9131_v0 }
  0x92   :  { %4207 = vmatmul.mubr.bf16.gmra.mrb[56].mxu0 %v4636_v37  ;;  %4323 = vmatmul.mubr.bf16.gmra.mrb[56].mxu1 %v4637_v38 }
  0x93   :  { %4210 = vmatprep.mubr.msk.bf16.mxu0 %vm4712_vm0, %v9131_v0  ;;  %4326 = vmatprep.mubr.msk.bf16.mxu1 %vm4712_vm0, %v9131_v0 }
  0x9a   :  { %4211 = vmatmul.mubr.bf16.gmra.mrb[60].mxu0 %v4638_v39  ;;  %4327 = vmatmul.mubr.bf16.gmra.mrb[60].mxu1 %v4639_v40 }
  0x9b   :  { %4214 = vmatprep.mubr.msk.bf16.mxu0 %vm4712_vm0, %v9131_v0  ;;  %4330 = vmatprep.mubr.msk.bf16.mxu1 %vm4712_vm0, %v9131_v0 }
  0xa2   :  { %4215 = vmatmul.mubr.bf16.gmra.mrb[64].mxu0 %v4640_v41  ;;  %4331 = vmatmul.mubr.bf16.gmra.mrb[64].mxu1 %v4641_v42 }
  0xa3   :  { %4218 = vmatprep.mubr.msk.bf16.mxu0 %vm4712_vm0, %v9131_v0  ;;  %4334 = vmatprep.mubr.msk.bf16.mxu1 %vm4712_vm0, %v9131_v0 }
  0xaa   :  { %4219 = vmatmul.mubr.bf16.gmra.mrb[68].mxu0 %v4642_v43  ;;  %4335 = vmatmul.mubr.bf16.gmra.mrb[68].mxu1 %v4643_v44  ;;  %v4670_v44 = vld [vmem:[%s9126_s0 + $0x1b8] sm:$0xff]  }
  0xab   :  { %4222 = vmatprep.mubr.msk.bf16.mxu0 %vm4712_vm0, %v9131_v0  ;;  %4338 = vmatprep.mubr.msk.bf16.mxu1 %vm4712_vm0, %v9131_v0 }
  0xb2   :  { %4223 = vmatmul.mubr.bf16.gmra.mrb[72].mxu0 %v4644_v45  ;;  %4339 = vmatmul.mubr.bf16.gmra.mrb[72].mxu1 %v4645_v46  ;;  %v4671_v45 = vld [vmem:[%s9126_s0 + $0x27c] sm:$0xff]  }
  0xb3   :  { %4226 = vmatprep.mubr.msk.bf16.mxu0 %vm4712_vm0, %v9131_v0  ;;  %4342 = vmatprep.mubr.msk.bf16.mxu1 %vm4712_vm0, %v9131_v0 }
  0xba   :  { %4227 = vmatmul.mubr.bf16.gmra.mrb[76].mxu0 %v4646_v47  ;;  %4343 = vmatmul.mubr.bf16.gmra.mrb[76].mxu1 %v4647_v48 }
  0xbb   :  { %4230 = vmatprep.mubr.msk.bf16.mxu0 %vm4712_vm0, %v9131_v0  ;;  %4346 = vmatprep.mubr.msk.bf16.mxu1 %vm4712_vm0, %v9131_v0 }
  0xc2   :  { %4231 = vmatmul.mubr.bf16.gmra.mrb[80].mxu0 %v4648_v49  ;;  %4347 = vmatmul.mubr.bf16.gmra.mrb[80].mxu1 %v4649_v50 }
  0xc3   :  { %4234 = vmatprep.mubr.msk.bf16.mxu0 %vm4712_vm0, %v9131_v0  ;;  %4350 = vmatprep.mubr.msk.bf16.mxu1 %vm4712_vm0, %v9131_v0 }
  0xca   :  { %4235 = vmatmul.mubr.bf16.gmra.mrb[84].mxu0 %v4650_v51  ;;  %4351 = vmatmul.mubr.bf16.gmra.mrb[84].mxu1 %v4651_v52 }
  0xcb   :  { %4238 = vmatprep.mubr.msk.bf16.mxu0 %vm4712_vm0, %v9131_v0  ;;  %4354 = vmatprep.mubr.msk.bf16.mxu1 %vm4712_vm0, %v9131_v0 }
  0xd2   :  { %4239 = vmatmul.mubr.bf16.gmra.mrb[88].mxu0 %v4652_v53  ;;  %4355 = vmatmul.mubr.bf16.gmra.mrb[88].mxu1 %v4653_v54  ;;  %v4672_v54 = vld [vmem:[%s9126_s0 + $0x1c0] sm:$0xff]  }
  0xd3   :  { %4242 = vmatprep.mubr.msk.bf16.mxu0 %vm4712_vm0, %v9131_v0  ;;  %4358 = vmatprep.mubr.msk.bf16.mxu1 %vm4712_vm0, %v9131_v0 }
  0xda   :  { %4243 = vmatmul.mubr.bf16.gmra.mrb[92].mxu0 %v4654_v55  ;;  %4359 = vmatmul.mubr.bf16.gmra.mrb[92].mxu1 %v4655_v56  ;;  %v4673_v55 = vld [vmem:[%s9126_s0 + $0x284] sm:$0xff]  }
  0xdb   :  { %4246 = vmatprep.mubr.msk.bf16.mxu0 %vm4712_vm0, %v9131_v0  ;;  %4362 = vmatprep.mubr.msk.bf16.mxu1 %vm4712_vm0, %v9131_v0 }
  0xe2   :  { %4247 = vmatmul.mubr.bf16.gmra.mrb[96].mxu0 %v4656_v57  ;;  %4363 = vmatmul.mubr.bf16.gmra.mrb[96].mxu1 %v4657_v58 }
  0xe3   :  { %4382 = vmatprep.mubr.msk.bf16.mxu0 %vm4712_vm0, %v9131_v0  ;;  %4498 = vmatprep.mubr.msk.bf16.mxu1 %vm4712_vm0, %v9131_v0 }
  0xea   :  { %4383 = vmatmul.mubr.bf16.vlgmr.msra.gmra.mrb[100].mxu0 %v4658_v59  ;;  %4499 = vmatmul.mubr.bf16.vlgmr.msra.gmra.mrb[100].mxu1 %v4659_v60 }
  0xeb   :  { %4386 = vmatprep.mubr.msk.bf16.mxu0 %vm4712_vm0, %v9131_v0  ;;  %4502 = vmatprep.mubr.msk.bf16.mxu1 %vm4712_vm0, %v9131_v0 }
  0xf2   :  { %4387 = vmatmul.mubr.bf16.gmra.mrb[104].mxu0 %v4660_v61  ;;  %4503 = vmatmul.mubr.bf16.gmra.mrb[104].mxu1 %v4661_v62 }
  0xf3   :  { %4390 = vmatprep.mubr.msk.bf16.mxu0 %vm4712_vm0, %v9131_v0  ;;  %4506 = vmatprep.mubr.msk.bf16.mxu1 %vm4712_vm0, %v9131_v0 }
  0xf5   :  { %v5073_v63 = vpop.f32.mrb[0].mxu0  ;;  %v5075_v1 = vpop.f32.mrb[0].mxu1 }
  0xf6   :  { %v4152_v2 = vpop.f32.mrb[1].mxu0  ;;  %v4268_v3 = vpop.f32.mrb[1].mxu1 }
  0xf7   :  { %v5083_v6 = vpop.f32.mrb[2].mxu0  ;;  %v5085_v7 = vpop.f32.mrb[2].mxu1  ;;  %v4674_v3 = vld [vmem:[%s9126_s0 + $0x1c8] sm:$0xff]  }
  0xf8   :  { %v4153_v8 = vpop.f32.mrb[3].mxu0  ;;  %v4269_v9 = vpop.f32.mrb[3].mxu1 }
  0xfa   :  { %4391 = vmatmul.mubr.bf16.gmra.mrb[108].mxu0 %v4662_v4  ;;  %4507 = vmatmul.mubr.bf16.gmra.mrb[108].mxu1 %v4663_v5  ;;  %v4675_v4 = vld [vmem:[%s9126_s0 + $0x28c] sm:$0xff]  }
  0xfb   :  { %4394 = vmatprep.mubr.msk.bf16.mxu0 %vm4712_vm0, %v9131_v0  ;;  %4510 = vmatprep.mubr.msk.bf16.mxu1 %vm4712_vm0, %v9131_v0 }
  0xfd   :  { %v5091_v10 = vpop.f32.mrb[4].mxu0  ;;  %v5093_v11 = vpop.f32.mrb[4].mxu1 }
  0xfe   :  { %v4156_v12 = vpop.f32.mrb[5].mxu0  ;;  %v4272_v13 = vpop.f32.mrb[5].mxu1 }
  0xff   :  { %v5101_v16 = vpop.f32.mrb[6].mxu0  ;;  %v5103_v17 = vpop.f32.mrb[6].mxu1 }
 0x100   :  { %v4157_v18 = vpop.f32.mrb[7].mxu0  ;;  %v4273_v19 = vpop.f32.mrb[7].mxu1 }
 0x101   :  { %v4676_v19 = vld [vmem:[%s9126_s0 + $0x1d0] sm:$0xff]  }
 0x102   :  { %4395 = vmatmul.mubr.bf16.gmra.mrb[112].mxu0 %v4664_v14  ;;  %4511 = vmatmul.mubr.bf16.gmra.mrb[112].mxu1 %v4665_v15 }
 0x103   :  { %4398 = vmatprep.mubr.msk.bf16.mxu0 %vm4712_vm0, %v9131_v0  ;;  %4514 = vmatprep.mubr.msk.bf16.mxu1 %vm4712_vm0, %v9131_v0 }
 0x105   :  { %v5109_v20 = vpop.f32.mrb[8].mxu0  ;;  %v5111_v21 = vpop.f32.mrb[8].mxu1 }
 0x106   :  { %v4160_v22 = vpop.f32.mrb[9].mxu0  ;;  %v4276_v23 = vpop.f32.mrb[9].mxu1 }
 0x107   :  { %v5119_v26 = vpop.f32.mrb[10].mxu0  ;;  %v5121_v27 = vpop.f32.mrb[10].mxu1  ;;  %v4677_v22 = vld [vmem:[%s9126_s0 + $0x294] sm:$0xff]  }
 0x108   :  { %v4161_v28 = vpop.f32.mrb[11].mxu0  ;;  %v4277_v29 = vpop.f32.mrb[11].mxu1 }
 0x10a   :  { %4399 = vmatmul.mubr.bf16.gmra.mrb[116].mxu0 %v4666_v24  ;;  %4515 = vmatmul.mubr.bf16.gmra.mrb[116].mxu1 %v4667_v25 }
 0x10b   :  { %4402 = vmatprep.mubr.msk.bf16.mxu0 %vm4712_vm0, %v9131_v0  ;;  %4518 = vmatprep.mubr.msk.bf16.mxu1 %vm4712_vm0, %v9131_v0 }
 0x10d   :  { %v5127_v30 = vpop.f32.mrb[12].mxu0  ;;  %v5129_v31 = vpop.f32.mrb[12].mxu1 }
 0x10e   :  { %v4164_v32 = vpop.f32.mrb[13].mxu0  ;;  %v4280_v33 = vpop.f32.mrb[13].mxu1 }
 0x10f   :  { %v5137_v36 = vpop.f32.mrb[14].mxu0  ;;  %v5139_v37 = vpop.f32.mrb[14].mxu1 }
 0x110   :  { %v4165_v38 = vpop.f32.mrb[15].mxu0  ;;  %v4281_v39 = vpop.f32.mrb[15].mxu1 }
 0x111   :  { %v4679_v38 = vld [vmem:[%s9126_s0 + $0x29c] sm:$0xff]  }
 0x112   :  { %4403 = vmatmul.mubr.bf16.gmra.mrb[120].mxu0 %v4668_v34  ;;  %4519 = vmatmul.mubr.bf16.gmra.mrb[120].mxu1 %v4669_v35  ;;  %v4678_v35 = vld [vmem:[%s9126_s0 + $0x1d8] sm:$0xff]  }
 0x113   :  { %4406 = vmatprep.mubr.msk.bf16.mxu0 %vm4712_vm0, %v9131_v0  ;;  %4522 = vmatprep.mubr.msk.bf16.mxu1 %vm4712_vm0, %v9131_v0 }
 0x115   :  { %v5145_v40 = vpop.f32.mrb[16].mxu0  ;;  %v5147_v41 = vpop.f32.mrb[16].mxu1 }
 0x116   :  { %v4168_v42 = vpop.f32.mrb[17].mxu0  ;;  %v4284_v43 = vpop.f32.mrb[17].mxu1 }
 0x117   :  { %v5155_v46 = vpop.f32.mrb[18].mxu0  ;;  %v5157_v47 = vpop.f32.mrb[18].mxu1 }
 0x118   :  { %v4169_v48 = vpop.f32.mrb[19].mxu0  ;;  %v4285_v49 = vpop.f32.mrb[19].mxu1 }
 0x11a   :  { %4407 = vmatmul.mubr.bf16.gmra.mrb[124].mxu0 %v4670_v44  ;;  %4523 = vmatmul.mubr.bf16.gmra.mrb[124].mxu1 %v4671_v45 }
 0x11b   :  { %4410 = vmatprep.mubr.msk.bf16.mxu0 %vm4712_vm0, %v9131_v0  ;;  %4526 = vmatprep.mubr.msk.bf16.mxu1 %vm4712_vm0, %v9131_v0 }
 0x11d   :  { %v5163_v50 = vpop.f32.mrb[20].mxu0  ;;  %v5165_v51 = vpop.f32.mrb[20].mxu1 }
 0x11e   :  { %v4172_v52 = vpop.f32.mrb[21].mxu0  ;;  %v4288_v53 = vpop.f32.mrb[21].mxu1 }
 0x11f   :  { %v5173_v56 = vpop.f32.mrb[22].mxu0  ;;  %v5175_v57 = vpop.f32.mrb[22].mxu1  ;;  %v4680_v53 = vld [vmem:[%s9126_s0 + $0x1e0] sm:$0xff]  }
 0x120   :  { %v4173_v58 = vpop.f32.mrb[23].mxu0  ;;  %v4289_v59 = vpop.f32.mrb[23].mxu1 }
 0x122   :  { %4411 = vmatmul.mubr.bf16.gmra.mrb[128].mxu0 %v4672_v54  ;;  %4527 = vmatmul.mubr.bf16.gmra.mrb[128].mxu1 %v4673_v55  ;;  %v4681_v54 = vld [vmem:[%s9126_s0 + $0x2a4] sm:$0xff]  }
 0x123   :  { %4414 = vmatprep.mubr.msk.bf16.mxu0 %vm4712_vm0, %v9131_v0  ;;  %4530 = vmatprep.mubr.msk.bf16.mxu1 %vm4712_vm0, %v9131_v0 }
 0x125   :  { %v5181_v60 = vpop.f32.mrb[24].mxu0  ;;  %v5183_v61 = vpop.f32.mrb[24].mxu1 }
 0x126   :  { %v4176_v62 = vpop.f32.mrb[25].mxu0  ;;  %v4292_v2 = vpop.f32.mrb[25].mxu1 }
 0x127   :  { %v5191_v5 = vpop.f32.mrb[26].mxu0  ;;  %v5193_v8 = vpop.f32.mrb[26].mxu1 }
 0x128   :  { %v4177_v9 = vpop.f32.mrb[27].mxu0  ;;  %v4293_v12 = vpop.f32.mrb[27].mxu1 }
 0x129   :  { %v4682_v12 = vld [vmem:[%s9126_s0 + $0x1e8] sm:$0xff]  }
 0x12a   :  { %4415 = vmatmul.mubr.bf16.gmra.mrb[132].mxu0 %v4674_v3  ;;  %4531 = vmatmul.mubr.bf16.gmra.mrb[132].mxu1 %v4675_v4 }
 0x12b   :  { %4418 = vmatprep.mubr.msk.bf16.mxu0 %vm4712_vm0, %v9131_v0  ;;  %4534 = vmatprep.mubr.msk.bf16.mxu1 %vm4712_vm0, %v9131_v0 }
 0x12d   :  { %v5199_v13 = vpop.f32.mrb[28].mxu0  ;;  %v5201_v14 = vpop.f32.mrb[28].mxu1 }
 0x12e   :  { %v4180_v15 = vpop.f32.mrb[29].mxu0  ;;  %v4296_v18 = vpop.f32.mrb[29].mxu1 }
 0x12f   :  { %v5209_v23 = vpop.f32.mrb[30].mxu0  ;;  %v5211_v24 = vpop.f32.mrb[30].mxu1  ;;  %v4683_v15 = vld [vmem:[%s9126_s0 + $0x2ac] sm:$0xff]  }
 0x130   :  { %9616 = vst [vmem:[#allocation2_spill] sm:$0xff] %v5209_v23  ;;  %9617 = vst [vmem:[#allocation3_spill] sm:$0xff] %v5211_v24  ;;  %v4181_v25 = vpop.f32.mrb[31].mxu0  ;;  %v4297_v28 = vpop.f32.mrb[31].mxu1 }
 0x132   :  { %4419 = vmatmul.mubr.bf16.gmra.mrb[136].mxu0 %v4676_v19  ;;  %4535 = vmatmul.mubr.bf16.gmra.mrb[136].mxu1 %v4677_v22 }
 0x133   :  { %4422 = vmatprep.mubr.msk.bf16.mxu0 %vm4712_vm0, %v9131_v0  ;;  %4538 = vmatprep.mubr.msk.bf16.mxu1 %vm4712_vm0, %v9131_v0 }
 0x135   :  { %v5217_v29 = vpop.f32.mrb[32].mxu0  ;;  %v5219_v32 = vpop.f32.mrb[32].mxu1 }
 0x136   :  { %9618 = vst [vmem:[#allocation4_spill] sm:$0xff] %v5217_v29  ;;  %9619 = vst [vmem:[#allocation5_spill] sm:$0xff] %v5219_v32  ;;  %v4184_v33 = vpop.f32.mrb[33].mxu0  ;;  %v4300_v34 = vpop.f32.mrb[33].mxu1 }
 0x137   :  { %v5227_v39 = vpop.f32.mrb[34].mxu0  ;;  %v5229_v42 = vpop.f32.mrb[34].mxu1 }
 0x138   :  { %9620 = vst [vmem:[#allocation6_spill] sm:$0xff] %v5227_v39  ;;  %9621 = vst [vmem:[#allocation7_spill] sm:$0xff] %v5229_v42  ;;  %v4185_v43 = vpop.f32.mrb[35].mxu0  ;;  %v4301_v44 = vpop.f32.mrb[35].mxu1 }
 0x139   :  { %v4685_v43 = vld [vmem:[%s9126_s0 + $0x2b4] sm:$0xff]  }
 0x13a   :  { %4423 = vmatmul.mubr.bf16.gmra.mrb[140].mxu0 %v4678_v35  ;;  %4539 = vmatmul.mubr.bf16.gmra.mrb[140].mxu1 %v4679_v38  ;;  %v4684_v38 = vld [vmem:[%s9126_s0 + $0x1f0] sm:$0xff]  }
 0x13b   :  { %4426 = vmatprep.mubr.msk.bf16.mxu0 %vm4712_vm0, %v9131_v0  ;;  %4542 = vmatprep.mubr.msk.bf16.mxu1 %vm4712_vm0, %v9131_v0 }
 0x13d   :  { %v5235_v45 = vpop.f32.mrb[36].mxu0  ;;  %v5237_v48 = vpop.f32.mrb[36].mxu1 }
 0x13e   :  { %9622 = vst [vmem:[#allocation8_spill] sm:$0xff] %v5235_v45  ;;  %9623 = vst [vmem:[#allocation9_spill] sm:$0xff] %v5237_v48  ;;  %v4188_v49 = vpop.f32.mrb[37].mxu0  ;;  %v4304_v52 = vpop.f32.mrb[37].mxu1 }
 0x13f   :  { %v5245_v55 = vpop.f32.mrb[38].mxu0  ;;  %v5247_v58 = vpop.f32.mrb[38].mxu1 }
 0x140   :  { %9624 = vst [vmem:[#allocation10_spill] sm:$0xff] %v5245_v55  ;;  %9625 = vst [vmem:[#allocation11_spill] sm:$0xff] %v5247_v58  ;;  %v4189_v59 = vpop.f32.mrb[39].mxu0  ;;  %v4305_v62 = vpop.f32.mrb[39].mxu1 }
 0x142   :  { %4427 = vmatmul.mubr.bf16.gmra.mrb[144].mxu0 %v4680_v53  ;;  %4543 = vmatmul.mubr.bf16.gmra.mrb[144].mxu1 %v4681_v54 }
 0x143   :  { %4430 = vmatprep.mubr.msk.bf16.mxu0 %vm4712_vm0, %v9131_v0  ;;  %4546 = vmatprep.mubr.msk.bf16.mxu1 %vm4712_vm0, %v9131_v0 }
 0x145   :  { %v5253_v2 = vpop.f32.mrb[40].mxu0  ;;  %v5255_v3 = vpop.f32.mrb[40].mxu1 }
 0x146   :  { %9626 = vst [vmem:[#allocation12_spill] sm:$0xff] %v5253_v2  ;;  %9627 = vst [vmem:[#allocation13_spill] sm:$0xff] %v5255_v3  ;;  %v4192_v4 = vpop.f32.mrb[41].mxu0  ;;  %v4308_v9 = vpop.f32.mrb[41].mxu1 }
 0x147   :  { %v5263_v18 = vpop.f32.mrb[42].mxu0  ;;  %v5265_v19 = vpop.f32.mrb[42].mxu1  ;;  %v4686_v9 = vld [vmem:[%s9126_s0 + $0x1f8] sm:$0xff]  }
 0x148   :  { %9628 = vst [vmem:[#allocation14_spill] sm:$0xff] %v5263_v18  ;;  %9629 = vst [vmem:[#allocation15_spill] sm:$0xff] %v5265_v19  ;;  %v4193_v22 = vpop.f32.mrb[43].mxu0  ;;  %v4309_v25 = vpop.f32.mrb[43].mxu1 }
 0x14a   :  { %4431 = vmatmul.mubr.bf16.gmra.mrb[148].mxu0 %v4682_v12  ;;  %4547 = vmatmul.mubr.bf16.gmra.mrb[148].mxu1 %v4683_v15  ;;  %v4687_v12 = vld [vmem:[%s9126_s0 + $0x2bc] sm:$0xff]  }
 0x14b   :  { %4434 = vmatprep.mubr.msk.bf16.mxu0 %vm4712_vm0, %v9131_v0  ;;  %4550 = vmatprep.mubr.msk.bf16.mxu1 %vm4712_vm0, %v9131_v0 }
 0x14d   :  { %v5271_v28 = vpop.f32.mrb[44].mxu0  ;;  %v5273_v33 = vpop.f32.mrb[44].mxu1 }
 0x14e   :  { %9630 = vst [vmem:[#allocation16_spill] sm:$0xff] %v5271_v28  ;;  %9631 = vst [vmem:[#allocation17_spill] sm:$0xff] %v5273_v33  ;;  %v4196_v34 = vpop.f32.mrb[45].mxu0  ;;  %v4312_v35 = vpop.f32.mrb[45].mxu1 }
 0x14f   :  { %v5281_v44 = vpop.f32.mrb[46].mxu0  ;;  %v5283_v49 = vpop.f32.mrb[46].mxu1 }
 0x150   :  { %9632 = vst [vmem:[#allocation18_spill] sm:$0xff] %v5281_v44  ;;  %9633 = vst [vmem:[#allocation19_spill] sm:$0xff] %v5283_v49  ;;  %v4197_v52 = vpop.f32.mrb[47].mxu0  ;;  %v4313_v53 = vpop.f32.mrb[47].mxu1 }
 0x151   :  { %v4688_v53 = vld [vmem:[%s9126_s0 + $0x200] sm:$0xff]  }
 0x152   :  { %4435 = vmatmul.mubr.bf16.gmra.mrb[152].mxu0 %v4684_v38  ;;  %4551 = vmatmul.mubr.bf16.gmra.mrb[152].mxu1 %v4685_v43 }
 0x153   :  { %4438 = vmatprep.mubr.msk.bf16.mxu0 %vm4712_vm0, %v9131_v0  ;;  %4554 = vmatprep.mubr.msk.bf16.mxu1 %vm4712_vm0, %v9131_v0 }
 0x155   :  { %v5289_v54 = vpop.f32.mrb[48].mxu0  ;;  %v5291_v59 = vpop.f32.mrb[48].mxu1 }
 0x156   :  { %9634 = vst [vmem:[#allocation20_spill] sm:$0xff] %v5289_v54  ;;  %9635 = vst [vmem:[#allocation21_spill] sm:$0xff] %v5291_v59  ;;  %v4200_v62 = vpop.f32.mrb[49].mxu0  ;;  %v4316_v4 = vpop.f32.mrb[49].mxu1 }
 0x157   :  { %v5299_v15 = vpop.f32.mrb[50].mxu0  ;;  %v5301_v22 = vpop.f32.mrb[50].mxu1  ;;  %v4689_v62 = vld [vmem:[%s9126_s0 + $0x2c4] sm:$0xff]  }
 0x158   :  { %9636 = vst [vmem:[#allocation22_spill] sm:$0xff] %v5299_v15  ;;  %9637 = vst [vmem:[#allocation23_spill] sm:$0xff] %v5301_v22  ;;  %v4201_v25 = vpop.f32.mrb[51].mxu0  ;;  %v4317_v34 = vpop.f32.mrb[51].mxu1 }
 0x15a   :  { %4439 = vmatmul.mubr.bf16.gmra.mrb[156].mxu0 %v4686_v9  ;;  %4555 = vmatmul.mubr.bf16.gmra.mrb[156].mxu1 %v4687_v12 }
 0x15b   :  { %4442 = vmatprep.mubr.msk.bf16.mxu0 %vm4712_vm0, %v9131_v0  ;;  %4558 = vmatprep.mubr.msk.bf16.mxu1 %vm4712_vm0, %v9131_v0 }
 0x15d   :  { %v5307_v35 = vpop.f32.mrb[52].mxu0  ;;  %v5309_v38 = vpop.f32.mrb[52].mxu1 }
 0x15e   :  { %9638 = vst [vmem:[#allocation24_spill] sm:$0xff] %v5307_v35  ;;  %9639 = vst [vmem:[#allocation25_spill] sm:$0xff] %v5309_v38  ;;  %v4204_v43 = vpop.f32.mrb[53].mxu0  ;;  %v4320_v52 = vpop.f32.mrb[53].mxu1 }
 0x15f   :  { %v5317_v4 = vpop.f32.mrb[54].mxu0  ;;  %v5319_v9 = vpop.f32.mrb[54].mxu1 }
 0x160   :  { %9640 = vst [vmem:[#allocation26_spill] sm:$0xff] %v5317_v4  ;;  %9641 = vst [vmem:[#allocation27_spill] sm:$0xff] %v5319_v9  ;;  %v4205_v12 = vpop.f32.mrb[55].mxu0  ;;  %v4321_v25 = vpop.f32.mrb[55].mxu1  ;;  %v4690_v9 = vld [vmem:[%s9126_s0 + $0x208] sm:$0xff]  }
 0x162   :  { %4443 = vmatmul.mubr.bf16.gmra.mrb[160].mxu0 %v4688_v53  ;;  %4559 = vmatmul.mubr.bf16.gmra.mrb[160].mxu1 %v4689_v62  ;;  %v4691_v53 = vld [vmem:[%s9126_s0 + $0x2cc] sm:$0xff]  }
 0x163   :  { %4446 = vmatprep.mubr.msk.bf16.mxu0 %vm4712_vm0, %v9131_v0  ;;  %4562 = vmatprep.mubr.msk.bf16.mxu1 %vm4712_vm0, %v9131_v0 }
 0x165   :  { %v5325_v34 = vpop.f32.mrb[56].mxu0  ;;  %v5327_v43 = vpop.f32.mrb[56].mxu1 }
 0x166   :  { %9642 = vst [vmem:[#allocation28_spill] sm:$0xff] %v5325_v34  ;;  %9643 = vst [vmem:[#allocation29_spill] sm:$0xff] %v5327_v43  ;;  %v4208_v52 = vpop.f32.mrb[57].mxu0  ;;  %v4324_v38 = vpop.f32.mrb[57].mxu1  ;;  %v9646_v34 = vmov 0.0  }
 0x167   :  { %v5335_v62 = vpop.f32.mrb[58].mxu0  ;;  %v5337_v12 = vpop.f32.mrb[58].mxu1 }
 0x168   :  { %9644 = vst [vmem:[#allocation30_spill] sm:$0xff] %v5335_v62  ;;  %9645 = vst [vmem:[#allocation31_spill] sm:$0xff] %v5337_v12  ;;  %v4209_v25 = vpop.f32.mrb[59].mxu0  ;;  %v4325_v0 = vpop.f32.mrb[59].mxu1  ;;  %v4692_v12 = vld [vmem:[%s9126_s0 + $0x210] sm:$0xff]  }
 0x169   :  { %v4693_v0 = vld [vmem:[%s9126_s0 + $0x2d4] sm:$0xff]  }
 0x16a   :  { %4447 = vmatmul.mubr.bf16.gmra.mrb[164].mxu0 %v4690_v9  ;;  %4563 = vmatmul.mubr.bf16.gmra.mrb[164].mxu1 %v4691_v53 }
 0x16b   :  { %4450 = vmatprep.mubr.msk.bf16.mxu0 %vm4712_vm0, %v9646_v34  ;;  %4566 = vmatprep.mubr.msk.bf16.mxu1 %vm4712_vm0, %v9646_v34 }
 0x16d   :  { %v5343_v38 = vpop.f32.mrb[60].mxu0  ;;  %v5345_v52 = vpop.f32.mrb[60].mxu1 }
 0x16e   :  { %9647 = vst [vmem:[#allocation32_spill] sm:$0xff] %v5343_v38  ;;  %9648 = vst [vmem:[#allocation33_spill] sm:$0xff] %v5345_v52  ;;  %v4212_v43 = vpop.f32.mrb[61].mxu0  ;;  %v4328_v4 = vpop.f32.mrb[61].mxu1 }
 0x16f   :  { %v5353_v9 = vpop.f32.mrb[62].mxu0  ;;  %v5355_v53 = vpop.f32.mrb[62].mxu1 }
 0x170   :  { %9649 = vst [vmem:[#allocation34_spill] sm:$0xff] %v5353_v9  ;;  %9650 = vst [vmem:[#allocation35_spill] sm:$0xff] %v5355_v53  ;;  %v4213_v25 = vpop.f32.mrb[63].mxu0  ;;  %v4329_v62 = vpop.f32.mrb[63].mxu1  ;;  %v4694_v53 = vld [vmem:[%s9126_s0 + $0x218] sm:$0xff]  }
 0x171   :  { %v4695_v62 = vld [vmem:[%s9126_s0 + $0x2dc] sm:$0xff]  }
 0x172   :  { %4451 = vmatmul.mubr.bf16.gmra.mrb[168].mxu0 %v4692_v12  ;;  %4567 = vmatmul.mubr.bf16.gmra.mrb[168].mxu1 %v4693_v0 }
 0x173   :  { %4454 = vmatprep.mubr.msk.bf16.mxu0 %vm4712_vm0, %v9646_v34  ;;  %4570 = vmatprep.mubr.msk.bf16.mxu1 %vm4712_vm0, %v9646_v34 }
 0x175   :  { %v5361_v4 = vpop.f32.mrb[64].mxu0  ;;  %v5363_v43 = vpop.f32.mrb[64].mxu1 }
 0x176   :  { %9651 = vst [vmem:[#allocation36_spill] sm:$0xff] %v5361_v4  ;;  %9652 = vst [vmem:[#allocation37_spill] sm:$0xff] %v5363_v43  ;;  %v4216_v52 = vpop.f32.mrb[65].mxu0  ;;  %v4332_v38 = vpop.f32.mrb[65].mxu1 }
 0x177   :  { %v5371_v12 = vpop.f32.mrb[66].mxu0  ;;  %v5373_v0 = vpop.f32.mrb[66].mxu1 }
 0x178   :  { %9653 = vst [vmem:[#allocation38_spill] sm:$0xff] %v5371_v12  ;;  %9654 = vst [vmem:[#allocation39_spill] sm:$0xff] %v5373_v0  ;;  %v4217_v25 = vpop.f32.mrb[67].mxu0  ;;  %v4333_v9 = vpop.f32.mrb[67].mxu1  ;;  %v4696_v0 = vld [vmem:[%s9126_s0 + $0x220] sm:$0xff]  }
 0x179   :  { %v4697_v9 = vld [vmem:[%s9126_s0 + $0x2e4] sm:$0xff]  }
 0x17a   :  { %4455 = vmatmul.mubr.bf16.gmra.mrb[172].mxu0 %v4694_v53  ;;  %4571 = vmatmul.mubr.bf16.gmra.mrb[172].mxu1 %v4695_v62 }
 0x17b   :  { %4458 = vmatprep.mubr.msk.bf16.mxu0 %vm4712_vm0, %v9646_v34  ;;  %4574 = vmatprep.mubr.msk.bf16.mxu1 %vm4712_vm0, %v9646_v34 }
 0x17d   :  { %v5379_v38 = vpop.f32.mrb[68].mxu0  ;;  %v5381_v52 = vpop.f32.mrb[68].mxu1 }
 0x17e   :  { %9655 = vst [vmem:[#allocation40_spill] sm:$0xff] %v5379_v38  ;;  %9656 = vst [vmem:[#allocation41_spill] sm:$0xff] %v5381_v52  ;;  %v4220_v43 = vpop.f32.mrb[69].mxu0  ;;  %v4336_v4 = vpop.f32.mrb[69].mxu1 }
 0x17f   :  { %v5389_v53 = vpop.f32.mrb[70].mxu0  ;;  %v5391_v62 = vpop.f32.mrb[70].mxu1 }
 0x180   :  { %9657 = vst [vmem:[#allocation42_spill] sm:$0xff] %v5389_v53  ;;  %9658 = vst [vmem:[#allocation43_spill] sm:$0xff] %v5391_v62  ;;  %v4221_v25 = vpop.f32.mrb[71].mxu0  ;;  %v4337_v12 = vpop.f32.mrb[71].mxu1  ;;  %v4698_v62 = vld [vmem:[%s9126_s0 + $0x228] sm:$0xff]  }
 0x181   :  { %v4699_v12 = vld [vmem:[%s9126_s0 + $0x2ec] sm:$0xff]  }
 0x182   :  { %4459 = vmatmul.mubr.bf16.gmra.mrb[176].mxu0 %v4696_v0  ;;  %4575 = vmatmul.mubr.bf16.gmra.mrb[176].mxu1 %v4697_v9 }
 0x183   :  { %4462 = vmatprep.mubr.msk.bf16.mxu0 %vm4712_vm0, %v9646_v34  ;;  %4578 = vmatprep.mubr.msk.bf16.mxu1 %vm4712_vm0, %v9646_v34 }
 0x185   :  { %v5397_v4 = vpop.f32.mrb[72].mxu0  ;;  %v5399_v43 = vpop.f32.mrb[72].mxu1 }
 0x186   :  { %9659 = vst [vmem:[#allocation44_spill] sm:$0xff] %v5397_v4  ;;  %9660 = vst [vmem:[#allocation45_spill] sm:$0xff] %v5399_v43  ;;  %v4224_v52 = vpop.f32.mrb[73].mxu0  ;;  %v4340_v38 = vpop.f32.mrb[73].mxu1 }
 0x187   :  { %v5407_v0 = vpop.f32.mrb[74].mxu0  ;;  %v5409_v9 = vpop.f32.mrb[74].mxu1 }
 0x188   :  { %9661 = vst [vmem:[#allocation46_spill] sm:$0xff] %v5407_v0  ;;  %9662 = vst [vmem:[#allocation47_spill] sm:$0xff] %v5409_v9  ;;  %v4225_v25 = vpop.f32.mrb[75].mxu0  ;;  %v4341_v53 = vpop.f32.mrb[75].mxu1  ;;  %v4700_v9 = vld [vmem:[%s9126_s0 + $0x230] sm:$0xff]  }
 0x189   :  { %v4701_v53 = vld [vmem:[%s9126_s0 + $0x2f4] sm:$0xff]  }
 0x18a   :  { %4463 = vmatmul.mubr.bf16.gmra.mrb[180].mxu0 %v4698_v62  ;;  %4579 = vmatmul.mubr.bf16.gmra.mrb[180].mxu1 %v4699_v12 }
 0x18b   :  { %4466 = vmatprep.mubr.msk.bf16.mxu0 %vm4712_vm0, %v9646_v34  ;;  %4582 = vmatprep.mubr.msk.bf16.mxu1 %vm4712_vm0, %v9646_v34 }
 0x18d   :  { %v5415_v38 = vpop.f32.mrb[76].mxu0  ;;  %v5417_v52 = vpop.f32.mrb[76].mxu1 }
 0x18e   :  { %9663 = vst [vmem:[#allocation48_spill] sm:$0xff] %v5415_v38  ;;  %9664 = vst [vmem:[#allocation49_spill] sm:$0xff] %v5417_v52  ;;  %v4228_v43 = vpop.f32.mrb[77].mxu0  ;;  %v4344_v4 = vpop.f32.mrb[77].mxu1 }
 0x18f   :  { %v5425_v62 = vpop.f32.mrb[78].mxu0  ;;  %v5427_v12 = vpop.f32.mrb[78].mxu1 }
 0x190   :  { %9665 = vst [vmem:[#allocation50_spill] sm:$0xff] %v5425_v62  ;;  %9666 = vst [vmem:[#allocation51_spill] sm:$0xff] %v5427_v12  ;;  %v4229_v25 = vpop.f32.mrb[79].mxu0  ;;  %v4345_v0 = vpop.f32.mrb[79].mxu1  ;;  %v4702_v12 = vld [vmem:[%s9126_s0 + $0x238] sm:$0xff]  }
 0x191   :  { %v4703_v0 = vld [vmem:[%s9126_s0 + $0x2fc] sm:$0xff]  }
 0x192   :  { %4467 = vmatmul.mubr.bf16.gmra.mrb[184].mxu0 %v4700_v9  ;;  %4583 = vmatmul.mubr.bf16.gmra.mrb[184].mxu1 %v4701_v53 }
 0x193   :  { %4470 = vmatprep.mubr.msk.bf16.mxu0 %vm4712_vm0, %v9646_v34  ;;  %4586 = vmatprep.mubr.msk.bf16.mxu1 %vm4712_vm0, %v9646_v34 }
 0x195   :  { %v5433_v4 = vpop.f32.mrb[80].mxu0  ;;  %v5435_v43 = vpop.f32.mrb[80].mxu1 }
 0x196   :  { %9667 = vst [vmem:[#allocation52_spill] sm:$0xff] %v5433_v4  ;;  %9668 = vst [vmem:[#allocation53_spill] sm:$0xff] %v5435_v43  ;;  %v4232_v52 = vpop.f32.mrb[81].mxu0  ;;  %v4348_v38 = vpop.f32.mrb[81].mxu1 }
 0x197   :  { %v5443_v9 = vpop.f32.mrb[82].mxu0  ;;  %v5445_v53 = vpop.f32.mrb[82].mxu1 }
 0x198   :  { %9669 = vst [vmem:[#allocation54_spill] sm:$0xff] %v5443_v9  ;;  %9670 = vst [vmem:[#allocation55_spill] sm:$0xff] %v5445_v53  ;;  %v4233_v25 = vpop.f32.mrb[83].mxu0  ;;  %v4349_v62 = vpop.f32.mrb[83].mxu1  ;;  %v4704_v53 = vld [vmem:[%s9126_s0 + $0x240] sm:$0xff]  }
 0x199   :  { %v4705_v62 = vld [vmem:[%s9126_s0 + $0x304] sm:$0xff]  }
 0x19a   :  { %4471 = vmatmul.mubr.bf16.gmra.mrb[188].mxu0 %v4702_v12  ;;  %4587 = vmatmul.mubr.bf16.gmra.mrb[188].mxu1 %v4703_v0 }
 0x19b   :  { %4474 = vmatprep.mubr.msk.bf16.mxu0 %vm4712_vm0, %v9646_v34  ;;  %4590 = vmatprep.mubr.msk.bf16.mxu1 %vm4712_vm0, %v9646_v34 }
 0x19d   :  { %v5451_v38 = vpop.f32.mrb[84].mxu0  ;;  %v5453_v52 = vpop.f32.mrb[84].mxu1 }
 0x19e   :  { %9671 = vst [vmem:[#allocation56_spill] sm:$0xff] %v5451_v38  ;;  %9672 = vst [vmem:[#allocation57_spill] sm:$0xff] %v5453_v52  ;;  %v4236_v43 = vpop.f32.mrb[85].mxu0  ;;  %v4352_v4 = vpop.f32.mrb[85].mxu1 }
 0x19f   :  { %v5461_v12 = vpop.f32.mrb[86].mxu0  ;;  %v5463_v0 = vpop.f32.mrb[86].mxu1 }
 0x1a0   :  { %9673 = vst [vmem:[#allocation58_spill] sm:$0xff] %v5461_v12  ;;  %9674 = vst [vmem:[#allocation59_spill] sm:$0xff] %v5463_v0  ;;  %v4237_v25 = vpop.f32.mrb[87].mxu0  ;;  %v4353_v9 = vpop.f32.mrb[87].mxu1  ;;  %v4706_v0 = vld [vmem:[%s9126_s0 + $0x248] ss:$0 sps:$4 sm:$0xff]  }
 0x1a1   :  { %v4707_v9 = vld [vmem:[%s9126_s0 + $0x30c] ss:$0 sps:$4 sm:$0xff]  }
 0x1a2   :  { %4475 = vmatmul.mubr.bf16.gmra.mrb[192].mxu0 %v4704_v53  ;;  %4591 = vmatmul.mubr.bf16.gmra.mrb[192].mxu1 %v4705_v62 }
 0x1a3   :  { %4478 = vmatprep.mubr.msk.bf16.mxu0 %vm4712_vm0, %v9646_v34  ;;  %4594 = vmatprep.mubr.msk.bf16.mxu1 %vm4712_vm0, %v9646_v34 }
 0x1a5   :  { %v5469_v4 = vpop.f32.mrb[88].mxu0  ;;  %v5471_v43 = vpop.f32.mrb[88].mxu1 }
 0x1a6   :  { %9675 = vst [vmem:[#allocation60_spill] sm:$0xff] %v5469_v4  ;;  %9676 = vst [vmem:[#allocation61_spill] sm:$0xff] %v5471_v43  ;;  %v4240_v52 = vpop.f32.mrb[89].mxu0  ;;  %v4356_v38 = vpop.f32.mrb[89].mxu1 }
 0x1a7   :  { %v5479_v53 = vpop.f32.mrb[90].mxu0  ;;  %v5481_v62 = vpop.f32.mrb[90].mxu1 }
 0x1a8   :  { %9677 = vst [vmem:[#allocation62_spill] sm:$0xff] %v5479_v53  ;;  %9678 = vst [vmem:[#allocation63_spill] sm:$0xff] %v5481_v62  ;;  %v4241_v25 = vpop.f32.mrb[91].mxu0  ;;  %v4357_v34 = vpop.f32.mrb[91].mxu1 }
 0x1aa   :  { %4479 = vmatmul.mubr.bf16.gmra.mrb[196].mxu0 %v4706_v0  ;;  %4595 = vmatmul.mubr.bf16.gmra.mrb[196].mxu1 %v4707_v9 }
 0x1ad   :  { %v5483_v4 = vpop.f32.mrb[92].mxu0  ;;  %v5485_v52 = vpop.f32.mrb[92].mxu1 }
 0x1ae   :  { %9679 = vst [vmem:[#allocation64_spill] sm:$0xff] %v5483_v4  ;;  %9680 = vst [vmem:[#allocation65_spill] sm:$0xff] %v5485_v52  ;;  %v4244_v38 = vpop.f32.mrb[93].mxu0  ;;  %v4360_v43 = vpop.f32.mrb[93].mxu1 }
 0x1af   :  { %v5487_v12 = vpop.f32.mrb[94].mxu0  ;;  %v5489_v35 = vpop.f32.mrb[94].mxu1 }
 0x1b0   :  { %9681 = vst [vmem:[#allocation66_spill] sm:$0xff] %v5487_v12  ;;  %9682 = vst [vmem:[#allocation67_spill] sm:$0xff] %v5489_v35  ;;  %v4245_v22 = vpop.f32.mrb[95].mxu0  ;;  %v4361_v15 = vpop.f32.mrb[95].mxu1 }
 0x1b5   :  { %v5491_v59 = vpop.f32.mrb[96].mxu0  ;;  %v5493_v53 = vpop.f32.mrb[96].mxu1 }
 0x1b6   :  { %9683 = vst [vmem:[#allocation68_spill] sm:$0xff] %v5491_v59  ;;  %9684 = vst [vmem:[#allocation69_spill] sm:$0xff] %v5493_v53  ;;  %v4248_v25 = vpop.f32.mrb[97].mxu0  ;;  %v4364_v34 = vpop.f32.mrb[97].mxu1 }
 0x1b7   :  { %v518_v0 = vpop.f32.mrb[98].mxu0  ;;  %v948_v9 = vpop.f32.mrb[98].mxu1 }
 0x1b8   :  { %v4249_v62 = vpop.f32.mrb[99].mxu0  ;;  %v4365_v4 = vpop.f32.mrb[99].mxu1 }
 0x1bd   :  { %v5495_v54 = vpop.f32.mrb[100].mxu0  ;;  %v5497_v38 = vpop.f32.mrb[100].mxu1 }
 0x1be   :  { %v4384_v43 = vpop.f32.mrb[101].mxu0  ;;  %v4500_v12 = vpop.f32.mrb[101].mxu1 }
 0x1bf   :  { %v5499_v52 = vpop.f32.mrb[102].mxu0  ;;  %v5501_v22 = vpop.f32.mrb[102].mxu1 }
 0x1c0   :  { %v4385_v15 = vpop.f32.mrb[103].mxu0  ;;  %v4501_v59 = vpop.f32.mrb[103].mxu1 }
 0x1c5   :  { %v5503_v35 = vpop.f32.mrb[104].mxu0  ;;  %v5505_v25 = vpop.f32.mrb[104].mxu1 }
 0x1c6   :  { %v4388_v34 = vpop.f32.mrb[105].mxu0  ;;  %v4504_v0 = vpop.f32.mrb[105].mxu1 }
 0x1c7   :  { %v5507_v62 = vpop.f32.mrb[106].mxu0  ;;  %v5509_v4 = vpop.f32.mrb[106].mxu1 }
 0x1c8   :  { %v4389_v9 = vpop.f32.mrb[107].mxu0  ;;  %v4505_v53 = vpop.f32.mrb[107].mxu1 }
 0x1cd   :  { %v5511_v43 = vpop.f32.mrb[108].mxu0  ;;  %v5513_v12 = vpop.f32.mrb[108].mxu1 }
 0x1ce   :  { %v4392_v49 = vpop.f32.mrb[109].mxu0  ;;  %v4508_v44 = vpop.f32.mrb[109].mxu1 }
 0x1cf   :  { %v5515_v15 = vpop.f32.mrb[110].mxu0  ;;  %v5517_v59 = vpop.f32.mrb[110].mxu1 }
 0x1d0   :  { %v4393_v33 = vpop.f32.mrb[111].mxu0  ;;  %v4509_v28 = vpop.f32.mrb[111].mxu1 }
 0x1d5   :  { %v5519_v34 = vpop.f32.mrb[112].mxu0  ;;  %v5521_v0 = vpop.f32.mrb[112].mxu1 }
 0x1d6   :  { %v4396_v19 = vpop.f32.mrb[113].mxu0  ;;  %v4512_v18 = vpop.f32.mrb[113].mxu1 }
 0x1d7   :  { %v5523_v9 = vpop.f32.mrb[114].mxu0  ;;  %v5525_v53 = vpop.f32.mrb[114].mxu1 }
 0x1d8   :  { %v4397_v3 = vpop.f32.mrb[115].mxu0  ;;  %v4513_v2 = vpop.f32.mrb[115].mxu1 }
 0x1dd   :  { %v5527_v49 = vpop.f32.mrb[116].mxu0  ;;  %v5529_v44 = vpop.f32.mrb[116].mxu1 }
 0x1de   :  { %v4400_v58 = vpop.f32.mrb[117].mxu0  ;;  %v4516_v55 = vpop.f32.mrb[117].mxu1 }
 0x1df   :  { %v5531_v33 = vpop.f32.mrb[118].mxu0  ;;  %v5533_v28 = vpop.f32.mrb[118].mxu1  ;;  %v5546_v55 = vld [vmem:[%s9127_s2] ss:$0 sm:$0xff] }
 0x1e0   :  { %v4401_v48 = vpop.f32.mrb[119].mxu0  ;;  %v4517_v45 = vpop.f32.mrb[119].mxu1 }
 0x1e1   :  { %v5550_v45 = vadd.f32 %v5546_v55, %v5075_v1  ;;  %v5554_v48 = vadd.f32 %v5546_v55, %v5083_v6  ;;  %v5570_v1 = vadd.f32 %v5546_v55, %v5093_v11  ;;  %v5584_v11 = vadd.f32 %v5546_v55, %v5101_v16 }
 0x1e2   :  { %v5604_v16 = vadd.f32 %v5546_v55, %v5111_v21 }
 0x1e3   :  { %9685 = vst [vmem:[#allocation70_spill] sm:$0xff] %v5550_v45  ;;  %9686 = vst [vmem:[#allocation71_spill] sm:$0xff] %v5554_v48 }
 0x1e4   :  { %9689 = vst [vmem:[#allocation74_spill] sm:$0xff] %v5570_v1  ;;  %9692 = vst [vmem:[#allocation77_spill] sm:$0xff] %v5604_v16 }
 0x1e5   :  { %v5535_v19 = vpop.f32.mrb[120].mxu0  ;;  %v5537_v18 = vpop.f32.mrb[120].mxu1 }
 0x1e6   :  { %v4404_v42 = vpop.f32.mrb[121].mxu0  ;;  %v4520_v39 = vpop.f32.mrb[121].mxu1 }
 0x1e7   :  { %v5539_v3 = vpop.f32.mrb[122].mxu0  ;;  %v5541_v2 = vpop.f32.mrb[122].mxu1  ;;  %v5558_v39 = vadd.f32 %v5546_v55, %v5085_v7  ;;  %v5562_v42 = vadd.f32 %v5546_v55, %v5073_v63 }
 0x1e8   :  { %v4405_v58 = vpop.f32.mrb[123].mxu0  ;;  %v4521_v32 = vpop.f32.mrb[123].mxu1 }
 0x1e9   :  { %9687 = vst [vmem:[#allocation72_spill] sm:$0xff] %v5558_v39  ;;  %9688 = vst [vmem:[#allocation73_spill] sm:$0xff] %v5562_v42  ;;  %v5566_v58 = vadd.f32 %v5546_v55, %v5091_v10  ;;  %v1811_v6 = vadd.f32 %v5554_v48, %v5562_v42  ;;  %v1865_v32 = vadd.f32 %v5558_v39, %v5550_v45 }
 0x1ea   :  { %v5588_v48 = vadd.f32 %v5546_v55, %v5103_v17  ;;  %v5608_v17 = vadd.f32 %v5546_v55, %v5495_v54  ;;  %v5634_v45 = vadd.f32 %v5546_v55, %v5119_v26 }
 0x1eb   :  { %v1812_v23 = vadd.f32 %v1811_v6, %v5566_v58  ;;  %v1866_v10 = vadd.f32 %v1865_v32, %v5570_v1  ;;  %v5600_v32 = vadd.f32 %v5546_v55, %v5109_v20  ;;  %v5612_v1 = vadd.f32 %v5546_v55, %v5497_v38 }
 0x1ec   :  { %9690 = vst [vmem:[#allocation75_spill] sm:$0xff] %v5588_v48  ;;  %9693 = vst [vmem:[#allocation78_spill] sm:$0xff] %v5608_v17  ;;  %v5620_v20 = vadd.f32 %v5546_v55, %v5503_v35 }
 0x1ed   :  { %v5576_v7 = vpop.f32.mrb[124].mxu0  ;;  %v5578_v29 = vpop.f32.mrb[124].mxu1  ;;  %9694 = vst [vmem:[#allocation79_spill] sm:$0xff] %v5612_v1  ;;  %v1867_v21 = vadd.f32 %v1866_v10, %v5588_v48 }
 0x1ee   :  { %v4408_v63 = vpop.f32.mrb[125].mxu0  ;;  %v4524_v24 = vpop.f32.mrb[125].mxu1  ;;  %9696 = vst [vmem:[#allocation81_spill] sm:$0xff] %v5620_v20 }
 0x1ef   :  { %v5590_v42 = vpop.f32.mrb[126].mxu0  ;;  %v5592_v39 = vpop.f32.mrb[126].mxu1  ;;  %v5596_v63 = vadd.f32 %v5546_v55, %v5499_v52  ;;  %v5616_v52 = vadd.f32 %v5546_v55, %v5501_v22  ;;  %v1868_v22 = vadd.f32 %v1867_v21, %v5604_v16 }
 0x1f0   :  { %v4409_v24 = vpop.f32.mrb[127].mxu0  ;;  %v4525_v6 = vpop.f32.mrb[127].mxu1 }
 0x1f1   :  { %9691 = vst [vmem:[#allocation76_spill] sm:$0xff] %v5596_v63  ;;  %9695 = vst [vmem:[#allocation80_spill] sm:$0xff] %v5616_v52  ;;  %v1813_v24 = vadd.f32 %v1812_v23, %v5584_v11  ;;  %v1920_v54 = vadd.f32 %v5596_v63, %v5608_v17  ;;  %v5628_v6 = vadd.f32 %v5546_v55, %v5505_v25 }
 0x1f2   :  { %v5638_v23 = vadd.f32 %v5546_v55, %v5121_v27  ;;  %v1975_v25 = vadd.f32 %v5616_v52, %v5612_v1  ;;  %v5653_v17 = vadd.f32 %v5546_v55, %v5127_v30  ;;  %v5657_v27 = vadd.f32 %v5546_v55, %v5129_v31 }
 0x1f3   :  { %9697 = vst [vmem:[#allocation82_spill] sm:$0xff] %v5628_v6  ;;  %v1814_v38 = vadd.f32 %v1813_v24, %v5600_v32  ;;  %v1921_v63 = vadd.f32 %v1920_v54, %v5620_v20  ;;  %v5649_v24 = vadd.f32 %v5546_v55, %v5507_v62  ;;  %v5666_v62 = vadd.f32 %v5546_v55, %v5509_v4 }
 0x1f4   :  { %9698 = vst [vmem:[#allocation83_spill] sm:$0xff] %v5638_v23  ;;  %9700 = vst [vmem:[#allocation85_spill] sm:$0xff] %v5657_v27  ;;  %v1976_v54 = vadd.f32 %v1975_v25, %v5628_v6  ;;  %v1869_v31 = vadd.f32 %v1868_v22, %v5638_v23  ;;  %v5677_v20 = vadd.f32 %v5546_v55, %v5513_v12 }
 0x1f5   :  { %v5640_v35 = vpop.f32.mrb[128].mxu0  ;;  %v5642_v10 = vpop.f32.mrb[128].mxu1  ;;  %9699 = vst [vmem:[#allocation84_spill] sm:$0xff] %v5649_v24  ;;  %9701 = vst [vmem:[#allocation86_spill] sm:$0xff] %v5666_v62  ;;  %v1815_v52 = vadd.f32 %v1814_v38, %v5634_v45  ;;  %v1922_v1 = vadd.f32 %v1921_v63, %v5649_v24  ;;  %v5693_v12 = vadd.f32 %v5546_v55, %v5515_v15 }
 0x1f6   :  { %v4412_v21 = vpop.f32.mrb[129].mxu0  ;;  %v4528_v26 = vpop.f32.mrb[129].mxu1  ;;  %9703 = vst [vmem:[#allocation88_spill] sm:$0xff] %v5677_v20  ;;  %v1870_v4 = vadd.f32 %v1869_v31, %v5657_v27  ;;  %v1977_v38 = vadd.f32 %v1976_v54, %v5666_v62  ;;  %v5714_v15 = vadd.f32 %v5546_v55, %v5519_v34 }
 0x1f7   :  { %v5659_v16 = vpop.f32.mrb[130].mxu0  ;;  %v5661_v48 = vpop.f32.mrb[130].mxu1  ;;  %v5670_v21 = vadd.f32 %v5546_v55, %v5511_v43  ;;  %v1816_v25 = vadd.f32 %v1815_v52, %v5653_v17  ;;  %v5683_v43 = vadd.f32 %v5546_v55, %v5137_v36  ;;  %9705 = vst [vmem:[#allocation90_spill] sm:$0xff] %v5693_v12  ;;  %v5697_v52 = vadd.f32 %v5546_v55, %v5145_v40 }
 0x1f8   :  { %v4413_v30 = vpop.f32.mrb[131].mxu0  ;;  %v4529_v26 = vpop.f32.mrb[131].mxu1  ;;  %v5701_v36 = vadd.f32 %v5546_v55, %v5147_v41  ;;  %v1978_v54 = vadd.f32 %v1977_v38, %v5677_v20  ;;  %9708 = vst [vmem:[#allocation93_spill] sm:$0xff] %v5714_v15 }
 0x1f9   :  { %9702 = vst [vmem:[#allocation87_spill] sm:$0xff] %v5670_v21  ;;  %v5687_v30 = vadd.f32 %v5546_v55, %v5139_v37  ;;  %v1923_v63 = vadd.f32 %v1922_v1, %v5670_v21  ;;  %v5710_v1 = vadd.f32 %v5546_v55, %v5517_v59  ;;  %v1817_v31 = vadd.f32 %v1816_v25, %v5683_v43 }
 0x1fa   :  { %9706 = vst [vmem:[#allocation91_spill] sm:$0xff] %v5701_v36  ;;  %v5725_v59 = vadd.f32 %v5546_v55, %v5521_v0  ;;  %v5731_v25 = vadd.f32 %v5546_v55, %v5155_v46  ;;  %v5741_v0 = vadd.f32 %v5546_v55, %v5523_v9  ;;  %v5749_v46 = vadd.f32 %v5546_v55, %v5165_v51 }
 0x1fb   :  { %9704 = vst [vmem:[#allocation89_spill] sm:$0xff] %v5687_v30  ;;  %9707 = vst [vmem:[#allocation92_spill] sm:$0xff] %v5710_v1  ;;  %v1871_v41 = vadd.f32 %v1870_v4, %v5687_v30  ;;  %v1924_v38 = vadd.f32 %v1923_v63, %v5693_v12  ;;  %v1818_v34 = vadd.f32 %v1817_v31, %v5697_v52 }
 0x1fc   :  { %9709 = vst [vmem:[#allocation94_spill] sm:$0xff] %v5725_v59  ;;  %v5735_v4 = vadd.f32 %v5546_v55, %v5157_v47  ;;  %v1979_v63 = vadd.f32 %v1978_v54, %v5710_v1  ;;  %9711 = vst [vmem:[#allocation96_spill] sm:$0xff] %v5741_v0  ;;  %v5754_v47 = vadd.f32 %v5546_v55, %v5525_v53 }
 0x1fd   :  { %v5703_v22 = vpop.f32.mrb[132].mxu0  ;;  %v5705_v37 = vpop.f32.mrb[132].mxu1  ;;  %9712 = vst [vmem:[#allocation97_spill] sm:$0xff] %v5749_v46  ;;  %v5758_v54 = vadd.f32 %v5546_v55, %v5527_v49  ;;  %v1819_v9 = vadd.f32 %v1818_v34, %v5731_v25  ;;  %v5775_v34 = vadd.f32 %v5546_v55, %v5173_v56  ;;  %v5793_v56 = vadd.f32 %v5546_v55, %v5181_v60 }
 0x1fe   :  { %v4416_v40 = vpop.f32.mrb[133].mxu0  ;;  %v4532_v26 = vpop.f32.mrb[133].mxu1  ;;  %9710 = vst [vmem:[#allocation95_spill] sm:$0xff] %v5735_v4  ;;  %9713 = vst [vmem:[#allocation98_spill] sm:$0xff] %v5754_v47 }
 0x1ff   :  { %v5718_v62 = vpop.f32.mrb[134].mxu0  ;;  %v5720_v6 = vpop.f32.mrb[134].mxu1  ;;  %v1872_v40 = vadd.f32 %v1871_v41, %v5701_v36  ;;  %v1925_v26 = vadd.f32 %v1924_v38, %v5714_v15  ;;  %9714 = vst [vmem:[#allocation99_spill] sm:$0xff] %v5758_v54  ;;  %v5769_v38 = vadd.f32 %v5546_v55, %v5529_v44 }
 0x200   :  { %v4417_v20 = vpop.f32.mrb[135].mxu0  ;;  %v4533_v21 = vpop.f32.mrb[135].mxu1 }
 0x201   :  { %v5745_v20 = vadd.f32 %v5546_v55, %v5163_v50  ;;  %v1980_v21 = vadd.f32 %v1979_v63, %v5725_v59  ;;  %v1873_v31 = vadd.f32 %v1872_v40, %v5735_v4  ;;  %v1926_v51 = vadd.f32 %v1925_v26, %v5741_v0  ;;  %9715 = vst [vmem:[#allocation100_spill] sm:$0xff] %v5769_v38 }
 0x202   :  { %v5779_v40 = vadd.f32 %v5546_v55, %v5175_v57  ;;  %v5797_v57 = vadd.f32 %v5546_v55, %v5183_v61  ;;  %v5813_v61 = vadd.f32 %v5546_v55, %v5537_v18 }
 0x203   :  { %v1820_v59 = vadd.f32 %v1819_v9, %v5745_v20  ;;  %v1874_v49 = vadd.f32 %v1873_v31, %v5749_v46  ;;  %v1981_v44 = vadd.f32 %v1980_v21, %v5754_v47  ;;  %v5789_v9 = vadd.f32 %v5546_v55, %v5531_v33 }
 0x204   :  { %9716 = vst [vmem:[#allocation101_spill] sm:$0xff] %v5779_v40  ;;  %9718 = vst [vmem:[#allocation103_spill] sm:$0xff] %v5797_v57  ;;  %v5802_v21 = vadd.f32 %v5546_v55, %v5533_v28  ;;  %v5806_v33 = vadd.f32 %v5546_v55, %v5535_v19  ;;  %v5819_v28 = vadd.f32 %v5546_v55, %v5191_v5 }
 0x205   :  { %v5762_v50 = vpop.f32.mrb[136].mxu0  ;;  %v5764_v41 = vpop.f32.mrb[136].mxu1  ;;  %9717 = vst [vmem:[#allocation102_spill] sm:$0xff] %v5789_v9  ;;  %v1982_v0 = vadd.f32 %v1981_v44, %v5769_v38  ;;  %9721 = vst [vmem:[#allocation106_spill] sm:$0xff] %v5813_v61  ;;  %v5823_v19 = vadd.f32 %v5546_v55, %v5193_v8  ;;  %v5837_v5 = vadd.f32 %v5546_v55, %v5199_v13 }
 0x206   :  { %v4420_v53 = vpop.f32.mrb[137].mxu0  ;;  %v4536_v63 = vpop.f32.mrb[137].mxu1  ;;  %9719 = vst [vmem:[#allocation104_spill] sm:$0xff] %v5802_v21  ;;  %9720 = vst [vmem:[#allocation105_spill] sm:$0xff] %v5806_v33  ;;  %v5841_v8 = vadd.f32 %v5546_v55, %v5201_v14 }
 0x207   :  { %v5781_v1 = vpop.f32.mrb[138].mxu0  ;;  %v5783_v26 = vpop.f32.mrb[138].mxu1  ;;  %v1927_v53 = vadd.f32 %v1926_v51, %v5758_v54  ;;  %v1821_v51 = vadd.f32 %v1820_v59, %v5775_v34  ;;  %9722 = vst [vmem:[#allocation107_spill] sm:$0xff] %v5823_v19 }
 0x208   :  { %v4421_v31 = vpop.f32.mrb[139].mxu0  ;;  %v4537_v63 = vpop.f32.mrb[139].mxu1  ;;  %9724 = vst [vmem:[#allocation109_spill] sm:$0xff] %v5841_v8 }
 0x209   :  { %v1875_v31 = vadd.f32 %v1874_v49, %v5779_v40  ;;  %v1928_v60 = vadd.f32 %v1927_v53, %v5789_v9  ;;  %v1822_v44 = vadd.f32 %v1821_v51, %v5793_v56  ;;  %v1983_v53 = vadd.f32 %v1982_v0, %v5802_v21 }
 0x20a   :  { %v5833_v51 = vadd.f32 %v5546_v55, %v5539_v3  ;;  %v5850_v3 = vadd.f32 %v5546_v55, %v5541_v2 }
 0x20b   :  { %v1876_v63 = vadd.f32 %v1875_v31, %v5797_v57  ;;  %v1929_v18 = vadd.f32 %v1928_v60, %v5806_v33  ;;  %v1984_v0 = vadd.f32 %v1983_v53, %v5813_v61  ;;  %v5861_v33 = vadd.f32 %v5546_v55, %v5578_v29  ;;  %v9728_v61 = vld [vmem:[#allocation2_spill] sm:$0xff] }
 0x20c   :  { %9723 = vst [vmem:[#allocation108_spill] sm:$0xff] %v5833_v51  ;;  %9725 = vst [vmem:[#allocation110_spill] sm:$0xff] %v5850_v3  ;;  %v5877_v29 = vadd.f32 %v5546_v55, %v5590_v42  ;;  %v5898_v42 = vadd.f32 %v5546_v55, %v5640_v35 }
 0x20d   :  { %v5825_v59 = vpop.f32.mrb[140].mxu0  ;;  %v5827_v49 = vpop.f32.mrb[140].mxu1  ;;  %v1877_v14 = vadd.f32 %v1876_v63, %v5823_v19  ;;  %v1930_v21 = vadd.f32 %v1929_v18, %v5833_v51  ;;  %9727 = vst [vmem:[#allocation112_spill] sm:$0xff] %v5861_v33  ;;  %v9732_v18 = vld [vmem:[#allocation4_spill] sm:$0xff] }
 0x20e   :  { %v4424_v31 = vpop.f32.mrb[141].mxu0  ;;  %v4540_v38 = vpop.f32.mrb[141].mxu1  ;;  %9736 = vst [vmem:[#allocation113_spill] sm:$0xff] %v5898_v42 }
 0x20f   :  { %v5843_v47 = vpop.f32.mrb[142].mxu0  ;;  %v5845_v9 = vpop.f32.mrb[142].mxu1  ;;  %v5854_v38 = vadd.f32 %v5546_v55, %v5576_v7  ;;  %v1823_v31 = vadd.f32 %v1822_v44, %v5819_v28  ;;  %v1878_v2 = vadd.f32 %v1877_v14, %v5841_v8  ;;  %v5867_v7 = vadd.f32 %v5546_v55, %v9728_v61  ;;  %v9733_v14 = vld [vmem:[#allocation5_spill] sm:$0xff] }
 0x210   :  { %v4425_v13 = vpop.f32.mrb[143].mxu0  ;;  %v4541_v60 = vpop.f32.mrb[143].mxu1  ;;  %v1985_v44 = vadd.f32 %v1984_v0, %v5850_v3  ;;  %v5885_v61 = vadd.f32 %v5546_v55, %v9733_v14 }
 0x211   :  { %9726 = vst [vmem:[#allocation111_spill] sm:$0xff] %v5854_v38  ;;  %v1824_v53 = vadd.f32 %v1823_v31, %v5837_v5  ;;  %v9729_v13 = vld [vmem:[#allocation3_spill] sm:$0xff]  ;;  %v1931_v63 = vadd.f32 %v1930_v21, %v5854_v38  ;;  %v5881_v31 = vadd.f32 %v5546_v55, %v9732_v18  ;;  %v5894_v21 = vadd.f32 %v5546_v55, %v5592_v39 }
 0x212   :  { %v5871_v60 = vadd.f32 %v5546_v55, %v9729_v13  ;;  %9731 = vst [vmem:[#allocation3_spill] sm:$0xff] %v5877_v29  ;;  %9734 = vst [vmem:[#allocation4_spill] sm:$0xff] %v5885_v61  ;;  %v1986_v0 = vadd.f32 %v1985_v44, %v5861_v33  ;;  %v5909_v39 = vadd.f32 %v5546_v55, %v5642_v10 }
 0x213   :  { %9735 = vst [vmem:[#allocation5_spill] sm:$0xff] %v5894_v21  ;;  %v1825_v38 = vadd.f32 %v1824_v53, %v5867_v7  ;;  %v1932_v44 = vadd.f32 %v1931_v63, %v5877_v29  ;;  %v5925_v10 = vadd.f32 %v5546_v55, %v5659_v16 }
 0x214   :  { %9730 = vst [vmem:[#allocation2_spill] sm:$0xff] %v5871_v60  ;;  %v1879_v14 = vadd.f32 %v1878_v2, %v5871_v60  ;;  %9737 = vst [vmem:[#allocation114_spill] sm:$0xff] %v5909_v39  ;;  %v9739_v2 = vld [vmem:[#allocation7_spill] sm:$0xff]  ;;  %v1987_v63 = vadd.f32 %v1986_v0, %v5894_v21  ;;  %v5942_v0 = vadd.f32 %v5546_v55, %v5703_v22 }
 0x215   :  { %v5887_v51 = vpop.f32.mrb[144].mxu0  ;;  %v5889_v13 = vpop.f32.mrb[144].mxu1  ;;  %v1826_v35 = vadd.f32 %v1825_v38, %v5881_v31  ;;  %v5919_v24 = vadd.f32 %v5546_v55, %v9739_v2  ;;  %v1933_v29 = vadd.f32 %v1932_v44, %v5898_v42  ;;  %9741 = vst [vmem:[#allocation7_spill] sm:$0xff] %v5925_v10  ;;  %v9743_v38 = vld [vmem:[#allocation9_spill] sm:$0xff]  ;;  %v5938_v2 = vadd.f32 %v5546_v55, %v5661_v48 }
 0x216   :  { %v4428_v18 = vpop.f32.mrb[145].mxu0  ;;  %v4544_v3 = vpop.f32.mrb[145].mxu1  ;;  %9746 = vst [vmem:[#allocation115_spill] sm:$0xff] %v5942_v0 }
 0x217   :  { %v5902_v54 = vpop.f32.mrb[146].mxu0  ;;  %v5904_v15 = vpop.f32.mrb[146].mxu1  ;;  %v1880_v3 = vadd.f32 %v1879_v14, %v5885_v61  ;;  %v9738_v18 = vld [vmem:[#allocation6_spill] sm:$0xff]  ;;  %v5933_v14 = vadd.f32 %v5546_v55, %v9743_v38  ;;  %9745 = vst [vmem:[#allocation9_spill] sm:$0xff] %v5938_v2  ;;  %v1934_v38 = vadd.f32 %v1933_v29, %v5925_v10 }
 0x218   :  { %v4429_v33 = vpop.f32.mrb[147].mxu0  ;;  %v4545_v12 = vpop.f32.mrb[147].mxu1  ;;  %v5915_v53 = vadd.f32 %v5546_v55, %v9738_v18  ;;  %9740 = vst [vmem:[#allocation6_spill] sm:$0xff] %v5919_v24  ;;  %v1988_v18 = vadd.f32 %v1987_v63, %v5909_v39  ;;  %v5953_v63 = vadd.f32 %v5546_v55, %v5705_v37  ;;  %v9748_v61 = vld [vmem:[#allocation10_spill] sm:$0xff] }
 0x219   :  { %v9742_v12 = vld [vmem:[#allocation8_spill] sm:$0xff]  ;;  %v1881_v44 = vadd.f32 %v1880_v3, %v5919_v24  ;;  %v9749_v3 = vld [vmem:[#allocation11_spill] sm:$0xff] }
 0x21a   :  { %v5929_v33 = vadd.f32 %v5546_v55, %v9742_v12  ;;  %9744 = vst [vmem:[#allocation8_spill] sm:$0xff] %v5933_v14  ;;  %v1827_v16 = vadd.f32 %v1826_v35, %v5915_v53  ;;  %9747 = vst [vmem:[#allocation116_spill] sm:$0xff] %v5953_v63  ;;  %v5959_v35 = vadd.f32 %v5546_v55, %v9748_v61  ;;  %v9752_v61 = vld [vmem:[#allocation12_spill] sm:$0xff] }
 0x21b   :  { %v1882_v22 = vadd.f32 %v1881_v44, %v5933_v14  ;;  %v5963_v24 = vadd.f32 %v5546_v55, %v9749_v3  ;;  %v1989_v37 = vadd.f32 %v1988_v18, %v5938_v2  ;;  %v5977_v10 = vadd.f32 %v5546_v55, %v9752_v61  ;;  %v9754_v3 = vld [vmem:[#allocation13_spill] sm:$0xff] }
 0x21c   :  { %v1828_v42 = vadd.f32 %v1827_v16, %v5929_v33  ;;  %v5973_v16 = vadd.f32 %v5546_v55, %v5718_v62  ;;  %v5981_v14 = vadd.f32 %v5546_v55, %v9754_v3  ;;  %v5986_v18 = vadd.f32 %v5546_v55, %v5720_v6  ;;  %v9759_v6 = vld [vmem:[#allocation14_spill] sm:$0xff] }
 0x21d   :  { %v5946_v12 = vpop.f32.mrb[148].mxu0  ;;  %v5948_v21 = vpop.f32.mrb[148].mxu1  ;;  %9750 = vst [vmem:[#allocation10_spill] sm:$0xff] %v5963_v24  ;;  %9753 = vst [vmem:[#allocation12_spill] sm:$0xff] %v5977_v10  ;;  %v1990_v8 = vadd.f32 %v1989_v37, %v5953_v63  ;;  %v5990_v62 = vadd.f32 %v5546_v55, %v5762_v50  ;;  %v5997_v61 = vadd.f32 %v5546_v55, %v5764_v41  ;;  %v9761_v50 = vld [vmem:[#allocation15_spill] sm:$0xff] }
 0x21e   :  { %v4432_v48 = vpop.f32.mrb[149].mxu0  ;;  %v4548_v39 = vpop.f32.mrb[149].mxu1  ;;  %9751 = vst [vmem:[#allocation11_spill] sm:$0xff] %v5973_v16  ;;  %9755 = vst [vmem:[#allocation13_spill] sm:$0xff] %v5981_v14  ;;  %v6003_v63 = vadd.f32 %v5546_v55, %v9759_v6  ;;  %v6007_v2 = vadd.f32 %v5546_v55, %v9761_v50  ;;  %v9764_v6 = vld [vmem:[#allocation16_spill] sm:$0xff]  ;;  %v9766_v50 = vld [vmem:[#allocation17_spill] sm:$0xff] }
 0x21f   :  { %v5965_v60 = vpop.f32.mrb[150].mxu0  ;;  %v5967_v29 = vpop.f32.mrb[150].mxu1  ;;  %v1935_v39 = vadd.f32 %v1934_v38, %v5942_v0  ;;  %9756 = vst [vmem:[#allocation117_spill] sm:$0xff] %v5986_v18  ;;  %9757 = vst [vmem:[#allocation118_spill] sm:$0xff] %v5990_v62  ;;  %v1829_v38 = vadd.f32 %v1828_v42, %v5959_v35  ;;  %v6021_v0 = vadd.f32 %v5546_v55, %v9764_v6 }
 0x220   :  { %v4433_v44 = vpop.f32.mrb[151].mxu0  ;;  %v4549_v48 = vpop.f32.mrb[151].mxu1  ;;  %9758 = vst [vmem:[#allocation119_spill] sm:$0xff] %v5997_v61  ;;  %9760 = vst [vmem:[#allocation14_spill] sm:$0xff] %v6003_v63 }
 0x221   :  { %v1883_v44 = vadd.f32 %v1882_v22, %v5963_v24  ;;  %v1936_v48 = vadd.f32 %v1935_v39, %v5973_v16  ;;  %v1830_v37 = vadd.f32 %v1829_v38, %v5977_v10  ;;  %9762 = vst [vmem:[#allocation15_spill] sm:$0xff] %v6007_v2  ;;  %v1991_v39 = vadd.f32 %v1990_v8, %v5986_v18 }
 0x222   :  { %v6017_v38 = vadd.f32 %v5546_v55, %v5781_v1  ;;  %9765 = vst [vmem:[#allocation16_spill] sm:$0xff] %v6021_v0  ;;  %v6034_v1 = vadd.f32 %v5546_v55, %v5783_v26 }
 0x223   :  { %v1884_v3 = vadd.f32 %v1883_v44, %v5981_v14  ;;  %v1937_v41 = vadd.f32 %v1936_v48, %v5990_v62  ;;  %v6025_v14 = vadd.f32 %v5546_v55, %v9766_v50  ;;  %v1992_v8 = vadd.f32 %v1991_v39, %v5997_v61  ;;  %v9771_v61 = vld [vmem:[#allocation18_spill] sm:$0xff] }
 0x224   :  { %9763 = vst [vmem:[#allocation120_spill] sm:$0xff] %v6017_v38  ;;  %9768 = vst [vmem:[#allocation121_spill] sm:$0xff] %v6034_v1  ;;  %v1831_v6 = vadd.f32 %v1830_v37, %v6003_v63  ;;  %v6045_v62 = vadd.f32 %v5546_v55, %v5827_v49  ;;  %v6061_v49 = vadd.f32 %v5546_v55, %v5843_v47 }
 0x225   :  { %v6009_v42 = vpop.f32.mrb[152].mxu0  ;;  %v6011_v22 = vpop.f32.mrb[152].mxu1  ;;  %9767 = vst [vmem:[#allocation17_spill] sm:$0xff] %v6025_v14  ;;  %v1885_v50 = vadd.f32 %v1884_v3, %v6007_v2  ;;  %v1938_v18 = vadd.f32 %v1937_v41, %v6017_v38  ;;  %v1993_v37 = vadd.f32 %v1992_v8, %v6034_v1  ;;  %v9776_v41 = vld [vmem:[#allocation20_spill] sm:$0xff]  ;;  %v6082_v47 = vadd.f32 %v5546_v55, %v5887_v51 }
 0x226   :  { %v4436_v44 = vpop.f32.mrb[153].mxu0  ;;  %v4552_v16 = vpop.f32.mrb[153].mxu1  ;;  %9770 = vst [vmem:[#allocation123_spill] sm:$0xff] %v6045_v62  ;;  %v1832_v39 = vadd.f32 %v1831_v6, %v6021_v0  ;;  %9775 = vst [vmem:[#allocation124_spill] sm:$0xff] %v6061_v49  ;;  %v6065_v6 = vadd.f32 %v5546_v55, %v9776_v41 }
 0x227   :  { %v6027_v24 = vpop.f32.mrb[154].mxu0  ;;  %v6029_v10 = vpop.f32.mrb[154].mxu1  ;;  %v6038_v16 = vadd.f32 %v5546_v55, %v5825_v59  ;;  %v1886_v26 = vadd.f32 %v1885_v50, %v6025_v14  ;;  %v6051_v59 = vadd.f32 %v5546_v55, %v9771_v61  ;;  %v9778_v50 = vld [vmem:[#allocation21_spill] sm:$0xff]  ;;  %v1994_v8 = vadd.f32 %v1993_v37, %v6045_v62  ;;  %9781 = vst [vmem:[#allocation126_spill] sm:$0xff] %v6082_v47 }
 0x228   :  { %v4437_v48 = vpop.f32.mrb[155].mxu0  ;;  %v4553_v44 = vpop.f32.mrb[155].mxu1  ;;  %9777 = vst [vmem:[#allocation20_spill] sm:$0xff] %v6065_v6  ;;  %v6069_v61 = vadd.f32 %v5546_v55, %v9778_v50 }
 0x229   :  { %9769 = vst [vmem:[#allocation122_spill] sm:$0xff] %v6038_v16  ;;  %9772 = vst [vmem:[#allocation18_spill] sm:$0xff] %v6051_v59  ;;  %v9773_v48 = vld [vmem:[#allocation19_spill] sm:$0xff]  ;;  %v1939_v3 = vadd.f32 %v1938_v18, %v6038_v16  ;;  %v6078_v18 = vadd.f32 %v5546_v55, %v5845_v9  ;;  %v1833_v16 = vadd.f32 %v1832_v39, %v6051_v59 }
 0x22a   :  { %v6055_v44 = vadd.f32 %v5546_v55, %v9773_v48  ;;  %9779 = vst [vmem:[#allocation21_spill] sm:$0xff] %v6069_v61  ;;  %v6093_v9 = vadd.f32 %v5546_v55, %v5889_v13  ;;  %v6109_v13 = vadd.f32 %v5546_v55, %v5902_v54 }
 0x22b   :  { %9780 = vst [vmem:[#allocation125_spill] sm:$0xff] %v6078_v18  ;;  %v1940_v37 = vadd.f32 %v1939_v3, %v6061_v49  ;;  %v1834_v51 = vadd.f32 %v1833_v16, %v6065_v6  ;;  %v1995_v3 = vadd.f32 %v1994_v8, %v6078_v18  ;;  %v9790_v16 = vld [vmem:[#allocation25_spill] sm:$0xff]  ;;  %v6126_v8 = vadd.f32 %v5546_v55, %v5946_v12 }
 0x22c   :  { %9774 = vst [vmem:[#allocation19_spill] sm:$0xff] %v6055_v44  ;;  %v1887_v50 = vadd.f32 %v1886_v26, %v6055_v44  ;;  %9782 = vst [vmem:[#allocation127_spill] sm:$0xff] %v6093_v9  ;;  %v9785_v26 = vld [vmem:[#allocation23_spill] sm:$0xff] }
 0x22d   :  { %v6071_v38 = vpop.f32.mrb[156].mxu0  ;;  %v6073_v48 = vpop.f32.mrb[156].mxu1  ;;  %v6103_v44 = vadd.f32 %v5546_v55, %v9785_v26  ;;  %v1941_v49 = vadd.f32 %v1940_v37, %v6082_v47  ;;  %9787 = vst [vmem:[#allocation128_spill] sm:$0xff] %v6109_v13  ;;  %v6122_v26 = vadd.f32 %v5546_v55, %v5904_v15  ;;  %9793 = vst [vmem:[#allocation130_spill] sm:$0xff] %v6126_v8 }
 0x22e   :  { %v4440_v41 = vpop.f32.mrb[157].mxu0  ;;  %v4556_v1 = vpop.f32.mrb[157].mxu1 }
 0x22f   :  { %v6086_v14 = vpop.f32.mrb[158].mxu0  ;;  %v6088_v2 = vpop.f32.mrb[158].mxu1  ;;  %v1888_v1 = vadd.f32 %v1887_v50, %v6069_v61  ;;  %v9783_v41 = vld [vmem:[#allocation22_spill] sm:$0xff]  ;;  %9786 = vst [vmem:[#allocation23_spill] sm:$0xff] %v6103_v44  ;;  %v6117_v50 = vadd.f32 %v5546_v55, %v9790_v16  ;;  %9792 = vst [vmem:[#allocation129_spill] sm:$0xff] %v6122_v26  ;;  %v1942_v16 = vadd.f32 %v1941_v49, %v6109_v13 }
 0x230   :  { %v4441_v62 = vpop.f32.mrb[159].mxu0  ;;  %v4557_v0 = vpop.f32.mrb[159].mxu1  ;;  %v6099_v39 = vadd.f32 %v5546_v55, %v9783_v41  ;;  %v1996_v41 = vadd.f32 %v1995_v3, %v6093_v9  ;;  %v6137_v3 = vadd.f32 %v5546_v55, %v5948_v21  ;;  %v9795_v61 = vld [vmem:[#allocation26_spill] sm:$0xff] }
 0x231   :  { %v9788_v0 = vld [vmem:[#allocation24_spill] sm:$0xff]  ;;  %9791 = vst [vmem:[#allocation25_spill] sm:$0xff] %v6117_v50  ;;  %v1889_v37 = vadd.f32 %v1888_v1, %v6103_v44  ;;  %v9797_v1 = vld [vmem:[#allocation27_spill] sm:$0xff] }
 0x232   :  { %9784 = vst [vmem:[#allocation22_spill] sm:$0xff] %v6099_v39  ;;  %v6113_v62 = vadd.f32 %v5546_v55, %v9788_v0  ;;  %v1835_v54 = vadd.f32 %v1834_v51, %v6099_v39  ;;  %9794 = vst [vmem:[#allocation131_spill] sm:$0xff] %v6137_v3  ;;  %v6143_v51 = vadd.f32 %v5546_v55, %v9795_v61  ;;  %v9800_v61 = vld [vmem:[#allocation28_spill] sm:$0xff] }
 0x233   :  { %v1890_v12 = vadd.f32 %v1889_v37, %v6117_v50  ;;  %v6147_v44 = vadd.f32 %v5546_v55, %v9797_v1  ;;  %v1997_v21 = vadd.f32 %v1996_v41, %v6122_v26  ;;  %v6161_v13 = vadd.f32 %v5546_v55, %v9800_v61  ;;  %v9802_v1 = vld [vmem:[#allocation29_spill] sm:$0xff] }
 0x234   :  { %9789 = vst [vmem:[#allocation24_spill] sm:$0xff] %v6113_v62  ;;  %v1836_v47 = vadd.f32 %v1835_v54, %v6113_v62  ;;  %9796 = vst [vmem:[#allocation26_spill] sm:$0xff] %v6143_v51  ;;  %v6157_v54 = vadd.f32 %v5546_v55, %v5965_v60  ;;  %v6165_v50 = vadd.f32 %v5546_v55, %v9802_v1 }
 0x235   :  { %v6130_v0 = vpop.f32.mrb[160].mxu0  ;;  %v6132_v18 = vpop.f32.mrb[160].mxu1  ;;  %9798 = vst [vmem:[#allocation27_spill] sm:$0xff] %v6147_v44  ;;  %9801 = vst [vmem:[#allocation28_spill] sm:$0xff] %v6161_v13  ;;  %v1998_v62 = vadd.f32 %v1997_v21, %v6137_v3  ;;  %v6170_v41 = vadd.f32 %v5546_v55, %v5967_v29  ;;  %v6174_v60 = vadd.f32 %v5546_v55, %v6009_v42  ;;  %v9807_v29 = vld [vmem:[#allocation30_spill] sm:$0xff]  ;;  %v9809_v42 = vld [vmem:[#allocation31_spill] sm:$0xff] }
 0x236   :  { %v4444_v15 = vpop.f32.mrb[161].mxu0  ;;  %v4560_v9 = vpop.f32.mrb[161].mxu1  ;;  %9799 = vst [vmem:[#allocation132_spill] sm:$0xff] %v6157_v54  ;;  %9803 = vst [vmem:[#allocation29_spill] sm:$0xff] %v6165_v50  ;;  %v6181_v61 = vadd.f32 %v5546_v55, %v6011_v22  ;;  %v6187_v3 = vadd.f32 %v5546_v55, %v9807_v29  ;;  %v6191_v26 = vadd.f32 %v5546_v55, %v9809_v42 }
 0x237   :  { %v6149_v39 = vpop.f32.mrb[162].mxu0  ;;  %v6151_v49 = vpop.f32.mrb[162].mxu1  ;;  %v1943_v9 = vadd.f32 %v1942_v16, %v6126_v8  ;;  %9804 = vst [vmem:[#allocation133_spill] sm:$0xff] %v6170_v41  ;;  %9805 = vst [vmem:[#allocation134_spill] sm:$0xff] %v6174_v60  ;;  %v1837_v16 = vadd.f32 %v1836_v47, %v6143_v51  ;;  %v6197_v22 = vadd.f32 %v5546_v55, %v6027_v24  ;;  %v9812_v8 = vld [vmem:[#allocation32_spill] sm:$0xff] }
 0x238   :  { %v4445_v37 = vpop.f32.mrb[163].mxu0  ;;  %v4561_v15 = vpop.f32.mrb[163].mxu1  ;;  %9806 = vst [vmem:[#allocation135_spill] sm:$0xff] %v6181_v61  ;;  %9808 = vst [vmem:[#allocation30_spill] sm:$0xff] %v6187_v3  ;;  %v6201_v29 = vadd.f32 %v5546_v55, %v9812_v8  ;;  %v6214_v24 = vadd.f32 %v5546_v55, %v6029_v10 }
 0x239   :  { %v1891_v37 = vadd.f32 %v1890_v12, %v6147_v44  ;;  %v1944_v15 = vadd.f32 %v1943_v9, %v6157_v54  ;;  %v1838_v21 = vadd.f32 %v1837_v16, %v6161_v13  ;;  %9810 = vst [vmem:[#allocation31_spill] sm:$0xff] %v6191_v26  ;;  %v1999_v9 = vadd.f32 %v1998_v62, %v6170_v41 }
 0x23a   :  { %9811 = vst [vmem:[#allocation136_spill] sm:$0xff] %v6197_v22  ;;  %9813 = vst [vmem:[#allocation32_spill] sm:$0xff] %v6201_v29 }
 0x23b   :  { %v1892_v1 = vadd.f32 %v1891_v37, %v6165_v50  ;;  %v1945_v54 = vadd.f32 %v1944_v15, %v6174_v60  ;;  %v9814_v50 = vld [vmem:[#allocation33_spill] sm:$0xff]  ;;  %v2000_v62 = vadd.f32 %v1999_v9, %v6181_v61  ;;  %9816 = vst [vmem:[#allocation137_spill] sm:$0xff] %v6214_v24  ;;  %v6218_v15 = vadd.f32 %v5546_v55, %v6071_v38  ;;  %v9819_v61 = vld [vmem:[#allocation34_spill] sm:$0xff] }
 0x23c   :  { %v6205_v42 = vadd.f32 %v5546_v55, %v9814_v50  ;;  %v6225_v60 = vadd.f32 %v5546_v55, %v6073_v48  ;;  %v6231_v38 = vadd.f32 %v5546_v55, %v9819_v61  ;;  %v6241_v48 = vadd.f32 %v5546_v55, %v6086_v14 }
 0x23d   :  { %v1311_v47 = vpop.f32.mrb[164].mxu0  ;;  %v1741_v12 = vpop.f32.mrb[164].mxu1  ;;  %9817 = vst [vmem:[#allocation138_spill] sm:$0xff] %v6218_v15  ;;  %v1893_v50 = vadd.f32 %v1892_v1, %v6191_v26  ;;  %v1946_v41 = vadd.f32 %v1945_v54, %v6197_v22  ;;  %v9824_v1 = vld [vmem:[#allocation36_spill] sm:$0xff]  ;;  %v6258_v14 = vadd.f32 %v5546_v55, %v6130_v0 }
 0x23e   :  { %v4448_v16 = vpop.f32.mrb[165].mxu0  ;;  %v4564_v37 = vpop.f32.mrb[165].mxu1  ;;  %9815 = vst [vmem:[#allocation33_spill] sm:$0xff] %v6205_v42  ;;  %9818 = vst [vmem:[#allocation139_spill] sm:$0xff] %v6225_v60 }
 0x23f   :  { %v6207_v44 = vpop.f32.mrb[166].mxu0  ;;  %v6209_v13 = vpop.f32.mrb[166].mxu1  ;;  %v1839_v37 = vadd.f32 %v1838_v21, %v6187_v3  ;;  %v1894_v10 = vadd.f32 %v1893_v50, %v6205_v42  ;;  %9820 = vst [vmem:[#allocation34_spill] sm:$0xff] %v6231_v38  ;;  %v2001_v21 = vadd.f32 %v2000_v62, %v6214_v24  ;;  %v1947_v54 = vadd.f32 %v1946_v41, %v6218_v15  ;;  %v9826_v50 = vld [vmem:[#allocation37_spill] sm:$0xff] }
 0x240   :  { %v4449_v8 = vpop.f32.mrb[167].mxu0  ;;  %v4565_v16 = vpop.f32.mrb[167].mxu1  ;;  %9823 = vst [vmem:[#allocation140_spill] sm:$0xff] %v6241_v48  ;;  %v6249_v61 = vadd.f32 %v5546_v55, %v9826_v50  ;;  %v6254_v62 = vadd.f32 %v5546_v55, %v6088_v2  ;;  %9829 = vst [vmem:[#allocation142_spill] sm:$0xff] %v6258_v14 }
 0x241   :  { %v1840_v9 = vadd.f32 %v1839_v37, %v6201_v29  ;;  %v9821_v8 = vld [vmem:[#allocation35_spill] sm:$0xff]  ;;  %v6245_v37 = vadd.f32 %v5546_v55, %v9824_v1  ;;  %v1948_v29 = vadd.f32 %v1947_v54, %v6241_v48 }
 0x242   :  { %v6235_v16 = vadd.f32 %v5546_v55, %v9821_v8  ;;  %9827 = vst [vmem:[#allocation37_spill] sm:$0xff] %v6249_v61  ;;  %v2002_v8 = vadd.f32 %v2001_v21, %v6225_v60  ;;  %9828 = vst [vmem:[#allocation141_spill] sm:$0xff] %v6254_v62  ;;  %v6265_v21 = vadd.f32 %v5546_v55, %v6132_v18 }
 0x243   :  { %9825 = vst [vmem:[#allocation36_spill] sm:$0xff] %v6245_v37  ;;  %v1841_v1 = vadd.f32 %v1840_v9, %v6231_v38  ;;  %v9833_v9 = vld [vmem:[#allocation39_spill] sm:$0xff]  ;;  %v1949_v48 = vadd.f32 %v1948_v29, %v6258_v14  ;;  %v6281_v18 = vadd.f32 %v5546_v55, %v6149_v39  ;;  %v6297_v29 = vadd.f32 %v5546_v55, %v1311_v47 }
 0x244   :  { %9822 = vst [vmem:[#allocation35_spill] sm:$0xff] %v6235_v16  ;;  %v1895_v15 = vadd.f32 %v1894_v10, %v6235_v16  ;;  %9830 = vst [vmem:[#allocation143_spill] sm:$0xff] %v6265_v21  ;;  %v6275_v10 = vadd.f32 %v5546_v55, %v9833_v9  ;;  %v2003_v54 = vadd.f32 %v2002_v8, %v6254_v62  ;;  %v9843_v16 = vld [vmem:[#allocation42_spill] sm:$0xff] }
 0x245   :  { %v1319_v22 = vpop.f32.mrb[168].mxu0  ;;  %v1749_v42 = vpop.f32.mrb[168].mxu1  ;;  %v1842_v3 = vadd.f32 %v1841_v1, %v6245_v37  ;;  %9835 = vst [vmem:[#allocation144_spill] sm:$0xff] %v6281_v18  ;;  %v6294_v9 = vadd.f32 %v5546_v55, %v6151_v49  ;;  %9841 = vst [vmem:[#allocation146_spill] sm:$0xff] %v6297_v29  ;;  %v1950_v14 = vadd.f32 %v1949_v48, %v6281_v18  ;;  %v9850_v18 = vld [vmem:[#allocation45_spill] sm:$0xff] }
 0x246   :  { %v4452_v41 = vpop.f32.mrb[169].mxu0  ;;  %v4568_v24 = vpop.f32.mrb[169].mxu1  ;;  %v1896_v0 = vadd.f32 %v1895_v15, %v6249_v61  ;;  %9834 = vst [vmem:[#allocation39_spill] sm:$0xff] %v6275_v10  ;;  %v9838_v15 = vld [vmem:[#allocation41_spill] sm:$0xff]  ;;  %v6309_v47 = vadd.f32 %v5546_v55, %v9843_v16 }
 0x247   :  { %v1322_v50 = vpop.f32.mrb[170].mxu0  ;;  %v1752_v26 = vpop.f32.mrb[170].mxu1  ;;  %v9831_v41 = vld [vmem:[#allocation38_spill] sm:$0xff]  ;;  %9840 = vst [vmem:[#allocation145_spill] sm:$0xff] %v6294_v9 }
 0x248   :  { %v4453_v2 = vpop.f32.mrb[171].mxu0  ;;  %v4569_v60 = vpop.f32.mrb[171].mxu1  ;;  %v6271_v24 = vadd.f32 %v5546_v55, %v9831_v41  ;;  %v2004_v41 = vadd.f32 %v2003_v54, %v6265_v21  ;;  %v1897_v8 = vadd.f32 %v1896_v0, %v6275_v10  ;;  %9844 = vst [vmem:[#allocation42_spill] sm:$0xff] %v6309_v47 }
 0x249   :  { %v9836_v60 = vld [vmem:[#allocation40_spill] sm:$0xff]  ;;  %v6289_v2 = vadd.f32 %v5546_v55, %v9838_v15  ;;  %v6303_v15 = vadd.f32 %v5546_v55, %v1741_v12  ;;  %v1951_v12 = vadd.f32 %v1950_v14, %v6297_v29  ;;  %v6335_v14 = vadd.f32 %v5546_v55, %v1319_v22 }
 0x24a   :  { %9832 = vst [vmem:[#allocation38_spill] sm:$0xff] %v6271_v24  ;;  %v6285_v1 = vadd.f32 %v5546_v55, %v9836_v60  ;;  %v1843_v39 = vadd.f32 %v1842_v3, %v6271_v24  ;;  %v9845_v3 = vld [vmem:[#allocation43_spill] sm:$0xff]  ;;  %v2005_v48 = vadd.f32 %v2004_v41, %v6294_v9  ;;  %v6332_v41 = vadd.f32 %v5546_v55, %v6209_v13 }
 0x24b   :  { %9839 = vst [vmem:[#allocation41_spill] sm:$0xff] %v6289_v2  ;;  %9842 = vst [vmem:[#allocation147_spill] sm:$0xff] %v6303_v15  ;;  %v1898_v49 = vadd.f32 %v1897_v8, %v6289_v2  ;;  %v6313_v0 = vadd.f32 %v5546_v55, %v9845_v3  ;;  %v6327_v3 = vadd.f32 %v5546_v55, %v9850_v18  ;;  %v9857_v9 = vld [vmem:[#allocation47_spill] sm:$0xff] }
 0x24c   :  { %9837 = vst [vmem:[#allocation40_spill] sm:$0xff] %v6285_v1  ;;  %v1844_v21 = vadd.f32 %v1843_v39, %v6285_v1  ;;  %v2006_v2 = vadd.f32 %v2005_v48, %v6303_v15  ;;  %9852 = vst [vmem:[#allocation149_spill] sm:$0xff] %v6332_v41  ;;  %v9855_v15 = vld [vmem:[#allocation46_spill] sm:$0xff]  ;;  %v6351_v22 = vadd.f32 %v5546_v55, %v9857_v9 }
 0x24d   :  { %v1327_v62 = vpop.f32.mrb[172].mxu0  ;;  %v1757_v60 = vpop.f32.mrb[172].mxu1  ;;  %9846 = vst [vmem:[#allocation43_spill] sm:$0xff] %v6313_v0  ;;  %9851 = vst [vmem:[#allocation45_spill] sm:$0xff] %v6327_v3  ;;  %v6347_v13 = vadd.f32 %v5546_v55, %v9855_v15  ;;  %v9862_v15 = vld [vmem:[#allocation49_spill] sm:$0xff] }
 0x24e   :  { %v4456_v61 = vpop.f32.mrb[173].mxu0  ;;  %v4572_v54 = vpop.f32.mrb[173].mxu1  ;;  %9853 = vst [vmem:[#allocation150_spill] sm:$0xff] %v6335_v14  ;;  %9858 = vst [vmem:[#allocation47_spill] sm:$0xff] %v6351_v22 }
 0x24f   :  { %v1330_v10 = vpop.f32.mrb[174].mxu0  ;;  %v1760_v24 = vpop.f32.mrb[174].mxu1  ;;  %v6319_v61 = vadd.f32 %v5546_v55, %v6207_v44  ;;  %v9848_v54 = vld [vmem:[#allocation44_spill] sm:$0xff]  ;;  %v1845_v44 = vadd.f32 %v1844_v21, %v6309_v47  ;;  %9856 = vst [vmem:[#allocation46_spill] sm:$0xff] %v6347_v13 }
 0x250   :  { %v4457_v39 = vpop.f32.mrb[175].mxu0  ;;  %v4573_v8 = vpop.f32.mrb[175].mxu1  ;;  %v6323_v16 = vadd.f32 %v5546_v55, %v9848_v54  ;;  %v6341_v54 = vadd.f32 %v5546_v55, %v1749_v42  ;;  %v6356_v42 = vadd.f32 %v5546_v55, %v1322_v50  ;;  %v6371_v50 = vadd.f32 %v5546_v55, %v1327_v62  ;;  %v9868_v62 = vld [vmem:[#allocation51_spill] sm:$0xff] }
 0x251   :  { %9847 = vst [vmem:[#allocation148_spill] sm:$0xff] %v6319_v61  ;;  %v1899_v39 = vadd.f32 %v1898_v49, %v6313_v0  ;;  %v1952_v8 = vadd.f32 %v1951_v12, %v6319_v61  ;;  %v2007_v49 = vadd.f32 %v2006_v2, %v6332_v41  ;;  %v6364_v0 = vadd.f32 %v5546_v55, %v9862_v15 }
 0x252   :  { %9849 = vst [vmem:[#allocation44_spill] sm:$0xff] %v6323_v16  ;;  %9854 = vst [vmem:[#allocation151_spill] sm:$0xff] %v6341_v54  ;;  %v1846_v18 = vadd.f32 %v1845_v44, %v6323_v16  ;;  %v6368_v2 = vadd.f32 %v5546_v55, %v1752_v26  ;;  %v6377_v15 = vadd.f32 %v5546_v55, %v1757_v60  ;;  %v9867_v26 = vld [vmem:[#allocation50_spill] sm:$0xff]  ;;  %v9871_v60 = vld [vmem:[#allocation52_spill] sm:$0xff] }
 0x253   :  { %v1900_v48 = vadd.f32 %v1899_v39, %v6327_v3  ;;  %v1953_v12 = vadd.f32 %v1952_v8, %v6335_v14  ;;  %9859 = vst [vmem:[#allocation152_spill] sm:$0xff] %v6356_v42  ;;  %v9860_v39 = vld [vmem:[#allocation48_spill] sm:$0xff]  ;;  %9863 = vst [vmem:[#allocation49_spill] sm:$0xff] %v6364_v0  ;;  %v2008_v47 = vadd.f32 %v2007_v49, %v6341_v54 }
 0x254   :  { %v6360_v3 = vadd.f32 %v5546_v55, %v9860_v39  ;;  %9864 = vst [vmem:[#allocation153_spill] sm:$0xff] %v6368_v2  ;;  %9865 = vst [vmem:[#allocation154_spill] sm:$0xff] %v6371_v50  ;;  %v6383_v54 = vadd.f32 %v5546_v55, %v9867_v26 }
 0x255   :  { %v1335_v21 = vpop.f32.mrb[176].mxu0  ;;  %v1765_v29 = vpop.f32.mrb[176].mxu1  ;;  %v1901_v39 = vadd.f32 %v1900_v48, %v6351_v22  ;;  %v1954_v41 = vadd.f32 %v1953_v12, %v6356_v42  ;;  %9866 = vst [vmem:[#allocation155_spill] sm:$0xff] %v6377_v15  ;;  %v6392_v12 = vadd.f32 %v5546_v55, %v1330_v10  ;;  %v6404_v42 = vadd.f32 %v5546_v55, %v1760_v24 }
 0x256   :  { %v4460_v44 = vpop.f32.mrb[177].mxu0  ;;  %v4576_v61 = vpop.f32.mrb[177].mxu1  ;;  %9861 = vst [vmem:[#allocation48_spill] sm:$0xff] %v6360_v3 }
 0x257   :  { %v1338_v9 = vpop.f32.mrb[178].mxu0  ;;  %v1768_v16 = vpop.f32.mrb[178].mxu1  ;;  %v1847_v44 = vadd.f32 %v1846_v18, %v6347_v13  ;;  %v1902_v49 = vadd.f32 %v1901_v39, %v6364_v0  ;;  %v2009_v18 = vadd.f32 %v2008_v47, %v6368_v2  ;;  %v1955_v48 = vadd.f32 %v1954_v41, %v6371_v50  ;;  %9870 = vst [vmem:[#allocation51_spill] sm:$0xff] %v6392_v12  ;;  %v9878_v13 = vld [vmem:[#allocation54_spill] sm:$0xff] }
 0x258   :  { %v4461_v8 = vpop.f32.mrb[179].mxu0  ;;  %v4577_v61 = vpop.f32.mrb[179].mxu1  ;;  %9875 = vst [vmem:[#allocation156_spill] sm:$0xff] %v6404_v42  ;;  %v6407_v47 = vadd.f32 %v5546_v55, %v1335_v21 }
 0x259   :  { %v1848_v14 = vadd.f32 %v1847_v44, %v6360_v3  ;;  %v6387_v8 = vadd.f32 %v5546_v55, %v9868_v62  ;;  %v6396_v61 = vadd.f32 %v5546_v55, %v9871_v60  ;;  %v9873_v44 = vld [vmem:[#allocation53_spill] sm:$0xff]  ;;  %v2010_v62 = vadd.f32 %v2009_v18, %v6377_v15 }
 0x25a   :  { %v6400_v39 = vadd.f32 %v5546_v55, %v9873_v44  ;;  %9876 = vst [vmem:[#allocation157_spill] sm:$0xff] %v6407_v47  ;;  %v1956_v44 = vadd.f32 %v1955_v48, %v6392_v12  ;;  %v6413_v3 = vadd.f32 %v5546_v55, %v1765_v29  ;;  %v6428_v29 = vadd.f32 %v5546_v55, %v1338_v9 }
 0x25b   :  { %9869 = vst [vmem:[#allocation50_spill] sm:$0xff] %v6387_v8  ;;  %9872 = vst [vmem:[#allocation52_spill] sm:$0xff] %v6396_v61  ;;  %v1849_v2 = vadd.f32 %v1848_v14, %v6383_v54  ;;  %v1903_v60 = vadd.f32 %v1902_v49, %v6387_v8  ;;  %v9880_v14 = vld [vmem:[#allocation55_spill] sm:$0xff] }
 0x25c   :  { %9874 = vst [vmem:[#allocation53_spill] sm:$0xff] %v6400_v39  ;;  %9877 = vst [vmem:[#allocation158_spill] sm:$0xff] %v6413_v3  ;;  %v6423_v49 = vadd.f32 %v5546_v55, %v9880_v14  ;;  %v1957_v48 = vadd.f32 %v1956_v44, %v6407_v47  ;;  %v6440_v14 = vadd.f32 %v5546_v55, %v1768_v16 }
 0x25d   :  { %v1343_v26 = vpop.f32.mrb[180].mxu0  ;;  %v1773_v0 = vpop.f32.mrb[180].mxu1  ;;  %v1850_v24 = vadd.f32 %v1849_v2, %v6396_v61  ;;  %v1904_v21 = vadd.f32 %v1903_v60, %v6400_v39  ;;  %9882 = vst [vmem:[#allocation159_spill] sm:$0xff] %v6428_v29  ;;  %v9885_v60 = vld [vmem:[#allocation57_spill] sm:$0xff] }
 0x25e   :  { %v4464_v10 = vpop.f32.mrb[181].mxu0  ;;  %v4580_v41 = vpop.f32.mrb[181].mxu1  ;;  %9881 = vst [vmem:[#allocation55_spill] sm:$0xff] %v6423_v49  ;;  %9887 = vst [vmem:[#allocation160_spill] sm:$0xff] %v6440_v14  ;;  %v6449_v61 = vadd.f32 %v5546_v55, %v1773_v0 }
 0x25f   :  { %v1346_v50 = vpop.f32.mrb[182].mxu0  ;;  %v1776_v22 = vpop.f32.mrb[182].mxu1  ;;  %v6419_v10 = vadd.f32 %v5546_v55, %v9878_v13  ;;  %v2011_v41 = vadd.f32 %v2010_v62, %v6404_v42  ;;  %v6443_v62 = vadd.f32 %v5546_v55, %v1343_v26  ;;  %v1905_v9 = vadd.f32 %v1904_v21, %v6423_v49 }
 0x260   :  { %v4465_v18 = vpop.f32.mrb[183].mxu0  ;;  %v4581_v15 = vpop.f32.mrb[183].mxu1  ;;  %9889 = vst [vmem:[#allocation162_spill] sm:$0xff] %v6449_v61 }
 0x261   :  { %9879 = vst [vmem:[#allocation54_spill] sm:$0xff] %v6419_v10  ;;  %v9883_v15 = vld [vmem:[#allocation56_spill] sm:$0xff]  ;;  %v6436_v18 = vadd.f32 %v5546_v55, %v9885_v60  ;;  %v2012_v13 = vadd.f32 %v2011_v41, %v6413_v3  ;;  %9888 = vst [vmem:[#allocation161_spill] sm:$0xff] %v6443_v62  ;;  %v1851_v44 = vadd.f32 %v1850_v24, %v6419_v10  ;;  %v9890_v3 = vld [vmem:[#allocation58_spill] sm:$0xff] }
 0x262   :  { %v6432_v2 = vadd.f32 %v5546_v55, %v9883_v15  ;;  %v1958_v15 = vadd.f32 %v1957_v48, %v6428_v29  ;;  %v6455_v26 = vadd.f32 %v5546_v55, %v9890_v3  ;;  %v9892_v24 = vld [vmem:[#allocation59_spill] sm:$0xff]  ;;  %v9897_v3 = vld [vmem:[#allocation61_spill] sm:$0xff]  ;;  %v6476_v29 = vadd.f32 %v5546_v55, %v1776_v22 }
 0x263   :  { %9886 = vst [vmem:[#allocation57_spill] sm:$0xff] %v6436_v18  ;;  %v1906_v16 = vadd.f32 %v1905_v9, %v6436_v18  ;;  %v6459_v21 = vadd.f32 %v5546_v55, %v9892_v24  ;;  %v2013_v48 = vadd.f32 %v2012_v13, %v6440_v14  ;;  %v9895_v9 = vld [vmem:[#allocation60_spill] sm:$0xff] }
 0x264   :  { %9884 = vst [vmem:[#allocation56_spill] sm:$0xff] %v6432_v2  ;;  %v1852_v41 = vadd.f32 %v1851_v44, %v6432_v2  ;;  %9891 = vst [vmem:[#allocation58_spill] sm:$0xff] %v6455_v26  ;;  %v1959_v0 = vadd.f32 %v1958_v15, %v6443_v62  ;;  %v6468_v18 = vadd.f32 %v5546_v55, %v9895_v9 }
 0x265   :  { %v1351_v42 = vpop.f32.mrb[184].mxu0  ;;  %v1781_v39 = vpop.f32.mrb[184].mxu1  ;;  %9893 = vst [vmem:[#allocation59_spill] sm:$0xff] %v6459_v21  ;;  %v6472_v2 = vadd.f32 %v5546_v55, %v9897_v3  ;;  %v2014_v24 = vadd.f32 %v2013_v48, %v6449_v61  ;;  %9899 = vst [vmem:[#allocation164_spill] sm:$0xff] %v6476_v29  ;;  %v1907_v15 = vadd.f32 %v1906_v16, %v6459_v21  ;;  %v9902_v48 = vld [vmem:[#allocation62_spill] sm:$0xff]  ;;  %v9904_v61 = vld [vmem:[#allocation63_spill] sm:$0xff] }
 0x266   :  { %v4468_v60 = vpop.f32.mrb[185].mxu0  ;;  %v4584_v47 = vpop.f32.mrb[185].mxu1  ;;  %9896 = vst [vmem:[#allocation60_spill] sm:$0xff] %v6468_v18  ;;  %v6479_v13 = vadd.f32 %v5546_v55, %v1351_v42  ;;  %v6491_v22 = vadd.f32 %v5546_v55, %v9902_v48  ;;  %v6495_v42 = vadd.f32 %v5546_v55, %v9904_v61  ;;  %v9909_v48 = vld [vmem:[#allocation65_spill] sm:$0xff] }
 0x267   :  { %v1354_v49 = vpop.f32.mrb[186].mxu0  ;;  %v1784_v10 = vpop.f32.mrb[186].mxu1  ;;  %v6464_v47 = vadd.f32 %v5546_v55, %v1346_v50  ;;  %9898 = vst [vmem:[#allocation61_spill] sm:$0xff] %v6472_v2  ;;  %v1853_v50 = vadd.f32 %v1852_v41, %v6455_v26  ;;  %v1908_v3 = vadd.f32 %v1907_v15, %v6472_v2  ;;  %v2015_v16 = vadd.f32 %v2014_v24, %v6476_v29  ;;  %v9907_v15 = vld [vmem:[#allocation64_spill] sm:$0xff] }
 0x268   :  { %v4469_v44 = vpop.f32.mrb[187].mxu0  ;;  %v4585_v60 = vpop.f32.mrb[187].mxu1  ;;  %9900 = vst [vmem:[#allocation165_spill] sm:$0xff] %v6479_v13  ;;  %9903 = vst [vmem:[#allocation62_spill] sm:$0xff] %v6491_v22  ;;  %v6504_v2 = vadd.f32 %v5546_v55, %v9907_v15  ;;  %v6508_v21 = vadd.f32 %v5546_v55, %v9909_v48  ;;  %v6512_v24 = vadd.f32 %v5546_v55, %v1784_v10  ;;  %v9914_v10 = vld [vmem:[#allocation66_spill] sm:$0xff] }
 0x269   :  { %9894 = vst [vmem:[#allocation163_spill] sm:$0xff] %v6464_v47  ;;  %v1960_v44 = vadd.f32 %v1959_v0, %v6464_v47  ;;  %v6485_v60 = vadd.f32 %v5546_v55, %v1781_v39  ;;  %v1854_v9 = vadd.f32 %v1853_v50, %v6468_v18  ;;  %9905 = vst [vmem:[#allocation63_spill] sm:$0xff] %v6495_v42 }
 0x26a   :  { %v6500_v39 = vadd.f32 %v5546_v55, %v1354_v49  ;;  %9908 = vst [vmem:[#allocation64_spill] sm:$0xff] %v6504_v2  ;;  %9910 = vst [vmem:[#allocation65_spill] sm:$0xff] %v6508_v21  ;;  %v1909_v15 = vadd.f32 %v1908_v3, %v6495_v42 }
 0x26b   :  { %9901 = vst [vmem:[#allocation166_spill] sm:$0xff] %v6485_v60  ;;  %v1961_v0 = vadd.f32 %v1960_v44, %v6479_v13  ;;  %v2016_v47 = vadd.f32 %v2015_v16, %v6485_v60  ;;  %9911 = vst [vmem:[#allocation168_spill] sm:$0xff] %v6512_v24  ;;  %v6527_v60 = vadd.f32 %v5546_v55, %v9914_v10 }
 0x26c   :  { %9906 = vst [vmem:[#allocation167_spill] sm:$0xff] %v6500_v39  ;;  %v1910_v16 = vadd.f32 %v1909_v15, %v6508_v21  ;;  %v9921_v21 = vld [vmem:[#allocation69_spill] sm:$0xff] }
 0x26d   :  { %v1359_v41 = vpop.f32.mrb[188].mxu0  ;;  %v1789_v14 = vpop.f32.mrb[188].mxu1  ;;  %v1962_v29 = vadd.f32 %v1961_v0, %v6500_v39  ;;  %9915 = vst [vmem:[#allocation66_spill] sm:$0xff] %v6527_v60  ;;  %v6544_v10 = vadd.f32 %v5546_v55, %v9921_v21  ;;  %v4710_v21 = vld [vmem:[%s9127_s2] ss:$0 sm:$0xff] }
 0x26e   :  { %v4472_v50 = vpop.f32.mrb[189].mxu0  ;;  %v4588_v18 = vpop.f32.mrb[189].mxu1  ;;  %v6515_v49 = vadd.f32 %v5546_v55, %v1359_v41  ;;  %v6521_v48 = vadd.f32 %v5546_v55, %v1789_v14  ;;  %v9916_v41 = vld [vmem:[#allocation67_spill] sm:$0xff]  ;;  %v9919_v14 = vld [vmem:[#allocation68_spill] sm:$0xff] }
 0x26f   :  { %v1362_v61 = vpop.f32.mrb[190].mxu0  ;;  %v1792_v26 = vpop.f32.mrb[190].mxu1  ;;  %v1855_v50 = vadd.f32 %v1854_v9, %v6491_v22  ;;  %v2017_v9 = vadd.f32 %v2016_v47, %v6512_v24  ;;  %9922 = vst [vmem:[#allocation69_spill] sm:$0xff] %v6544_v10 }
 0x270   :  { %9912 = vst [vmem:[#allocation169_spill] sm:$0xff] %v6515_v49  ;;  %v4473_v44 = vpop.f32.mrb[191].mxu0  ;;  %v4589_v18 = vpop.f32.mrb[191].mxu1  ;;  %9913 = vst [vmem:[#allocation170_spill] sm:$0xff] %v6521_v48  ;;  %v1963_v3 = vadd.f32 %v1962_v29, %v6515_v49  ;;  %v6536_v0 = vadd.f32 %v5546_v55, %v1362_v61 }
 0x271   :  { %v1856_v13 = vadd.f32 %v1855_v50, %v6504_v2  ;;  %v6531_v44 = vadd.f32 %v5546_v55, %v9916_v41  ;;  %v6540_v18 = vadd.f32 %v5546_v55, %v9919_v14  ;;  %v2018_v41 = vadd.f32 %v2017_v9, %v6521_v48 }
 0x272   :  { %9918 = vst [vmem:[#allocation171_spill] sm:$0xff] %v6536_v0  ;;  %v6548_v2 = vadd.f32 %v5546_v55, %v1792_v26  ;;  %v1964_v22 = vadd.f32 %v1963_v3, %v6536_v0 }
 0x273   :  { %9917 = vst [vmem:[#allocation67_spill] sm:$0xff] %v6531_v44  ;;  %9920 = vst [vmem:[#allocation68_spill] sm:$0xff] %v6540_v18  ;;  %v1857_v24 = vadd.f32 %v1856_v13, %v6527_v60  ;;  %v1911_v42 = vadd.f32 %v1910_v16, %v6531_v44 }
 0x274   :  { %9923 = vst [vmem:[#allocation172_spill] sm:$0xff] %v6548_v2  ;;  %v2019_v13 = vadd.f32 %v2018_v41, %v6548_v2 }
 0x275   :  { %v1367_v50 = vpop.f32.mrb[192].mxu0  ;;  %v1797_v15 = vpop.f32.mrb[192].mxu1 }
 0x276   :  { %v6551_v29 = vadd.f32 %v5546_v55, %v1367_v50  ;;  %v4476_v47 = vpop.f32.mrb[193].mxu0  ;;  %v4592_v61 = vpop.f32.mrb[193].mxu1  ;;  %v6559_v9 = vadd.f32 %v4710_v21, %v1797_v15  ;;  %v1858_v55 = vadd.f32 %v1857_v24, %v6540_v18  ;;  %v1912_v50 = vadd.f32 %v1911_v42, %v6544_v10 }
 0x277   :  { %v1370_v14 = vpop.f32.mrb[194].mxu0  ;;  %v1800_v49 = vpop.f32.mrb[194].mxu1 }
 0x278   :  { %9924 = vst [vmem:[#allocation173_spill] sm:$0xff] %v6551_v29  ;;  %9925 = vst [vmem:[#allocation174_spill] sm:$0xff] %v6559_v9  ;;  %v4477_v26 = vpop.f32.mrb[195].mxu0  ;;  %v4593_v48 = vpop.f32.mrb[195].mxu1  ;;  %v1965_v47 = vadd.f32 %v1964_v22, %v6551_v29  ;;  %v6565_v61 = vadd.f32 %v4710_v21, %v1370_v14  ;;  %v2020_v16 = vadd.f32 %v2019_v13, %v6559_v9  ;;  %v1859_v44 = vrot.slane %v1858_v55, 4 }
 0x279   :  { %v6568_v3 = vadd.f32 %v4710_v21, %v1800_v49  ;;  %v1913_v0 = vrot.slane %v1912_v50, 4 }
 0x27a   :  { %9926 = vst [vmem:[#allocation175_spill] sm:$0xff] %v6565_v61  ;;  %v1966_v48 = vadd.f32 %v1965_v47, %v6565_v61  ;;  %v1860_v10 = vadd.f32 %v1859_v44, %v1858_v55 }
 0x27b   :  { %9927 = vst [vmem:[#allocation176_spill] sm:$0xff] %v6568_v3  ;;  %v2021_v14 = vadd.f32 %v2020_v16, %v6568_v3  ;;  %v1914_v18 = vadd.f32 %v1913_v0, %v1912_v50 }
 0x27d   :  { %v1375_v60 = vpop.f32.mrb[196].mxu0  ;;  %v1805_v15 = vpop.f32.mrb[196].mxu1  ;;  %v1915_v61 = vrot.slane %v1914_v18, 2 }
 0x27e   :  { %v6571_v26 = vadd.f32 %v4710_v21, %v1375_v60  ;;  %v6573_v24 = vadd.f32 %v4710_v21, %v1805_v15  ;;  %v4480_v42 = vpop.f32.mrb[197].mxu0  ;;  %v4596_v41 = vpop.f32.mrb[197].mxu1  ;;  %v1861_v60 = vrot.slane %v1860_v10, 2 }
 0x27f   :  { %v1378_v2 = vpop.f32.mrb[198].mxu0  ;;  %v1808_v22 = vpop.f32.mrb[198].mxu1  ;;  %v1916_v41 = vadd.f32 %v1915_v61, %v1914_v18 }
 0x280   :  { %9928 = vst [vmem:[#allocation177_spill] sm:$0xff] %v6571_v26  ;;  %9929 = vst [vmem:[#allocation178_spill] sm:$0xff] %v6573_v24  ;;  %v1967_v13 = vadd.f32 %v1966_v48, %v6571_v26  ;;  %v4481_v49 = vpop.f32.mrb[199].mxu0  ;;  %v4597_v9 = vpop.f32.mrb[199].mxu1  ;;  %v2022_v39 = vadd.f32 %v2021_v14, %v6573_v24  ;;  %v1862_v42 = vadd.f32 %v1861_v60, %v1860_v10  ;;  %v9930_v10 = vld [vmem:[#allocation73_spill] sm:$0xff] }
 0x281   :  { %v1917_v16 = vrot.slane %v1916_v41, 1 }
 0x282   :  { %v1968_v29 = vrot.slane %v1967_v13, 4  ;;  %v2023_v21 = vrot.slane %v2022_v39, 4  ;;  %v1863_v62 = vrot.slane %v1862_v42, 1 }
 0x283   :  { %v1918_v9 = vadd.f32 %v1917_v16, %v1916_v41 }
 0x284   :  { %v1969_v47 = vadd.f32 %v1968_v29, %v1967_v13  ;;  %v2024_v2 = vadd.f32 %v2023_v21, %v2022_v39  ;;  %v1864_v49 = vadd.f32 %v1863_v62, %v1862_v42  ;;  %v9931_v39 = vld [vmem:[#allocation71_spill] sm:$0xff] }
 0x286   :  { %v1970_v15 = vrot.slane %v1969_v47, 2  ;;  %v2025_v3 = vrot.slane %v2024_v2, 2  ;;  %v1919_v55 = vadd.f32 %v1918_v9, %v1864_v49 }
 0x288   :  { %v1971_v22 = vadd.f32 %v1970_v15, %v1969_v47  ;;  %v2026_v44 = vadd.f32 %v2025_v3, %v2024_v2 }
 0x28a   :  { %v1972_v48 = vrot.slane %v1971_v22, 1  ;;  %v2027_v50 = vrot.slane %v2026_v44, 1 }
 0x28c   :  { %v1973_v0 = vadd.f32 %v1972_v48, %v1971_v22  ;;  %v2028_v29 = vadd.f32 %v2027_v50, %v2026_v44 }
 0x28e   :  { %v1974_v14 = vadd.f32 %v1973_v0, %v1919_v55 }
 0x290   :  { %v2029_v13 = vadd.f32 %v2028_v29, %v1974_v14 }
 0x292   :  { %v6578_v24 = vmul.f32 0.0006377551, %v2029_v13 }
 0x294   :  { %v2031_v18 = vsub.f32 %v9930_v10, %v6578_v24  ;;  %v2032_v61 = vsub.f32 %v9931_v39, %v6578_v24  ;;  %v2033_v47 = vsub.f32 %v5566_v58, %v6578_v24  ;;  %v2034_v3 = vsub.f32 %v5584_v11, %v6578_v24 }
 0x295   :  { %v2035_v21 = vsub.f32 %v5600_v32, %v6578_v24  ;;  %v2036_v41 = vsub.f32 %v5634_v45, %v6578_v24  ;;  %v2037_v16 = vsub.f32 %v5653_v17, %v6578_v24  ;;  %v2038_v9 = vsub.f32 %v5683_v43, %v6578_v24 }
 0x296   :  { %v2080_v62 = vmul.f32 %v2031_v18, %v2031_v18  ;;  %v2081_v60 = vmul.f32 %v2032_v61, %v2032_v61  ;;  %v2082_v15 = vmul.f32 %v2033_v47, %v2033_v47  ;;  %v2083_v2 = vmul.f32 %v2034_v3, %v2034_v3 }
 0x297   :  { %v2084_v48 = vmul.f32 %v2035_v21, %v2035_v21  ;;  %v2085_v44 = vmul.f32 %v2036_v41, %v2036_v41  ;;  %v2039_v55 = vsub.f32 %v5697_v52, %v6578_v24  ;;  %v2086_v50 = vmul.f32 %v2037_v16, %v2037_v16  ;;  %v9933_v16 = vld [vmem:[#allocation72_spill] sm:$0xff] }
 0x298   :  { %v2129_v42 = vadd.f32 %v2081_v60, %v2080_v62  ;;  %v2040_v29 = vsub.f32 %v5731_v25, %v6578_v24  ;;  %v2087_v13 = vmul.f32 %v2038_v9, %v2038_v9  ;;  %v2041_v62 = vsub.f32 %v5745_v20, %v6578_v24 }
 0x299   :  { %v2088_v61 = vmul.f32 %v2039_v55, %v2039_v55 }
 0x29a   :  { %v2130_v22 = vadd.f32 %v2129_v42, %v2082_v15  ;;  %v2089_v60 = vmul.f32 %v2040_v29, %v2040_v29  ;;  %v2042_v15 = vsub.f32 %v5775_v34, %v6578_v24  ;;  %v2090_v42 = vmul.f32 %v2041_v62, %v2041_v62  ;;  %v9936_v62 = vld [vmem:[#allocation77_spill] sm:$0xff] }
 0x29b   :  { %v2044_v29 = vsub.f32 %v5819_v28, %v6578_v24 }
 0x29c   :  { %v2131_v49 = vadd.f32 %v2130_v22, %v2083_v2  ;;  %v9932_v2 = vld [vmem:[#allocation70_spill] sm:$0xff]  ;;  %v2091_v9 = vmul.f32 %v2042_v15, %v2042_v15  ;;  %v2045_v15 = vsub.f32 %v5837_v5, %v6578_v24 }
 0x29d   :  { %v2183_v22 = vsub.f32 %v9932_v2, %v6578_v24  ;;  %v9973_v2 = vld [vmem:[#allocation7_spill] sm:$0xff] }
 0x29e   :  { %v2132_v0 = vadd.f32 %v2131_v49, %v2084_v48  ;;  %v2184_v48 = vsub.f32 %v9933_v16, %v6578_v24  ;;  %v2043_v49 = vsub.f32 %v5793_v56, %v6578_v24 }
 0x2a0   :  { %v2133_v14 = vadd.f32 %v2132_v0, %v2085_v44  ;;  %v9934_v0 = vld [vmem:[#allocation74_spill] sm:$0xff] }
 0x2a1   :  { %v2185_v55 = vsub.f32 %v9934_v0, %v6578_v24 }
 0x2a2   :  { %v2134_v18 = vadd.f32 %v2133_v14, %v2086_v50  ;;  %v2232_v50 = vmul.f32 %v2183_v22, %v2183_v22  ;;  %v2233_v14 = vmul.f32 %v2184_v48, %v2184_v48 }
 0x2a4   :  { %v2135_v47 = vadd.f32 %v2134_v18, %v2087_v13  ;;  %v2092_v13 = vmul.f32 %v2043_v49, %v2043_v49  ;;  %v9935_v18 = vld [vmem:[#allocation75_spill] sm:$0xff]  ;;  %v2189_v49 = vsub.f32 %v5657_v27, %v6578_v24 }
 0x2a6   :  { %v2136_v3 = vadd.f32 %v2135_v47, %v2088_v61  ;;  %v2186_v61 = vsub.f32 %v9935_v18, %v6578_v24 }
 0x2a8   :  { %v2137_v21 = vadd.f32 %v2136_v3, %v2089_v60  ;;  %v2187_v60 = vsub.f32 %v9936_v62, %v6578_v24  ;;  %v2234_v3 = vmul.f32 %v2185_v55, %v2185_v55  ;;  %v2235_v22 = vmul.f32 %v2186_v61, %v2186_v61 }
 0x2a9   :  { %v2094_v55 = vmul.f32 %v2045_v15, %v2045_v15  ;;  %v2191_v61 = vsub.f32 %v5701_v36, %v6578_v24  ;;  %v9946_v36 = vld [vmem:[#allocation10_spill] sm:$0xff] }
 0x2aa   :  { %v2138_v41 = vadd.f32 %v2137_v21, %v2090_v42  ;;  %v2281_v21 = vadd.f32 %v2233_v14, %v2232_v50  ;;  %v2093_v42 = vmul.f32 %v2044_v29, %v2044_v29  ;;  %v2236_v18 = vmul.f32 %v2187_v60, %v2187_v60 }
 0x2ab   :  { %v2190_v50 = vsub.f32 %v5687_v30, %v6578_v24  ;;  %v9949_v30 = vld [vmem:[#allocation16_spill] sm:$0xff] }
 0x2ac   :  { %v2139_v44 = vadd.f32 %v2138_v41, %v2091_v9  ;;  %v2188_v41 = vsub.f32 %v5638_v23, %v6578_v24  ;;  %v2282_v48 = vadd.f32 %v2281_v21, %v2234_v3  ;;  %v2238_v3 = vmul.f32 %v2189_v49, %v2189_v49 }
 0x2ad   :  { %v2047_v21 = vsub.f32 %v5881_v31, %v6578_v24 }
 0x2ae   :  { %v2140_v47 = vadd.f32 %v2139_v44, %v2092_v13  ;;  %v2283_v44 = vadd.f32 %v2282_v48, %v2235_v22  ;;  %v2046_v13 = vsub.f32 %v5867_v7, %v6578_v24  ;;  %v2237_v14 = vmul.f32 %v2188_v41, %v2188_v41 }
 0x2af   :  { %v2239_v22 = vmul.f32 %v2190_v50, %v2190_v50  ;;  %v2193_v41 = vsub.f32 %v5749_v46, %v6578_v24  ;;  %v2096_v49 = vmul.f32 %v2047_v21, %v2047_v21  ;;  %v2195_v50 = vsub.f32 %v5797_v57, %v6578_v24 }
 0x2b0   :  { %v2141_v9 = vadd.f32 %v2140_v47, %v2093_v42  ;;  %v2284_v29 = vadd.f32 %v2283_v44, %v2236_v18  ;;  %v2095_v60 = vmul.f32 %v2046_v13, %v2046_v13  ;;  %v2192_v42 = vsub.f32 %v5735_v4, %v6578_v24 }
 0x2b1   :  { %v2240_v18 = vmul.f32 %v2191_v61, %v2191_v61  ;;  %v2048_v44 = vsub.f32 %v5915_v53, %v6578_v24 }
 0x2b2   :  { %v2142_v62 = vadd.f32 %v2141_v9, %v2094_v55  ;;  %v2285_v47 = vadd.f32 %v2284_v29, %v2237_v14  ;;  %v2194_v55 = vsub.f32 %v5779_v40, %v6578_v24  ;;  %v2241_v14 = vmul.f32 %v2192_v42, %v2192_v42  ;;  %v9937_v40 = vld [vmem:[#allocation109_spill] sm:$0xff] }
 0x2b3   :  { %v2097_v61 = vmul.f32 %v2048_v44, %v2048_v44  ;;  %v2197_v42 = vsub.f32 %v9937_v40, %v6578_v24 }
 0x2b4   :  { %v2286_v15 = vadd.f32 %v2285_v47, %v2238_v3  ;;  %v2143_v48 = vadd.f32 %v2142_v62, %v2095_v60  ;;  %v2242_v3 = vmul.f32 %v2193_v41, %v2193_v41  ;;  %v2049_v47 = vsub.f32 %v5929_v33, %v6578_v24 }
 0x2b5   :  { %v2196_v60 = vsub.f32 %v5823_v19, %v6578_v24  ;;  %v9939_v19 = vld [vmem:[#allocation4_spill] sm:$0xff] }
 0x2b6   :  { %v2287_v9 = vadd.f32 %v2286_v15, %v2239_v22  ;;  %v2144_v29 = vadd.f32 %v2143_v48, %v2096_v49  ;;  %v2243_v22 = vmul.f32 %v2194_v55, %v2194_v55  ;;  %v2098_v41 = vmul.f32 %v2049_v47, %v2049_v47  ;;  %v9938_v49 = vld [vmem:[#allocation2_spill] sm:$0xff] }
 0x2b7   :  { %v2199_v55 = vsub.f32 %v9939_v19, %v6578_v24  ;;  %v2052_v19 = vsub.f32 %v6003_v63, %v6578_v24 }
 0x2b8   :  { %v2288_v13 = vadd.f32 %v2287_v9, %v2240_v18  ;;  %v2145_v15 = vadd.f32 %v2144_v29, %v2097_v61  ;;  %v2244_v18 = vmul.f32 %v2195_v50, %v2195_v50  ;;  %v2050_v9 = vsub.f32 %v5959_v35, %v6578_v24  ;;  %v9941_v50 = vld [vmem:[#allocation78_spill] sm:$0xff] }
 0x2ba   :  { %v2289_v62 = vadd.f32 %v2288_v13, %v2241_v14  ;;  %v2198_v14 = vsub.f32 %v9938_v49, %v6578_v24  ;;  %v2245_v13 = vmul.f32 %v2196_v60, %v2196_v60  ;;  %v2146_v57 = vadd.f32 %v2145_v15, %v2098_v41  ;;  %v9943_v49 = vld [vmem:[#allocation6_spill] sm:$0xff]  ;;  %v9944_v41 = vld [vmem:[#allocation8_spill] sm:$0xff] }
 0x2bb   :  { %v2099_v40 = vmul.f32 %v2050_v9, %v2050_v9  ;;  %v2200_v60 = vsub.f32 %v9943_v49, %v6578_v24  ;;  %v2202_v49 = vsub.f32 %v9946_v36, %v6578_v24  ;;  %v2101_v36 = vmul.f32 %v2052_v19, %v2052_v19 }
 0x2bc   :  { %v2290_v21 = vadd.f32 %v2289_v62, %v2242_v3  ;;  %v2246_v3 = vmul.f32 %v2197_v42, %v2197_v42  ;;  %v9940_v62 = vld [vmem:[#allocation12_spill] sm:$0xff]  ;;  %v2201_v42 = vsub.f32 %v9944_v41, %v6578_v24 }
 0x2bd   :  { %v2051_v61 = vsub.f32 %v9940_v62, %v6578_v24 }
 0x2be   :  { %v2291_v48 = vadd.f32 %v2290_v21, %v2243_v22  ;;  %v2336_v22 = vsub.f32 %v9941_v50, %v6578_v24  ;;  %v9942_v21 = vld [vmem:[#allocation76_spill] sm:$0xff]  ;;  %v9945_v50 = vld [vmem:[#allocation81_spill] sm:$0xff] }
 0x2bf   :  { %v2337_v47 = vsub.f32 %v9942_v21, %v6578_v24  ;;  %v2338_v46 = vsub.f32 %v9945_v50, %v6578_v24  ;;  %v2100_v9 = vmul.f32 %v2051_v61, %v2051_v61  ;;  %v2053_v50 = vsub.f32 %v9949_v30, %v6578_v24 }
 0x2c0   :  { %v2292_v44 = vadd.f32 %v2291_v48, %v2244_v18  ;;  %v2247_v18 = vmul.f32 %v2198_v14, %v2198_v14  ;;  %v2147_v48 = vadd.f32 %v2146_v57, %v2099_v40  ;;  %v2385_v4 = vmul.f32 %v2336_v22, %v2336_v22  ;;  %v9947_v40 = vld [vmem:[#allocation84_spill] sm:$0xff]  ;;  %v9950_v22 = vld [vmem:[#allocation87_spill] sm:$0xff] }
 0x2c1   :  { %v2386_v21 = vmul.f32 %v2337_v47, %v2337_v47  ;;  %v2249_v14 = vmul.f32 %v2200_v60, %v2200_v60  ;;  %v2339_v57 = vsub.f32 %v9947_v40, %v6578_v24  ;;  %v2340_v61 = vsub.f32 %v9950_v22, %v6578_v24  ;;  %v9951_v60 = vld [vmem:[#allocation15_spill] sm:$0xff] }
 0x2c2   :  { %v2293_v29 = vadd.f32 %v2292_v44, %v2245_v13  ;;  %v2248_v13 = vmul.f32 %v2199_v55, %v2199_v55  ;;  %v9948_v55 = vld [vmem:[#allocation13_spill] sm:$0xff]  ;;  %v2387_v47 = vmul.f32 %v2338_v46, %v2338_v46 }
 0x2c3   :  { %v2434_v27 = vadd.f32 %v2386_v21, %v2385_v4  ;;  %v9954_v46 = vld [vmem:[#allocation93_spill] sm:$0xff]  ;;  %v2389_v19 = vmul.f32 %v2340_v61, %v2340_v61  ;;  %v9957_v61 = vld [vmem:[#allocation99_spill] sm:$0xff] }
 0x2c4   :  { %v2294_v15 = vadd.f32 %v2293_v29, %v2246_v3  ;;  %v2148_v29 = vadd.f32 %v2147_v48, %v2100_v9  ;;  %v9952_v48 = vld [vmem:[#allocation90_spill] sm:$0xff]  ;;  %v2342_v4 = vsub.f32 %v9954_v46, %v6578_v24 }
 0x2c5   :  { %v2341_v9 = vsub.f32 %v9952_v48, %v6578_v24 }
 0x2c6   :  { %v2295_v44 = vadd.f32 %v2294_v15, %v2247_v18  ;;  %v2203_v18 = vsub.f32 %v9948_v55, %v6578_v24  ;;  %v2250_v15 = vmul.f32 %v2201_v42, %v2201_v42  ;;  %v2388_v55 = vmul.f32 %v2339_v57, %v2339_v57  ;;  %v9955_v57 = vld [vmem:[#allocation19_spill] sm:$0xff] }
 0x2c7   :  { %v2435_v42 = vadd.f32 %v2434_v27, %v2387_v47  ;;  %v2206_v27 = vsub.f32 %v9955_v57, %v6578_v24  ;;  %v2390_v47 = vmul.f32 %v2341_v9, %v2341_v9  ;;  %v9959_v9 = vld [vmem:[#allocation102_spill] sm:$0xff] }
 0x2c8   :  { %v2296_v3 = vadd.f32 %v2295_v44, %v2248_v13  ;;  %v2204_v13 = vsub.f32 %v9951_v60, %v6578_v24  ;;  %v2251_v44 = vmul.f32 %v2202_v49, %v2202_v49  ;;  %v2252_v0 = vmul.f32 %v2203_v18, %v2203_v18 }
 0x2c9   :  { %v2436_v21 = vadd.f32 %v2435_v42, %v2388_v55  ;;  %v2054_v49 = vsub.f32 %v6051_v59, %v6578_v24  ;;  %v2344_v55 = vsub.f32 %v9957_v61, %v6578_v24  ;;  %v2391_v42 = vmul.f32 %v2342_v4, %v2342_v4 }
 0x2ca   :  { %v2297_v41 = vadd.f32 %v2296_v3, %v2249_v14  ;;  %v2149_v14 = vadd.f32 %v2148_v29, %v2101_v36  ;;  %v9953_v3 = vld [vmem:[#allocation17_spill] sm:$0xff]  ;;  %v9956_v36 = vld [vmem:[#allocation96_spill] sm:$0xff] }
 0x2cb   :  { %v2205_v23 = vsub.f32 %v9953_v3, %v6578_v24  ;;  %v2343_v29 = vsub.f32 %v9956_v36, %v6578_v24  ;;  %v2437_v18 = vadd.f32 %v2436_v21, %v2389_v19  ;;  %v2255_v3 = vmul.f32 %v2206_v27, %v2206_v27  ;;  %v9962_v36 = vld [vmem:[#allocation23_spill] sm:$0xff] }
 0x2cc   :  { %v2298_v40 = vadd.f32 %v2297_v41, %v2250_v15  ;;  %v2102_v41 = vmul.f32 %v2053_v50, %v2053_v50  ;;  %v2253_v15 = vmul.f32 %v2204_v13, %v2204_v13  ;;  %v2055_v50 = vsub.f32 %v6065_v6, %v6578_v24 }
 0x2cd   :  { %v2438_v46 = vadd.f32 %v2437_v18, %v2390_v47  ;;  %v2345_v19 = vsub.f32 %v9959_v9, %v6578_v24  ;;  %v9961_v18 = vld [vmem:[#allocation22_spill] sm:$0xff] }
 0x2ce   :  { %v2299_v16 = vadd.f32 %v2298_v40, %v2251_v44  ;;  %v2150_v40 = vadd.f32 %v2149_v14, %v2102_v41  ;;  %v2254_v44 = vmul.f32 %v2205_v23, %v2205_v23  ;;  %v2392_v14 = vmul.f32 %v2343_v29, %v2343_v29  ;;  %v9960_v41 = vld [vmem:[#allocation105_spill] sm:$0xff] }
 0x2cf   :  { %v2439_v23 = vadd.f32 %v2438_v46, %v2391_v42  ;;  %v2346_v4 = vsub.f32 %v9960_v41, %v6578_v24  ;;  %v2104_v61 = vmul.f32 %v2055_v50, %v2055_v50  ;;  %v2394_v29 = vmul.f32 %v2345_v19, %v2345_v19  ;;  %v9966_v41 = vld [vmem:[#allocation25_spill] sm:$0xff] }
 0x2d0   :  { %v2300_v22 = vadd.f32 %v2299_v16, %v2252_v0  ;;  %v2103_v16 = vmul.f32 %v2054_v49, %v2054_v49  ;;  %v9958_v0 = vld [vmem:[#allocation21_spill] sm:$0xff]  ;;  %v2056_v49 = vsub.f32 %v9961_v18, %v6578_v24 }
 0x2d1   :  { %v2207_v13 = vsub.f32 %v9958_v0, %v6578_v24  ;;  %v2440_v47 = vadd.f32 %v2439_v23, %v2392_v14  ;;  %v9965_v14 = vld [vmem:[#allocation24_spill] sm:$0xff]  ;;  %v9967_v0 = vld [vmem:[#allocation3_spill] sm:$0xff] }
 0x2d2   :  { %v2301_v48 = vadd.f32 %v2300_v22, %v2253_v15  ;;  %v2151_v22 = vadd.f32 %v2150_v40, %v2103_v16  ;;  %v2393_v15 = vmul.f32 %v2344_v55, %v2344_v55  ;;  %v2395_v55 = vmul.f32 %v2346_v4, %v2346_v4 }
 0x2d3   :  { %v2256_v27 = vmul.f32 %v2207_v13, %v2207_v13  ;;  %v2057_v23 = vsub.f32 %v9965_v14, %v6578_v24  ;;  %v2105_v50 = vmul.f32 %v2056_v49, %v2056_v49 }
 0x2d4   :  { %v2302_v57 = vadd.f32 %v2301_v48, %v2254_v44  ;;  %v2208_v48 = vsub.f32 %v9962_v36, %v6578_v24  ;;  %v9963_v44 = vld [vmem:[#allocation108_spill] sm:$0xff]  ;;  %v2441_v46 = vadd.f32 %v2440_v47, %v2393_v15  ;;  %v2152_v40 = vadd.f32 %v2151_v22, %v2104_v61 }
 0x2d5   :  { %v2347_v9 = vsub.f32 %v9963_v44, %v6578_v24  ;;  %v2209_v36 = vsub.f32 %v9966_v41, %v6578_v24  ;;  %v2349_v44 = vsub.f32 %v9967_v0, %v6578_v24  ;;  %v2058_v61 = vsub.f32 %v6143_v51, %v6578_v24  ;;  %v9968_v22 = vld [vmem:[#allocation28_spill] sm:$0xff] }
 0x2d6   :  { %v2303_v21 = vadd.f32 %v2302_v57, %v2255_v3  ;;  %v9964_v57 = vld [vmem:[#allocation111_spill] sm:$0xff]  ;;  %v2442_v16 = vadd.f32 %v2441_v46, %v2394_v29  ;;  %v2257_v13 = vmul.f32 %v2208_v48, %v2208_v48  ;;  %v2153_v4 = vadd.f32 %v2152_v40, %v2105_v50  ;;  %v9970_v48 = vld [vmem:[#allocation30_spill] sm:$0xff]  ;;  %v9971_v0 = vld [vmem:[#allocation32_spill] sm:$0xff] }
 0x2d7   :  { %v2348_v42 = vsub.f32 %v9964_v57, %v6578_v24  ;;  %v2396_v19 = vmul.f32 %v2347_v9, %v2347_v9  ;;  %v2060_v57 = vsub.f32 %v9970_v48, %v6578_v24  ;;  %v2061_v9 = vsub.f32 %v9971_v0, %v6578_v24  ;;  %v9975_v0 = vld [vmem:[#allocation115_spill] sm:$0xff] }
 0x2d8   :  { %v2304_v3 = vadd.f32 %v2303_v21, %v2256_v27  ;;  %v2443_v15 = vadd.f32 %v2442_v16, %v2395_v55  ;;  %v2059_v21 = vsub.f32 %v9968_v22, %v6578_v24  ;;  %v9969_v27 = vld [vmem:[#allocation113_spill] sm:$0xff]  ;;  %v2106_v55 = vmul.f32 %v2057_v23, %v2057_v23  ;;  %v9972_v16 = vld [vmem:[#allocation27_spill] sm:$0xff] }
 0x2d9   :  { %v2350_v49 = vsub.f32 %v9969_v27, %v6578_v24  ;;  %v2397_v29 = vmul.f32 %v2348_v42, %v2348_v42  ;;  %v2210_v41 = vsub.f32 %v9972_v16, %v6578_v24  ;;  %v2258_v60 = vmul.f32 %v2209_v36, %v2209_v36 }
 0x2da   :  { %v2305_v47 = vadd.f32 %v2304_v3, %v2257_v13  ;;  %v2444_v46 = vadd.f32 %v2443_v15, %v2396_v19  ;;  %v2351_v40 = vsub.f32 %v9973_v2, %v6578_v24  ;;  %v2398_v3 = vmul.f32 %v2349_v44, %v2349_v44  ;;  %v9974_v19 = vld [vmem:[#allocation38_spill] sm:$0xff] }
 0x2db   :  { %v2062_v42 = vsub.f32 %v6231_v38, %v6578_v24  ;;  %v2063_v13 = vsub.f32 %v6245_v37, %v6578_v24  ;;  %v2064_v15 = vsub.f32 %v9974_v19, %v6578_v24  ;;  %v2154_v27 = vadd.f32 %v2153_v4, %v2106_v55  ;;  %v9977_v38 = vld [vmem:[#allocation29_spill] sm:$0xff]  ;;  %v9978_v19 = vld [vmem:[#allocation11_spill] sm:$0xff]  ;;  %v9979_v55 = vld [vmem:[#allocation44_spill] sm:$0xff] }
 0x2dc   :  { %v2445_v50 = vadd.f32 %v2444_v46, %v2397_v29  ;;  %v2306_v23 = vadd.f32 %v2305_v47, %v2258_v60  ;;  %v2352_v16 = vsub.f32 %v9975_v0, %v6578_v24  ;;  %v2399_v36 = vmul.f32 %v2350_v49, %v2350_v49  ;;  %v9976_v29 = vld [vmem:[#allocation42_spill] sm:$0xff] }
 0x2dd   :  { %v2065_v44 = vsub.f32 %v6285_v1, %v6578_v24  ;;  %v2066_v46 = vsub.f32 %v9976_v29, %v6578_v24  ;;  %v2107_v2 = vmul.f32 %v2058_v61, %v2058_v61  ;;  %v2211_v37 = vsub.f32 %v9977_v38, %v6578_v24  ;;  %v9981_v29 = vld [vmem:[#allocation118_spill] sm:$0xff]  ;;  %v9982_v1 = vld [vmem:[#allocation48_spill] sm:$0xff] }
 0x2de   :  { %v2446_v48 = vadd.f32 %v2445_v50, %v2398_v3  ;;  %v2259_v22 = vmul.f32 %v2210_v41, %v2210_v41  ;;  %v2353_v4 = vsub.f32 %v9978_v19, %v6578_v24  ;;  %v2400_v60 = vmul.f32 %v2351_v40, %v2351_v40  ;;  %v9980_v3 = vld [vmem:[#allocation46_spill] sm:$0xff] }
 0x2df   :  { %v2067_v49 = vsub.f32 %v9979_v55, %v6578_v24  ;;  %v6750_v50 = vsub.f32 %v9980_v3, %v6578_v24  ;;  %v2155_v0 = vadd.f32 %v2154_v27, %v2107_v2  ;;  %v2354_v61 = vsub.f32 %v9981_v29, %v6578_v24  ;;  %v9983_v55 = vld [vmem:[#allocation31_spill] sm:$0xff]  ;;  %v9984_v3 = vld [vmem:[#allocation120_spill] sm:$0xff] }
 0x2e0   :  { %v2447_v47 = vadd.f32 %v2446_v48, %v2399_v36  ;;  %v6756_v38 = vsub.f32 %v9982_v1, %v6578_v24  ;;  %v2307_v41 = vadd.f32 %v2306_v23, %v2259_v22  ;;  %v2401_v51 = vmul.f32 %v2352_v16, %v2352_v16  ;;  %v9985_v1 = vld [vmem:[#allocation122_spill] sm:$0xff] }
 0x2e1   :  { %v2108_v40 = vmul.f32 %v2059_v21, %v2059_v21  ;;  %v2109_v48 = vmul.f32 %v2060_v57, %v2060_v57  ;;  %v2110_v36 = vmul.f32 %v2061_v9, %v2061_v9  ;;  %v2212_v14 = vsub.f32 %v9983_v55, %v6578_v24  ;;  %v9986_v57 = vld [vmem:[#allocation79_spill] sm:$0xff]  ;;  %v9987_v9 = vld [vmem:[#allocation80_spill] sm:$0xff] }
 0x2e2   :  { %v2448_v19 = vadd.f32 %v2447_v47, %v2400_v60  ;;  %v2260_v18 = vmul.f32 %v2211_v37, %v2211_v37  ;;  %v2355_v2 = vsub.f32 %v9984_v3, %v6578_v24  ;;  %v2402_v27 = vmul.f32 %v2353_v4, %v2353_v4 }
 0x2e3   :  { %v2111_v29 = vmul.f32 %v2062_v42, %v2062_v42  ;;  %v2156_v59 = vadd.f32 %v2155_v0, %v2108_v40  ;;  %v2356_v30 = vsub.f32 %v9985_v1, %v6578_v24  ;;  %v2403_v22 = vmul.f32 %v2354_v61, %v2354_v61 }
 0x2e4   :  { %v2449_v6 = vadd.f32 %v2448_v19, %v2401_v51  ;;  %v2308_v16 = vadd.f32 %v2307_v41, %v2260_v18  ;;  %v2489_v21 = vsub.f32 %v9986_v57, %v6578_v24  ;;  %v2490_v60 = vsub.f32 %v9987_v9, %v6578_v24  ;;  %v9988_v51 = vld [vmem:[#allocation33_spill] sm:$0xff]  ;;  %v9989_v19 = vld [vmem:[#allocation124_spill] sm:$0xff]  ;;  %v9990_v41 = vld [vmem:[#allocation126_spill] sm:$0xff] }
 0x2e5   :  { %v2112_v37 = vmul.f32 %v2063_v13, %v2063_v13  ;;  %v6768_v47 = vmul.f32 %v2064_v15, %v2064_v15  ;;  %v6770_v3 = vmul.f32 %v2065_v44, %v2065_v44  ;;  %v2213_v0 = vsub.f32 %v9988_v51, %v6578_v24  ;;  %v9991_v13 = vld [vmem:[#allocation82_spill] sm:$0xff] }
 0x2e6   :  { %v2450_v23 = vadd.f32 %v2449_v6, %v2402_v27  ;;  %v2261_v42 = vmul.f32 %v2212_v14, %v2212_v14  ;;  %v2357_v4 = vsub.f32 %v9989_v19, %v6578_v24  ;;  %v2404_v18 = vmul.f32 %v2355_v2, %v2355_v2  ;;  %v9992_v19 = vld [vmem:[#allocation35_spill] sm:$0xff] }
 0x2e7   :  { %v2157_v61 = vadd.f32 %v2156_v59, %v2109_v48  ;;  %v2358_v40 = vsub.f32 %v9990_v41, %v6578_v24  ;;  %v2405_v27 = vmul.f32 %v2356_v30, %v2356_v30  ;;  %v2491_v15 = vsub.f32 %v9991_v13, %v6578_v24  ;;  %v9993_v59 = vld [vmem:[#allocation128_spill] sm:$0xff]  ;;  %v9994_v41 = vld [vmem:[#allocation86_spill] sm:$0xff] }
 0x2e8   :  { %v2451_v6 = vadd.f32 %v2450_v23, %v2403_v22  ;;  %v2309_v9 = vadd.f32 %v2308_v16, %v2261_v42  ;;  %v2538_v57 = vmul.f32 %v2489_v21, %v2489_v21  ;;  %v2539_v1 = vmul.f32 %v2490_v60, %v2490_v60  ;;  %v9995_v21 = vld [vmem:[#allocation130_spill] sm:$0xff] }
 0x2e9   :  { %v6780_v55 = vmul.f32 %v2066_v46, %v2066_v46  ;;  %v6782_v14 = vmul.f32 %v2067_v49, %v2067_v49  ;;  %v2214_v2 = vsub.f32 %v9992_v19, %v6578_v24  ;;  %v2359_v48 = vsub.f32 %v9993_v59, %v6578_v24  ;;  %v9996_v49 = vld [vmem:[#allocation88_spill] sm:$0xff]  ;;  %v9997_v59 = vld [vmem:[#allocation37_spill] sm:$0xff] }
 0x2ea   :  { %v2452_v44 = vadd.f32 %v2451_v6, %v2404_v18  ;;  %v2262_v22 = vmul.f32 %v2213_v0, %v2213_v0  ;;  %v2406_v23 = vmul.f32 %v2357_v4, %v2357_v4  ;;  %v2492_v13 = vsub.f32 %v9994_v41, %v6578_v24 }
 0x2eb   :  { %v2158_v16 = vadd.f32 %v2157_v61, %v2110_v36  ;;  %v2360_v60 = vsub.f32 %v9995_v21, %v6578_v24  ;;  %v2407_v46 = vmul.f32 %v2358_v40, %v2358_v40  ;;  %v2493_v42 = vsub.f32 %v9996_v49, %v6578_v24  ;;  %v9999_v61 = vld [vmem:[#allocation92_spill] sm:$0xff] }
 0x2ec   :  { %v2453_v30 = vadd.f32 %v2452_v44, %v2405_v27  ;;  %v2310_v18 = vadd.f32 %v2309_v9, %v2262_v22  ;;  %v2540_v19 = vmul.f32 %v2491_v15, %v2491_v15  ;;  %v2587_v51 = vadd.f32 %v2539_v1, %v2538_v57  ;;  %v9998_v27 = vld [vmem:[#allocation132_spill] sm:$0xff]  ;;  %v10000_v9 = vld [vmem:[#allocation134_spill] sm:$0xff] }
 0x2ed   :  { %v2215_v0 = vsub.f32 %v9997_v59, %v6578_v24  ;;  %v2263_v4 = vmul.f32 %v2214_v2, %v2214_v2  ;;  %v2361_v44 = vsub.f32 %v9998_v27, %v6578_v24  ;;  %v2408_v41 = vmul.f32 %v2359_v48, %v2359_v48  ;;  %v10001_v1 = vld [vmem:[#allocation94_spill] sm:$0xff]  ;;  %v10002_v48 = vld [vmem:[#allocation39_spill] sm:$0xff] }
 0x2ee   :  { %v2454_v6 = vadd.f32 %v2453_v30, %v2406_v23  ;;  %v2494_v21 = vsub.f32 %v9999_v61, %v6578_v24  ;;  %v2541_v40 = vmul.f32 %v2492_v13, %v2492_v13  ;;  %v2588_v63 = vadd.f32 %v2587_v51, %v2540_v19  ;;  %v10003_v61 = vld [vmem:[#allocation136_spill] sm:$0xff]  ;;  %v10004_v19 = vld [vmem:[#allocation98_spill] sm:$0xff] }
 0x2ef   :  { %v2159_v62 = vadd.f32 %v2158_v16, %v2111_v29  ;;  %v2362_v22 = vsub.f32 %v10000_v9, %v6578_v24  ;;  %v2409_v15 = vmul.f32 %v2360_v60, %v2360_v60  ;;  %v2495_v57 = vsub.f32 %v10001_v1, %v6578_v24 }
 0x2f0   :  { %v2455_v36 = vadd.f32 %v2454_v6, %v2407_v46  ;;  %v2311_v23 = vadd.f32 %v2310_v18, %v2263_v4  ;;  %v2542_v30 = vmul.f32 %v2493_v42, %v2493_v42  ;;  %v2589_v49 = vadd.f32 %v2588_v63, %v2541_v40  ;;  %v10005_v18 = vld [vmem:[#allocation138_spill] sm:$0xff]  ;;  %v10006_v63 = vld [vmem:[#allocation100_spill] sm:$0xff] }
 0x2f1   :  { %v2216_v46 = vsub.f32 %v10002_v48, %v6578_v24  ;;  %v2264_v6 = vmul.f32 %v2215_v0, %v2215_v0  ;;  %v2363_v13 = vsub.f32 %v10003_v61, %v6578_v24  ;;  %v2410_v51 = vmul.f32 %v2361_v44, %v2361_v44  ;;  %v10007_v44 = vld [vmem:[#allocation41_spill] sm:$0xff]  ;;  %v10043_v61 = vld [vmem:[#allocation56_spill] sm:$0xff] }
 0x2f2   :  { %v2456_v2 = vadd.f32 %v2455_v36, %v2408_v41  ;;  %v2496_v16 = vsub.f32 %v10004_v19, %v6578_v24  ;;  %v2543_v60 = vmul.f32 %v2494_v21, %v2494_v21  ;;  %v2590_v9 = vadd.f32 %v2589_v49, %v2542_v30  ;;  %v10008_v19 = vld [vmem:[#allocation140_spill] sm:$0xff]  ;;  %v10113_v48 = vld [vmem:[#allocation77_spill] sm:$0xff] }
 0x2f3   :  { %v2160_v27 = vadd.f32 %v2159_v62, %v2112_v37  ;;  %v2364_v41 = vsub.f32 %v10005_v18, %v6578_v24  ;;  %v2411_v42 = vmul.f32 %v2362_v22, %v2362_v22  ;;  %v2497_v4 = vsub.f32 %v10006_v63, %v6578_v24  ;;  %v10009_v37 = vld [vmem:[#allocation104_spill] sm:$0xff] }
 0x2f4   :  { %v2457_v29 = vadd.f32 %v2456_v2, %v2409_v15  ;;  %v2312_v36 = vadd.f32 %v2311_v23, %v2264_v6  ;;  %v2544_v40 = vmul.f32 %v2495_v57, %v2495_v57  ;;  %v2591_v1 = vadd.f32 %v2590_v9, %v2543_v60  ;;  %v10010_v23 = vld [vmem:[#allocation142_spill] sm:$0xff] }
 0x2f5   :  { %v2217_v15 = vsub.f32 %v10007_v44, %v6578_v24  ;;  %v2265_v2 = vmul.f32 %v2216_v46, %v2216_v46  ;;  %v2365_v21 = vsub.f32 %v10008_v19, %v6578_v24  ;;  %v2412_v49 = vmul.f32 %v2363_v13, %v2363_v13  ;;  %v10011_v6 = vld [vmem:[#allocation106_spill] sm:$0xff]  ;;  %v10012_v13 = vld [vmem:[#allocation43_spill] sm:$0xff] }
 0x2f6   :  { %v2458_v0 = vadd.f32 %v2457_v29, %v2410_v51  ;;  %v2498_v30 = vsub.f32 %v10009_v37, %v6578_v24  ;;  %v2545_v22 = vmul.f32 %v2496_v16, %v2496_v16  ;;  %v2592_v18 = vadd.f32 %v2591_v1, %v2544_v40  ;;  %v10013_v16 = vld [vmem:[#allocation144_spill] sm:$0xff] }
 0x2f7   :  { %v2161_v63 = vadd.f32 %v2160_v27, %v6768_v47  ;;  %v2366_v57 = vsub.f32 %v10010_v23, %v6578_v24  ;;  %v2413_v9 = vmul.f32 %v2364_v41, %v2364_v41  ;;  %v2499_v51 = vsub.f32 %v10011_v6, %v6578_v24  ;;  %v10014_v27 = vld [vmem:[#allocation110_spill] sm:$0xff] }
 0x2f8   :  { %v2459_v62 = vadd.f32 %v2458_v0, %v2411_v42  ;;  %v2313_v46 = vadd.f32 %v2312_v36, %v2265_v2  ;;  %v2546_v60 = vmul.f32 %v2497_v4, %v2497_v4  ;;  %v2593_v19 = vadd.f32 %v2592_v18, %v2545_v22  ;;  %v10015_v36 = vld [vmem:[#allocation146_spill] sm:$0xff]  ;;  %v10016_v2 = vld [vmem:[#allocation112_spill] sm:$0xff] }
 0x2f9   :  { %v2218_v42 = vsub.f32 %v10012_v13, %v6578_v24  ;;  %v2266_v0 = vmul.f32 %v2217_v15, %v2217_v15  ;;  %v2367_v1 = vsub.f32 %v10013_v16, %v6578_v24  ;;  %v2414_v40 = vmul.f32 %v2365_v21, %v2365_v21  ;;  %v10017_v21 = vld [vmem:[#allocation45_spill] sm:$0xff] }
 0x2fa   :  { %v2460_v29 = vadd.f32 %v2459_v62, %v2412_v49  ;;  %v2500_v37 = vsub.f32 %v10014_v27, %v6578_v24  ;;  %v2547_v41 = vmul.f32 %v2498_v30, %v2498_v30  ;;  %v2594_v23 = vadd.f32 %v2593_v19, %v2546_v60  ;;  %v10018_v30 = vld [vmem:[#allocation148_spill] sm:$0xff] }
 0x2fb   :  { %v2162_v6 = vadd.f32 %v2161_v63, %v6770_v3  ;;  %v2368_v4 = vsub.f32 %v10015_v36, %v6578_v24  ;;  %v2415_v18 = vmul.f32 %v2366_v57, %v2366_v57  ;;  %v2501_v49 = vsub.f32 %v10016_v2, %v6578_v24  ;;  %v10019_v63 = vld [vmem:[#allocation5_spill] sm:$0xff] }
 0x2fc   :  { %v2461_v47 = vadd.f32 %v2460_v29, %v2413_v9  ;;  %v2314_v15 = vadd.f32 %v2313_v46, %v2266_v0  ;;  %v2548_v22 = vmul.f32 %v2499_v51, %v2499_v51  ;;  %v2595_v16 = vadd.f32 %v2594_v23, %v2547_v41  ;;  %v10020_v46 = vld [vmem:[#allocation150_spill] sm:$0xff] }
 0x2fd   :  { %v2219_v9 = vsub.f32 %v10017_v21, %v6578_v24  ;;  %v2267_v29 = vmul.f32 %v2218_v42, %v2218_v42  ;;  %v2369_v19 = vsub.f32 %v10018_v30, %v6578_v24  ;;  %v2416_v60 = vmul.f32 %v2367_v1, %v2367_v1  ;;  %v10021_v0 = vld [vmem:[#allocation114_spill] sm:$0xff]  ;;  %v10022_v1 = vld [vmem:[#allocation47_spill] sm:$0xff] }
 0x2fe   :  { %v2462_v62 = vadd.f32 %v2461_v47, %v2414_v40  ;;  %v2502_v27 = vsub.f32 %v10019_v63, %v6578_v24  ;;  %v2549_v57 = vmul.f32 %v2500_v37, %v2500_v37  ;;  %v2596_v36 = vadd.f32 %v2595_v16, %v2548_v22  ;;  %v10023_v37 = vld [vmem:[#allocation152_spill] sm:$0xff] }
 0x2ff   :  { %v2163_v2 = vadd.f32 %v2162_v6, %v6780_v55  ;;  %v2370_v51 = vsub.f32 %v10020_v46, %v6578_v24  ;;  %v2417_v23 = vmul.f32 %v2368_v4, %v2368_v4  ;;  %v2503_v40 = vsub.f32 %v10021_v0, %v6578_v24  ;;  %v10024_v6 = vld [vmem:[#allocation9_spill] sm:$0xff] }
 0x300   :  { %v2463_v3 = vadd.f32 %v2462_v62, %v2415_v18  ;;  %v2315_v42 = vadd.f32 %v2314_v15, %v2267_v29  ;;  %v2550_v41 = vmul.f32 %v2501_v49, %v2501_v49  ;;  %v2597_v30 = vadd.f32 %v2596_v36, %v2549_v57  ;;  %v10025_v15 = vld [vmem:[#allocation154_spill] sm:$0xff]  ;;  %v10026_v29 = vld [vmem:[#allocation116_spill] sm:$0xff] }
 0x301   :  { %v2220_v18 = vsub.f32 %v10022_v1, %v6578_v24  ;;  %v2268_v62 = vmul.f32 %v2219_v9, %v2219_v9  ;;  %v2371_v16 = vsub.f32 %v10023_v37, %v6578_v24  ;;  %v2418_v22 = vmul.f32 %v2369_v19, %v2369_v19 }
 0x302   :  { %v2464_v47 = vadd.f32 %v2463_v3, %v2416_v60  ;;  %v2504_v63 = vsub.f32 %v10024_v6, %v6578_v24  ;;  %v2551_v4 = vmul.f32 %v2502_v27, %v2502_v27  ;;  %v2598_v46 = vadd.f32 %v2597_v30, %v2550_v41 }
 0x303   :  { %v2164_v0 = vadd.f32 %v2163_v2, %v6782_v14  ;;  %v2372_v49 = vsub.f32 %v10025_v15, %v6578_v24  ;;  %v2419_v36 = vmul.f32 %v2370_v51, %v2370_v51  ;;  %v2505_v60 = vsub.f32 %v10026_v29, %v6578_v24  ;;  %v10028_v2 = vld [vmem:[#allocation117_spill] sm:$0xff] }
 0x304   :  { %v2465_v55 = vadd.f32 %v2464_v47, %v2417_v23  ;;  %v2316_v9 = vadd.f32 %v2315_v42, %v2268_v62  ;;  %v2552_v57 = vmul.f32 %v2503_v40, %v2503_v40  ;;  %v2599_v37 = vadd.f32 %v2598_v46, %v2551_v4  ;;  %v10027_v23 = vld [vmem:[#allocation49_spill] sm:$0xff]  ;;  %v10029_v46 = vld [vmem:[#allocation119_spill] sm:$0xff] }
 0x305   :  { %v2117_v19 = vmul.f32 %v6750_v50, %v6750_v50  ;;  %v2221_v27 = vsub.f32 %v10027_v23, %v6578_v24  ;;  %v2269_v30 = vmul.f32 %v2220_v18, %v2220_v18  ;;  %v2420_v47 = vmul.f32 %v2371_v16, %v2371_v16 }
 0x306   :  { %v2466_v3 = vadd.f32 %v2465_v55, %v2418_v22  ;;  %v2506_v41 = vsub.f32 %v10028_v2, %v6578_v24  ;;  %v2553_v51 = vmul.f32 %v2504_v63, %v2504_v63  ;;  %v2600_v6 = vadd.f32 %v2599_v37, %v2552_v57 }
 0x307   :  { %v2165_v15 = vadd.f32 %v2164_v0, %v2117_v19  ;;  %v2373_v42 = vsub.f32 %v6392_v12, %v6578_v24  ;;  %v2421_v40 = vmul.f32 %v2372_v49, %v2372_v49  ;;  %v2507_v62 = vsub.f32 %v10029_v46, %v6578_v24  ;;  %v10030_v49 = vld [vmem:[#allocation121_spill] sm:$0xff]  ;;  %v10032_v19 = vld [vmem:[#allocation123_spill] sm:$0xff]  ;;  %v10033_v46 = vld [vmem:[#allocation52_spill] sm:$0xff] }
 0x308   :  { %v2467_v14 = vadd.f32 %v2466_v3, %v2419_v36  ;;  %v2317_v50 = vadd.f32 %v2316_v9, %v2269_v30  ;;  %v2554_v55 = vmul.f32 %v2505_v60, %v2505_v60  ;;  %v2601_v4 = vadd.f32 %v2600_v6, %v2553_v51  ;;  %v10031_v9 = vld [vmem:[#allocation157_spill] sm:$0xff] }
 0x309   :  { %v2070_v18 = vsub.f32 %v6383_v54, %v6578_v24  ;;  %v2118_v16 = vmul.f32 %v6756_v38, %v6756_v38  ;;  %v2222_v63 = vsub.f32 %v6387_v8, %v6578_v24  ;;  %v2270_v0 = vmul.f32 %v2221_v27, %v2221_v27 }
 0x30a   :  { %v2468_v22 = vadd.f32 %v2467_v14, %v2420_v47  ;;  %v2508_v36 = vsub.f32 %v10030_v49, %v6578_v24  ;;  %v2555_v3 = vmul.f32 %v2506_v41, %v2506_v41  ;;  %v2602_v57 = vadd.f32 %v2601_v4, %v2554_v55  ;;  %v10035_v4 = vld [vmem:[#allocation125_spill] sm:$0xff] }
 0x30b   :  { %v2374_v60 = vsub.f32 %v10031_v9, %v6578_v24  ;;  %v2422_v6 = vmul.f32 %v2373_v42, %v2373_v42  ;;  %v2509_v30 = vsub.f32 %v10032_v19, %v6578_v24  ;;  %v2166_v47 = vadd.f32 %v2165_v15, %v2118_v16  ;;  %v10036_v19 = vld [vmem:[#allocation159_spill] sm:$0xff]  ;;  %v10038_v9 = vld [vmem:[#allocation54_spill] sm:$0xff] }
 0x30c   :  { %v2469_v37 = vadd.f32 %v2468_v22, %v2421_v40  ;;  %v2318_v14 = vadd.f32 %v2317_v50, %v2270_v0  ;;  %v2556_v38 = vmul.f32 %v2507_v62, %v2507_v62  ;;  %v2603_v51 = vadd.f32 %v2602_v57, %v2555_v3  ;;  %v10034_v22 = vld [vmem:[#allocation53_spill] sm:$0xff]  ;;  %v10037_v62 = vld [vmem:[#allocation127_spill] sm:$0xff] }
 0x30d   :  { %v2071_v27 = vsub.f32 %v10033_v46, %v6578_v24  ;;  %v2119_v40 = vmul.f32 %v2070_v18, %v2070_v18  ;;  %v2223_v49 = vsub.f32 %v10034_v22, %v6578_v24  ;;  %v2271_v41 = vmul.f32 %v2222_v63, %v2222_v63 }
 0x30e   :  { %v2470_v55 = vadd.f32 %v2469_v37, %v2422_v6  ;;  %v2510_v2 = vsub.f32 %v10035_v4, %v6578_v24  ;;  %v2557_v42 = vmul.f32 %v2508_v36, %v2508_v36  ;;  %v2604_v29 = vadd.f32 %v2603_v51, %v2556_v38  ;;  %v10039_v6 = vld [vmem:[#allocation55_spill] sm:$0xff]  ;;  %v10040_v51 = vld [vmem:[#allocation129_spill] sm:$0xff] }
 0x30f   :  { %v2375_v15 = vsub.f32 %v10036_v19, %v6578_v24  ;;  %v2423_v50 = vmul.f32 %v2374_v60, %v2374_v60  ;;  %v2511_v16 = vsub.f32 %v10037_v62, %v6578_v24  ;;  %v2167_v0 = vadd.f32 %v2166_v47, %v2119_v40  ;;  %v10041_v62 = vld [vmem:[#allocation161_spill] sm:$0xff] }
 0x310   :  { %v2319_v3 = vadd.f32 %v2318_v14, %v2271_v41  ;;  %v2558_v18 = vmul.f32 %v2509_v30, %v2509_v30  ;;  %v2605_v57 = vadd.f32 %v2604_v29, %v2557_v42  ;;  %v2072_v63 = vsub.f32 %v10038_v9, %v6578_v24  ;;  %v10042_v29 = vld [vmem:[#allocation131_spill] sm:$0xff] }
 0x311   :  { %v2120_v37 = vmul.f32 %v2071_v27, %v2071_v27  ;;  %v2224_v4 = vsub.f32 %v10039_v6, %v6578_v24  ;;  %v2272_v36 = vmul.f32 %v2223_v49, %v2223_v49  ;;  %v2471_v38 = vadd.f32 %v2470_v55, %v2423_v50  ;;  %v10044_v50 = vld [vmem:[#allocation57_spill] sm:$0xff] }
 0x312   :  { %v2512_v19 = vsub.f32 %v10040_v51, %v6578_v24  ;;  %v2559_v60 = vmul.f32 %v2510_v2, %v2510_v2  ;;  %v2606_v12 = vadd.f32 %v2605_v57, %v2558_v18  ;;  %v2376_v47 = vsub.f32 %v10041_v62, %v6578_v24  ;;  %v10045_v57 = vld [vmem:[#allocation133_spill] sm:$0xff] }
 0x313   :  { %v2424_v14 = vmul.f32 %v2375_v15, %v2375_v15  ;;  %v2513_v30 = vsub.f32 %v10042_v29, %v6578_v24  ;;  %v2168_v40 = vadd.f32 %v2167_v0, %v2120_v37  ;;  %v2320_v41 = vadd.f32 %v2319_v3, %v2272_v36  ;;  %v10046_v29 = vld [vmem:[#allocation163_spill] sm:$0xff] }
 0x314   :  { %v2560_v27 = vmul.f32 %v2511_v16, %v2511_v16  ;;  %v2607_v42 = vadd.f32 %v2606_v12, %v2559_v60  ;;  %v2073_v49 = vsub.f32 %v10043_v61, %v6578_v24  ;;  %v2121_v55 = vmul.f32 %v2072_v63, %v2072_v63  ;;  %v10047_v12 = vld [vmem:[#allocation135_spill] sm:$0xff] }
 0x315   :  { %v2225_v51 = vsub.f32 %v10044_v50, %v6578_v24  ;;  %v2273_v2 = vmul.f32 %v2224_v4, %v2224_v4  ;;  %v2472_v18 = vadd.f32 %v2471_v38, %v2424_v14  ;;  %v2514_v62 = vsub.f32 %v10045_v57, %v6578_v24  ;;  %v10048_v50 = vld [vmem:[#allocation58_spill] sm:$0xff]  ;;  %v10049_v14 = vld [vmem:[#allocation59_spill] sm:$0xff] }
 0x316   :  { %v2561_v15 = vmul.f32 %v2512_v19, %v2512_v19  ;;  %v2608_v6 = vadd.f32 %v2607_v42, %v2560_v27  ;;  %v2377_v0 = vsub.f32 %v10046_v29, %v6578_v24  ;;  %v2425_v3 = vmul.f32 %v2376_v47, %v2376_v47  ;;  %v10050_v42 = vld [vmem:[#allocation137_spill] sm:$0xff] }
 0x317   :  { %v2515_v16 = vsub.f32 %v10047_v12, %v6578_v24  ;;  %v2169_v37 = vadd.f32 %v2168_v40, %v2121_v55  ;;  %v2321_v36 = vadd.f32 %v2320_v41, %v2273_v2  ;;  %v2562_v63 = vmul.f32 %v2513_v30, %v2513_v30  ;;  %v10051_v12 = vld [vmem:[#allocation165_spill] sm:$0xff] }
 0x318   :  { %v2609_v60 = vadd.f32 %v2608_v6, %v2561_v15  ;;  %v2074_v4 = vsub.f32 %v10048_v50, %v6578_v24  ;;  %v2122_v38 = vmul.f32 %v2073_v49, %v2073_v49  ;;  %v2226_v57 = vsub.f32 %v10049_v14, %v6578_v24  ;;  %v10052_v6 = vld [vmem:[#allocation139_spill] sm:$0xff]  ;;  %v10053_v14 = vld [vmem:[#allocation60_spill] sm:$0xff] }
 0x319   :  { %v2274_v19 = vmul.f32 %v2225_v51, %v2225_v51  ;;  %v2473_v27 = vadd.f32 %v2472_v18, %v2425_v3  ;;  %v2516_v29 = vsub.f32 %v10050_v42, %v6578_v24  ;;  %v2563_v47 = vmul.f32 %v2514_v62, %v2514_v62  ;;  %v10054_v3 = vld [vmem:[#allocation61_spill] sm:$0xff] }
 0x31a   :  { %v2610_v22 = vadd.f32 %v2609_v60, %v2562_v63  ;;  %v2378_v40 = vsub.f32 %v10051_v12, %v6578_v24  ;;  %v2426_v41 = vmul.f32 %v2377_v0, %v2377_v0  ;;  %v2517_v30 = vsub.f32 %v10052_v6, %v6578_v24  ;;  %v10055_v60 = vld [vmem:[#allocation141_spill] sm:$0xff]  ;;  %v10056_v6 = vld [vmem:[#allocation167_spill] sm:$0xff] }
 0x31b   :  { %v2170_v55 = vadd.f32 %v2169_v37, %v2122_v38  ;;  %v2322_v2 = vadd.f32 %v2321_v36, %v2274_v19  ;;  %v2564_v49 = vmul.f32 %v2515_v16, %v2515_v16  ;;  %v2075_v51 = vsub.f32 %v10053_v14, %v6578_v24 }
 0x31c   :  { %v2611_v15 = vadd.f32 %v2610_v22, %v2563_v47  ;;  %v2123_v18 = vmul.f32 %v2074_v4, %v2074_v4  ;;  %v2227_v42 = vsub.f32 %v10054_v3, %v6578_v24  ;;  %v2275_v62 = vmul.f32 %v2226_v57, %v2226_v57  ;;  %v10057_v22 = vld [vmem:[#allocation143_spill] sm:$0xff]  ;;  %v10058_v3 = vld [vmem:[#allocation62_spill] sm:$0xff] }
 0x31d   :  { %v2474_v63 = vadd.f32 %v2473_v27, %v2426_v41  ;;  %v2518_v12 = vsub.f32 %v10055_v60, %v6578_v24  ;;  %v2565_v0 = vmul.f32 %v2516_v29, %v2516_v29  ;;  %v2379_v37 = vsub.f32 %v10056_v6, %v6578_v24  ;;  %v10059_v41 = vld [vmem:[#allocation63_spill] sm:$0xff] }
 0x31e   :  { %v2612_v8 = vadd.f32 %v2611_v15, %v2564_v49  ;;  %v2427_v36 = vmul.f32 %v2378_v40, %v2378_v40  ;;  %v2519_v16 = vsub.f32 %v10057_v22, %v6578_v24  ;;  %v2171_v38 = vadd.f32 %v2170_v55, %v2123_v18  ;;  %v10060_v15 = vld [vmem:[#allocation145_spill] sm:$0xff] }
 0x31f   :  { %v2323_v19 = vadd.f32 %v2322_v2, %v2275_v62  ;;  %v2566_v4 = vmul.f32 %v2517_v30, %v2517_v30  ;;  %v2076_v57 = vsub.f32 %v10058_v3, %v6578_v24  ;;  %v2124_v27 = vmul.f32 %v2075_v51, %v2075_v51  ;;  %v10061_v22 = vld [vmem:[#allocation169_spill] sm:$0xff] }
 0x320   :  { %v2613_v47 = vadd.f32 %v2612_v8, %v2565_v0  ;;  %v2228_v60 = vsub.f32 %v10059_v41, %v6578_v24  ;;  %v2276_v29 = vmul.f32 %v2227_v42, %v2227_v42  ;;  %v2475_v49 = vadd.f32 %v2474_v63, %v2427_v36  ;;  %v10062_v8 = vld [vmem:[#allocation147_spill] sm:$0xff]  ;;  %v10063_v41 = vld [vmem:[#allocation64_spill] sm:$0xff]  ;;  %v10064_v36 = vld [vmem:[#allocation65_spill] sm:$0xff] }
 0x321   :  { %v2520_v6 = vsub.f32 %v10060_v15, %v6578_v24  ;;  %v2567_v40 = vmul.f32 %v2518_v12, %v2518_v12  ;;  %v2380_v55 = vsub.f32 %v10061_v22, %v6578_v24  ;;  %v2428_v2 = vmul.f32 %v2379_v37, %v2379_v37 }
 0x322   :  { %v2614_v23 = vadd.f32 %v2613_v47, %v2566_v4  ;;  %v2521_v30 = vsub.f32 %v10062_v8, %v6578_v24  ;;  %v2172_v18 = vadd.f32 %v2171_v38, %v2124_v27  ;;  %v2324_v62 = vadd.f32 %v2323_v19, %v2276_v29  ;;  %v10065_v47 = vld [vmem:[#allocation149_spill] sm:$0xff]  ;;  %v10066_v8 = vld [vmem:[#allocation171_spill] sm:$0xff] }
 0x323   :  { %v2568_v51 = vmul.f32 %v2519_v16, %v2519_v16  ;;  %v2077_v42 = vsub.f32 %v10063_v41, %v6578_v24  ;;  %v2125_v63 = vmul.f32 %v2076_v57, %v2076_v57  ;;  %v2229_v15 = vsub.f32 %v10064_v36, %v6578_v24  ;;  %v10068_v36 = vld [vmem:[#allocation66_spill] sm:$0xff] }
 0x324   :  { %v2615_v0 = vadd.f32 %v2614_v23, %v2567_v40  ;;  %v2277_v12 = vmul.f32 %v2228_v60, %v2228_v60  ;;  %v2476_v4 = vadd.f32 %v2475_v49, %v2428_v2  ;;  %v2522_v22 = vsub.f32 %v10065_v47, %v6578_v24  ;;  %v10067_v23 = vld [vmem:[#allocation151_spill] sm:$0xff] }
 0x325   :  { %v2569_v37 = vmul.f32 %v2520_v6, %v2520_v6  ;;  %v2381_v38 = vsub.f32 %v10066_v8, %v6578_v24  ;;  %v2429_v19 = vmul.f32 %v2380_v55, %v2380_v55  ;;  %v2523_v16 = vsub.f32 %v10067_v23, %v6578_v24  ;;  %v10069_v2 = vld [vmem:[#allocation67_spill] sm:$0xff]  ;;  %v10071_v23 = vld [vmem:[#allocation173_spill] sm:$0xff] }
 0x326   :  { %v2616_v1 = vadd.f32 %v2615_v0, %v2568_v51  ;;  %v2173_v27 = vadd.f32 %v2172_v18, %v2125_v63  ;;  %v2325_v29 = vadd.f32 %v2324_v62, %v2277_v12  ;;  %v2570_v57 = vmul.f32 %v2521_v30, %v2521_v30  ;;  %v10070_v0 = vld [vmem:[#allocation153_spill] sm:$0xff] }
 0x327   :  { %v2078_v60 = vsub.f32 %v10068_v36, %v6578_v24  ;;  %v2126_v49 = vmul.f32 %v2077_v42, %v2077_v42  ;;  %v2230_v47 = vsub.f32 %v10069_v2, %v6578_v24  ;;  %v2278_v6 = vmul.f32 %v2229_v15, %v2229_v15  ;;  %v10073_v2 = vld [vmem:[#allocation68_spill] sm:$0xff] }
 0x328   :  { %v2617_v40 = vadd.f32 %v2616_v1, %v2569_v37  ;;  %v2477_v51 = vadd.f32 %v2476_v4, %v2429_v19  ;;  %v2524_v8 = vsub.f32 %v10070_v0, %v6578_v24  ;;  %v2571_v55 = vmul.f32 %v2522_v22, %v2522_v22  ;;  %v10072_v1 = vld [vmem:[#allocation155_spill] sm:$0xff]  ;;  %v10074_v19 = vld [vmem:[#allocation69_spill] sm:$0xff] }
 0x329   :  { %v2382_v18 = vsub.f32 %v10071_v23, %v6578_v24  ;;  %v2430_v62 = vmul.f32 %v2381_v38, %v2381_v38  ;;  %v2525_v30 = vsub.f32 %v10072_v1, %v6578_v24  ;;  %v2174_v63 = vadd.f32 %v2173_v27, %v2126_v49  ;;  %v10076_v1 = vld [vmem:[#allocation175_spill] sm:$0xff] }
 0x32a   :  { %v2618_v21 = vadd.f32 %v2617_v40, %v2570_v57  ;;  %v2326_v12 = vadd.f32 %v2325_v29, %v2278_v6  ;;  %v2572_v42 = vmul.f32 %v2523_v16, %v2523_v16  ;;  %v2079_v15 = vsub.f32 %v10073_v2, %v6578_v24  ;;  %v10075_v40 = vld [vmem:[#allocation156_spill] sm:$0xff] }
 0x32b   :  { %v2127_v4 = vmul.f32 %v2078_v60, %v2078_v60  ;;  %v2231_v0 = vsub.f32 %v10074_v19, %v6578_v24  ;;  %v2279_v22 = vmul.f32 %v2230_v47, %v2230_v47  ;;  %v2478_v57 = vadd.f32 %v2477_v51, %v2430_v62  ;;  %v10078_v51 = vld [vmem:[#allocation160_spill] sm:$0xff] }
 0x32c   :  { %v2619_v37 = vadd.f32 %v2618_v21, %v2571_v55  ;;  %v2526_v23 = vsub.f32 %v10075_v40, %v6578_v24  ;;  %v2573_v38 = vmul.f32 %v2524_v8, %v2524_v8  ;;  %v2383_v27 = vsub.f32 %v10076_v1, %v6578_v24  ;;  %v10077_v21 = vld [vmem:[#allocation158_spill] sm:$0xff] }
 0x32d   :  { %v2431_v29 = vmul.f32 %v2382_v18, %v2382_v18  ;;  %v2527_v16 = vsub.f32 %v10077_v21, %v6578_v24  ;;  %v2175_v49 = vadd.f32 %v2174_v63, %v2127_v4  ;;  %v2327_v6 = vadd.f32 %v2326_v12, %v2279_v22  ;;  %v10079_v18 = vld [vmem:[#allocation162_spill] sm:$0xff] }
 0x32e   :  { %v2620_v13 = vadd.f32 %v2619_v37, %v2572_v42  ;;  %v2574_v60 = vmul.f32 %v2525_v30, %v2525_v30  ;;  %v2128_v44 = vmul.f32 %v2079_v15, %v2079_v15  ;;  %v2280_v19 = vmul.f32 %v2231_v0, %v2231_v0  ;;  %v10080_v0 = vld [vmem:[#allocation164_spill] sm:$0xff] }
 0x32f   :  { %v2479_v47 = vadd.f32 %v2478_v57, %v2431_v29  ;;  %v2528_v62 = vsub.f32 %v10078_v51, %v6578_v24  ;;  %v2575_v40 = vmul.f32 %v2526_v23, %v2526_v23  ;;  %v2384_v42 = vsub.f32 %v6571_v26, %v6578_v24  ;;  %v10081_v23 = vld [vmem:[#allocation166_spill] sm:$0xff] }
 0x330   :  { %v2621_v55 = vadd.f32 %v2620_v13, %v2573_v38  ;;  %v2432_v37 = vmul.f32 %v2383_v27, %v2383_v27  ;;  %v2529_v1 = vsub.f32 %v10079_v18, %v6578_v24  ;;  %v2176_v21 = vadd.f32 %v2175_v49, %v2128_v44  ;;  %v10082_v44 = vld [vmem:[#allocation168_spill] sm:$0xff]  ;;  %v10083_v49 = vld [vmem:[#allocation170_spill] sm:$0xff] }
 0x331   :  { %v2328_v63 = vadd.f32 %v2327_v6, %v2280_v19  ;;  %v2576_v12 = vmul.f32 %v2527_v16, %v2527_v16  ;;  %v2530_v15 = vsub.f32 %v10080_v0, %v6578_v24  ;;  %v2577_v4 = vmul.f32 %v2528_v62, %v2528_v62 }
 0x332   :  { %v2622_v8 = vadd.f32 %v2621_v55, %v2574_v60  ;;  %v2480_v13 = vadd.f32 %v2479_v47, %v2432_v37  ;;  %v2433_v57 = vmul.f32 %v2384_v42, %v2384_v42  ;;  %v2531_v38 = vsub.f32 %v10081_v23, %v6578_v24 }
 0x333   :  { %v2177_v29 = vrot.slane %v2176_v21, 4  ;;  %v2329_v60 = vrot.slane %v2328_v63, 4  ;;  %v2578_v27 = vmul.f32 %v2529_v1, %v2529_v1  ;;  %v2532_v19 = vsub.f32 %v10082_v44, %v6578_v24 }
 0x334   :  { %v2623_v30 = vadd.f32 %v2622_v8, %v2575_v40  ;;  %v2481_v51 = vadd.f32 %v2480_v13, %v2433_v57  ;;  %v2579_v16 = vmul.f32 %v2530_v15, %v2530_v15  ;;  %v2533_v6 = vsub.f32 %v10083_v49, %v6578_v24  ;;  %v10085_v13 = vld [vmem:[#allocation174_spill] sm:$0xff]  ;;  %v10086_v49 = vld [vmem:[#allocation176_spill] sm:$0xff] }
 0x335   :  { %v2178_v47 = vadd.f32 %v2177_v29, %v2176_v21  ;;  %v2330_v62 = vadd.f32 %v2329_v60, %v2328_v63  ;;  %v2580_v8 = vmul.f32 %v2531_v38, %v2531_v38  ;;  %v2581_v23 = vmul.f32 %v2532_v19, %v2532_v19  ;;  %v10087_v29 = vld [vmem:[#allocation178_spill] sm:$0xff] }
 0x336   :  { %v2624_v22 = vadd.f32 %v2623_v30, %v2576_v12  ;;  %v2482_v37 = vrot.slane %v2481_v51, 4  ;;  %v10084_v12 = vld [vmem:[#allocation172_spill] sm:$0xff]  ;;  %v2582_v15 = vmul.f32 %v2533_v6, %v2533_v6  ;;  %v2536_v21 = vsub.f32 %v10086_v49, %v6578_v24 }
 0x337   :  { %v2534_v30 = vsub.f32 %v10084_v12, %v6578_v24  ;;  %v2331_v57 = vrot.slane %v2330_v62, 2  ;;  %v2537_v60 = vsub.f32 %v10087_v29, %v6578_v24 }
 0x338   :  { %v2625_v55 = vadd.f32 %v2624_v22, %v2577_v4  ;;  %v2535_v4 = vsub.f32 %v10085_v13, %v6578_v24  ;;  %v2179_v22 = vrot.slane %v2178_v47, 2  ;;  %v2585_v12 = vmul.f32 %v2536_v21, %v2536_v21 }
 0x339   :  { %v2583_v63 = vmul.f32 %v2534_v30, %v2534_v30  ;;  %v2586_v6 = vmul.f32 %v2537_v60, %v2537_v60  ;;  %v2651_v60 = vlaneseq }
 0x33a   :  { %v2626_v40 = vadd.f32 %v2625_v55, %v2578_v27  ;;  %v2483_v55 = vadd.f32 %v2482_v37, %v2481_v51  ;;  %v2584_v19 = vmul.f32 %v2535_v4, %v2535_v4 }
 0x33c   :  { %v2627_v42 = vadd.f32 %v2626_v40, %v2579_v16  ;;  %v2180_v16 = vadd.f32 %v2179_v22, %v2178_v47  ;;  %v2332_v40 = vadd.f32 %v2331_v57, %v2330_v62 }
 0x33e   :  { %v2628_v1 = vadd.f32 %v2627_v42, %v2580_v8  ;;  %v2484_v42 = vrot.slane %v2483_v55, 2  ;;  %v2181_v44 = vrot.slane %v2180_v16, 1  ;;  %v2333_v0 = vrot.slane %v2332_v40, 1 }
 0x340   :  { %v2629_v27 = vadd.f32 %v2628_v1, %v2581_v23  ;;  %v2485_v51 = vadd.f32 %v2484_v42, %v2483_v55  ;;  %v2182_v1 = vadd.f32 %v2181_v44, %v2180_v16  ;;  %v2334_v49 = vadd.f32 %v2333_v0, %v2332_v40  ;;  %v2643_v0 = vld [vmem:[%s9128_s3] sm:$0x1] }
 0x342   :  { %v2630_v38 = vadd.f32 %v2629_v27, %v2582_v15  ;;  %v2486_v15 = vrot.slane %v2485_v51, 1  ;;  %v2335_v18 = vadd.f32 %v2334_v49, %v2182_v1  ;;  %v2647_v49 = vld [vmem:[%s9129_s4] sm:$0x1]  ;;  %v10090_v1 = vld [vmem:[#allocation16_spill] sm:$0xff] }
 0x344   :  { %v2631_v8 = vadd.f32 %v2630_v38, %v2583_v63  ;;  %v2487_v47 = vadd.f32 %v2486_v15, %v2485_v51  ;;  %v10088_v51 = vld [vmem:[#allocation12_spill] sm:$0xff] }
 0x345   :  { %v10092_v15 = vld [vmem:[#allocation20_spill] sm:$0xff] }
 0x346   :  { %v2632_v13 = vadd.f32 %v2631_v8, %v2584_v19  ;;  %v2488_v4 = vadd.f32 %v2487_v47, %v2335_v18  ;;  %v10094_v47 = vld [vmem:[#allocation24_spill] sm:$0xff] }
 0x348   :  { %v2633_v23 = vadd.f32 %v2632_v13, %v2585_v12  ;;  %v2652_v12 = vshrl.u32 %v2651_v60, 7 }
 0x34a   :  { %v2634_v37 = vadd.f32 %v2633_v23, %v2586_v6  ;;  %v2653_v44 = vsub.s32 0, %v2652_v12  ;;  %v10099_v12 = vld [vmem:[#allocation34_spill] sm:$0xff] }
 0x34c   :  { %v2635_v30 = vrot.slane %v2634_v37, 4 }
 0x34e   :  { %v2636_v27 = vadd.f32 %v2635_v30, %v2634_v37  ;;  %v10089_v37 = vld [vmem:[#allocation14_spill] sm:$0xff] }
 0x34f   :  { %v10091_v30 = vld [vmem:[#allocation18_spill] sm:$0xff] }
 0x350   :  { %v2637_v29 = vrot.slane %v2636_v27, 2 }
 0x352   :  { %v2638_v62 = vadd.f32 %v2637_v29, %v2636_v27  ;;  %v10093_v27 = vld [vmem:[#allocation22_spill] sm:$0xff] }
 0x354   :  { %v2639_v22 = vrot.slane %v2638_v62, 1 }
 0x356   :  { %v2640_v57 = vadd.f32 %v2639_v22, %v2638_v62  ;;  %v10095_v62 = vld [vmem:[#allocation26_spill] sm:$0xff]  ;;  %v10096_v22 = vld [vmem:[#allocation28_spill] sm:$0xff] }
 0x358   :  { %v2641_v21 = vadd.f32 %v2640_v57, %v2488_v4 }
 0x35a   :  { %v2642_v63 = vmul.f32 0.0006377551, %v2641_v21  ;;  %v10097_v21 = vld [vmem:[#allocation30_spill] sm:$0xff] }
 0x35c   :  { %v2644_v38 = vadd.f32 1e-05, %v2642_v63 }
 0x35e   :  { %4708 = vrsqrt.f32 %v2644_v38  ;;  %v10098_v38 = vld [vmem:[#allocation32_spill] sm:$0xff] }
 0x368   :  { %v4709_v13 = vpop.eup %4708 }
 0x369   :  { %v2646_v55 = vmul.f32 %v4709_v13, %v2643_v0  ;;  %v10100_v13 = vld [vmem:[#allocation36_spill] sm:$0xff] }
 0x36b   :  { %v2648_v18 = vmul.f32 %v2646_v55, %v6578_v24  ;;  %v6999_v29 = vrot.slane %v2646_v55, %v2653_v44 }
 0x36d   :  { %v2649_v16 = vsub.f32 %v2647_v49, %v2648_v18  ;;  %v2656_v40 = vmul.f32 %v6999_v29, %v9930_v10  ;;  %v2657_v19 = vmul.f32 %v6999_v29, %v9931_v39  ;;  %v2658_v8 = vmul.f32 %v6999_v29, %v5566_v58  ;;  %v10101_v49 = vld [vmem:[#allocation38_spill] sm:$0xff] }
 0x36e   :  { %v2659_v42 = vmul.f32 %v6999_v29, %v5584_v11  ;;  %v2660_v6 = vmul.f32 %v6999_v29, %v5600_v32  ;;  %v2661_v24 = vmul.f32 %v6999_v29, %v5634_v45  ;;  %v2662_v23 = vmul.f32 %v6999_v29, %v5653_v17 }
 0x36f   :  { %v2663_v10 = vmul.f32 %v6999_v29, %v5683_v43  ;;  %v2664_v39 = vmul.f32 %v6999_v29, %v5697_v52  ;;  %v2665_v58 = vmul.f32 %v6999_v29, %v5731_v25  ;;  %v2666_v11 = vmul.f32 %v6999_v29, %v5745_v20 }
 0x370   :  { %v2667_v32 = vmul.f32 %v6999_v29, %v5775_v34  ;;  %v2668_v45 = vmul.f32 %v6999_v29, %v5793_v56  ;;  %v2669_v17 = vmul.f32 %v6999_v29, %v5819_v28  ;;  %v2670_v43 = vmul.f32 %v6999_v29, %v5837_v5 }
 0x371   :  { %v2671_v52 = vmul.f32 %v6999_v29, %v5867_v7  ;;  %v2672_v25 = vmul.f32 %v6999_v29, %v5881_v31  ;;  %v2673_v20 = vmul.f32 %v6999_v29, %v5915_v53  ;;  %v2674_v34 = vmul.f32 %v6999_v29, %v5929_v33 }
 0x372   :  { %v2675_v56 = vmul.f32 %v6999_v29, %v5959_v35  ;;  %v2676_v28 = vmul.f32 %v6999_v29, %v10088_v51  ;;  %v2677_v5 = vmul.f32 %v6999_v29, %v10089_v37  ;;  %v2678_v7 = vmul.f32 %v6999_v29, %v10090_v1  ;;  %v10102_v51 = vld [vmem:[#allocation40_spill] sm:$0xff]  ;;  %v10103_v1 = vld [vmem:[#allocation42_spill] sm:$0xff] }
 0x373   :  { %v2679_v31 = vmul.f32 %v6999_v29, %v10091_v30  ;;  %v2680_v53 = vmul.f32 %v6999_v29, %v10092_v15  ;;  %v2681_v33 = vmul.f32 %v6999_v29, %v10093_v27  ;;  %v2682_v35 = vmul.f32 %v6999_v29, %v10094_v47  ;;  %v10104_v15 = vld [vmem:[#allocation44_spill] sm:$0xff]  ;;  %v10105_v47 = vld [vmem:[#allocation46_spill] sm:$0xff] }
 0x374   :  { %v2683_v4 = vmul.f32 %v6999_v29, %v10095_v62  ;;  %v2684_v57 = vmul.f32 %v6999_v29, %v10096_v22  ;;  %v2685_v63 = vmul.f32 %v6999_v29, %v10097_v21  ;;  %v2686_v60 = vmul.f32 %v6999_v29, %v10098_v38  ;;  %v10106_v22 = vld [vmem:[#allocation48_spill] sm:$0xff] }
 0x375   :  { %v2687_v0 = vmul.f32 %v6999_v29, %v10099_v12  ;;  %v2688_v55 = vmul.f32 %v6999_v29, %v10100_v13  ;;  %v2689_v18 = vmul.f32 %v6999_v29, %v10101_v49  ;;  %v2690_v37 = vmul.f32 %v6999_v29, %v10102_v51 }
 0x376   :  { %v2691_v30 = vmul.f32 %v6999_v29, %v10103_v1  ;;  %v2692_v27 = vmul.f32 %v6999_v29, %v10104_v15  ;;  %v2693_v62 = vmul.f32 %v6999_v29, %v10105_v47  ;;  %v2694_v21 = vmul.f32 %v6999_v29, %v10106_v22  ;;  %v10108_v22 = vld [vmem:[#allocation72_spill] sm:$0xff] }
 0x377   :  { %v2695_v38 = vmul.f32 %v6999_v29, %v6383_v54  ;;  %v2696_v12 = vmul.f32 %v6999_v29, %v10033_v46  ;;  %v2697_v13 = vmul.f32 %v6999_v29, %v10038_v9  ;;  %v2698_v49 = vmul.f32 %v6999_v29, %v10043_v61  ;;  %v10107_v61 = vld [vmem:[#allocation70_spill] sm:$0xff] }
 0x378   :  { %v2699_v51 = vmul.f32 %v6999_v29, %v10048_v50  ;;  %v2700_v1 = vmul.f32 %v6999_v29, %v10053_v14  ;;  %v2701_v15 = vmul.f32 %v6999_v29, %v10058_v3  ;;  %v2702_v54 = vmul.f32 %v6999_v29, %v10063_v41  ;;  %v10109_v3 = vld [vmem:[#allocation74_spill] sm:$0xff]  ;;  %v10111_v41 = vld [vmem:[#allocation75_spill] sm:$0xff] }
 0x379   :  { %v2703_v46 = vmul.f32 %v6999_v29, %v10068_v36  ;;  %v2704_v9 = vmul.f32 %v6999_v29, %v10073_v2  ;;  %v7099_v47 = vrot.slane %v2649_v16, %v2653_v44  ;;  %v7103_v50 = vmul.f32 %v6999_v29, %v10107_v61 }
 0x37a   :  { %v7107_v14 = vmul.f32 %v6999_v29, %v10108_v22  ;;  %v7111_v26 = vmul.f32 %v6999_v29, %v10109_v3  ;;  %v7115_v36 = vmul.f32 %v6999_v29, %v10111_v41  ;;  %v7119_v2 = vmul.f32 %v6999_v29, %v10113_v48 }
 0x37b   :  { %v7122_v44 = vadd.f32 %v7099_v47, %v2656_v40  ;;  %v7125_v16 = vadd.f32 %v7099_v47, %v2657_v19  ;;  %v7128_v61 = vadd.f32 %v7099_v47, %v2658_v8  ;;  %v7131_v22 = vadd.f32 %v7099_v47, %v2659_v42 }
 0x37c   :  { %10110 = vst [vmem:[#allocation73_spill] sm:$0xff] %v7111_v26  ;;  %10112 = vst [vmem:[#allocation71_spill] sm:$0xff] %v7115_v36  ;;  %v7134_v3 = vadd.f32 %v7099_v47, %v2660_v6  ;;  %v7137_v41 = vadd.f32 %v7099_v47, %v2661_v24  ;;  %v7140_v48 = vadd.f32 %v7099_v47, %v2662_v23 }
 0x37d   :  { %10114 = vst [vmem:[#allocation37_spill] sm:$0xff] %v7119_v2  ;;  %10115 = vst [vmem:[#allocation52_spill] sm:$0xff] %v7125_v16  ;;  %v7143_v40 = vadd.f32 %v7099_v47, %v2663_v10  ;;  %v7146_v19 = vadd.f32 %v7099_v47, %v2664_v39  ;;  %v7149_v8 = vadd.f32 %v7099_v47, %v2665_v58 }
 0x37e   :  { %10116 = vst [vmem:[#allocation54_spill] sm:$0xff] %v7128_v61  ;;  %10117 = vst [vmem:[#allocation56_spill] sm:$0xff] %v7131_v22  ;;  %v7152_v42 = vadd.f32 %v7099_v47, %v2666_v11  ;;  %v7155_v6 = vadd.f32 %v7099_v47, %v2667_v32  ;;  %v7158_v24 = vadd.f32 %v7099_v47, %v2668_v45 }
 0x37f   :  { %10118 = vst [vmem:[#allocation58_spill] sm:$0xff] %v7134_v3  ;;  %10119 = vst [vmem:[#allocation60_spill] sm:$0xff] %v7137_v41  ;;  %v7161_v23 = vadd.f32 %v7099_v47, %v2669_v17  ;;  %v7164_v10 = vadd.f32 %v7099_v47, %v2670_v43  ;;  %v7167_v39 = vadd.f32 %v7099_v47, %v2671_v52 }
 0x380   :  { %10120 = vst [vmem:[#allocation62_spill] sm:$0xff] %v7140_v48  ;;  %10121 = vst [vmem:[#allocation64_spill] sm:$0xff] %v7143_v40  ;;  %v7170_v58 = vadd.f32 %v7099_v47, %v2672_v25  ;;  %v7173_v11 = vadd.f32 %v7099_v47, %v2673_v20  ;;  %v7176_v32 = vadd.f32 %v7099_v47, %v2674_v34 }
 0x381   :  { %10122 = vst [vmem:[#allocation66_spill] sm:$0xff] %v7146_v19  ;;  %10123 = vst [vmem:[#allocation68_spill] sm:$0xff] %v7149_v8  ;;  %v7179_v45 = vadd.f32 %v7099_v47, %v2675_v56  ;;  %v7182_v17 = vadd.f32 %v7099_v47, %v2676_v28  ;;  %v7185_v43 = vadd.f32 %v7099_v47, %v2677_v5  ;;  %v10205_v8 = vld [vmem:[#allocation69_spill] sm:$0xff] }
 0x382   :  { %10124 = vst [vmem:[#allocation12_spill] sm:$0xff] %v7152_v42  ;;  %10125 = vst [vmem:[#allocation14_spill] sm:$0xff] %v7155_v6  ;;  %v7188_v52 = vadd.f32 %v7099_v47, %v2678_v7  ;;  %v7191_v25 = vadd.f32 %v7099_v47, %v2679_v31  ;;  %v7194_v20 = vadd.f32 %v7099_v47, %v2680_v53  ;;  %v10203_v6 = vld [vmem:[#allocation65_spill] sm:$0xff]  ;;  %v10204_v42 = vld [vmem:[#allocation67_spill] sm:$0xff] }
 0x383   :  { %10126 = vst [vmem:[#allocation16_spill] sm:$0xff] %v7158_v24  ;;  %10127 = vst [vmem:[#allocation18_spill] sm:$0xff] %v7161_v23  ;;  %v7197_v34 = vadd.f32 %v7099_v47, %v2681_v33  ;;  %v7200_v56 = vadd.f32 %v7099_v47, %v2682_v35  ;;  %v7203_v28 = vadd.f32 %v7099_v47, %v2683_v4  ;;  %v10201_v23 = vld [vmem:[#allocation61_spill] sm:$0xff]  ;;  %v10202_v24 = vld [vmem:[#allocation63_spill] sm:$0xff] }
 0x384   :  { %10128 = vst [vmem:[#allocation20_spill] sm:$0xff] %v7164_v10  ;;  %10129 = vst [vmem:[#allocation22_spill] sm:$0xff] %v7167_v39  ;;  %v7206_v5 = vadd.f32 %v7099_v47, %v2684_v57  ;;  %v7209_v7 = vadd.f32 %v7099_v47, %v2685_v63  ;;  %v7212_v31 = vadd.f32 %v7099_v47, %v2686_v60  ;;  %v10199_v39 = vld [vmem:[#allocation57_spill] sm:$0xff]  ;;  %v10200_v10 = vld [vmem:[#allocation59_spill] sm:$0xff] }
 0x385   :  { %10130 = vst [vmem:[#allocation24_spill] sm:$0xff] %v7170_v58  ;;  %10131 = vst [vmem:[#allocation26_spill] sm:$0xff] %v7173_v11  ;;  %v7215_v53 = vadd.f32 %v7099_v47, %v2687_v0  ;;  %v7218_v33 = vadd.f32 %v7099_v47, %v2688_v55  ;;  %v7221_v35 = vadd.f32 %v7099_v47, %v2689_v18  ;;  %v10197_v11 = vld [vmem:[#allocation53_spill] sm:$0xff]  ;;  %v10198_v58 = vld [vmem:[#allocation55_spill] sm:$0xff] }
 0x386   :  { %10132 = vst [vmem:[#allocation28_spill] sm:$0xff] %v7176_v32  ;;  %10133 = vst [vmem:[#allocation30_spill] sm:$0xff] %v7179_v45  ;;  %v7224_v4 = vadd.f32 %v7099_v47, %v2690_v37  ;;  %v7227_v57 = vadd.f32 %v7099_v47, %v2691_v30  ;;  %v7230_v63 = vadd.f32 %v7099_v47, %v2692_v27  ;;  %v10195_v45 = vld [vmem:[#allocation49_spill] sm:$0xff]  ;;  %v10196_v32 = vld [vmem:[#allocation50_spill] sm:$0xff] }
 0x387   :  { %10134 = vst [vmem:[#allocation32_spill] sm:$0xff] %v7182_v17  ;;  %10135 = vst [vmem:[#allocation34_spill] sm:$0xff] %v7185_v43  ;;  %v7233_v60 = vadd.f32 %v7099_v47, %v2693_v62  ;;  %v7236_v0 = vadd.f32 %v7099_v47, %v2694_v21  ;;  %v7239_v55 = vadd.f32 %v7099_v47, %v2695_v38  ;;  %v10193_v43 = vld [vmem:[#allocation45_spill] sm:$0xff]  ;;  %v10194_v17 = vld [vmem:[#allocation47_spill] sm:$0xff] }
 0x388   :  { %10136 = vst [vmem:[#allocation36_spill] sm:$0xff] %v7188_v52  ;;  %10137 = vst [vmem:[#allocation38_spill] sm:$0xff] %v7191_v25  ;;  %v7242_v18 = vadd.f32 %v7099_v47, %v2696_v12  ;;  %v7245_v37 = vadd.f32 %v7099_v47, %v2697_v13  ;;  %v7248_v30 = vadd.f32 %v7099_v47, %v2698_v49  ;;  %v10164_v49 = vld [vmem:[#allocation85_spill] sm:$0xff]  ;;  %v10192_v52 = vld [vmem:[#allocation43_spill] sm:$0xff] }
 0x389   :  { %10138 = vst [vmem:[#allocation40_spill] sm:$0xff] %v7194_v20  ;;  %10139 = vst [vmem:[#allocation42_spill] sm:$0xff] %v7197_v34  ;;  %v7251_v27 = vadd.f32 %v7099_v47, %v2699_v51  ;;  %v7254_v62 = vadd.f32 %v7099_v47, %v2700_v1  ;;  %v7257_v21 = vadd.f32 %v7099_v47, %v2701_v15  ;;  %v10166_v1 = vld [vmem:[#allocation91_spill] sm:$0xff]  ;;  %v10191_v25 = vld [vmem:[#allocation41_spill] sm:$0xff] }
 0x38a   :  { %10140 = vst [vmem:[#allocation44_spill] sm:$0xff] %v7200_v56  ;;  %10141 = vst [vmem:[#allocation46_spill] sm:$0xff] %v7203_v28  ;;  %v7260_v38 = vadd.f32 %v7099_v47, %v2702_v54  ;;  %v7263_v12 = vadd.f32 %v7099_v47, %v2703_v46  ;;  %v7266_v13 = vadd.f32 %v7099_v47, %v2704_v9  ;;  %v10168_v54 = vld [vmem:[#allocation97_spill] sm:$0xff]  ;;  %v10187_v28 = vld [vmem:[#allocation31_spill] sm:$0xff] }
 0x38b   :  { %10142 = vst [vmem:[#allocation48_spill] sm:$0xff] %v7206_v5  ;;  %10143 = vst [vmem:[#allocation70_spill] sm:$0xff] %v7209_v7  ;;  %v2815_v51 = vmul.f32 %v6999_v29, %v10164_v49  ;;  %v2817_v15 = vmul.f32 %v6999_v29, %v10166_v1  ;;  %v2819_v46 = vmul.f32 %v6999_v29, %v10168_v54  ;;  %v10185_v7 = vld [vmem:[#allocation27_spill] sm:$0xff]  ;;  %v10186_v5 = vld [vmem:[#allocation29_spill] sm:$0xff] }
 0x38c   :  { %10144 = vst [vmem:[#allocation72_spill] sm:$0xff] %v7212_v31  ;;  %10145 = vst [vmem:[#allocation74_spill] sm:$0xff] %v7215_v53  ;;  %v10183_v53 = vld [vmem:[#allocation23_spill] sm:$0xff]  ;;  %v10184_v31 = vld [vmem:[#allocation25_spill] sm:$0xff] }
 0x38d   :  { %10146 = vst [vmem:[#allocation75_spill] sm:$0xff] %v7218_v33  ;;  %10147 = vst [vmem:[#allocation77_spill] sm:$0xff] %v7221_v35  ;;  %v10181_v35 = vld [vmem:[#allocation19_spill] sm:$0xff]  ;;  %v10182_v33 = vld [vmem:[#allocation21_spill] sm:$0xff] }
 0x38e   :  { %10148 = vst [vmem:[#allocation179_spill] sm:$0xff] %v7224_v4  ;;  %10149 = vst [vmem:[#allocation180_spill] sm:$0xff] %v7227_v57  ;;  %v10179_v57 = vld [vmem:[#allocation15_spill] sm:$0xff]  ;;  %v10180_v4 = vld [vmem:[#allocation17_spill] sm:$0xff] }
 0x38f   :  { %10150 = vst [vmem:[#allocation181_spill] sm:$0xff] %v7230_v63  ;;  %10151 = vst [vmem:[#allocation182_spill] sm:$0xff] %v7233_v60  ;;  %v10177_v60 = vld [vmem:[#allocation10_spill] sm:$0xff]  ;;  %v10178_v63 = vld [vmem:[#allocation13_spill] sm:$0xff] }
 0x390   :  { %10152 = vst [vmem:[#allocation183_spill] sm:$0xff] %v7236_v0  ;;  %10153 = vst [vmem:[#allocation184_spill] sm:$0xff] %v7239_v55  ;;  %v10163_v0 = vld [vmem:[#allocation83_spill] sm:$0xff]  ;;  %v10176_v55 = vld [vmem:[#allocation8_spill] sm:$0xff] }
 0x391   :  { %10154 = vst [vmem:[#allocation185_spill] sm:$0xff] %v7242_v18  ;;  %10155 = vst [vmem:[#allocation186_spill] sm:$0xff] %v7245_v37  ;;  %v2814_v9 = vmul.f32 %v6999_v29, %v10163_v0  ;;  %v10165_v37 = vld [vmem:[#allocation89_spill] sm:$0xff]  ;;  %v10175_v18 = vld [vmem:[#allocation6_spill] sm:$0xff] }
 0x392   :  { %10156 = vst [vmem:[#allocation187_spill] sm:$0xff] %v7248_v30  ;;  %10157 = vst [vmem:[#allocation188_spill] sm:$0xff] %v7251_v27  ;;  %v2816_v2 = vmul.f32 %v6999_v29, %v10165_v37  ;;  %v10173_v27 = vld [vmem:[#allocation2_spill] sm:$0xff]  ;;  %v10174_v30 = vld [vmem:[#allocation4_spill] sm:$0xff]  ;;  %v2826_v54 = vmul.f32 %v6999_v29, %v10175_v18  ;;  %v2833_v18 = vmul.f32 %v6999_v29, %v10182_v33 }
 0x393   :  { %10158 = vst [vmem:[#allocation189_spill] sm:$0xff] %v7254_v62  ;;  %10159 = vst [vmem:[#allocation190_spill] sm:$0xff] %v7257_v21  ;;  %v10167_v62 = vld [vmem:[#allocation95_spill] sm:$0xff]  ;;  %v10172_v21 = vld [vmem:[#allocation109_spill] sm:$0xff]  ;;  %v2824_v1 = vmul.f32 %v6999_v29, %v10173_v27  ;;  %v2831_v27 = vmul.f32 %v6999_v29, %v10180_v4  ;;  %v2838_v4 = vmul.f32 %v6999_v29, %v10187_v28 }
 0x394   :  { %10160 = vst [vmem:[#allocation191_spill] sm:$0xff] %v7260_v38  ;;  %10161 = vst [vmem:[#allocation192_spill] sm:$0xff] %v7263_v12  ;;  %v2818_v36 = vmul.f32 %v6999_v29, %v10167_v62  ;;  %v10169_v12 = vld [vmem:[#allocation101_spill] sm:$0xff]  ;;  %v10171_v38 = vld [vmem:[#allocation107_spill] sm:$0xff]  ;;  %v2823_v37 = vmul.f32 %v6999_v29, %v10172_v21  ;;  %v2825_v62 = vmul.f32 %v6999_v29, %v10174_v30 }
 0x395   :  { %10162 = vst [vmem:[#allocation193_spill] sm:$0xff] %v7266_v13  ;;  %v2820_v26 = vmul.f32 %v6999_v29, %v10169_v12  ;;  %v10170_v13 = vld [vmem:[#allocation103_spill] sm:$0xff]  ;;  %v2822_v49 = vmul.f32 %v6999_v29, %v10171_v38  ;;  %v2827_v12 = vmul.f32 %v6999_v29, %v10176_v55  ;;  %v2829_v38 = vmul.f32 %v6999_v29, %v10178_v63  ;;  %v10188_v56 = vld [vmem:[#allocation33_spill] sm:$0xff] }
 0x396   :  { %v2821_v0 = vmul.f32 %v6999_v29, %v10170_v13  ;;  %v2828_v13 = vmul.f32 %v6999_v29, %v10177_v60  ;;  %v2830_v21 = vmul.f32 %v6999_v29, %v10179_v57  ;;  %v2832_v30 = vmul.f32 %v6999_v29, %v10181_v35  ;;  %v10189_v34 = vld [vmem:[#allocation35_spill] sm:$0xff] }
 0x397   :  { %v2834_v55 = vmul.f32 %v6999_v29, %v10183_v53  ;;  %v2835_v60 = vmul.f32 %v6999_v29, %v10184_v31  ;;  %v2836_v63 = vmul.f32 %v6999_v29, %v10185_v7  ;;  %v2837_v57 = vmul.f32 %v6999_v29, %v10186_v5  ;;  %v10190_v20 = vld [vmem:[#allocation39_spill] sm:$0xff] }
 0x398   :  { %v2839_v35 = vmul.f32 %v6999_v29, %v10188_v56  ;;  %v2840_v33 = vmul.f32 %v6999_v29, %v10189_v34  ;;  %v2841_v53 = vmul.f32 %v6999_v29, %v9997_v59  ;;  %v2842_v31 = vmul.f32 %v6999_v29, %v10190_v20 }
 0x399   :  { %v2843_v7 = vmul.f32 %v6999_v29, %v10191_v25  ;;  %v2844_v5 = vmul.f32 %v6999_v29, %v10192_v52  ;;  %v2845_v28 = vmul.f32 %v6999_v29, %v10193_v43  ;;  %v2846_v56 = vmul.f32 %v6999_v29, %v10194_v17 }
 0x39a   :  { %v2847_v34 = vmul.f32 %v6999_v29, %v10195_v45  ;;  %v2848_v59 = vmul.f32 %v6999_v29, %v10196_v32  ;;  %v2849_v20 = vmul.f32 %v6999_v29, %v10197_v11  ;;  %v2850_v25 = vmul.f32 %v6999_v29, %v10198_v58 }
 0x39b   :  { %v2851_v52 = vmul.f32 %v6999_v29, %v10199_v39  ;;  %v2852_v43 = vmul.f32 %v6999_v29, %v10200_v10  ;;  %v2853_v17 = vmul.f32 %v6999_v29, %v10201_v23  ;;  %v2854_v45 = vmul.f32 %v6999_v29, %v10202_v24  ;;  %v10206_v23 = vld [vmem:[#allocation73_spill] sm:$0xff] }
 0x39c   :  { %v2855_v32 = vmul.f32 %v6999_v29, %v10203_v6  ;;  %v2856_v11 = vmul.f32 %v6999_v29, %v10204_v42  ;;  %v2857_v58 = vmul.f32 %v6999_v29, %v10205_v8  ;;  %v7407_v39 = vadd.f32 %v7103_v50, %v7099_v47  ;;  %v10208_v6 = vld [vmem:[#allocation71_spill] sm:$0xff]  ;;  %v10210_v42 = vld [vmem:[#allocation37_spill] sm:$0xff] }
 0x39d   :  { %v7411_v10 = vadd.f32 %v7107_v14, %v7099_v47  ;;  %v7415_v24 = vadd.f32 %v10206_v23, %v7099_v47  ;;  %v7419_v19 = vadd.f32 %v10208_v6, %v7099_v47  ;;  %v7423_v40 = vadd.f32 %v10210_v42, %v7099_v47 }
 0x39e   :  { %v7426_v8 = vadd.f32 %v2814_v9, %v7099_v47  ;;  %v7429_v50 = vadd.f32 %v2815_v51, %v7099_v47  ;;  %v7432_v14 = vadd.f32 %v2816_v2, %v7099_v47  ;;  %v7435_v23 = vadd.f32 %v2817_v15, %v7099_v47 }
 0x39f   :  { %10207 = vst [vmem:[#allocation83_spill] sm:$0xff] %v7415_v24  ;;  %10209 = vst [vmem:[#allocation85_spill] sm:$0xff] %v7419_v19  ;;  %v7438_v48 = vadd.f32 %v2818_v36, %v7099_v47  ;;  %v7441_v6 = vadd.f32 %v2819_v46, %v7099_v47  ;;  %v7444_v42 = vadd.f32 %v2820_v26, %v7099_v47  ;;  %v10304_v19 = vld [vmem:[#allocation177_spill] sm:$0xff] }
 0x3a0   :  { %10211 = vst [vmem:[#allocation89_spill] sm:$0xff] %v7423_v40  ;;  %10212 = vst [vmem:[#allocation91_spill] sm:$0xff] %v7426_v8  ;;  %v7447_v9 = vadd.f32 %v2821_v0, %v7099_v47  ;;  %v7450_v51 = vadd.f32 %v2822_v49, %v7099_v47  ;;  %v7453_v2 = vadd.f32 %v2823_v37, %v7099_v47  ;;  %v10302_v8 = vld [vmem:[#allocation173_spill] sm:$0xff]  ;;  %v10303_v40 = vld [vmem:[#allocation175_spill] sm:$0xff] }
 0x3a1   :  { %10213 = vst [vmem:[#allocation95_spill] sm:$0xff] %v7429_v50  ;;  %10214 = vst [vmem:[#allocation97_spill] sm:$0xff] %v7432_v14  ;;  %v7456_v15 = vadd.f32 %v2824_v1, %v7099_v47  ;;  %v7459_v36 = vadd.f32 %v2825_v62, %v7099_v47  ;;  %v7462_v46 = vadd.f32 %v2826_v54, %v7099_v47  ;;  %v10300_v14 = vld [vmem:[#allocation169_spill] sm:$0xff]  ;;  %v10301_v50 = vld [vmem:[#allocation171_spill] sm:$0xff] }
 0x3a2   :  { %10215 = vst [vmem:[#allocation101_spill] sm:$0xff] %v7435_v23  ;;  %10216 = vst [vmem:[#allocation103_spill] sm:$0xff] %v7438_v48  ;;  %v7465_v26 = vadd.f32 %v2827_v12, %v7099_v47  ;;  %v7468_v0 = vadd.f32 %v2828_v13, %v7099_v47  ;;  %v7471_v49 = vadd.f32 %v2829_v38, %v7099_v47  ;;  %v10298_v48 = vld [vmem:[#allocation165_spill] sm:$0xff]  ;;  %v10299_v23 = vld [vmem:[#allocation167_spill] sm:$0xff] }
 0x3a3   :  { %10217 = vst [vmem:[#allocation107_spill] sm:$0xff] %v7441_v6  ;;  %10218 = vst [vmem:[#allocation109_spill] sm:$0xff] %v7444_v42  ;;  %v7474_v37 = vadd.f32 %v2830_v21, %v7099_v47  ;;  %v7477_v1 = vadd.f32 %v2831_v27, %v7099_v47  ;;  %v7480_v62 = vadd.f32 %v2832_v30, %v7099_v47  ;;  %v10296_v42 = vld [vmem:[#allocation161_spill] sm:$0xff]  ;;  %v10297_v6 = vld [vmem:[#allocation163_spill] sm:$0xff] }
 0x3a4   :  { %10219 = vst [vmem:[#allocation2_spill] sm:$0xff] %v7447_v9  ;;  %10220 = vst [vmem:[#allocation4_spill] sm:$0xff] %v7450_v51  ;;  %v7483_v54 = vadd.f32 %v2833_v18, %v7099_v47  ;;  %v7486_v12 = vadd.f32 %v2834_v55, %v7099_v47  ;;  %v7489_v13 = vadd.f32 %v2835_v60, %v7099_v47  ;;  %v10294_v51 = vld [vmem:[#allocation157_spill] sm:$0xff]  ;;  %v10295_v9 = vld [vmem:[#allocation159_spill] sm:$0xff] }
 0x3a5   :  { %10221 = vst [vmem:[#allocation6_spill] sm:$0xff] %v7453_v2  ;;  %10222 = vst [vmem:[#allocation8_spill] sm:$0xff] %v7456_v15  ;;  %v7492_v38 = vadd.f32 %v2836_v63, %v7099_v47  ;;  %v7495_v21 = vadd.f32 %v2837_v57, %v7099_v47  ;;  %v7498_v27 = vadd.f32 %v2838_v4, %v7099_v47  ;;  %v10292_v15 = vld [vmem:[#allocation154_spill] sm:$0xff]  ;;  %v10293_v2 = vld [vmem:[#allocation51_spill] sm:$0xff] }
 0x3a6   :  { %10223 = vst [vmem:[#allocation10_spill] sm:$0xff] %v7459_v36  ;;  %10224 = vst [vmem:[#allocation13_spill] sm:$0xff] %v7462_v46  ;;  %v7501_v30 = vadd.f32 %v2839_v35, %v7099_v47  ;;  %v7504_v18 = vadd.f32 %v2840_v33, %v7099_v47  ;;  %v7507_v55 = vadd.f32 %v2841_v53, %v7099_v47  ;;  %v10290_v46 = vld [vmem:[#allocation150_spill] sm:$0xff]  ;;  %v10291_v36 = vld [vmem:[#allocation152_spill] sm:$0xff] }
 0x3a7   :  { %10225 = vst [vmem:[#allocation15_spill] sm:$0xff] %v7465_v26  ;;  %10226 = vst [vmem:[#allocation17_spill] sm:$0xff] %v7468_v0  ;;  %v7510_v60 = vadd.f32 %v2842_v31, %v7099_v47  ;;  %v7513_v63 = vadd.f32 %v2843_v7, %v7099_v47  ;;  %v7516_v57 = vadd.f32 %v2844_v5, %v7099_v47  ;;  %v10288_v0 = vld [vmem:[#allocation146_spill] sm:$0xff]  ;;  %v10289_v26 = vld [vmem:[#allocation148_spill] sm:$0xff] }
 0x3a8   :  { %10227 = vst [vmem:[#allocation19_spill] sm:$0xff] %v7471_v49  ;;  %10228 = vst [vmem:[#allocation21_spill] sm:$0xff] %v7474_v37  ;;  %v7519_v4 = vadd.f32 %v2845_v28, %v7099_v47  ;;  %v7522_v35 = vadd.f32 %v2846_v56, %v7099_v47  ;;  %v7525_v33 = vadd.f32 %v2847_v34, %v7099_v47  ;;  %v10286_v37 = vld [vmem:[#allocation142_spill] sm:$0xff]  ;;  %v10287_v49 = vld [vmem:[#allocation144_spill] sm:$0xff] }
 0x3a9   :  { %10229 = vst [vmem:[#allocation23_spill] sm:$0xff] %v7477_v1  ;;  %10230 = vst [vmem:[#allocation25_spill] sm:$0xff] %v7480_v62  ;;  %v7528_v53 = vadd.f32 %v2848_v59, %v7099_v47  ;;  %v7531_v31 = vadd.f32 %v2849_v20, %v7099_v47  ;;  %v7534_v7 = vadd.f32 %v2850_v25, %v7099_v47  ;;  %v10284_v62 = vld [vmem:[#allocation138_spill] sm:$0xff]  ;;  %v10285_v1 = vld [vmem:[#allocation140_spill] sm:$0xff] }
 0x3aa   :  { %10231 = vst [vmem:[#allocation27_spill] sm:$0xff] %v7483_v54  ;;  %10232 = vst [vmem:[#allocation29_spill] sm:$0xff] %v7486_v12  ;;  %v7537_v5 = vadd.f32 %v2851_v52, %v7099_v47  ;;  %v7540_v28 = vadd.f32 %v2852_v43, %v7099_v47  ;;  %v7543_v56 = vadd.f32 %v2853_v17, %v7099_v47  ;;  %v10257_v52 = vld [vmem:[#allocation76_spill] sm:$0xff]  ;;  %v10282_v12 = vld [vmem:[#allocation134_spill] sm:$0xff] }
 0x3ab   :  { %10233 = vst [vmem:[#allocation31_spill] sm:$0xff] %v7489_v13  ;;  %10234 = vst [vmem:[#allocation33_spill] sm:$0xff] %v7492_v38  ;;  %v7546_v34 = vadd.f32 %v2854_v45, %v7099_v47  ;;  %v7549_v59 = vadd.f32 %v2855_v32, %v7099_v47  ;;  %v7552_v20 = vadd.f32 %v2856_v11, %v7099_v47  ;;  %v10259_v17 = vld [vmem:[#allocation84_spill] sm:$0xff]  ;;  %v10261_v32 = vld [vmem:[#allocation90_spill] sm:$0xff] }
 0x3ac   :  { %10235 = vst [vmem:[#allocation35_spill] sm:$0xff] %v7495_v21  ;;  %10236 = vst [vmem:[#allocation39_spill] sm:$0xff] %v7498_v27  ;;  %v7555_v25 = vadd.f32 %v2857_v58, %v7099_v47  ;;  %v2957_v43 = vmul.f32 %v6999_v29, %v10257_v52  ;;  %v2959_v45 = vmul.f32 %v6999_v29, %v10259_v17  ;;  %v10278_v27 = vld [vmem:[#allocation126_spill] sm:$0xff]  ;;  %v10279_v21 = vld [vmem:[#allocation128_spill] sm:$0xff] }
 0x3ad   :  { %10237 = vst [vmem:[#allocation41_spill] sm:$0xff] %v7501_v30  ;;  %10238 = vst [vmem:[#allocation43_spill] sm:$0xff] %v7504_v18  ;;  %v2961_v11 = vmul.f32 %v6999_v29, %v10261_v32  ;;  %v10276_v18 = vld [vmem:[#allocation122_spill] sm:$0xff]  ;;  %v10277_v30 = vld [vmem:[#allocation124_spill] sm:$0xff] }
 0x3ae   :  { %10239 = vst [vmem:[#allocation45_spill] sm:$0xff] %v7507_v55  ;;  %10240 = vst [vmem:[#allocation47_spill] sm:$0xff] %v7510_v60  ;;  %v10274_v60 = vld [vmem:[#allocation118_spill] sm:$0xff]  ;;  %v10275_v55 = vld [vmem:[#allocation120_spill] sm:$0xff] }
 0x3af   :  { %10241 = vst [vmem:[#allocation49_spill] sm:$0xff] %v7513_v63  ;;  %10242 = vst [vmem:[#allocation50_spill] sm:$0xff] %v7516_v57  ;;  %v10272_v57 = vld [vmem:[#allocation115_spill] sm:$0xff]  ;;  %v10280_v38 = vld [vmem:[#allocation130_spill] sm:$0xff] }
 0x3b0   :  { %10243 = vst [vmem:[#allocation53_spill] sm:$0xff] %v7519_v4  ;;  %10244 = vst [vmem:[#allocation55_spill] sm:$0xff] %v7522_v35  ;;  %v10270_v35 = vld [vmem:[#allocation113_spill] sm:$0xff]  ;;  %v10271_v4 = vld [vmem:[#allocation7_spill] sm:$0xff] }
 0x3b1   :  { %10245 = vst [vmem:[#allocation57_spill] sm:$0xff] %v7525_v33  ;;  %10246 = vst [vmem:[#allocation59_spill] sm:$0xff] %v7528_v53  ;;  %v10256_v33 = vld [vmem:[#allocation78_spill] sm:$0xff]  ;;  %v10269_v53 = vld [vmem:[#allocation3_spill] sm:$0xff] }
 0x3b2   :  { %10247 = vst [vmem:[#allocation61_spill] sm:$0xff] %v7531_v31  ;;  %10248 = vst [vmem:[#allocation63_spill] sm:$0xff] %v7534_v7  ;;  %v2956_v58 = vmul.f32 %v6999_v29, %v10256_v33  ;;  %v10258_v7 = vld [vmem:[#allocation81_spill] sm:$0xff]  ;;  %v10268_v31 = vld [vmem:[#allocation111_spill] sm:$0xff] }
 0x3b3   :  { %10249 = vst [vmem:[#allocation65_spill] sm:$0xff] %v7537_v5  ;;  %10250 = vst [vmem:[#allocation67_spill] sm:$0xff] %v7540_v28  ;;  %v2958_v41 = vmul.f32 %v6999_v29, %v10258_v7  ;;  %v10266_v28 = vld [vmem:[#allocation105_spill] sm:$0xff]  ;;  %v10267_v5 = vld [vmem:[#allocation108_spill] sm:$0xff]  ;;  %v2968_v32 = vmul.f32 %v6999_v29, %v10268_v31  ;;  %v2975_v31 = vmul.f32 %v6999_v29, %v10275_v55 }
 0x3b4   :  { %10251 = vst [vmem:[#allocation69_spill] sm:$0xff] %v7543_v56  ;;  %10252 = vst [vmem:[#allocation73_spill] sm:$0xff] %v7546_v34  ;;  %v10260_v56 = vld [vmem:[#allocation87_spill] sm:$0xff]  ;;  %v10265_v34 = vld [vmem:[#allocation102_spill] sm:$0xff]  ;;  %v2966_v17 = vmul.f32 %v6999_v29, %v10266_v28  ;;  %v2982_v55 = vmul.f32 %v6999_v29, %v10282_v12  ;;  %v2989_v12 = vmul.f32 %v6999_v29, %v10289_v26 }
 0x3b5   :  { %10253 = vst [vmem:[#allocation71_spill] sm:$0xff] %v7549_v59  ;;  %10254 = vst [vmem:[#allocation37_spill] sm:$0xff] %v7552_v20  ;;  %v2960_v3 = vmul.f32 %v6999_v29, %v10260_v56  ;;  %v10262_v20 = vld [vmem:[#allocation93_spill] sm:$0xff]  ;;  %v10264_v59 = vld [vmem:[#allocation99_spill] sm:$0xff]  ;;  %v2965_v7 = vmul.f32 %v6999_v29, %v10265_v34  ;;  %v2967_v56 = vmul.f32 %v6999_v29, %v10267_v5 }
 0x3b6   :  { %10255 = vst [vmem:[#allocation194_spill] sm:$0xff] %v7555_v25  ;;  %v2962_v22 = vmul.f32 %v6999_v29, %v10262_v20  ;;  %v10263_v25 = vld [vmem:[#allocation96_spill] sm:$0xff]  ;;  %v2964_v52 = vmul.f32 %v6999_v29, %v10264_v59  ;;  %v2969_v20 = vmul.f32 %v6999_v29, %v10269_v53  ;;  %v2971_v59 = vmul.f32 %v6999_v29, %v10271_v4  ;;  %v10273_v63 = vld [vmem:[#allocation11_spill] sm:$0xff] }
 0x3b7   :  { %v2963_v33 = vmul.f32 %v6999_v29, %v10263_v25  ;;  %v2970_v25 = vmul.f32 %v6999_v29, %v10270_v35  ;;  %v2972_v34 = vmul.f32 %v6999_v29, %v10272_v57  ;;  %v2973_v28 = vmul.f32 %v6999_v29, %v10273_v63  ;;  %v10281_v13 = vld [vmem:[#allocation132_spill] sm:$0xff] }
 0x3b8   :  { %v2974_v5 = vmul.f32 %v6999_v29, %v10274_v60  ;;  %v2976_v53 = vmul.f32 %v6999_v29, %v10276_v18  ;;  %v2977_v35 = vmul.f32 %v6999_v29, %v10277_v30  ;;  %v2978_v4 = vmul.f32 %v6999_v29, %v10278_v27  ;;  %v10283_v54 = vld [vmem:[#allocation136_spill] sm:$0xff] }
 0x3b9   :  { %v2979_v57 = vmul.f32 %v6999_v29, %v10279_v21  ;;  %v2980_v63 = vmul.f32 %v6999_v29, %v10280_v38  ;;  %v2981_v60 = vmul.f32 %v6999_v29, %v10281_v13  ;;  %v2983_v18 = vmul.f32 %v6999_v29, %v10283_v54 }
 0x3ba   :  { %v2984_v30 = vmul.f32 %v6999_v29, %v10284_v62  ;;  %v2985_v27 = vmul.f32 %v6999_v29, %v10285_v1  ;;  %v2986_v21 = vmul.f32 %v6999_v29, %v10286_v37  ;;  %v2987_v38 = vmul.f32 %v6999_v29, %v10287_v49 }
 0x3bb   :  { %v2988_v13 = vmul.f32 %v6999_v29, %v10288_v0  ;;  %v2990_v54 = vmul.f32 %v6999_v29, %v10290_v46  ;;  %v2991_v62 = vmul.f32 %v6999_v29, %v10291_v36  ;;  %v2992_v1 = vmul.f32 %v6999_v29, %v10292_v15 }
 0x3bc   :  { %v2993_v37 = vmul.f32 %v6999_v29, %v10293_v2  ;;  %v2994_v49 = vmul.f32 %v6999_v29, %v10294_v51  ;;  %v2995_v0 = vmul.f32 %v6999_v29, %v10295_v9  ;;  %v2996_v26 = vmul.f32 %v6999_v29, %v10296_v42 }
 0x3bd   :  { %v2997_v46 = vmul.f32 %v6999_v29, %v10297_v6  ;;  %v2998_v36 = vmul.f32 %v6999_v29, %v10298_v48  ;;  %v2999_v15 = vmul.f32 %v6999_v29, %v10299_v23  ;;  %v3000_v2 = vmul.f32 %v6999_v29, %v10300_v14 }
 0x3be   :  { %v3001_v51 = vmul.f32 %v6999_v29, %v10301_v50  ;;  %v3002_v9 = vmul.f32 %v6999_v29, %v10302_v8  ;;  %v3003_v42 = vmul.f32 %v6999_v29, %v10303_v40  ;;  %v3004_v6 = vmul.f32 %v6999_v29, %v10304_v19 }
 0x3bf   :  { %v7705_v48 = vadd.f32 %v2956_v58, %v7099_v47  ;;  %v7708_v23 = vadd.f32 %v2957_v43, %v7099_v47  ;;  %v7711_v14 = vadd.f32 %v2958_v41, %v7099_v47  ;;  %v7714_v50 = vadd.f32 %v2959_v45, %v7099_v47 }
 0x3c0   :  { %v7717_v8 = vadd.f32 %v2960_v3, %v7099_v47  ;;  %v7720_v40 = vadd.f32 %v2961_v11, %v7099_v47  ;;  %v7723_v19 = vadd.f32 %v2962_v22, %v7099_v47  ;;  %v7726_v58 = vadd.f32 %v2963_v33, %v7099_v47 }
 0x3c1   :  { %10305 = vst [vmem:[#allocation78_spill] sm:$0xff] %v7708_v23  ;;  %10306 = vst [vmem:[#allocation76_spill] sm:$0xff] %v7711_v14  ;;  %v7729_v43 = vadd.f32 %v2964_v52, %v7099_v47  ;;  %v7732_v41 = vadd.f32 %v2965_v7, %v7099_v47  ;;  %v7735_v45 = vadd.f32 %v2966_v17, %v7099_v47 }
 0x3c2   :  { %10307 = vst [vmem:[#allocation81_spill] sm:$0xff] %v7714_v50  ;;  %10308 = vst [vmem:[#allocation84_spill] sm:$0xff] %v7717_v8  ;;  %v7738_v3 = vadd.f32 %v2967_v56, %v7099_v47  ;;  %v7741_v11 = vadd.f32 %v2968_v32, %v7099_v47  ;;  %v7744_v22 = vadd.f32 %v2969_v20, %v7099_v47  ;;  %v10400_v8 = vld [vmem:[#allocation176_spill] sm:$0xff]  ;;  %v10401_v50 = vld [vmem:[#allocation178_spill] sm:$0xff] }
 0x3c3   :  { %10309 = vst [vmem:[#allocation87_spill] sm:$0xff] %v7720_v40  ;;  %10310 = vst [vmem:[#allocation90_spill] sm:$0xff] %v7723_v19  ;;  %v7747_v33 = vadd.f32 %v2970_v25, %v7099_v47  ;;  %v7750_v52 = vadd.f32 %v2971_v59, %v7099_v47  ;;  %v7753_v7 = vadd.f32 %v2972_v34, %v7099_v47  ;;  %v10398_v19 = vld [vmem:[#allocation172_spill] sm:$0xff]  ;;  %v10399_v40 = vld [vmem:[#allocation174_spill] sm:$0xff] }
 0x3c4   :  { %10311 = vst [vmem:[#allocation93_spill] sm:$0xff] %v7726_v58  ;;  %10312 = vst [vmem:[#allocation96_spill] sm:$0xff] %v7729_v43  ;;  %v7756_v17 = vadd.f32 %v2973_v28, %v7099_v47  ;;  %v7759_v56 = vadd.f32 %v2974_v5, %v7099_v47  ;;  %v7762_v32 = vadd.f32 %v2975_v31, %v7099_v47  ;;  %v10396_v43 = vld [vmem:[#allocation168_spill] sm:$0xff]  ;;  %v10397_v58 = vld [vmem:[#allocation170_spill] sm:$0xff] }
 0x3c5   :  { %10313 = vst [vmem:[#allocation99_spill] sm:$0xff] %v7732_v41  ;;  %10314 = vst [vmem:[#allocation102_spill] sm:$0xff] %v7735_v45  ;;  %v7765_v20 = vadd.f32 %v2976_v53, %v7099_v47  ;;  %v7768_v25 = vadd.f32 %v2977_v35, %v7099_v47  ;;  %v7771_v59 = vadd.f32 %v2978_v4, %v7099_v47  ;;  %v10394_v45 = vld [vmem:[#allocation164_spill] sm:$0xff]  ;;  %v10395_v41 = vld [vmem:[#allocation166_spill] sm:$0xff] }
 0x3c6   :  { %10315 = vst [vmem:[#allocation105_spill] sm:$0xff] %v7738_v3  ;;  %10316 = vst [vmem:[#allocation108_spill] sm:$0xff] %v7741_v11  ;;  %v7774_v34 = vadd.f32 %v2979_v57, %v7099_v47  ;;  %v7777_v28 = vadd.f32 %v2980_v63, %v7099_v47  ;;  %v7780_v5 = vadd.f32 %v2981_v60, %v7099_v47  ;;  %v10392_v11 = vld [vmem:[#allocation160_spill] sm:$0xff]  ;;  %v10393_v3 = vld [vmem:[#allocation162_spill] sm:$0xff] }
 0x3c7   :  { %10317 = vst [vmem:[#allocation111_spill] sm:$0xff] %v7744_v22  ;;  %10318 = vst [vmem:[#allocation3_spill] sm:$0xff] %v7747_v33  ;;  %v7783_v31 = vadd.f32 %v2982_v55, %v7099_v47  ;;  %v7786_v53 = vadd.f32 %v2983_v18, %v7099_v47  ;;  %v7789_v35 = vadd.f32 %v2984_v30, %v7099_v47  ;;  %v10390_v33 = vld [vmem:[#allocation156_spill] sm:$0xff]  ;;  %v10391_v22 = vld [vmem:[#allocation158_spill] sm:$0xff] }
 0x3c8   :  { %10319 = vst [vmem:[#allocation113_spill] sm:$0xff] %v7750_v52  ;;  %10320 = vst [vmem:[#allocation7_spill] sm:$0xff] %v7753_v7  ;;  %v7792_v4 = vadd.f32 %v2985_v27, %v7099_v47  ;;  %v7795_v57 = vadd.f32 %v2986_v21, %v7099_v47  ;;  %v7798_v63 = vadd.f32 %v2987_v38, %v7099_v47  ;;  %v10388_v7 = vld [vmem:[#allocation153_spill] sm:$0xff]  ;;  %v10389_v52 = vld [vmem:[#allocation155_spill] sm:$0xff] }
 0x3c9   :  { %10321 = vst [vmem:[#allocation115_spill] sm:$0xff] %v7756_v17  ;;  %10322 = vst [vmem:[#allocation11_spill] sm:$0xff] %v7759_v56  ;;  %v7801_v60 = vadd.f32 %v2988_v13, %v7099_v47  ;;  %v7804_v55 = vadd.f32 %v2989_v12, %v7099_v47  ;;  %v7807_v18 = vadd.f32 %v2990_v54, %v7099_v47  ;;  %v10386_v56 = vld [vmem:[#allocation149_spill] sm:$0xff]  ;;  %v10387_v17 = vld [vmem:[#allocation151_spill] sm:$0xff] }
 0x3ca   :  { %10323 = vst [vmem:[#allocation118_spill] sm:$0xff] %v7762_v32  ;;  %10324 = vst [vmem:[#allocation120_spill] sm:$0xff] %v7765_v20  ;;  %v7810_v30 = vadd.f32 %v2991_v62, %v7099_v47  ;;  %v7813_v27 = vadd.f32 %v2992_v1, %v7099_v47  ;;  %v7816_v21 = vadd.f32 %v2993_v37, %v7099_v47  ;;  %v10384_v20 = vld [vmem:[#allocation145_spill] sm:$0xff]  ;;  %v10385_v32 = vld [vmem:[#allocation147_spill] sm:$0xff] }
 0x3cb   :  { %10325 = vst [vmem:[#allocation122_spill] sm:$0xff] %v7768_v25  ;;  %10326 = vst [vmem:[#allocation124_spill] sm:$0xff] %v7771_v59  ;;  %v7819_v38 = vadd.f32 %v2994_v49, %v7099_v47  ;;  %v7822_v13 = vadd.f32 %v2995_v0, %v7099_v47  ;;  %v7825_v12 = vadd.f32 %v2996_v26, %v7099_v47  ;;  %v10382_v59 = vld [vmem:[#allocation141_spill] sm:$0xff]  ;;  %v10383_v25 = vld [vmem:[#allocation143_spill] sm:$0xff] }
 0x3cc   :  { %10327 = vst [vmem:[#allocation126_spill] sm:$0xff] %v7774_v34  ;;  %10328 = vst [vmem:[#allocation128_spill] sm:$0xff] %v7777_v28  ;;  %v7828_v54 = vadd.f32 %v2997_v46, %v7099_v47  ;;  %v7831_v62 = vadd.f32 %v2998_v36, %v7099_v47  ;;  %v7834_v1 = vadd.f32 %v2999_v15, %v7099_v47  ;;  %v10354_v36 = vld [vmem:[#allocation80_spill] sm:$0xff]  ;;  %v10380_v28 = vld [vmem:[#allocation137_spill] sm:$0xff] }
 0x3cd   :  { %10329 = vst [vmem:[#allocation130_spill] sm:$0xff] %v7780_v5  ;;  %10330 = vst [vmem:[#allocation132_spill] sm:$0xff] %v7783_v31  ;;  %v7837_v37 = vadd.f32 %v3000_v2, %v7099_v47  ;;  %v7840_v49 = vadd.f32 %v3001_v51, %v7099_v47  ;;  %v7843_v0 = vadd.f32 %v3002_v9, %v7099_v47  ;;  %v10356_v2 = vld [vmem:[#allocation86_spill] sm:$0xff]  ;;  %v10358_v9 = vld [vmem:[#allocation92_spill] sm:$0xff] }
 0x3ce   :  { %10331 = vst [vmem:[#allocation134_spill] sm:$0xff] %v7786_v53  ;;  %10332 = vst [vmem:[#allocation136_spill] sm:$0xff] %v7789_v35  ;;  %v7846_v26 = vadd.f32 %v3003_v42, %v7099_v47  ;;  %v7849_v46 = vadd.f32 %v3004_v6, %v7099_v47  ;;  %v3104_v15 = vmul.f32 %v6999_v29, %v10354_v36  ;;  %v10376_v35 = vld [vmem:[#allocation129_spill] sm:$0xff]  ;;  %v10377_v53 = vld [vmem:[#allocation131_spill] sm:$0xff] }
 0x3cf   :  { %10333 = vst [vmem:[#allocation138_spill] sm:$0xff] %v7792_v4  ;;  %10334 = vst [vmem:[#allocation140_spill] sm:$0xff] %v7795_v57  ;;  %v3106_v51 = vmul.f32 %v6999_v29, %v10356_v2  ;;  %v3108_v42 = vmul.f32 %v6999_v29, %v10358_v9  ;;  %v10374_v57 = vld [vmem:[#allocation125_spill] sm:$0xff]  ;;  %v10375_v4 = vld [vmem:[#allocation127_spill] sm:$0xff] }
 0x3d0   :  { %10335 = vst [vmem:[#allocation142_spill] sm:$0xff] %v7798_v63  ;;  %10336 = vst [vmem:[#allocation144_spill] sm:$0xff] %v7801_v60  ;;  %v10372_v60 = vld [vmem:[#allocation121_spill] sm:$0xff]  ;;  %v10373_v63 = vld [vmem:[#allocation123_spill] sm:$0xff] }
 0x3d1   :  { %10337 = vst [vmem:[#allocation146_spill] sm:$0xff] %v7804_v55  ;;  %10338 = vst [vmem:[#allocation148_spill] sm:$0xff] %v7807_v18  ;;  %v10370_v18 = vld [vmem:[#allocation117_spill] sm:$0xff]  ;;  %v10371_v55 = vld [vmem:[#allocation119_spill] sm:$0xff] }
 0x3d2   :  { %10339 = vst [vmem:[#allocation150_spill] sm:$0xff] %v7810_v30  ;;  %10340 = vst [vmem:[#allocation152_spill] sm:$0xff] %v7813_v27  ;;  %v10368_v27 = vld [vmem:[#allocation9_spill] sm:$0xff]  ;;  %v10369_v30 = vld [vmem:[#allocation116_spill] sm:$0xff] }
 0x3d3   :  { %10341 = vst [vmem:[#allocation154_spill] sm:$0xff] %v7816_v21  ;;  %10342 = vst [vmem:[#allocation51_spill] sm:$0xff] %v7819_v38  ;;  %v10353_v38 = vld [vmem:[#allocation79_spill] sm:$0xff]  ;;  %v10367_v21 = vld [vmem:[#allocation114_spill] sm:$0xff] }
 0x3d4   :  { %10343 = vst [vmem:[#allocation157_spill] sm:$0xff] %v7822_v13  ;;  %10344 = vst [vmem:[#allocation159_spill] sm:$0xff] %v7825_v12  ;;  %v3103_v6 = vmul.f32 %v6999_v29, %v10353_v38  ;;  %v10365_v12 = vld [vmem:[#allocation112_spill] sm:$0xff]  ;;  %v10366_v13 = vld [vmem:[#allocation5_spill] sm:$0xff] }
 0x3d5   :  { %10345 = vst [vmem:[#allocation161_spill] sm:$0xff] %v7828_v54  ;;  %10346 = vst [vmem:[#allocation163_spill] sm:$0xff] %v7831_v62  ;;  %v10355_v54 = vld [vmem:[#allocation82_spill] sm:$0xff]  ;;  %v3115_v9 = vmul.f32 %v6999_v29, %v10365_v12  ;;  %v3122_v12 = vmul.f32 %v6999_v29, %v10372_v60  ;;  %v10378_v31 = vld [vmem:[#allocation133_spill] sm:$0xff] }
 0x3d6   :  { %10347 = vst [vmem:[#allocation165_spill] sm:$0xff] %v7834_v1  ;;  %10348 = vst [vmem:[#allocation167_spill] sm:$0xff] %v7837_v37  ;;  %v3105_v61 = vmul.f32 %v6999_v29, %v10355_v54  ;;  %v10357_v37 = vld [vmem:[#allocation88_spill] sm:$0xff]  ;;  %v10363_v1 = vld [vmem:[#allocation106_spill] sm:$0xff] }
 0x3d7   :  { %10349 = vst [vmem:[#allocation169_spill] sm:$0xff] %v7840_v49  ;;  %10350 = vst [vmem:[#allocation171_spill] sm:$0xff] %v7843_v0  ;;  %v3107_v24 = vmul.f32 %v6999_v29, %v10357_v37  ;;  %v10361_v0 = vld [vmem:[#allocation100_spill] sm:$0xff]  ;;  %v3113_v2 = vmul.f32 %v6999_v29, %v10363_v1  ;;  %v10364_v62 = vld [vmem:[#allocation110_spill] sm:$0xff]  ;;  %v3120_v1 = vmul.f32 %v6999_v29, %v10370_v18 }
 0x3d8   :  { %10351 = vst [vmem:[#allocation173_spill] sm:$0xff] %v7846_v26  ;;  %10352 = vst [vmem:[#allocation175_spill] sm:$0xff] %v7849_v46  ;;  %v10359_v26 = vld [vmem:[#allocation94_spill] sm:$0xff]  ;;  %v3111_v36 = vmul.f32 %v6999_v29, %v10361_v0  ;;  %v10362_v49 = vld [vmem:[#allocation104_spill] sm:$0xff]  ;;  %v3114_v37 = vmul.f32 %v6999_v29, %v10364_v62  ;;  %v3118_v0 = vmul.f32 %v6999_v29, %v10368_v27 }
 0x3d9   :  { %v3109_v16 = vmul.f32 %v6999_v29, %v10359_v26  ;;  %v10360_v46 = vld [vmem:[#allocation98_spill] sm:$0xff]  ;;  %v3112_v54 = vmul.f32 %v6999_v29, %v10362_v49  ;;  %v3116_v26 = vmul.f32 %v6999_v29, %v10366_v13  ;;  %v3119_v49 = vmul.f32 %v6999_v29, %v10369_v30  ;;  %v10379_v5 = vld [vmem:[#allocation135_spill] sm:$0xff] }
 0x3da   :  { %v3110_v38 = vmul.f32 %v6999_v29, %v10360_v46  ;;  %v3117_v46 = vmul.f32 %v6999_v29, %v10367_v21  ;;  %v3121_v62 = vmul.f32 %v6999_v29, %v10371_v55  ;;  %v3123_v13 = vmul.f32 %v6999_v29, %v10373_v63  ;;  %v10381_v34 = vld [vmem:[#allocation139_spill] sm:$0xff] }
 0x3db   :  { %v3124_v21 = vmul.f32 %v6999_v29, %v10374_v57  ;;  %v3125_v27 = vmul.f32 %v6999_v29, %v10375_v4  ;;  %v3126_v30 = vmul.f32 %v6999_v29, %v10376_v35  ;;  %v3127_v18 = vmul.f32 %v6999_v29, %v10377_v53 }
 0x3dc   :  { %v3128_v55 = vmul.f32 %v6999_v29, %v10378_v31  ;;  %v3129_v60 = vmul.f32 %v6999_v29, %v10379_v5  ;;  %v3130_v63 = vmul.f32 %v6999_v29, %v10380_v28  ;;  %v3131_v57 = vmul.f32 %v6999_v29, %v10381_v34 }
 0x3dd   :  { %v3132_v4 = vmul.f32 %v6999_v29, %v10382_v59  ;;  %v3133_v35 = vmul.f32 %v6999_v29, %v10383_v25  ;;  %v3134_v53 = vmul.f32 %v6999_v29, %v10384_v20  ;;  %v3135_v31 = vmul.f32 %v6999_v29, %v10385_v32 }
 0x3de   :  { %v3136_v5 = vmul.f32 %v6999_v29, %v10386_v56  ;;  %v3137_v28 = vmul.f32 %v6999_v29, %v10387_v17  ;;  %v3138_v34 = vmul.f32 %v6999_v29, %v10388_v7  ;;  %v3139_v59 = vmul.f32 %v6999_v29, %v10389_v52 }
 0x3df   :  { %v3140_v25 = vmul.f32 %v6999_v29, %v10390_v33  ;;  %v3141_v20 = vmul.f32 %v6999_v29, %v10391_v22  ;;  %v3142_v32 = vmul.f32 %v6999_v29, %v10392_v11  ;;  %v3143_v56 = vmul.f32 %v6999_v29, %v10393_v3 }
 0x3e0   :  { %v3144_v17 = vmul.f32 %v6999_v29, %v10394_v45  ;;  %v3145_v7 = vmul.f32 %v6999_v29, %v10395_v41  ;;  %v3146_v52 = vmul.f32 %v6999_v29, %v10396_v43  ;;  %v3147_v33 = vmul.f32 %v6999_v29, %v10397_v58 }
 0x3e1   :  { %v3148_v22 = vmul.f32 %v6999_v29, %v10398_v19  ;;  %v3149_v11 = vmul.f32 %v6999_v29, %v10399_v40  ;;  %v3150_v3 = vmul.f32 %v6999_v29, %v10400_v8  ;;  %v3151_v45 = vmul.f32 %v6999_v29, %v10401_v50 }
 0x3e2   :  { %v7999_v41 = vadd.f32 %v3103_v6, %v7099_v47  ;;  %v8002_v43 = vadd.f32 %v3104_v15, %v7099_v47  ;;  %v8005_v58 = vadd.f32 %v3105_v61, %v7099_v47  ;;  %v8008_v19 = vadd.f32 %v3106_v51, %v7099_v47 }
 0x3e3   :  { %v8011_v40 = vadd.f32 %v3107_v24, %v7099_v47  ;;  %v8014_v8 = vadd.f32 %v3108_v42, %v7099_v47  ;;  %v8017_v29 = vadd.f32 %v3109_v16, %v7099_v47  ;;  %v8020_v50 = vadd.f32 %v3110_v38, %v7099_v47 }
 0x3e4   :  { %v8023_v15 = vadd.f32 %v3111_v36, %v7099_v47  ;;  %v8026_v61 = vadd.f32 %v3112_v54, %v7099_v47  ;;  %v8029_v51 = vadd.f32 %v3113_v2, %v7099_v47  ;;  %v8032_v24 = vadd.f32 %v3114_v37, %v7099_v47 }
 0x3e5   :  { %v8035_v42 = vadd.f32 %v3115_v9, %v7099_v47  ;;  %v8038_v16 = vadd.f32 %v3116_v26, %v7099_v47  ;;  %v8041_v6 = vadd.f32 %v3117_v46, %v7099_v47  ;;  %v8044_v38 = vadd.f32 %v3118_v0, %v7099_v47 }
 0x3e6   :  { %v8047_v36 = vadd.f32 %v3119_v49, %v7099_v47  ;;  %v8050_v54 = vadd.f32 %v3120_v1, %v7099_v47  ;;  %v8053_v2 = vadd.f32 %v3121_v62, %v7099_v47  ;;  %v8056_v37 = vadd.f32 %v3122_v12, %v7099_v47 }
 0x3e7   :  { %v8059_v9 = vadd.f32 %v3123_v13, %v7099_v47  ;;  %v8062_v26 = vadd.f32 %v3124_v21, %v7099_v47  ;;  %v8065_v46 = vadd.f32 %v3125_v27, %v7099_v47  ;;  %v8068_v0 = vadd.f32 %v3126_v30, %v7099_v47 }
 0x3e8   :  { %v8071_v49 = vadd.f32 %v3127_v18, %v7099_v47  ;;  %v8074_v1 = vadd.f32 %v3128_v55, %v7099_v47  ;;  %v8077_v62 = vadd.f32 %v3129_v60, %v7099_v47  ;;  %v8080_v12 = vadd.f32 %v3130_v63, %v7099_v47 }
 0x3e9   :  { %v8083_v13 = vadd.f32 %v3131_v57, %v7099_v47  ;;  %v8086_v21 = vadd.f32 %v3132_v4, %v7099_v47  ;;  %v8089_v27 = vadd.f32 %v3133_v35, %v7099_v47  ;;  %v8092_v30 = vadd.f32 %v3134_v53, %v7099_v47 }
 0x3ea   :  { %v8095_v18 = vadd.f32 %v3135_v31, %v7099_v47  ;;  %v8098_v55 = vadd.f32 %v3136_v5, %v7099_v47  ;;  %v8101_v60 = vadd.f32 %v3137_v28, %v7099_v47  ;;  %v8104_v63 = vadd.f32 %v3138_v34, %v7099_v47 }
 0x3eb   :  { %v8107_v57 = vadd.f32 %v3139_v59, %v7099_v47  ;;  %v8110_v4 = vadd.f32 %v3140_v25, %v7099_v47  ;;  %v8113_v35 = vadd.f32 %v3141_v20, %v7099_v47  ;;  %v8116_v53 = vadd.f32 %v3142_v32, %v7099_v47 }
 0x3ec   :  { %v8119_v31 = vadd.f32 %v3143_v56, %v7099_v47  ;;  %v8122_v5 = vadd.f32 %v3144_v17, %v7099_v47  ;;  %v8125_v28 = vadd.f32 %v3145_v7, %v7099_v47  ;;  %v8128_v34 = vadd.f32 %v3146_v52, %v7099_v47  ;;  %v10411_v7 = vld [vmem:[#allocation52_spill] sm:$0xff] }
 0x3ed   :  { %v8131_v59 = vadd.f32 %v3147_v33, %v7099_v47  ;;  %v8134_v25 = vadd.f32 %v3148_v22, %v7099_v47  ;;  %v8137_v20 = vadd.f32 %v3149_v11, %v7099_v47  ;;  %v8140_v32 = vadd.f32 %v3150_v3, %v7099_v47  ;;  %v10414_v22 = vld [vmem:[#allocation83_spill] sm:$0xff]  ;;  %v10419_v3 = vld [vmem:[#allocation85_spill] sm:$0xff] }
 0x3ee   :  { %10402 = vst [vmem:[#allocation177_spill] sm:$0xff] %v8128_v34  ;;  %v8143_v56 = vadd.f32 %v3151_v45, %v7099_v47  ;;  %v10407_v47 = vmax.f32 %v7407_v39, 0.0  ;;  %v10408_v45 = vmax.f32 %v7122_v44, 0.0  ;;  %v10410_v52 = vmax.f32 %v7411_v10, 0.0  ;;  %v10424_v44 = vld [vmem:[#allocation89_spill] sm:$0xff] }
 0x3ef   :  { %10403 = vst [vmem:[#allocation79_spill] sm:$0xff] %v8134_v25  ;;  %10404 = vst [vmem:[#allocation80_spill] sm:$0xff] %v8137_v20  ;;  %v10412_v33 = vmax.f32 %v10411_v7, 0.0  ;;  %v10415_v14 = vmax.f32 %v10414_v22, 0.0  ;;  %v10416_v25 = vld [vmem:[#allocation54_spill] sm:$0xff]  ;;  %v10420_v23 = vmax.f32 %v10419_v3, 0.0 }
 0x3f0   :  { %10405 = vst [vmem:[#allocation82_spill] sm:$0xff] %v8140_v32  ;;  %10406 = vst [vmem:[#allocation86_spill] sm:$0xff] %v8143_v56  ;;  %v8198_v17 = vmax.f32 %v10408_v45, %v10407_v47  ;;  %v10417_v11 = vmax.f32 %v10416_v25, 0.0  ;;  %v10421_v56 = vld [vmem:[#allocation56_spill] sm:$0xff]  ;;  %v10425_v47 = vmax.f32 %v10424_v44, 0.0  ;;  %v10426_v45 = vld [vmem:[#allocation58_spill] sm:$0xff] }
 0x3f1   :  { %v8204_v34 = vmax.f32 %v10412_v33, %v10410_v52  ;;  %v10422_v39 = vmax.f32 %v10421_v56, 0.0  ;;  %v10427_v10 = vmax.f32 %v10426_v45, 0.0  ;;  %v10429_v7 = vld [vmem:[#allocation91_spill] sm:$0xff]  ;;  %v10431_v33 = vld [vmem:[#allocation60_spill] sm:$0xff] }
 0x3f2   :  { %10409 = vst [vmem:[#allocation88_spill] sm:$0xff] %v8198_v17  ;;  %v8210_v20 = vmax.f32 %v10417_v11, %v10415_v14  ;;  %v10430_v52 = vmax.f32 %v10429_v7, 0.0  ;;  %v10432_v22 = vmax.f32 %v10431_v33, 0.0  ;;  %v10434_v14 = vld [vmem:[#allocation95_spill] sm:$0xff]  ;;  %v10436_v11 = vld [vmem:[#allocation62_spill] sm:$0xff] }
 0x3f3   :  { %10413 = vst [vmem:[#allocation92_spill] sm:$0xff] %v8204_v34  ;;  %v8216_v32 = vmax.f32 %v10422_v39, %v10420_v23  ;;  %v8222_v17 = vmax.f32 %v10427_v10, %v10425_v47  ;;  %v10435_v25 = vmax.f32 %v10434_v14, 0.0  ;;  %v10437_v3 = vmax.f32 %v10436_v11, 0.0  ;;  %v10439_v23 = vld [vmem:[#allocation97_spill] sm:$0xff]  ;;  %v10441_v39 = vld [vmem:[#allocation64_spill] sm:$0xff]  ;;  %v10446_v10 = vld [vmem:[#allocation66_spill] sm:$0xff] }
 0x3f4   :  { %10418 = vst [vmem:[#allocation94_spill] sm:$0xff] %v8210_v20  ;;  %v8228_v34 = vmax.f32 %v10432_v22, %v10430_v52  ;;  %v10440_v56 = vmax.f32 %v10439_v23, 0.0  ;;  %v10442_v44 = vmax.f32 %v10441_v39, 0.0  ;;  %v10444_v47 = vld [vmem:[#allocation101_spill] sm:$0xff]  ;;  %v10447_v7 = vmax.f32 %v10446_v10, 0.0  ;;  %v10449_v52 = vld [vmem:[#allocation103_spill] sm:$0xff] }
 0x3f5   :  { %10423 = vst [vmem:[#allocation98_spill] sm:$0xff] %v8216_v32  ;;  %10428 = vst [vmem:[#allocation100_spill] sm:$0xff] %v8222_v17  ;;  %v8234_v20 = vmax.f32 %v10437_v3, %v10435_v25  ;;  %v10445_v45 = vmax.f32 %v10444_v47, 0.0  ;;  %v10450_v33 = vmax.f32 %v10449_v52, 0.0  ;;  %v10451_v22 = vld [vmem:[#allocation68_spill] sm:$0xff]  ;;  %v10454_v25 = vld [vmem:[#allocation107_spill] sm:$0xff] }
 0x3f6   :  { %10433 = vst [vmem:[#allocation104_spill] sm:$0xff] %v8228_v34  ;;  %v8240_v32 = vmax.f32 %v10442_v44, %v10440_v56  ;;  %v10452_v14 = vmax.f32 %v10451_v22, 0.0  ;;  %v10455_v11 = vmax.f32 %v10454_v25, 0.0  ;;  %v10456_v3 = vld [vmem:[#allocation12_spill] sm:$0xff]  ;;  %v10459_v56 = vld [vmem:[#allocation109_spill] sm:$0xff]  ;;  %v10461_v44 = vld [vmem:[#allocation14_spill] sm:$0xff] }
 0x3f7   :  { %10438 = vst [vmem:[#allocation106_spill] sm:$0xff] %v8234_v20  ;;  %v8246_v17 = vmax.f32 %v10447_v7, %v10445_v45  ;;  %v10457_v23 = vmax.f32 %v10456_v3, 0.0  ;;  %v10460_v39 = vmax.f32 %v10459_v56, 0.0  ;;  %v10462_v47 = vmax.f32 %v10461_v44, 0.0  ;;  %v10464_v45 = vld [vmem:[#allocation2_spill] sm:$0xff]  ;;  %v10466_v7 = vld [vmem:[#allocation16_spill] sm:$0xff] }
 0x3f8   :  { %10443 = vst [vmem:[#allocation110_spill] sm:$0xff] %v8240_v32  ;;  %v8252_v34 = vmax.f32 %v10452_v14, %v10450_v33  ;;  %v10465_v10 = vmax.f32 %v10464_v45, 0.0  ;;  %v10467_v52 = vmax.f32 %v10466_v7, 0.0  ;;  %v10469_v33 = vld [vmem:[#allocation4_spill] sm:$0xff]  ;;  %v10471_v14 = vld [vmem:[#allocation18_spill] sm:$0xff] }
 0x3f9   :  { %10448 = vst [vmem:[#allocation112_spill] sm:$0xff] %v8246_v17  ;;  %v8258_v20 = vmax.f32 %v10457_v23, %v10455_v11  ;;  %v8264_v32 = vmax.f32 %v10462_v47, %v10460_v39  ;;  %v10470_v22 = vmax.f32 %v10469_v33, 0.0  ;;  %v10472_v25 = vmax.f32 %v10471_v14, 0.0  ;;  %v10474_v11 = vld [vmem:[#allocation6_spill] sm:$0xff]  ;;  %v10476_v23 = vld [vmem:[#allocation20_spill] sm:$0xff] }
 0x3fa   :  { %10453 = vst [vmem:[#allocation5_spill] sm:$0xff] %v8252_v34  ;;  %v8270_v17 = vmax.f32 %v10467_v52, %v10465_v10  ;;  %v10475_v3 = vmax.f32 %v10474_v11, 0.0  ;;  %v10477_v56 = vmax.f32 %v10476_v23, 0.0  ;;  %v10479_v39 = vld [vmem:[#allocation8_spill] sm:$0xff]  ;;  %v10481_v47 = vld [vmem:[#allocation22_spill] sm:$0xff] }
 0x3fb   :  { %10458 = vst [vmem:[#allocation114_spill] sm:$0xff] %v8258_v20  ;;  %10463 = vst [vmem:[#allocation9_spill] sm:$0xff] %v8264_v32  ;;  %v8276_v34 = vmax.f32 %v10472_v25, %v10470_v22  ;;  %v10480_v44 = vmax.f32 %v10479_v39, 0.0  ;;  %v10482_v45 = vmax.f32 %v10481_v47, 0.0  ;;  %v10484_v10 = vld [vmem:[#allocation10_spill] sm:$0xff]  ;;  %v10486_v52 = vld [vmem:[#allocation24_spill] sm:$0xff] }
 0x3fc   :  { %10468 = vst [vmem:[#allocation116_spill] sm:$0xff] %v8270_v17  ;;  %v8282_v20 = vmax.f32 %v10477_v56, %v10475_v3  ;;  %v10485_v7 = vmax.f32 %v10484_v10, 0.0  ;;  %v10487_v33 = vmax.f32 %v10486_v52, 0.0  ;;  %v10489_v22 = vld [vmem:[#allocation13_spill] sm:$0xff]  ;;  %v10491_v25 = vld [vmem:[#allocation26_spill] sm:$0xff]  ;;  %v10494_v3 = vld [vmem:[#allocation15_spill] sm:$0xff] }
 0x3fd   :  { %10473 = vst [vmem:[#allocation117_spill] sm:$0xff] %v8276_v34  ;;  %v8288_v32 = vmax.f32 %v10482_v45, %v10480_v44  ;;  %v10490_v14 = vmax.f32 %v10489_v22, 0.0  ;;  %v10492_v11 = vmax.f32 %v10491_v25, 0.0  ;;  %v10495_v23 = vmax.f32 %v10494_v3, 0.0  ;;  %v10496_v56 = vld [vmem:[#allocation28_spill] sm:$0xff]  ;;  %v10499_v44 = vld [vmem:[#allocation17_spill] sm:$0xff] }
 0x3fe   :  { %10478 = vst [vmem:[#allocation119_spill] sm:$0xff] %v8282_v20  ;;  %v8294_v17 = vmax.f32 %v10487_v33, %v10485_v7  ;;  %v10497_v39 = vmax.f32 %v10496_v56, 0.0  ;;  %v10500_v47 = vmax.f32 %v10499_v44, 0.0  ;;  %v10501_v45 = vld [vmem:[#allocation30_spill] sm:$0xff]  ;;  %v10504_v7 = vld [vmem:[#allocation19_spill] sm:$0xff]  ;;  %v10506_v33 = vld [vmem:[#allocation32_spill] sm:$0xff] }
 0x3ff   :  { %10483 = vst [vmem:[#allocation121_spill] sm:$0xff] %v8288_v32  ;;  %v8300_v34 = vmax.f32 %v10492_v11, %v10490_v14  ;;  %v10502_v10 = vmax.f32 %v10501_v45, 0.0  ;;  %v10505_v52 = vmax.f32 %v10504_v7, 0.0  ;;  %v10507_v22 = vmax.f32 %v10506_v33, 0.0  ;;  %v10509_v14 = vld [vmem:[#allocation21_spill] sm:$0xff]  ;;  %v10511_v11 = vld [vmem:[#allocation34_spill] sm:$0xff] }
 0x400   :  { %10488 = vst [vmem:[#allocation123_spill] sm:$0xff] %v8294_v17  ;;  %v8306_v20 = vmax.f32 %v10497_v39, %v10495_v23  ;;  %v10510_v25 = vmax.f32 %v10509_v14, 0.0  ;;  %v10512_v3 = vmax.f32 %v10511_v11, 0.0  ;;  %v10514_v23 = vld [vmem:[#allocation23_spill] sm:$0xff]  ;;  %v10516_v39 = vld [vmem:[#allocation36_spill] sm:$0xff] }
 0x401   :  { %10493 = vst [vmem:[#allocation125_spill] sm:$0xff] %v8300_v34  ;;  %v8312_v32 = vmax.f32 %v10502_v10, %v10500_v47  ;;  %v8318_v17 = vmax.f32 %v10507_v22, %v10505_v52  ;;  %v10515_v56 = vmax.f32 %v10514_v23, 0.0  ;;  %v10517_v44 = vmax.f32 %v10516_v39, 0.0  ;;  %v10519_v47 = vld [vmem:[#allocation25_spill] sm:$0xff]  ;;  %v10521_v10 = vld [vmem:[#allocation38_spill] sm:$0xff]  ;;  %v10524_v52 = vld [vmem:[#allocation27_spill] sm:$0xff] }
 0x402   :  { %10498 = vst [vmem:[#allocation127_spill] sm:$0xff] %v8306_v20  ;;  %v8324_v34 = vmax.f32 %v10512_v3, %v10510_v25  ;;  %v10520_v45 = vmax.f32 %v10519_v47, 0.0  ;;  %v10522_v7 = vmax.f32 %v10521_v10, 0.0  ;;  %v10525_v33 = vmax.f32 %v10524_v52, 0.0  ;;  %v10526_v22 = vld [vmem:[#allocation40_spill] sm:$0xff]  ;;  %v10529_v25 = vld [vmem:[#allocation29_spill] sm:$0xff] }
 0x403   :  { %10503 = vst [vmem:[#allocation129_spill] sm:$0xff] %v8312_v32  ;;  %10508 = vst [vmem:[#allocation131_spill] sm:$0xff] %v8318_v17  ;;  %v8330_v20 = vmax.f32 %v10517_v44, %v10515_v56  ;;  %v10527_v14 = vmax.f32 %v10526_v22, 0.0  ;;  %v10530_v11 = vmax.f32 %v10529_v25, 0.0  ;;  %v10531_v3 = vld [vmem:[#allocation42_spill] sm:$0xff]  ;;  %v10534_v56 = vld [vmem:[#allocation31_spill] sm:$0xff] }
 0x404   :  { %10513 = vst [vmem:[#allocation133_spill] sm:$0xff] %v8324_v34  ;;  %v8336_v32 = vmax.f32 %v10522_v7, %v10520_v45  ;;  %v10532_v23 = vmax.f32 %v10531_v3, 0.0  ;;  %v10535_v39 = vmax.f32 %v10534_v56, 0.0  ;;  %v10536_v44 = vld [vmem:[#allocation44_spill] sm:$0xff]  ;;  %v10539_v45 = vld [vmem:[#allocation33_spill] sm:$0xff]  ;;  %v10541_v7 = vld [vmem:[#allocation46_spill] sm:$0xff] }
 0x405   :  { %10518 = vst [vmem:[#allocation135_spill] sm:$0xff] %v8330_v20  ;;  %v8342_v17 = vmax.f32 %v10527_v14, %v10525_v33  ;;  %v10537_v47 = vmax.f32 %v10536_v44, 0.0  ;;  %v10540_v10 = vmax.f32 %v10539_v45, 0.0  ;;  %v10542_v52 = vmax.f32 %v10541_v7, 0.0  ;;  %v10544_v33 = vld [vmem:[#allocation35_spill] sm:$0xff]  ;;  %v10546_v14 = vld [vmem:[#allocation48_spill] sm:$0xff] }
 0x406   :  { %10523 = vst [vmem:[#allocation137_spill] sm:$0xff] %v8336_v32  ;;  %v8348_v34 = vmax.f32 %v10532_v23, %v10530_v11  ;;  %v10545_v22 = vmax.f32 %v10544_v33, 0.0  ;;  %v10547_v25 = vmax.f32 %v10546_v14, 0.0  ;;  %v10549_v11 = vld [vmem:[#allocation39_spill] sm:$0xff]  ;;  %v10551_v23 = vld [vmem:[#allocation70_spill] sm:$0xff] }
 0x407   :  { %10528 = vst [vmem:[#allocation139_spill] sm:$0xff] %v8342_v17  ;;  %v8354_v20 = vmax.f32 %v10537_v47, %v10535_v39  ;;  %v8360_v32 = vmax.f32 %v10542_v52, %v10540_v10  ;;  %v10550_v3 = vmax.f32 %v10549_v11, 0.0  ;;  %v10552_v56 = vmax.f32 %v10551_v23, 0.0  ;;  %v10554_v39 = vld [vmem:[#allocation41_spill] sm:$0xff]  ;;  %v10556_v47 = vld [vmem:[#allocation72_spill] sm:$0xff]  ;;  %v10559_v10 = vld [vmem:[#allocation43_spill] sm:$0xff] }
 0x408   :  { %10533 = vst [vmem:[#allocation141_spill] sm:$0xff] %v8348_v34  ;;  %v8366_v17 = vmax.f32 %v10547_v25, %v10545_v22  ;;  %v10555_v44 = vmax.f32 %v10554_v39, 0.0  ;;  %v10557_v45 = vmax.f32 %v10556_v47, 0.0  ;;  %v10560_v7 = vmax.f32 %v10559_v10, 0.0  ;;  %v10561_v52 = vld [vmem:[#allocation74_spill] sm:$0xff]  ;;  %v10564_v22 = vld [vmem:[#allocation45_spill] sm:$0xff] }
 0x409   :  { %10538 = vst [vmem:[#allocation143_spill] sm:$0xff] %v8354_v20  ;;  %10543 = vst [vmem:[#allocation145_spill] sm:$0xff] %v8360_v32  ;;  %v8372_v34 = vmax.f32 %v10552_v56, %v10550_v3  ;;  %v10562_v33 = vmax.f32 %v10561_v52, 0.0  ;;  %v10565_v14 = vmax.f32 %v10564_v22, 0.0  ;;  %v10566_v25 = vld [vmem:[#allocation75_spill] sm:$0xff]  ;;  %v10571_v56 = vld [vmem:[#allocation77_spill] sm:$0xff] }
 0x40a   :  { %10548 = vst [vmem:[#allocation147_spill] sm:$0xff] %v8366_v17  ;;  %v8378_v20 = vmax.f32 %v10557_v45, %v10555_v44  ;;  %v10567_v11 = vmax.f32 %v10566_v25, 0.0  ;;  %v10569_v3 = vld [vmem:[#allocation47_spill] sm:$0xff]  ;;  %v10572_v39 = vmax.f32 %v10571_v56, 0.0  ;;  %v10574_v44 = vld [vmem:[#allocation49_spill] sm:$0xff] }
 0x40b   :  { %10553 = vst [vmem:[#allocation149_spill] sm:$0xff] %v8372_v34  ;;  %v8384_v32 = vmax.f32 %v10562_v33, %v10560_v7  ;;  %v10570_v23 = vmax.f32 %v10569_v3, 0.0  ;;  %v10575_v47 = vmax.f32 %v10574_v44, 0.0  ;;  %v10576_v45 = vld [vmem:[#allocation179_spill] sm:$0xff]  ;;  %v10579_v7 = vld [vmem:[#allocation50_spill] sm:$0xff]  ;;  %v10581_v33 = vld [vmem:[#allocation180_spill] sm:$0xff] }
 0x40c   :  { %10558 = vst [vmem:[#allocation151_spill] sm:$0xff] %v8378_v20  ;;  %v8390_v17 = vmax.f32 %v10567_v11, %v10565_v14  ;;  %v10577_v10 = vmax.f32 %v10576_v45, 0.0  ;;  %v10580_v52 = vmax.f32 %v10579_v7, 0.0  ;;  %v10582_v22 = vmax.f32 %v10581_v33, 0.0  ;;  %v10584_v14 = vld [vmem:[#allocation53_spill] sm:$0xff] }
 0x40d   :  { %10563 = vst [vmem:[#allocation153_spill] sm:$0xff] %v8384_v32  ;;  %v8396_v34 = vmax.f32 %v10572_v39, %v10570_v23  ;;  %v10585_v25 = vmax.f32 %v10584_v14, 0.0  ;;  %v10586_v11 = vld [vmem:[#allocation181_spill] sm:$0xff]  ;;  %v10589_v23 = vld [vmem:[#allocation55_spill] sm:$0xff]  ;;  %v10591_v39 = vld [vmem:[#allocation182_spill] sm:$0xff] }
 0x40e   :  { %10568 = vst [vmem:[#allocation155_spill] sm:$0xff] %v8390_v17  ;;  %v8402_v20 = vmax.f32 %v10577_v10, %v10575_v47  ;;  %v8408_v32 = vmax.f32 %v10582_v22, %v10580_v52  ;;  %v10587_v3 = vmax.f32 %v10586_v11, 0.0  ;;  %v10590_v56 = vmax.f32 %v10589_v23, 0.0  ;;  %v10594_v47 = vld [vmem:[#allocation57_spill] sm:$0xff]  ;;  %v10596_v10 = vld [vmem:[#allocation183_spill] sm:$0xff]  ;;  %v10601_v22 = vld [vmem:[#allocation184_spill] sm:$0xff] }
 0x40f   :  { %10573 = vst [vmem:[#allocation156_spill] sm:$0xff] %v8396_v34  ;;  %v10592_v44 = vmax.f32 %v10591_v39, 0.0  ;;  %v10595_v45 = vmax.f32 %v10594_v47, 0.0  ;;  %v10597_v7 = vmax.f32 %v10596_v10, 0.0  ;;  %v10599_v52 = vld [vmem:[#allocation59_spill] sm:$0xff]  ;;  %v10602_v14 = vmax.f32 %v10601_v22, 0.0 }
 0x410   :  { %10578 = vst [vmem:[#allocation158_spill] sm:$0xff] %v8402_v20  ;;  %10583 = vst [vmem:[#allocation160_spill] sm:$0xff] %v8408_v32  ;;  %v8414_v17 = vmax.f32 %v10587_v3, %v10585_v25  ;;  %v10600_v33 = vmax.f32 %v10599_v52, 0.0  ;;  %v10604_v25 = vld [vmem:[#allocation61_spill] sm:$0xff] }
 0x411   :  { %v8420_v34 = vmax.f32 %v10592_v44, %v10590_v56  ;;  %v8426_v20 = vmax.f32 %v10597_v7, %v10595_v45  ;;  %v10605_v11 = vmax.f32 %v10604_v25, 0.0  ;;  %v10606_v3 = vld [vmem:[#allocation185_spill] sm:$0xff]  ;;  %v10609_v56 = vld [vmem:[#allocation63_spill] sm:$0xff]  ;;  %v10611_v44 = vld [vmem:[#allocation186_spill] sm:$0xff] }
 0x412   :  { %10588 = vst [vmem:[#allocation162_spill] sm:$0xff] %v8414_v17  ;;  %v8432_v32 = vmax.f32 %v10602_v14, %v10600_v33  ;;  %v10607_v23 = vmax.f32 %v10606_v3, 0.0  ;;  %v10610_v39 = vmax.f32 %v10609_v56, 0.0  ;;  %v10612_v47 = vmax.f32 %v10611_v44, 0.0  ;;  %v10614_v45 = vld [vmem:[#allocation65_spill] sm:$0xff]  ;;  %v10616_v7 = vld [vmem:[#allocation187_spill] sm:$0xff] }
 0x413   :  { %10593 = vst [vmem:[#allocation164_spill] sm:$0xff] %v8420_v34  ;;  %10598 = vst [vmem:[#allocation166_spill] sm:$0xff] %v8426_v20  ;;  %v10615_v10 = vmax.f32 %v10614_v45, 0.0  ;;  %v10617_v52 = vmax.f32 %v10616_v7, 0.0  ;;  %v10619_v33 = vld [vmem:[#allocation67_spill] sm:$0xff]  ;;  %v10621_v14 = vld [vmem:[#allocation188_spill] sm:$0xff] }
 0x414   :  { %10603 = vst [vmem:[#allocation168_spill] sm:$0xff] %v8432_v32  ;;  %v8438_v17 = vmax.f32 %v10607_v23, %v10605_v11  ;;  %v8444_v34 = vmax.f32 %v10612_v47, %v10610_v39  ;;  %v10620_v22 = vmax.f32 %v10619_v33, 0.0  ;;  %v10622_v25 = vmax.f32 %v10621_v14, 0.0  ;;  %v10624_v11 = vld [vmem:[#allocation69_spill] sm:$0xff]  ;;  %v10631_v47 = vld [vmem:[#allocation190_spill] sm:$0xff] }
 0x415   :  { %v8450_v20 = vmax.f32 %v10617_v52, %v10615_v10  ;;  %v10625_v3 = vmax.f32 %v10624_v11, 0.0  ;;  %v10626_v23 = vld [vmem:[#allocation189_spill] sm:$0xff]  ;;  %v10632_v45 = vmax.f32 %v10631_v47, 0.0  ;;  %v10634_v10 = vld [vmem:[#allocation71_spill] sm:$0xff]  ;;  %v10650_v47 = vmax.f32 %v7705_v48, 0.0 }
 0x416   :  { %10608 = vst [vmem:[#allocation170_spill] sm:$0xff] %v8438_v17  ;;  %10613 = vst [vmem:[#allocation172_spill] sm:$0xff] %v8444_v34  ;;  %v8456_v32 = vmax.f32 %v10622_v25, %v10620_v22  ;;  %v10627_v56 = vmax.f32 %v10626_v23, 0.0  ;;  %v10629_v39 = vld [vmem:[#allocation73_spill] sm:$0xff]  ;;  %v10635_v7 = vmax.f32 %v10634_v10, 0.0  ;;  %v10636_v52 = vld [vmem:[#allocation191_spill] sm:$0xff] }
 0x417   :  { %10618 = vst [vmem:[#allocation174_spill] sm:$0xff] %v8450_v20  ;;  %v10630_v44 = vmax.f32 %v10629_v39, 0.0  ;;  %v10637_v33 = vmax.f32 %v10636_v52, 0.0  ;;  %v10639_v22 = vld [vmem:[#allocation37_spill] sm:$0xff]  ;;  %v10641_v25 = vld [vmem:[#allocation192_spill] sm:$0xff]  ;;  %v10651_v10 = vmax.f32 %v8002_v43, 0.0 }
 0x418   :  { %10623 = vst [vmem:[#allocation176_spill] sm:$0xff] %v8456_v32  ;;  %v8462_v17 = vmax.f32 %v10627_v56, %v10625_v3  ;;  %v10640_v14 = vmax.f32 %v10639_v22, 0.0  ;;  %v10642_v11 = vmax.f32 %v10641_v25, 0.0  ;;  %v10644_v3 = vld [vmem:[#allocation194_spill] sm:$0xff]  ;;  %v10646_v56 = vld [vmem:[#allocation193_spill] sm:$0xff]  ;;  %v10654_v22 = vmax.f32 %v8005_v58, 0.0 }
 0x419   :  { %v8468_v34 = vmax.f32 %v10632_v45, %v10630_v44  ;;  %v8474_v20 = vmax.f32 %v10637_v33, %v10635_v7  ;;  %v10645_v23 = vmax.f32 %v10644_v3, 0.0  ;;  %v10647_v39 = vmax.f32 %v10646_v56, 0.0  ;;  %v10652_v7 = vld [vmem:[#allocation78_spill] sm:$0xff]  ;;  %v10658_v56 = vld [vmem:[#allocation81_spill] sm:$0xff] }
 0x41a   :  { %10628 = vst [vmem:[#allocation178_spill] sm:$0xff] %v8462_v17  ;;  %v8480_v32 = vmax.f32 %v10642_v11, %v10640_v14  ;;  %v10649_v44 = vmax.f32 %v7999_v41, 0.0  ;;  %v10653_v52 = vmax.f32 %v10652_v7, 0.0  ;;  %v10655_v14 = vld [vmem:[#allocation76_spill] sm:$0xff]  ;;  %v10657_v3 = vmax.f32 %v8008_v19, 0.0 }
 0x41b   :  { %10633 = vst [vmem:[#allocation52_spill] sm:$0xff] %v8468_v34  ;;  %10638 = vst [vmem:[#allocation83_spill] sm:$0xff] %v8474_v20  ;;  %v8486_v17 = vmax.f32 %v10647_v39, %v10645_v23  ;;  %v10656_v25 = vmax.f32 %v10655_v14, 0.0  ;;  %v10659_v23 = vmax.f32 %v10658_v56, 0.0  ;;  %v10660_v41 = vmax.f32 %v8011_v40, 0.0  ;;  %v10786_v20 = vld [vmem:[#allocation169_spill] sm:$0xff] }
 0x41c   :  { %10643 = vst [vmem:[#allocation54_spill] sm:$0xff] %v8480_v32  ;;  %v3299_v45 = vmax.f32 %v10650_v47, %v10649_v44  ;;  %v3300_v33 = vmax.f32 %v10653_v52, %v10651_v10  ;;  %v10663_v43 = vmax.f32 %v8014_v8, 0.0  ;;  %v10664_v47 = vld [vmem:[#allocation87_spill] sm:$0xff]  ;;  %v10666_v58 = vmax.f32 %v8017_v29, 0.0  ;;  %v10667_v52 = vld [vmem:[#allocation90_spill] sm:$0xff]  ;;  %v10779_v32 = vld [vmem:[#allocation165_spill] sm:$0xff] }
 0x41d   :  { %10648 = vst [vmem:[#allocation85_spill] sm:$0xff] %v8486_v17  ;;  %v3301_v11 = vmax.f32 %v10656_v25, %v10654_v22  ;;  %v3302_v39 = vmax.f32 %v10659_v23, %v10657_v3  ;;  %v10661_v17 = vld [vmem:[#allocation84_spill] sm:$0xff]  ;;  %v10665_v7 = vmax.f32 %v10664_v47, 0.0  ;;  %v10668_v14 = vmax.f32 %v10667_v52, 0.0  ;;  %v10670_v25 = vld [vmem:[#allocation93_spill] sm:$0xff]  ;;  %v10790_v34 = vld [vmem:[#allocation171_spill] sm:$0xff] }
 0x41e   :  { %v10662_v48 = vmax.f32 %v10661_v17, 0.0  ;;  %v10669_v19 = vmax.f32 %v8020_v50, 0.0  ;;  %v10671_v56 = vmax.f32 %v10670_v25, 0.0  ;;  %v10672_v40 = vmax.f32 %v8023_v15, 0.0  ;;  %v10673_v23 = vld [vmem:[#allocation96_spill] sm:$0xff] }
 0x41f   :  { %v3304_v10 = vmax.f32 %v10665_v7, %v10663_v43  ;;  %v3305_v22 = vmax.f32 %v10668_v14, %v10666_v58  ;;  %v10674_v17 = vmax.f32 %v10673_v23, 0.0  ;;  %v10675_v8 = vmax.f32 %v8026_v61, 0.0  ;;  %v10679_v7 = vld [vmem:[#allocation102_spill] sm:$0xff]  ;;  %v10682_v14 = vld [vmem:[#allocation105_spill] sm:$0xff] }
 0x420   :  { %v3303_v44 = vmax.f32 %v10662_v48, %v10660_v41  ;;  %v3306_v3 = vmax.f32 %v10671_v56, %v10669_v19  ;;  %v10676_v48 = vld [vmem:[#allocation99_spill] sm:$0xff]  ;;  %v10678_v29 = vmax.f32 %v8029_v51, 0.0  ;;  %v10680_v52 = vmax.f32 %v10679_v7, 0.0  ;;  %v10685_v56 = vld [vmem:[#allocation108_spill] sm:$0xff] }
 0x421   :  { %v3307_v41 = vmax.f32 %v10674_v17, %v10672_v40  ;;  %v10677_v47 = vmax.f32 %v10676_v48, 0.0  ;;  %v10681_v50 = vmax.f32 %v8032_v24, 0.0  ;;  %v10683_v25 = vmax.f32 %v10682_v14, 0.0  ;;  %v10688_v17 = vld [vmem:[#allocation111_spill] sm:$0xff] }
 0x422   :  { %v3309_v58 = vmax.f32 %v10680_v52, %v10678_v29  ;;  %v10684_v15 = vmax.f32 %v8035_v42, 0.0  ;;  %v10686_v23 = vmax.f32 %v10685_v56, 0.0  ;;  %v10687_v61 = vmax.f32 %v8038_v16, 0.0  ;;  %v10694_v52 = vld [vmem:[#allocation113_spill] sm:$0xff] }
 0x423   :  { %v3308_v43 = vmax.f32 %v10677_v47, %v10675_v8  ;;  %v3310_v19 = vmax.f32 %v10683_v25, %v10681_v50  ;;  %v10689_v48 = vmax.f32 %v10688_v17, 0.0  ;;  %v10690_v51 = vmax.f32 %v8041_v6, 0.0  ;;  %v10691_v47 = vld [vmem:[#allocation3_spill] sm:$0xff] }
 0x424   :  { %v3311_v40 = vmax.f32 %v10686_v23, %v10684_v15  ;;  %v10692_v7 = vmax.f32 %v10691_v47, 0.0  ;;  %v10693_v24 = vmax.f32 %v8044_v38, 0.0  ;;  %v10695_v14 = vmax.f32 %v10694_v52, 0.0  ;;  %v10697_v25 = vld [vmem:[#allocation7_spill] sm:$0xff] }
 0x425   :  { %v3312_v8 = vmax.f32 %v10689_v48, %v10687_v61  ;;  %v10696_v42 = vmax.f32 %v8047_v36, 0.0  ;;  %v10698_v56 = vmax.f32 %v10697_v25, 0.0  ;;  %v10699_v16 = vmax.f32 %v8050_v54, 0.0  ;;  %v10700_v23 = vld [vmem:[#allocation115_spill] sm:$0xff] }
 0x426   :  { %v3313_v29 = vmax.f32 %v10692_v7, %v10690_v51  ;;  %v3314_v50 = vmax.f32 %v10695_v14, %v10693_v24  ;;  %v10701_v17 = vmax.f32 %v10700_v23, 0.0  ;;  %v10702_v6 = vmax.f32 %v8053_v2, 0.0  ;;  %v10703_v48 = vld [vmem:[#allocation11_spill] sm:$0xff]  ;;  %v10706_v7 = vld [vmem:[#allocation118_spill] sm:$0xff]  ;;  %v10709_v14 = vld [vmem:[#allocation120_spill] sm:$0xff] }
 0x427   :  { %v3315_v15 = vmax.f32 %v10698_v56, %v10696_v42  ;;  %v10704_v47 = vmax.f32 %v10703_v48, 0.0  ;;  %v10705_v38 = vmax.f32 %v8056_v37, 0.0  ;;  %v10707_v52 = vmax.f32 %v10706_v7, 0.0  ;;  %v10712_v56 = vld [vmem:[#allocation122_spill] sm:$0xff] }
 0x428   :  { %v3316_v61 = vmax.f32 %v10701_v17, %v10699_v16  ;;  %v10708_v36 = vmax.f32 %v8059_v9, 0.0  ;;  %v10710_v25 = vmax.f32 %v10709_v14, 0.0  ;;  %v10711_v54 = vmax.f32 %v8062_v26, 0.0  ;;  %v10715_v17 = vld [vmem:[#allocation124_spill] sm:$0xff] }
 0x429   :  { %v3317_v51 = vmax.f32 %v10704_v47, %v10702_v6  ;;  %v3318_v24 = vmax.f32 %v10707_v52, %v10705_v38  ;;  %v10713_v23 = vmax.f32 %v10712_v56, 0.0  ;;  %v10714_v2 = vmax.f32 %v8065_v46, 0.0  ;;  %v10718_v47 = vld [vmem:[#allocation126_spill] sm:$0xff]  ;;  %v10721_v52 = vld [vmem:[#allocation128_spill] sm:$0xff] }
 0x42a   :  { %v3319_v42 = vmax.f32 %v10710_v25, %v10708_v36  ;;  %v10716_v48 = vmax.f32 %v10715_v17, 0.0  ;;  %v10717_v37 = vmax.f32 %v8068_v0, 0.0  ;;  %v10719_v7 = vmax.f32 %v10718_v47, 0.0  ;;  %v10724_v25 = vld [vmem:[#allocation130_spill] sm:$0xff] }
 0x42b   :  { %v3320_v16 = vmax.f32 %v10713_v23, %v10711_v54  ;;  %v10720_v9 = vmax.f32 %v8071_v49, 0.0  ;;  %v10722_v14 = vmax.f32 %v10721_v52, 0.0  ;;  %v10723_v26 = vmax.f32 %v8074_v1, 0.0  ;;  %v10727_v23 = vld [vmem:[#allocation132_spill] sm:$0xff] }
 0x42c   :  { %v3321_v6 = vmax.f32 %v10716_v48, %v10714_v2  ;;  %v3322_v38 = vmax.f32 %v10719_v7, %v10717_v37  ;;  %v10725_v56 = vmax.f32 %v10724_v25, 0.0  ;;  %v10726_v46 = vmax.f32 %v8077_v62, 0.0  ;;  %v10730_v48 = vld [vmem:[#allocation134_spill] sm:$0xff]  ;;  %v10733_v7 = vld [vmem:[#allocation136_spill] sm:$0xff] }
 0x42d   :  { %v3323_v36 = vmax.f32 %v10722_v14, %v10720_v9  ;;  %v10728_v17 = vmax.f32 %v10727_v23, 0.0  ;;  %v10729_v0 = vmax.f32 %v8080_v12, 0.0  ;;  %v10731_v47 = vmax.f32 %v10730_v48, 0.0  ;;  %v10736_v14 = vld [vmem:[#allocation138_spill] sm:$0xff] }
 0x42e   :  { %v3324_v54 = vmax.f32 %v10725_v56, %v10723_v26  ;;  %v10732_v49 = vmax.f32 %v8083_v13, 0.0  ;;  %v10734_v52 = vmax.f32 %v10733_v7, 0.0  ;;  %v10735_v1 = vmax.f32 %v8086_v21, 0.0  ;;  %v10739_v56 = vld [vmem:[#allocation140_spill] sm:$0xff] }
 0x42f   :  { %v3325_v2 = vmax.f32 %v10728_v17, %v10726_v46  ;;  %v3326_v37 = vmax.f32 %v10731_v47, %v10729_v0  ;;  %v10737_v25 = vmax.f32 %v10736_v14, 0.0  ;;  %v10738_v62 = vmax.f32 %v8089_v27, 0.0  ;;  %v10742_v17 = vld [vmem:[#allocation142_spill] sm:$0xff]  ;;  %v10745_v47 = vld [vmem:[#allocation144_spill] sm:$0xff] }
 0x430   :  { %v3327_v9 = vmax.f32 %v10734_v52, %v10732_v49  ;;  %v10740_v23 = vmax.f32 %v10739_v56, 0.0  ;;  %v10741_v12 = vmax.f32 %v8092_v30, 0.0  ;;  %v10743_v48 = vmax.f32 %v10742_v17, 0.0  ;;  %v10748_v52 = vld [vmem:[#allocation146_spill] sm:$0xff] }
 0x431   :  { %v3328_v26 = vmax.f32 %v10737_v25, %v10735_v1  ;;  %v10744_v13 = vmax.f32 %v8095_v18, 0.0  ;;  %v10746_v7 = vmax.f32 %v10745_v47, 0.0  ;;  %v10747_v21 = vmax.f32 %v8098_v55, 0.0  ;;  %v10751_v25 = vld [vmem:[#allocation148_spill] sm:$0xff] }
 0x432   :  { %v3329_v46 = vmax.f32 %v10740_v23, %v10738_v62  ;;  %v3330_v0 = vmax.f32 %v10743_v48, %v10741_v12  ;;  %v10749_v14 = vmax.f32 %v10748_v52, 0.0  ;;  %v10750_v27 = vmax.f32 %v8101_v60, 0.0  ;;  %v10754_v23 = vld [vmem:[#allocation150_spill] sm:$0xff]  ;;  %v10757_v48 = vld [vmem:[#allocation152_spill] sm:$0xff] }
 0x433   :  { %v3331_v49 = vmax.f32 %v10746_v7, %v10744_v13  ;;  %v10752_v56 = vmax.f32 %v10751_v25, 0.0  ;;  %v10753_v30 = vmax.f32 %v8104_v63, 0.0  ;;  %v10755_v17 = vmax.f32 %v10754_v23, 0.0  ;;  %v10760_v7 = vld [vmem:[#allocation154_spill] sm:$0xff] }
 0x434   :  { %v3332_v1 = vmax.f32 %v10749_v14, %v10747_v21  ;;  %v10756_v18 = vmax.f32 %v8107_v57, 0.0  ;;  %v10758_v47 = vmax.f32 %v10757_v48, 0.0  ;;  %v10759_v55 = vmax.f32 %v8110_v4, 0.0  ;;  %v10763_v14 = vld [vmem:[#allocation51_spill] sm:$0xff] }
 0x435   :  { %v3333_v62 = vmax.f32 %v10752_v56, %v10750_v27  ;;  %v3334_v12 = vmax.f32 %v10755_v17, %v10753_v30  ;;  %v10761_v52 = vmax.f32 %v10760_v7, 0.0  ;;  %v10762_v60 = vmax.f32 %v8113_v35, 0.0  ;;  %v10766_v56 = vld [vmem:[#allocation157_spill] sm:$0xff]  ;;  %v10769_v17 = vld [vmem:[#allocation159_spill] sm:$0xff] }
 0x436   :  { %v3335_v13 = vmax.f32 %v10758_v47, %v10756_v18  ;;  %v10764_v25 = vmax.f32 %v10763_v14, 0.0  ;;  %v10765_v63 = vmax.f32 %v8116_v53, 0.0  ;;  %v10767_v23 = vmax.f32 %v10766_v56, 0.0  ;;  %v10772_v47 = vld [vmem:[#allocation161_spill] sm:$0xff] }
 0x437   :  { %v3336_v21 = vmax.f32 %v10761_v52, %v10759_v55  ;;  %v10768_v57 = vmax.f32 %v8119_v31, 0.0  ;;  %v10770_v48 = vmax.f32 %v10769_v17, 0.0  ;;  %v10771_v4 = vmax.f32 %v8122_v5, 0.0  ;;  %v10775_v52 = vld [vmem:[#allocation163_spill] sm:$0xff] }
 0x438   :  { %v3337_v27 = vmax.f32 %v10764_v25, %v10762_v60  ;;  %v3338_v30 = vmax.f32 %v10767_v23, %v10765_v63  ;;  %v10773_v7 = vmax.f32 %v10772_v47, 0.0  ;;  %v10774_v35 = vmax.f32 %v8125_v28, 0.0  ;;  %v10777_v25 = vld [vmem:[#allocation177_spill] sm:$0xff]  ;;  %v10782_v23 = vld [vmem:[#allocation167_spill] sm:$0xff] }
 0x439   :  { %v3339_v18 = vmax.f32 %v10770_v48, %v10768_v57  ;;  %v10776_v14 = vmax.f32 %v10775_v52, 0.0  ;;  %v10778_v53 = vmax.f32 %v10777_v25, 0.0  ;;  %v10780_v56 = vmax.f32 %v10779_v32, 0.0  ;;  %v10784_v48 = vld [vmem:[#allocation79_spill] sm:$0xff]  ;;  %v10794_v32 = vld [vmem:[#allocation173_spill] sm:$0xff] }
 0x43a   :  { %v3340_v55 = vmax.f32 %v10773_v7, %v10771_v4  ;;  %v10781_v31 = vmax.f32 %v8131_v59, 0.0  ;;  %v10783_v17 = vmax.f32 %v10782_v23, 0.0  ;;  %v10785_v5 = vmax.f32 %v10784_v48, 0.0  ;;  %v10788_v7 = vld [vmem:[#allocation80_spill] sm:$0xff]  ;;  %v10796_v59 = vld [vmem:[#allocation86_spill] sm:$0xff] }
 0x43b   :  { %v3341_v60 = vmax.f32 %v10776_v14, %v10774_v35  ;;  %v3342_v63 = vmax.f32 %v10780_v56, %v10778_v53  ;;  %v10787_v47 = vmax.f32 %v10786_v20, 0.0  ;;  %v10789_v28 = vmax.f32 %v10788_v7, 0.0  ;;  %v10792_v14 = vld [vmem:[#allocation82_spill] sm:$0xff]  ;;  %v10800_v20 = vld [vmem:[#allocation88_spill] sm:$0xff] }
 0x43c   :  { %v3343_v57 = vmax.f32 %v10783_v17, %v10781_v31  ;;  %v10791_v52 = vmax.f32 %v10790_v34, 0.0  ;;  %v10793_v25 = vmax.f32 %v10792_v14, 0.0  ;;  %v10795_v53 = vmax.f32 %v10794_v32, 0.0  ;;  %v10798_v17 = vld [vmem:[#allocation175_spill] sm:$0xff]  ;;  %v10802_v34 = vld [vmem:[#allocation94_spill] sm:$0xff]  ;;  %v10804_v32 = vld [vmem:[#allocation100_spill] sm:$0xff] }
 0x43d   :  { %v3344_v4 = vmax.f32 %v10787_v47, %v10785_v5  ;;  %v10797_v23 = vmax.f32 %v10796_v59, 0.0  ;;  %v10799_v31 = vmax.f32 %v10798_v17, 0.0  ;;  %v8685_v5 = vmax.f32 %v10800_v20, %v3299_v45  ;;  %v10801_v47 = vld [vmem:[#allocation92_spill] sm:$0xff]  ;;  %v10806_v17 = vld [vmem:[#allocation106_spill] sm:$0xff] }
 0x43e   :  { %v3345_v35 = vmax.f32 %v10791_v52, %v10789_v28  ;;  %v3346_v56 = vmax.f32 %v10795_v53, %v10793_v25  ;;  %v8688_v7 = vmax.f32 %v10801_v47, %v3300_v33  ;;  %v8691_v28 = vmax.f32 %v10802_v34, %v3301_v11  ;;  %v10803_v52 = vld [vmem:[#allocation98_spill] sm:$0xff]  ;;  %v10805_v53 = vld [vmem:[#allocation104_spill] sm:$0xff]  ;;  %v10809_v11 = vld [vmem:[#allocation5_spill] sm:$0xff] }
 0x43f   :  { %v3347_v48 = vmax.f32 %v10799_v31, %v10797_v23  ;;  %v8694_v14 = vmax.f32 %v10803_v52, %v3302_v39  ;;  %v8697_v25 = vmax.f32 %v10804_v32, %v3303_v44  ;;  %v8700_v59 = vmax.f32 %v10805_v53, %v3304_v10  ;;  %v10807_v45 = vld [vmem:[#allocation110_spill] sm:$0xff]  ;;  %v10808_v33 = vld [vmem:[#allocation112_spill] sm:$0xff]  ;;  %v10811_v44 = vld [vmem:[#allocation9_spill] sm:$0xff] }
 0x440   :  { %v8703_v23 = vmax.f32 %v10806_v17, %v3305_v22  ;;  %v8706_v31 = vmax.f32 %v10807_v45, %v3306_v3  ;;  %v8709_v20 = vmax.f32 %v10808_v33, %v3307_v41  ;;  %v8712_v47 = vmax.f32 %v10809_v11, %v3308_v43  ;;  %v10810_v39 = vld [vmem:[#allocation114_spill] sm:$0xff]  ;;  %v10812_v10 = vld [vmem:[#allocation116_spill] sm:$0xff]  ;;  %v10813_v22 = vld [vmem:[#allocation117_spill] sm:$0xff] }
 0x441   :  { %v8715_v34 = vmax.f32 %v10810_v39, %v3309_v58  ;;  %v8718_v52 = vmax.f32 %v10811_v44, %v3310_v19  ;;  %v8721_v32 = vmax.f32 %v10812_v10, %v3311_v40  ;;  %v8724_v53 = vmax.f32 %v10813_v22, %v3312_v8  ;;  %v10814_v3 = vld [vmem:[#allocation119_spill] sm:$0xff]  ;;  %v10815_v41 = vld [vmem:[#allocation121_spill] sm:$0xff] }
 0x442   :  { %v8727_v17 = vmax.f32 %v10814_v3, %v3313_v29  ;;  %v8730_v45 = vmax.f32 %v10815_v41, %v3314_v50  ;;  %v10816_v43 = vld [vmem:[#allocation123_spill] sm:$0xff]  ;;  %v10817_v58 = vld [vmem:[#allocation125_spill] sm:$0xff] }
 0x443   :  { %v8733_v33 = vmax.f32 %v10816_v43, %v3315_v15  ;;  %v8736_v11 = vmax.f32 %v10817_v58, %v3316_v61  ;;  %v10818_v19 = vld [vmem:[#allocation127_spill] sm:$0xff]  ;;  %v10819_v40 = vld [vmem:[#allocation129_spill] sm:$0xff] }
 0x444   :  { %v8739_v39 = vmax.f32 %v10818_v19, %v3317_v51  ;;  %v8742_v44 = vmax.f32 %v10819_v40, %v3318_v24  ;;  %v10820_v8 = vld [vmem:[#allocation131_spill] sm:$0xff]  ;;  %v10821_v29 = vld [vmem:[#allocation133_spill] sm:$0xff] }
 0x445   :  { %v8745_v10 = vmax.f32 %v10820_v8, %v3319_v42  ;;  %v8748_v22 = vmax.f32 %v10821_v29, %v3320_v16  ;;  %v10822_v50 = vld [vmem:[#allocation135_spill] sm:$0xff]  ;;  %v10823_v15 = vld [vmem:[#allocation137_spill] sm:$0xff] }
 0x446   :  { %v8751_v3 = vmax.f32 %v10822_v50, %v3321_v6  ;;  %v8754_v41 = vmax.f32 %v10823_v15, %v3322_v38  ;;  %v10824_v61 = vld [vmem:[#allocation139_spill] sm:$0xff]  ;;  %v10825_v51 = vld [vmem:[#allocation141_spill] sm:$0xff] }
 0x447   :  { %v8757_v43 = vmax.f32 %v10824_v61, %v3323_v36  ;;  %v8760_v58 = vmax.f32 %v10825_v51, %v3324_v54  ;;  %v10826_v24 = vld [vmem:[#allocation143_spill] sm:$0xff]  ;;  %v10827_v42 = vld [vmem:[#allocation145_spill] sm:$0xff] }
 0x448   :  { %v8763_v19 = vmax.f32 %v10826_v24, %v3325_v2  ;;  %v8766_v40 = vmax.f32 %v10827_v42, %v3326_v37  ;;  %v10828_v16 = vld [vmem:[#allocation147_spill] sm:$0xff]  ;;  %v10829_v6 = vld [vmem:[#allocation149_spill] sm:$0xff]  ;;  %v10833_v2 = vld [vmem:[#allocation156_spill] sm:$0xff] }
 0x449   :  { %v8769_v8 = vmax.f32 %v10828_v16, %v3327_v9  ;;  %v8772_v29 = vmax.f32 %v10829_v6, %v3328_v26  ;;  %v10830_v38 = vld [vmem:[#allocation151_spill] sm:$0xff]  ;;  %v10831_v36 = vld [vmem:[#allocation153_spill] sm:$0xff]  ;;  %v8784_v51 = vmax.f32 %v10833_v2, %v3332_v1  ;;  %v10834_v37 = vld [vmem:[#allocation158_spill] sm:$0xff] }
 0x44a   :  { %v8775_v50 = vmax.f32 %v10830_v38, %v3329_v46  ;;  %v8778_v15 = vmax.f32 %v10831_v36, %v3330_v0  ;;  %v10832_v54 = vld [vmem:[#allocation155_spill] sm:$0xff]  ;;  %v8787_v24 = vmax.f32 %v10834_v37, %v3333_v62  ;;  %v10835_v9 = vld [vmem:[#allocation160_spill] sm:$0xff]  ;;  %v10836_v26 = vld [vmem:[#allocation162_spill] sm:$0xff] }
 0x44b   :  { %v8781_v61 = vmax.f32 %v10832_v54, %v3331_v49  ;;  %v8790_v42 = vmax.f32 %v10835_v9, %v3334_v12  ;;  %v8793_v16 = vmax.f32 %v10836_v26, %v3335_v13  ;;  %v10837_v46 = vld [vmem:[#allocation164_spill] sm:$0xff]  ;;  %v10838_v0 = vld [vmem:[#allocation166_spill] sm:$0xff] }
 0x44c   :  { %v8796_v6 = vmax.f32 %v10837_v46, %v3336_v21  ;;  %v8799_v38 = vmax.f32 %v10838_v0, %v3337_v27  ;;  %v10839_v49 = vld [vmem:[#allocation168_spill] sm:$0xff]  ;;  %v10840_v1 = vld [vmem:[#allocation170_spill] sm:$0xff] }
 0x44d   :  { %v8802_v36 = vmax.f32 %v10839_v49, %v3338_v30  ;;  %v8805_v54 = vmax.f32 %v10840_v1, %v3339_v18  ;;  %v10841_v62 = vld [vmem:[#allocation172_spill] sm:$0xff]  ;;  %v10842_v12 = vld [vmem:[#allocation174_spill] sm:$0xff]  ;;  %v10846_v30 = vld [vmem:[#allocation83_spill] sm:$0xff] }
 0x44e   :  { %v8808_v2 = vmax.f32 %v10841_v62, %v3340_v55  ;;  %v8811_v37 = vmax.f32 %v10842_v12, %v3341_v60  ;;  %v10843_v13 = vld [vmem:[#allocation176_spill] sm:$0xff]  ;;  %v10844_v21 = vld [vmem:[#allocation178_spill] sm:$0xff]  ;;  %v8823_v0 = vmax.f32 %v10846_v30, %v3345_v35  ;;  %v10848_v55 = vld [vmem:[#allocation85_spill] sm:$0xff]  ;;  %v3953_v60 = vpack.c.bf16 %v8685_v5, %v8685_v5 }
 0x44f   :  { %v8814_v9 = vmax.f32 %v10843_v13, %v3342_v63  ;;  %v8817_v26 = vmax.f32 %v10844_v21, %v3343_v57  ;;  %v10845_v27 = vld [vmem:[#allocation52_spill] sm:$0xff]  ;;  %v10847_v18 = vld [vmem:[#allocation54_spill] sm:$0xff]  ;;  %v8829_v1 = vmax.f32 %v10848_v55, %v3347_v48  ;;  %v3954_v63 = vpack.c.bf16 %v8688_v7, %v8688_v7 }
 0x450   :  { %v8820_v46 = vmax.f32 %v10845_v27, %v3344_v4  ;;  %v8826_v49 = vmax.f32 %v10847_v18, %v3346_v56  ;;  %v3955_v57 = vpack.c.bf16 %v8691_v28, %v8691_v28  ;;  %v3956_v4 = vpack.c.bf16 %v8694_v14, %v8694_v14  ;;  %3595 = vst.msk [vmem:[%s9130_s5] sm:$0xf] %vm3594_vm1, %v3953_v60 }
 0x451   :  { %v3957_v35 = vpack.c.bf16 %v8697_v25, %v8697_v25  ;;  %v3958_v56 = vpack.c.bf16 %v8700_v59, %v8700_v59  ;;  %v3959_v48 = vpack.c.bf16 %v8703_v23, %v8703_v23  ;;  %v3960_v5 = vpack.c.bf16 %v8706_v31, %v8706_v31  ;;  %3596 = vst.msk [vmem:[%s9130_s5 + $0x4] sm:$0xf] %vm3594_vm1, %v3954_v63 }
 0x452   :  { %v3961_v7 = vpack.c.bf16 %v8709_v20, %v8709_v20  ;;  %v3962_v28 = vpack.c.bf16 %v8712_v47, %v8712_v47  ;;  %v3963_v14 = vpack.c.bf16 %v8715_v34, %v8715_v34  ;;  %v3964_v25 = vpack.c.bf16 %v8718_v52, %v8718_v52  ;;  %3597 = vst.msk [vmem:[%s9130_s5 + $0x8] sm:$0xf] %vm3594_vm1, %v3955_v57 }
 0x453   :  { %v3965_v59 = vpack.c.bf16 %v8721_v32, %v8721_v32  ;;  %v3966_v23 = vpack.c.bf16 %v8724_v53, %v8724_v53  ;;  %v3967_v31 = vpack.c.bf16 %v8727_v17, %v8727_v17  ;;  %v3968_v20 = vpack.c.bf16 %v8730_v45, %v8730_v45  ;;  %3598 = vst.msk [vmem:[%s9130_s5 + $0xc] sm:$0xf] %vm3594_vm1, %v3956_v4 }
 0x454   :  { %v3969_v47 = vpack.c.bf16 %v8733_v33, %v8733_v33  ;;  %v3970_v34 = vpack.c.bf16 %v8736_v11, %v8736_v11  ;;  %v3971_v52 = vpack.c.bf16 %v8739_v39, %v8739_v39  ;;  %v3972_v32 = vpack.c.bf16 %v8742_v44, %v8742_v44  ;;  %3599 = vst.msk [vmem:[%s9130_s5 + $0x10] sm:$0xf] %vm3594_vm1, %v3957_v35 }
 0x455   :  { %v3973_v53 = vpack.c.bf16 %v8745_v10, %v8745_v10  ;;  %v3974_v17 = vpack.c.bf16 %v8748_v22, %v8748_v22  ;;  %v3975_v45 = vpack.c.bf16 %v8751_v3, %v8751_v3  ;;  %v3976_v33 = vpack.c.bf16 %v8754_v41, %v8754_v41  ;;  %3600 = vst.msk [vmem:[%s9130_s5 + $0x14] sm:$0xf] %vm3594_vm1, %v3958_v56 }
 0x456   :  { %v3977_v11 = vpack.c.bf16 %v8757_v43, %v8757_v43  ;;  %v3978_v39 = vpack.c.bf16 %v8760_v58, %v8760_v58  ;;  %v3979_v44 = vpack.c.bf16 %v8763_v19, %v8763_v19  ;;  %v3980_v10 = vpack.c.bf16 %v8766_v40, %v8766_v40  ;;  %3601 = vst.msk [vmem:[%s9130_s5 + $0x18] sm:$0xf] %vm3594_vm1, %v3959_v48 }
 0x457   :  { %v3981_v22 = vpack.c.bf16 %v8769_v8, %v8769_v8  ;;  %v3982_v3 = vpack.c.bf16 %v8772_v29, %v8772_v29  ;;  %v3983_v41 = vpack.c.bf16 %v8775_v50, %v8775_v50  ;;  %v3984_v43 = vpack.c.bf16 %v8778_v15, %v8778_v15  ;;  %3602 = vst.msk [vmem:[%s9130_s5 + $0x1c] sm:$0xf] %vm3594_vm1, %v3960_v5 }
 0x458   :  { %v3985_v58 = vpack.c.bf16 %v8781_v61, %v8781_v61  ;;  %v3986_v19 = vpack.c.bf16 %v8784_v51, %v8784_v51  ;;  %v3987_v40 = vpack.c.bf16 %v8787_v24, %v8787_v24  ;;  %v3988_v8 = vpack.c.bf16 %v8790_v42, %v8790_v42  ;;  %3603 = vst.msk [vmem:[%s9130_s5 + $0x20] sm:$0xf] %vm3594_vm1, %v3961_v7 }
 0x459   :  { %v3989_v29 = vpack.c.bf16 %v8793_v16, %v8793_v16  ;;  %v3990_v50 = vpack.c.bf16 %v8796_v6, %v8796_v6  ;;  %v3991_v15 = vpack.c.bf16 %v8799_v38, %v8799_v38  ;;  %v3992_v61 = vpack.c.bf16 %v8802_v36, %v8802_v36  ;;  %3604 = vst.msk [vmem:[%s9130_s5 + $0x24] sm:$0xf] %vm3594_vm1, %v3962_v28 }
 0x45a   :  { %v3993_v51 = vpack.c.bf16 %v8805_v54, %v8805_v54  ;;  %v3994_v24 = vpack.c.bf16 %v8808_v2, %v8808_v2  ;;  %v3995_v42 = vpack.c.bf16 %v8811_v37, %v8811_v37  ;;  %v3996_v16 = vpack.c.bf16 %v8814_v9, %v8814_v9  ;;  %3605 = vst.msk [vmem:[%s9130_s5 + $0x28] sm:$0xf] %vm3594_vm1, %v3963_v14 }
 0x45b   :  { %v3997_v6 = vpack.c.bf16 %v8817_v26, %v8817_v26  ;;  %v3998_v38 = vpack.c.bf16 %v8820_v46, %v8820_v46  ;;  %v3999_v36 = vpack.c.bf16 %v8823_v0, %v8823_v0  ;;  %v4000_v54 = vpack.c.bf16 %v8826_v49, %v8826_v49  ;;  %3606 = vst.msk [vmem:[%s9130_s5 + $0x2c] sm:$0xf] %vm3594_vm1, %v3964_v25 }
 0x45c   :  { %v4001_v62 = vpack.c.bf16 %v8829_v1, %v8829_v1  ;;  %3607 = vst.msk [vmem:[%s9130_s5 + $0x30] sm:$0xf] %vm3594_vm1, %v3965_v59  ;;  %3608 = vst.msk [vmem:[%s9130_s5 + $0x34] sm:$0xf] %vm3594_vm1, %v3966_v23 }
 0x45d   :  { %3609 = vst.msk [vmem:[%s9130_s5 + $0x38] sm:$0xf] %vm3594_vm1, %v3967_v31  ;;  %3610 = vst.msk [vmem:[%s9130_s5 + $0x3c] sm:$0xf] %vm3594_vm1, %v3968_v20 }
 0x45e   :  { %3611 = vst.msk [vmem:[%s9130_s5 + $0x40] sm:$0xf] %vm3594_vm1, %v3969_v47  ;;  %3612 = vst.msk [vmem:[%s9130_s5 + $0x44] sm:$0xf] %vm3594_vm1, %v3970_v34 }
 0x45f   :  { %3613 = vst.msk [vmem:[%s9130_s5 + $0x48] sm:$0xf] %vm3594_vm1, %v3971_v52  ;;  %3614 = vst.msk [vmem:[%s9130_s5 + $0x4c] sm:$0xf] %vm3594_vm1, %v3972_v32 }
 0x460   :  { %3615 = vst.msk [vmem:[%s9130_s5 + $0x50] sm:$0xf] %vm3594_vm1, %v3973_v53  ;;  %3616 = vst.msk [vmem:[%s9130_s5 + $0x54] sm:$0xf] %vm3594_vm1, %v3974_v17 }
 0x461   :  { %3617 = vst.msk [vmem:[%s9130_s5 + $0x58] sm:$0xf] %vm3594_vm1, %v3975_v45  ;;  %3618 = vst.msk [vmem:[%s9130_s5 + $0x5c] sm:$0xf] %vm3594_vm1, %v3976_v33 }
 0x462   :  { %3619 = vst.msk [vmem:[%s9130_s5 + $0x60] sm:$0xf] %vm3594_vm1, %v3977_v11  ;;  %3620 = vst.msk [vmem:[%s9130_s5 + $0x64] sm:$0xf] %vm3594_vm1, %v3978_v39 }
 0x463   :  { %3621 = vst.msk [vmem:[%s9130_s5 + $0x68] sm:$0xf] %vm3594_vm1, %v3979_v44  ;;  %3622 = vst.msk [vmem:[%s9130_s5 + $0x6c] sm:$0xf] %vm3594_vm1, %v3980_v10 }
 0x464   :  { %3623 = vst.msk [vmem:[%s9130_s5 + $0x70] sm:$0xf] %vm3594_vm1, %v3981_v22  ;;  %3624 = vst.msk [vmem:[%s9130_s5 + $0x74] sm:$0xf] %vm3594_vm1, %v3982_v3 }
 0x465   :  { %3625 = vst.msk [vmem:[%s9130_s5 + $0x78] sm:$0xf] %vm3594_vm1, %v3983_v41  ;;  %3626 = vst.msk [vmem:[%s9130_s5 + $0x7c] sm:$0xf] %vm3594_vm1, %v3984_v43 }
 0x466   :  { %3627 = vst.msk [vmem:[%s9130_s5 + $0x80] sm:$0xf] %vm3594_vm1, %v3985_v58  ;;  %3628 = vst.msk [vmem:[%s9130_s5 + $0x84] sm:$0xf] %vm3594_vm1, %v3986_v19 }
 0x467   :  { %3629 = vst.msk [vmem:[%s9130_s5 + $0x88] sm:$0xf] %vm3594_vm1, %v3987_v40  ;;  %3630 = vst.msk [vmem:[%s9130_s5 + $0x8c] sm:$0xf] %vm3594_vm1, %v3988_v8 }
 0x468   :  { %3631 = vst.msk [vmem:[%s9130_s5 + $0x90] sm:$0xf] %vm3594_vm1, %v3989_v29  ;;  %3632 = vst.msk [vmem:[%s9130_s5 + $0x94] sm:$0xf] %vm3594_vm1, %v3990_v50 }
 0x469   :  { %3633 = vst.msk [vmem:[%s9130_s5 + $0x98] sm:$0xf] %vm3594_vm1, %v3991_v15  ;;  %3634 = vst.msk [vmem:[%s9130_s5 + $0x9c] sm:$0xf] %vm3594_vm1, %v3992_v61 }
 0x46a   :  { %3635 = vst.msk [vmem:[%s9130_s5 + $0xa0] sm:$0xf] %vm3594_vm1, %v3993_v51  ;;  %3636 = vst.msk [vmem:[%s9130_s5 + $0xa4] sm:$0xf] %vm3594_vm1, %v3994_v24 }
 0x46b   :  { %3637 = vst.msk [vmem:[%s9130_s5 + $0xa8] sm:$0xf] %vm3594_vm1, %v3995_v42  ;;  %3638 = vst.msk [vmem:[%s9130_s5 + $0xac] sm:$0xf] %vm3594_vm1, %v3996_v16 }
 0x46c   :  { %3639 = vst.msk [vmem:[%s9130_s5 + $0xb0] sm:$0xf] %vm3594_vm1, %v3997_v6  ;;  %3640 = vst.msk [vmem:[%s9130_s5 + $0xb4] sm:$0xf] %vm3594_vm1, %v3998_v38 }
 0x46d   :  { %3641 = vst.msk [vmem:[%s9130_s5 + $0xb8] sm:$0xf] %vm3594_vm1, %v3999_v36  ;;  %3642 = vst.msk [vmem:[%s9130_s5 + $0xbc] sm:$0xf] %vm3594_vm1, %v4000_v54 }
 0x46e   :  { %3643 = vst.msk [vmem:[%s9130_s5 + $0xc0] sm:$0xf] %vm3594_vm1, %v4001_v62 }

// kernel: simple_convnet_forward.4
= control target key start
LH: loop header
LB: loop body
LE: loop exit
PB: predicated region body
PF: predicated region fallthrough
CT: control target
= control target key end

     0   :  { %vm1642_vm0 = vcmask 1041408   ;;  %vm2163_vm1 = vcmask 257024   ;;  %vm2176_vm2 = vcmask 253952   ;;  %s4460_s1 = inlined_call_operand.vmem [shape: bf16[512,128], index: 1, kind: input, shape index: {}]   ;;  %s4461_s0 = inlined_call_operand.vmem [shape: bf16[4,98,512], index: 0, kind: input, shape index: {}]   ;;  %s4462_s2 = inlined_call_operand.vmem [shape: f32[1,128], index: 2, kind: input, shape index: {}]   ;;  %s4463_s3 = inlined_call_operand.vmem [shape: f32[1,128], index: 3, kind: input, shape index: {}]   ;;  %s4464_s4 = inlined_call_operand.vmem [shape: f32[1,128], index: 4, kind: input, shape index: {}]   ;;  %s4465_s5 = inlined_call_operand.vmem [shape: bf16[98,32], index: 5, kind: output, shape index: {}]  }
   0x1   :  { %v3122_v0 = vld [vmem:[%s4460_s1 + $0x40] sm:$0xff]   ;;  %v3145_v4 = vld [vmem:[%s4460_s1 + $0x48] sm:$0xff]   ;;  %v3169_v8 = vld [vmem:[%s4460_s1 + $0x50] sm:$0xff]  }
   0x2   :  { %v3127_v1 = vld [vmem:[%s4460_s1 + $0xc0] sm:$0xff]   ;;  %2431 = vmatprep.subr.bf16.mxu0 %v3122_v0  ;;  %v3151_v5 = vld [vmem:[%s4460_s1 + $0xc8] sm:$0xff]   ;;  %v3175_v9 = vld [vmem:[%s4460_s1 + $0xd0] sm:$0xff]  }
   0x3   :  { %v3133_v2 = vld [vmem:[%s4460_s1] sm:$0xff]   ;;  %2489 = vmatprep.subr.bf16.mxu1 %v3127_v1  ;;  %v3157_v6 = vld [vmem:[%s4460_s1 + $0x8] sm:$0xff]   ;;  %v3181_v10 = vld [vmem:[%s4460_s1 + $0x10] sm:$0xff]  }
   0x4   :  { %v3139_v3 = vld [vmem:[%s4460_s1 + $0x80] sm:$0xff]   ;;  %2432 = vmatpush3.bf16.msra.mxu0 %v3133_v2  ;;  %v3163_v7 = vld [vmem:[%s4460_s1 + $0x88] sm:$0xff]   ;;  %v3187_v11 = vld [vmem:[%s4460_s1 + $0x90] sm:$0xff]  }
   0x5   :  { %2490 = vmatpush3.bf16.msra.mxu1 %v3139_v3  ;;  %2433 = vmatprep.subr.bf16.mxu0 %v3145_v4  ;;  %v3193_v12 = vld [vmem:[%s4460_s1 + $0x58] sm:$0xff]   ;;  %v3217_v16 = vld [vmem:[%s4460_s1 + $0x60] sm:$0xff]   ;;  %v3241_v20 = vld [vmem:[%s4460_s1 + $0x68] sm:$0xff]  }
   0x6   :  { %2491 = vmatprep.subr.bf16.mxu1 %v3151_v5  ;;  %v3199_v13 = vld [vmem:[%s4460_s1 + $0xd8] sm:$0xff]   ;;  %v3223_v17 = vld [vmem:[%s4460_s1 + $0xe0] sm:$0xff]   ;;  %v3247_v21 = vld [vmem:[%s4460_s1 + $0xe8] sm:$0xff]  }
   0x7   :  { %v3205_v14 = vld [vmem:[%s4460_s1 + $0x18] sm:$0xff]   ;;  %v3229_v18 = vld [vmem:[%s4460_s1 + $0x20] sm:$0xff]   ;;  %v3253_v22 = vld [vmem:[%s4460_s1 + $0x28] sm:$0xff]  }
   0x8   :  { %2434 = vmatpush3.bf16.msra.mxu0 %v3157_v6  ;;  %v3211_v15 = vld [vmem:[%s4460_s1 + $0x98] sm:$0xff]   ;;  %v3235_v19 = vld [vmem:[%s4460_s1 + $0xa0] sm:$0xff]   ;;  %v3259_v23 = vld [vmem:[%s4460_s1 + $0xa8] sm:$0xff]  }
   0x9   :  { %2492 = vmatpush3.bf16.msra.mxu1 %v3163_v7  ;;  %2435 = vmatprep.subr.bf16.mxu0 %v3169_v8  ;;  %v3265_v24 = vld [vmem:[%s4460_s1 + $0x70] sm:$0xff]   ;;  %v3289_v28 = vld [vmem:[%s4460_s1 + $0x78] sm:$0xff]   ;;  %v45_v54 = vld [vmem:[%s4461_s0 + $0xc0] sm:$0x11] }
   0xa   :  { %2493 = vmatprep.subr.bf16.mxu1 %v3175_v9  ;;  %v3271_v25 = vld [vmem:[%s4460_s1 + $0xf0] sm:$0xff]   ;;  %v3295_v29 = vld [vmem:[%s4460_s1 + $0xf8] sm:$0xff]   ;;  %v46_v55 = vld [vmem:[%s4461_s0 + $0xc8] sm:$0x11]  ;;  %v2208_v58 = vcombine.high %v45_v54, %v45_v54  ;;  %v2207_v60 = vcombine.low %v45_v54, %v45_v54 }
   0xb   :  { %v3277_v26 = vld [vmem:[%s4460_s1 + $0x30] sm:$0xff]   ;;  %v3301_v30 = vld [vmem:[%s4460_s1 + $0x38] sm:$0xff]   ;;  %v2210_v59 = vcombine.high %v46_v55, %v46_v55  ;;  %v2209_v61 = vcombine.low %v46_v55, %v46_v55 }
   0xc   :  { %2436 = vmatpush3.bf16.msra.mxu0 %v3181_v10  ;;  %v3283_v27 = vld [vmem:[%s4460_s1 + $0xb0] sm:$0xff]   ;;  %v3307_v31 = vld [vmem:[%s4460_s1 + $0xb8] sm:$0xff]  }
   0xd   :  { %2494 = vmatpush3.bf16.msra.mxu1 %v3187_v11  ;;  %2437 = vmatprep.subr.bf16.mxu0 %v3193_v12  ;;  %v2927_v32 = vld [vmem:[%s4461_s0] ss:$16 sps:$4 sm:$0xff]   ;;  %v2929_v33 = vld [vmem:[%s4461_s0 + $0x4] ss:$16 sps:$4 sm:$0xff]   ;;  %v2930_v34 = vld [vmem:[%s4461_s0 + $0x8] ss:$16 sps:$4 sm:$0xff]  }
   0xe   :  { %2495 = vmatprep.subr.bf16.mxu1 %v3199_v13  ;;  %v2932_v35 = vld [vmem:[%s4461_s0 + $0xc] ss:$16 sps:$4 sm:$0xff]   ;;  %476 = vmatprep.mubr.bf16.mxu0 %v2929_v33  ;;  %v2933_v36 = vld [vmem:[%s4461_s0 + $0x24] ss:$16 sps:$4 sm:$0xff]   ;;  %v2937_v38 = vld [vmem:[%s4461_s0 + $0x20] ss:$16 sps:$4 sm:$0xff]  }
   0xf   :  { %564 = vmatprep.mubr.bf16.mxu1 %v2932_v35  ;;  %v2935_v37 = vld [vmem:[%s4461_s0 + $0x2c] ss:$16 sps:$4 sm:$0xff]   ;;  %v2938_v39 = vld [vmem:[%s4461_s0 + $0x28] ss:$16 sps:$4 sm:$0xff]   ;;  %v2939_v40 = vld [vmem:[%s4461_s0 + $0x44] ss:$16 sps:$4 sm:$0xff]  }
  0x10   :  { %2438 = vmatpush3.bf16.msra.mxu0 %v3205_v14  ;;  %v2941_v41 = vld [vmem:[%s4461_s0 + $0x4c] ss:$16 sps:$4 sm:$0xff]   ;;  %v2943_v42 = vld [vmem:[%s4461_s0 + $0x40] ss:$16 sps:$4 sm:$0xff]   ;;  %v2944_v43 = vld [vmem:[%s4461_s0 + $0x48] ss:$16 sps:$4 sm:$0xff]  }
  0x11   :  { %2496 = vmatpush3.bf16.msra.mxu1 %v3211_v15  ;;  %2439 = vmatprep.subr.bf16.mxu0 %v3217_v16  ;;  %v2945_v44 = vld [vmem:[%s4461_s0 + $0x64] ss:$16 sps:$4 sm:$0xff]   ;;  %v2947_v45 = vld [vmem:[%s4461_s0 + $0x6c] ss:$16 sps:$4 sm:$0xff]   ;;  %v2949_v46 = vld [vmem:[%s4461_s0 + $0x60] ss:$16 sps:$4 sm:$0xff]  }
  0x12   :  { %2497 = vmatprep.subr.bf16.mxu1 %v3223_v17  ;;  %v2950_v47 = vld [vmem:[%s4461_s0 + $0x68] ss:$16 sps:$4 sm:$0xff]   ;;  %v2951_v48 = vld [vmem:[%s4461_s0 + $0x84] ss:$16 sps:$4 sm:$0xff]   ;;  %v2953_v49 = vld [vmem:[%s4461_s0 + $0x8c] ss:$16 sps:$4 sm:$0xff]  }
  0x13   :  { %v2955_v50 = vld [vmem:[%s4461_s0 + $0x80] ss:$16 sps:$4 sm:$0xff]   ;;  %v2956_v51 = vld [vmem:[%s4461_s0 + $0x88] ss:$16 sps:$4 sm:$0xff]   ;;  %v2957_v52 = vld [vmem:[%s4461_s0 + $0xa4] ss:$16 sps:$4 sm:$0xff]  }
  0x14   :  { %2440 = vmatpush3.bf16.msra.mxu0 %v3229_v18  ;;  %v2959_v53 = vld [vmem:[%s4461_s0 + $0xac] ss:$16 sps:$4 sm:$0xff]   ;;  %v2961_v56 = vld [vmem:[%s4461_s0 + $0xa0] ss:$16 sps:$4 sm:$0xff]   ;;  %v2962_v57 = vld [vmem:[%s4461_s0 + $0xa8] ss:$16 sps:$4 sm:$0xff]  }
  0x15   :  { %2498 = vmatpush3.bf16.msra.mxu1 %v3235_v19  ;;  %2441 = vmatprep.subr.bf16.mxu0 %v3241_v20  ;;  %v2969_v62 = vld [vmem:[%s4461_s0 + $0xd4] ss:$16 sps:$4 sm:$0xff]   ;;  %v2972_v63 = vld [vmem:[%s4461_s0 + $0xdc] ss:$16 sps:$4 sm:$0xff]   ;;  %v2970_v33 = vld [vmem:[%s4461_s0 + $0xd8] ss:$16 sps:$4 sm:$0xff]  }
  0x16   :  { %2499 = vmatprep.subr.bf16.mxu1 %v3247_v21  ;;  %v2975_v35 = vld [vmem:[%s4461_s0 + $0xfc] ss:$16 sps:$4 sm:$0xff]   ;;  %v3001_v54 = vld [vmem:[%s4461_s0 + $0x170] ss:$16 sps:$4 sm:$0xff]  }
  0x18   :  { %2442 = vmatpush3.bf16.msra.mxu0 %v3253_v22 }
  0x19   :  { %2500 = vmatpush3.bf16.msra.mxu1 %v3259_v23  ;;  %2443 = vmatprep.subr.bf16.mxu0 %v3265_v24 }
  0x1a   :  { %2501 = vmatprep.subr.bf16.mxu1 %v3271_v25 }
  0x1c   :  { %2444 = vmatpush3.bf16.msra.mxu0 %v3277_v26 }
  0x1d   :  { %2502 = vmatpush3.bf16.msra.mxu1 %v3283_v27  ;;  %2445 = vmatprep.subr.bf16.mxu0 %v3289_v28 }
  0x1e   :  { %2503 = vmatprep.subr.bf16.mxu1 %v3295_v29 }
  0x20   :  { %2446 = vmatpush3.bf16.msra.mxu0 %v3301_v30 }
  0x21   :  { %2504 = vmatpush3.bf16.msra.mxu1 %v3307_v31  ;;  %2547 = vmatprep.subr.bf16.mxu0 %v3122_v0 }
  0x22   :  { %2605 = vmatprep.subr.bf16.mxu1 %v3127_v1 }
  0x23   :  { %477 = vmatmul.mubr.bf16.vlgmr.msra.gmra.mrb[0].mxu0 %v2927_v32  ;;  %v2967_v32 = vld [vmem:[%s4461_s0 + $0xd0] ss:$16 sps:$4 sm:$0xff]  }
  0x24   :  { %565 = vmatmul.mubr.bf16.vlgmr.msra.gmra.mrb[0].mxu1 %v2930_v34  ;;  %2548 = vmatpush3.bf16.msra.mxu0 %v3133_v2  ;;  %v2973_v34 = vld [vmem:[%s4461_s0 + $0xf4] ss:$16 sps:$4 sm:$0xff]  }
  0x25   :  { %2606 = vmatpush3.bf16.msra.mxu1 %v3139_v3  ;;  %484 = vmatprep.mubr.bf16.mxu0 %v2933_v36  ;;  %v2977_v36 = vld [vmem:[%s4461_s0 + $0xf0] ss:$16 sps:$4 sm:$0xff]  }
  0x26   :  { %572 = vmatprep.mubr.bf16.mxu1 %v2935_v37  ;;  %2549 = vmatprep.subr.bf16.mxu0 %v3145_v4  ;;  %v2978_v37 = vld [vmem:[%s4461_s0 + $0xf8] ss:$16 sps:$4 sm:$0xff]  }
  0x27   :  { %2607 = vmatprep.subr.bf16.mxu1 %v3151_v5 }
  0x28   :  { %2550 = vmatpush3.bf16.msra.mxu0 %v3157_v6 }
  0x29   :  { %2608 = vmatpush3.bf16.msra.mxu1 %v3163_v7  ;;  %2551 = vmatprep.subr.bf16.mxu0 %v3169_v8 }
  0x2a   :  { %2609 = vmatprep.subr.bf16.mxu1 %v3175_v9 }
  0x2b   :  { %485 = vmatmul.mubr.bf16.gmra.mrb[4].mxu0 %v2937_v38  ;;  %v2979_v38 = vld [vmem:[%s4461_s0 + $0x114] ss:$16 sps:$4 sm:$0xff]  }
  0x2c   :  { %573 = vmatmul.mubr.bf16.gmra.mrb[4].mxu1 %v2938_v39  ;;  %492 = vmatprep.mubr.bf16.mxu0 %v2939_v40  ;;  %v2981_v39 = vld [vmem:[%s4461_s0 + $0x11c] ss:$16 sps:$4 sm:$0xff]   ;;  %v2983_v40 = vld [vmem:[%s4461_s0 + $0x110] ss:$16 sps:$4 sm:$0xff]  }
  0x2d   :  { %580 = vmatprep.mubr.bf16.mxu1 %v2941_v41  ;;  %2552 = vmatpush3.bf16.msra.mxu0 %v3181_v10  ;;  %v2984_v41 = vld [vmem:[%s4461_s0 + $0x118] ss:$16 sps:$4 sm:$0xff]  }
  0x2e   :  { %2610 = vmatpush3.bf16.msra.mxu1 %v3187_v11  ;;  %2553 = vmatprep.subr.bf16.mxu0 %v3193_v12 }
  0x2f   :  { %2611 = vmatprep.subr.bf16.mxu1 %v3199_v13 }
  0x31   :  { %2554 = vmatpush3.bf16.msra.mxu0 %v3205_v14 }
  0x32   :  { %2612 = vmatpush3.bf16.msra.mxu1 %v3211_v15  ;;  %2555 = vmatprep.subr.bf16.mxu0 %v3217_v16 }
  0x33   :  { %493 = vmatmul.mubr.bf16.gmra.mrb[8].mxu0 %v2943_v42  ;;  %2613 = vmatprep.subr.bf16.mxu1 %v3223_v17  ;;  %v2985_v42 = vld [vmem:[%s4461_s0 + $0x134] ss:$16 sps:$4 sm:$0xff]  }
  0x34   :  { %581 = vmatmul.mubr.bf16.gmra.mrb[8].mxu1 %v2944_v43  ;;  %500 = vmatprep.mubr.bf16.mxu0 %v2945_v44  ;;  %v2987_v43 = vld [vmem:[%s4461_s0 + $0x13c] ss:$16 sps:$4 sm:$0xff]   ;;  %v2989_v44 = vld [vmem:[%s4461_s0 + $0x130] ss:$16 sps:$4 sm:$0xff]  }
  0x35   :  { %588 = vmatprep.mubr.bf16.mxu1 %v2947_v45  ;;  %2556 = vmatpush3.bf16.msra.mxu0 %v3229_v18  ;;  %v2990_v45 = vld [vmem:[%s4461_s0 + $0x138] ss:$16 sps:$4 sm:$0xff]  }
  0x36   :  { %2614 = vmatpush3.bf16.msra.mxu1 %v3235_v19  ;;  %2557 = vmatprep.subr.bf16.mxu0 %v3241_v20 }
  0x37   :  { %2615 = vmatprep.subr.bf16.mxu1 %v3247_v21 }
  0x39   :  { %2558 = vmatpush3.bf16.msra.mxu0 %v3253_v22 }
  0x3a   :  { %2616 = vmatpush3.bf16.msra.mxu1 %v3259_v23  ;;  %2559 = vmatprep.subr.bf16.mxu0 %v3265_v24 }
  0x3b   :  { %501 = vmatmul.mubr.bf16.gmra.mrb[12].mxu0 %v2949_v46  ;;  %2617 = vmatprep.subr.bf16.mxu1 %v3271_v25  ;;  %v2991_v46 = vld [vmem:[%s4461_s0 + $0x154] ss:$16 sps:$4 sm:$0xff]  }
  0x3c   :  { %589 = vmatmul.mubr.bf16.gmra.mrb[12].mxu1 %v2950_v47  ;;  %508 = vmatprep.mubr.bf16.mxu0 %v2951_v48  ;;  %v2993_v47 = vld [vmem:[%s4461_s0 + $0x15c] ss:$16 sps:$4 sm:$0xff]   ;;  %v2995_v48 = vld [vmem:[%s4461_s0 + $0x150] ss:$16 sps:$4 sm:$0xff]  }
  0x3d   :  { %596 = vmatprep.mubr.bf16.mxu1 %v2953_v49  ;;  %2560 = vmatpush3.bf16.msra.mxu0 %v3277_v26  ;;  %v2996_v49 = vld [vmem:[%s4461_s0 + $0x158] ss:$16 sps:$4 sm:$0xff]  }
  0x3e   :  { %2618 = vmatpush3.bf16.msra.mxu1 %v3283_v27  ;;  %2561 = vmatprep.subr.bf16.mxu0 %v3289_v28 }
  0x3f   :  { %2619 = vmatprep.subr.bf16.mxu1 %v3295_v29 }
  0x41   :  { %2562 = vmatpush3.bf16.msra.mxu0 %v3301_v30 }
  0x42   :  { %2620 = vmatpush3.bf16.msra.mxu1 %v3307_v31  ;;  %2663 = vmatprep.subr.bf16.mxu0 %v3122_v0 }
  0x43   :  { %509 = vmatmul.mubr.bf16.gmra.mrb[16].mxu0 %v2955_v50  ;;  %2721 = vmatprep.subr.bf16.mxu1 %v3127_v1  ;;  %v2997_v50 = vld [vmem:[%s4461_s0 + $0x174] ss:$16 sps:$4 sm:$0xff]  }
  0x44   :  { %597 = vmatmul.mubr.bf16.gmra.mrb[16].mxu1 %v2956_v51  ;;  %516 = vmatprep.mubr.bf16.mxu0 %v2957_v52  ;;  %v2999_v51 = vld [vmem:[%s4461_s0 + $0x17c] ss:$16 sps:$4 sm:$0xff]   ;;  %v2267_v52 = vld [vmem:[%s4461_s0 + $0x190] sm:$0x11] }
  0x45   :  { %604 = vmatprep.mubr.bf16.mxu1 %v2959_v53  ;;  %v2268_v53 = vld [vmem:[%s4461_s0 + $0x198] sm:$0x11] }
  0x46   :  { %v2296_v55 = vcombine.high %v2268_v53, %v2268_v53 }
  0x4b   :  { %517 = vmatmul.mubr.bf16.gmra.mrb[20].mxu0 %v2961_v56  ;;  %v2293_v56 = vcombine.low %v2267_v52, %v2267_v52 }
  0x4c   :  { %605 = vmatmul.mubr.bf16.gmra.mrb[20].mxu1 %v2962_v57  ;;  %524 = vmatprep.mubr.bf16.mxu0 %v2208_v58  ;;  %v2295_v57 = vcombine.low %v2268_v53, %v2268_v53  ;;  %v3009_v58 = vld [vmem:[%s4461_s0 + $0x1a4] ss:$16 sps:$4 sm:$0xff]  }
  0x4d   :  { %612 = vmatprep.mubr.bf16.mxu1 %v2210_v59  ;;  %v3012_v59 = vld [vmem:[%s4461_s0 + $0x1ac] ss:$16 sps:$4 sm:$0xff]  }
  0x53   :  { %525 = vmatmul.mubr.bf16.gmra.mrb[24].mxu0 %v2207_v60  ;;  %v3007_v60 = vld [vmem:[%s4461_s0 + $0x1a0] ss:$16 sps:$4 sm:$0xff]  }
  0x54   :  { %613 = vmatmul.mubr.bf16.gmra.mrb[24].mxu1 %v2209_v61  ;;  %813 = vmatprep.mubr.bf16.mxu0 %v2969_v62  ;;  %v3010_v61 = vld [vmem:[%s4461_s0 + $0x1a8] ss:$16 sps:$4 sm:$0xff]   ;;  %v3013_v62 = vld [vmem:[%s4461_s0 + $0x1c4] ss:$16 sps:$4 sm:$0xff]  }
  0x55   :  { %901 = vmatprep.mubr.bf16.mxu1 %v2972_v63  ;;  %v3015_v63 = vld [vmem:[%s4461_s0 + $0x1cc] ss:$16 sps:$4 sm:$0xff]  }
  0x5b   :  { %814 = vmatmul.mubr.bf16.vlgmr.msra.gmra.mrb[28].mxu0 %v2967_v32  ;;  %v3017_v32 = vld [vmem:[%s4461_s0 + $0x1c0] ss:$16 sps:$4 sm:$0xff]  }
  0x5c   :  { %902 = vmatmul.mubr.bf16.vlgmr.msra.gmra.mrb[28].mxu1 %v2970_v33  ;;  %2664 = vmatpush3.bf16.msra.mxu0 %v3133_v2  ;;  %v3018_v33 = vld [vmem:[%s4461_s0 + $0x1c8] ss:$16 sps:$4 sm:$0xff]  }
  0x5d   :  { %2722 = vmatpush3.bf16.msra.mxu1 %v3139_v3  ;;  %821 = vmatprep.mubr.bf16.mxu0 %v2973_v34  ;;  %v3059_v34 = vld [vmem:[%s4461_s0 + $0x2b4] ss:$16 sps:$4 sm:$0xff]  }
  0x5e   :  { %909 = vmatprep.mubr.bf16.mxu1 %v2975_v35  ;;  %2665 = vmatprep.subr.bf16.mxu0 %v3145_v4  ;;  %v3061_v35 = vld [vmem:[%s4461_s0 + $0x2bc] ss:$16 sps:$4 sm:$0xff]  }
  0x5f   :  { %2723 = vmatprep.subr.bf16.mxu1 %v3151_v5 }
  0x60   :  { %2666 = vmatpush3.bf16.msra.mxu0 %v3157_v6 }
  0x61   :  { %2724 = vmatpush3.bf16.msra.mxu1 %v3163_v7  ;;  %2667 = vmatprep.subr.bf16.mxu0 %v3169_v8 }
  0x62   :  { %2725 = vmatprep.subr.bf16.mxu1 %v3175_v9 }
  0x63   :  { %822 = vmatmul.mubr.bf16.gmra.mrb[32].mxu0 %v2977_v36  ;;  %v3063_v36 = vld [vmem:[%s4461_s0 + $0x2b0] ss:$16 sps:$4 sm:$0xff]  }
  0x64   :  { %910 = vmatmul.mubr.bf16.gmra.mrb[32].mxu1 %v2978_v37  ;;  %829 = vmatprep.mubr.bf16.mxu0 %v2979_v38  ;;  %v3064_v37 = vld [vmem:[%s4461_s0 + $0x2b8] ss:$16 sps:$4 sm:$0xff]   ;;  %v3065_v38 = vld [vmem:[%s4461_s0 + $0x2d4] ss:$16 sps:$4 sm:$0xff]  }
  0x65   :  { %917 = vmatprep.mubr.bf16.mxu1 %v2981_v39  ;;  %2668 = vmatpush3.bf16.msra.mxu0 %v3181_v10  ;;  %v3067_v39 = vld [vmem:[%s4461_s0 + $0x2dc] ss:$16 sps:$4 sm:$0xff]  }
  0x66   :  { %2726 = vmatpush3.bf16.msra.mxu1 %v3187_v11  ;;  %2669 = vmatprep.subr.bf16.mxu0 %v3193_v12 }
  0x67   :  { %2727 = vmatprep.subr.bf16.mxu1 %v3199_v13 }
  0x69   :  { %2670 = vmatpush3.bf16.msra.mxu0 %v3205_v14 }
  0x6a   :  { %2728 = vmatpush3.bf16.msra.mxu1 %v3211_v15  ;;  %2671 = vmatprep.subr.bf16.mxu0 %v3217_v16 }
  0x6b   :  { %830 = vmatmul.mubr.bf16.gmra.mrb[36].mxu0 %v2983_v40  ;;  %2729 = vmatprep.subr.bf16.mxu1 %v3223_v17  ;;  %v3069_v40 = vld [vmem:[%s4461_s0 + $0x2d0] ss:$16 sps:$4 sm:$0xff]  }
  0x6c   :  { %918 = vmatmul.mubr.bf16.gmra.mrb[36].mxu1 %v2984_v41  ;;  %837 = vmatprep.mubr.bf16.mxu0 %v2985_v42  ;;  %v3070_v41 = vld [vmem:[%s4461_s0 + $0x2d8] ss:$16 sps:$4 sm:$0xff]   ;;  %v3071_v42 = vld [vmem:[%s4461_s0 + $0x2f4] ss:$16 sps:$4 sm:$0xff]  }
  0x6d   :  { %925 = vmatprep.mubr.bf16.mxu1 %v2987_v43  ;;  %2672 = vmatpush3.bf16.msra.mxu0 %v3229_v18  ;;  %v3073_v43 = vld [vmem:[%s4461_s0 + $0x2fc] ss:$16 sps:$4 sm:$0xff]  }
  0x6e   :  { %2730 = vmatpush3.bf16.msra.mxu1 %v3235_v19  ;;  %2673 = vmatprep.subr.bf16.mxu0 %v3241_v20 }
  0x6f   :  { %2731 = vmatprep.subr.bf16.mxu1 %v3247_v21 }
  0x71   :  { %2674 = vmatpush3.bf16.msra.mxu0 %v3253_v22 }
  0x72   :  { %2732 = vmatpush3.bf16.msra.mxu1 %v3259_v23  ;;  %2675 = vmatprep.subr.bf16.mxu0 %v3265_v24 }
  0x73   :  { %838 = vmatmul.mubr.bf16.gmra.mrb[40].mxu0 %v2989_v44  ;;  %2733 = vmatprep.subr.bf16.mxu1 %v3271_v25  ;;  %v3075_v44 = vld [vmem:[%s4461_s0 + $0x2f0] ss:$16 sps:$4 sm:$0xff]  }
  0x74   :  { %926 = vmatmul.mubr.bf16.gmra.mrb[40].mxu1 %v2990_v45  ;;  %845 = vmatprep.mubr.bf16.mxu0 %v2991_v46  ;;  %v3076_v45 = vld [vmem:[%s4461_s0 + $0x2f8] ss:$16 sps:$4 sm:$0xff]   ;;  %v3077_v46 = vld [vmem:[%s4461_s0 + $0x314] ss:$16 sps:$4 sm:$0xff]  }
  0x75   :  { %933 = vmatprep.mubr.bf16.mxu1 %v2993_v47  ;;  %2676 = vmatpush3.bf16.msra.mxu0 %v3277_v26  ;;  %v3079_v47 = vld [vmem:[%s4461_s0 + $0x31c] ss:$16 sps:$4 sm:$0xff]  }
  0x76   :  { %2734 = vmatpush3.bf16.msra.mxu1 %v3283_v27  ;;  %2677 = vmatprep.subr.bf16.mxu0 %v3289_v28 }
  0x77   :  { %2735 = vmatprep.subr.bf16.mxu1 %v3295_v29 }
  0x79   :  { %2678 = vmatpush3.bf16.msra.mxu0 %v3301_v30 }
  0x7a   :  { %2736 = vmatpush3.bf16.msra.mxu1 %v3307_v31  ;;  %2779 = vmatprep.subr.bf16.mxu0 %v3122_v0  ;;  %v3002_v0 = vld [vmem:[%s4461_s0 + $0x178] ss:$16 sps:$4 sm:$0xff]  }
  0x7b   :  { %846 = vmatmul.mubr.bf16.gmra.mrb[44].mxu0 %v2995_v48  ;;  %2837 = vmatprep.subr.bf16.mxu1 %v3127_v1  ;;  %v2294_v1 = vcombine.high %v2267_v52, %v2267_v52  ;;  %v2375_v48 = vld [vmem:[%s4461_s0 + $0x330] sm:$0x11] }
  0x7c   :  { %934 = vmatmul.mubr.bf16.gmra.mrb[44].mxu1 %v2996_v49  ;;  %853 = vmatprep.mubr.bf16.mxu0 %v2997_v50  ;;  %v2376_v49 = vld [vmem:[%s4461_s0 + $0x338] sm:$0x11]  ;;  %v3081_v50 = vld [vmem:[%s4461_s0 + $0x310] ss:$16 sps:$4 sm:$0xff]   ;;  %v2402_v52 = vcombine.high %v2375_v48, %v2375_v48 }
  0x7d   :  { %941 = vmatprep.mubr.bf16.mxu1 %v2999_v51  ;;  %v3082_v51 = vld [vmem:[%s4461_s0 + $0x318] ss:$16 sps:$4 sm:$0xff]   ;;  %v2404_v53 = vcombine.high %v2376_v49, %v2376_v49 }
  0x83   :  { %854 = vmatmul.mubr.bf16.gmra.mrb[48].mxu0 %v3001_v54 }
  0x84   :  { %942 = vmatmul.mubr.bf16.gmra.mrb[48].mxu1 %v3002_v0  ;;  %861 = vmatprep.mubr.bf16.mxu0 %v2294_v1  ;;  %v3722_v1 = vld [vmem:[%s4462_s2] ss:$0 sm:$0xff] }
  0x85   :  { %949 = vmatprep.mubr.bf16.mxu1 %v2296_v55 }
  0x8b   :  { %862 = vmatmul.mubr.bf16.gmra.mrb[52].mxu0 %v2293_v56  ;;  %v2401_v56 = vcombine.low %v2375_v48, %v2375_v48 }
  0x8c   :  { %950 = vmatmul.mubr.bf16.gmra.mrb[52].mxu1 %v2295_v57  ;;  %1150 = vmatprep.mubr.bf16.mxu0 %v3009_v58 }
  0x8d   :  { %1238 = vmatprep.mubr.bf16.mxu1 %v3012_v59 }
  0x93   :  { %1151 = vmatmul.mubr.bf16.vlgmr.msra.gmra.mrb[56].mxu0 %v3007_v60  ;;  %v2403_v60 = vcombine.low %v2376_v49, %v2376_v49 }
  0x94   :  { %1239 = vmatmul.mubr.bf16.vlgmr.msra.gmra.mrb[56].mxu1 %v3010_v61  ;;  %2780 = vmatpush3.bf16.msra.mxu0 %v3133_v2  ;;  %v3019_v2 = vld [vmem:[%s4461_s0 + $0x1e4] ss:$16 sps:$4 sm:$0xff]  }
  0x95   :  { %2838 = vmatpush3.bf16.msra.mxu1 %v3139_v3  ;;  %1158 = vmatprep.mubr.bf16.mxu0 %v3013_v62  ;;  %v3021_v3 = vld [vmem:[%s4461_s0 + $0x1ec] ss:$16 sps:$4 sm:$0xff]  }
  0x96   :  { %1246 = vmatprep.mubr.bf16.mxu1 %v3015_v63  ;;  %2781 = vmatprep.subr.bf16.mxu0 %v3145_v4  ;;  %v3023_v4 = vld [vmem:[%s4461_s0 + $0x1e0] ss:$16 sps:$4 sm:$0xff]  }
  0x97   :  { %2839 = vmatprep.subr.bf16.mxu1 %v3151_v5  ;;  %v3024_v5 = vld [vmem:[%s4461_s0 + $0x1e8] ss:$16 sps:$4 sm:$0xff]  }
  0x98   :  { %2782 = vmatpush3.bf16.msra.mxu0 %v3157_v6  ;;  %v3025_v6 = vld [vmem:[%s4461_s0 + $0x204] ss:$16 sps:$4 sm:$0xff]  }
  0x99   :  { %2840 = vmatpush3.bf16.msra.mxu1 %v3163_v7  ;;  %2783 = vmatprep.subr.bf16.mxu0 %v3169_v8  ;;  %v3027_v7 = vld [vmem:[%s4461_s0 + $0x20c] ss:$16 sps:$4 sm:$0xff]   ;;  %v3029_v8 = vld [vmem:[%s4461_s0 + $0x200] ss:$16 sps:$4 sm:$0xff]  }
  0x9a   :  { %2841 = vmatprep.subr.bf16.mxu1 %v3175_v9  ;;  %v3030_v9 = vld [vmem:[%s4461_s0 + $0x208] ss:$16 sps:$4 sm:$0xff]  }
  0x9b   :  { %1159 = vmatmul.mubr.bf16.gmra.mrb[60].mxu0 %v3017_v32 }
  0x9c   :  { %1247 = vmatmul.mubr.bf16.gmra.mrb[60].mxu1 %v3018_v33  ;;  %1166 = vmatprep.mubr.bf16.mxu0 %v3019_v2 }
  0x9d   :  { %1254 = vmatprep.mubr.bf16.mxu1 %v3021_v3  ;;  %2784 = vmatpush3.bf16.msra.mxu0 %v3181_v10  ;;  %v3031_v10 = vld [vmem:[%s4461_s0 + $0x224] ss:$16 sps:$4 sm:$0xff]  }
  0x9e   :  { %2842 = vmatpush3.bf16.msra.mxu1 %v3187_v11  ;;  %2785 = vmatprep.subr.bf16.mxu0 %v3193_v12  ;;  %v3033_v11 = vld [vmem:[%s4461_s0 + $0x22c] ss:$16 sps:$4 sm:$0xff]   ;;  %v3035_v12 = vld [vmem:[%s4461_s0 + $0x220] ss:$16 sps:$4 sm:$0xff]  }
  0x9f   :  { %2843 = vmatprep.subr.bf16.mxu1 %v3199_v13  ;;  %v3036_v13 = vld [vmem:[%s4461_s0 + $0x228] ss:$16 sps:$4 sm:$0xff]  }
  0xa1   :  { %2786 = vmatpush3.bf16.msra.mxu0 %v3205_v14  ;;  %v3037_v14 = vld [vmem:[%s4461_s0 + $0x244] ss:$16 sps:$4 sm:$0xff]  }
  0xa2   :  { %2844 = vmatpush3.bf16.msra.mxu1 %v3211_v15  ;;  %2787 = vmatprep.subr.bf16.mxu0 %v3217_v16  ;;  %v3039_v15 = vld [vmem:[%s4461_s0 + $0x24c] ss:$16 sps:$4 sm:$0xff]   ;;  %v2321_v16 = vld [vmem:[%s4461_s0 + $0x260] sm:$0x11] }
  0xa3   :  { %1167 = vmatmul.mubr.bf16.gmra.mrb[64].mxu0 %v3023_v4  ;;  %2845 = vmatprep.subr.bf16.mxu1 %v3223_v17  ;;  %v2322_v17 = vld [vmem:[%s4461_s0 + $0x268] sm:$0x11] }
  0xa4   :  { %1255 = vmatmul.mubr.bf16.gmra.mrb[64].mxu1 %v3024_v5  ;;  %1174 = vmatprep.mubr.bf16.mxu0 %v3025_v6 }
  0xa5   :  { %1262 = vmatprep.mubr.bf16.mxu1 %v3027_v7  ;;  %2788 = vmatpush3.bf16.msra.mxu0 %v3229_v18  ;;  %v3041_v18 = vld [vmem:[%s4461_s0 + $0x240] ss:$16 sps:$4 sm:$0xff]  }
  0xa6   :  { %2846 = vmatpush3.bf16.msra.mxu1 %v3235_v19  ;;  %2789 = vmatprep.subr.bf16.mxu0 %v3241_v20  ;;  %v3042_v19 = vld [vmem:[%s4461_s0 + $0x248] ss:$16 sps:$4 sm:$0xff]   ;;  %v2348_v20 = vcombine.high %v2321_v16, %v2321_v16 }
  0xa7   :  { %2847 = vmatprep.subr.bf16.mxu1 %v3247_v21  ;;  %v2350_v21 = vcombine.high %v2322_v17, %v2322_v17 }
  0xa9   :  { %2790 = vmatpush3.bf16.msra.mxu0 %v3253_v22  ;;  %v2347_v22 = vcombine.low %v2321_v16, %v2321_v16 }
  0xaa   :  { %2848 = vmatpush3.bf16.msra.mxu1 %v3259_v23  ;;  %2791 = vmatprep.subr.bf16.mxu0 %v3265_v24  ;;  %v2349_v23 = vcombine.low %v2322_v17, %v2322_v17  ;;  %v3049_v24 = vld [vmem:[%s4461_s0 + $0x274] ss:$16 sps:$4 sm:$0xff]  }
  0xab   :  { %1175 = vmatmul.mubr.bf16.gmra.mrb[68].mxu0 %v3029_v8  ;;  %2849 = vmatprep.subr.bf16.mxu1 %v3271_v25  ;;  %v3052_v25 = vld [vmem:[%s4461_s0 + $0x27c] ss:$16 sps:$4 sm:$0xff]  }
  0xac   :  { %1263 = vmatmul.mubr.bf16.gmra.mrb[68].mxu1 %v3030_v9  ;;  %1182 = vmatprep.mubr.bf16.mxu0 %v3031_v10 }
  0xad   :  { %1270 = vmatprep.mubr.bf16.mxu1 %v3033_v11  ;;  %2792 = vmatpush3.bf16.msra.mxu0 %v3277_v26  ;;  %v3047_v26 = vld [vmem:[%s4461_s0 + $0x270] ss:$16 sps:$4 sm:$0xff]  }
  0xae   :  { %2850 = vmatpush3.bf16.msra.mxu1 %v3283_v27  ;;  %2793 = vmatprep.subr.bf16.mxu0 %v3289_v28  ;;  %v3050_v27 = vld [vmem:[%s4461_s0 + $0x278] ss:$16 sps:$4 sm:$0xff]   ;;  %v3053_v28 = vld [vmem:[%s4461_s0 + $0x294] ss:$16 sps:$4 sm:$0xff]  }
  0xaf   :  { %2851 = vmatprep.subr.bf16.mxu1 %v3295_v29  ;;  %v3055_v29 = vld [vmem:[%s4461_s0 + $0x29c] ss:$16 sps:$4 sm:$0xff]  }
  0xb1   :  { %2794 = vmatpush3.bf16.msra.mxu0 %v3301_v30  ;;  %v3057_v30 = vld [vmem:[%s4461_s0 + $0x290] ss:$16 sps:$4 sm:$0xff]  }
  0xb2   :  { %2852 = vmatpush3.bf16.msra.mxu1 %v3307_v31  ;;  %v3058_v31 = vld [vmem:[%s4461_s0 + $0x298] ss:$16 sps:$4 sm:$0xff]  }
  0xb3   :  { %1183 = vmatmul.mubr.bf16.gmra.mrb[72].mxu0 %v3035_v12 }
  0xb4   :  { %1271 = vmatmul.mubr.bf16.gmra.mrb[72].mxu1 %v3036_v13  ;;  %1190 = vmatprep.mubr.bf16.mxu0 %v3037_v14 }
  0xb5   :  { %1278 = vmatprep.mubr.bf16.mxu1 %v3039_v15 }
  0xbb   :  { %1191 = vmatmul.mubr.bf16.gmra.mrb[76].mxu0 %v3041_v18 }
  0xbc   :  { %1279 = vmatmul.mubr.bf16.gmra.mrb[76].mxu1 %v3042_v19  ;;  %1198 = vmatprep.mubr.bf16.mxu0 %v2348_v20 }
  0xbd   :  { %1286 = vmatprep.mubr.bf16.mxu1 %v2350_v21 }
  0xc3   :  { %1199 = vmatmul.mubr.bf16.gmra.mrb[80].mxu0 %v2347_v22 }
  0xc4   :  { %1287 = vmatmul.mubr.bf16.gmra.mrb[80].mxu1 %v2349_v23  ;;  %1487 = vmatprep.mubr.bf16.mxu0 %v3049_v24 }
  0xc5   :  { %1575 = vmatprep.mubr.bf16.mxu1 %v3052_v25 }
  0xcb   :  { %1488 = vmatmul.mubr.bf16.vlgmr.msra.gmra.mrb[84].mxu0 %v3047_v26 }
  0xcc   :  { %1576 = vmatmul.mubr.bf16.vlgmr.msra.gmra.mrb[84].mxu1 %v3050_v27  ;;  %1495 = vmatprep.mubr.bf16.mxu0 %v3053_v28 }
  0xcd   :  { %1583 = vmatprep.mubr.bf16.mxu1 %v3055_v29 }
  0xd3   :  { %1496 = vmatmul.mubr.bf16.gmra.mrb[88].mxu0 %v3057_v30 }
  0xd4   :  { %1584 = vmatmul.mubr.bf16.gmra.mrb[88].mxu1 %v3058_v31  ;;  %1503 = vmatprep.mubr.bf16.mxu0 %v3059_v34 }
  0xd5   :  { %1591 = vmatprep.mubr.bf16.mxu1 %v3061_v35 }
  0xdb   :  { %1504 = vmatmul.mubr.bf16.gmra.mrb[92].mxu0 %v3063_v36 }
  0xdc   :  { %1592 = vmatmul.mubr.bf16.gmra.mrb[92].mxu1 %v3064_v37  ;;  %1511 = vmatprep.mubr.bf16.mxu0 %v3065_v38 }
  0xdd   :  { %1599 = vmatprep.mubr.bf16.mxu1 %v3067_v39 }
  0xe3   :  { %1512 = vmatmul.mubr.bf16.gmra.mrb[96].mxu0 %v3069_v40 }
  0xe4   :  { %1600 = vmatmul.mubr.bf16.gmra.mrb[96].mxu1 %v3070_v41  ;;  %1519 = vmatprep.mubr.bf16.mxu0 %v3071_v42 }
  0xe5   :  { %1607 = vmatprep.mubr.bf16.mxu1 %v3073_v43 }
  0xeb   :  { %1520 = vmatmul.mubr.bf16.gmra.mrb[100].mxu0 %v3075_v44 }
  0xec   :  { %1608 = vmatmul.mubr.bf16.gmra.mrb[100].mxu1 %v3076_v45  ;;  %1527 = vmatprep.mubr.bf16.mxu0 %v3077_v46 }
  0xed   :  { %1615 = vmatprep.mubr.bf16.mxu1 %v3079_v47 }
  0xf3   :  { %1528 = vmatmul.mubr.bf16.gmra.mrb[104].mxu0 %v3081_v50 }
  0xf4   :  { %1616 = vmatmul.mubr.bf16.gmra.mrb[104].mxu1 %v3082_v51  ;;  %1535 = vmatprep.mubr.bf16.mxu0 %v2402_v52 }
  0xf5   :  { %1623 = vmatprep.mubr.bf16.mxu1 %v2404_v53 }
  0xf6   :  { %v2447_v54 = vpop.f32.mrb[0].mxu0 }
  0xf7   :  { %v2505_v0 = vpop.f32.mrb[0].mxu1  ;;  %v2448_v55 = vpop.f32.mrb[1].mxu0 }
  0xf8   :  { %v2449_v57 = vadd.f32 %v2448_v55, %v2447_v54  ;;  %v2506_v58 = vpop.f32.mrb[1].mxu1  ;;  %v2450_v59 = vpop.f32.mrb[2].mxu0 }
  0xf9   :  { %v2507_v61 = vadd.f32 %v2506_v58, %v2505_v0  ;;  %v2508_v62 = vpop.f32.mrb[2].mxu1  ;;  %v2451_v63 = vpop.f32.mrb[3].mxu0 }
  0xfa   :  { %v479_v32 = vadd.f32 %v2449_v57, %v3722_v1  ;;  %v2452_v33 = vadd.f32 %v2451_v63, %v2450_v59  ;;  %v2509_v2 = vpop.f32.mrb[3].mxu1 }
  0xfb   :  { %v2510_v3 = vadd.f32 %v2509_v2, %v2508_v62  ;;  %1536 = vmatmul.mubr.bf16.gmra.mrb[108].mxu0 %v2401_v56 }
  0xfc   :  { %v3725_v4 = vadd.f32 %v2507_v61, %v479_v32  ;;  %v482_v5 = vadd.f32 %v2452_v33, %v3722_v1  ;;  %1624 = vmatmul.mubr.bf16.gmra.mrb[108].mxu1 %v2403_v60 }
  0xfe   :  { %v3728_v6 = vadd.f32 %v2510_v3, %v482_v5  ;;  %v2453_v7 = vpop.f32.mrb[4].mxu0 }
  0xff   :  { %v2511_v8 = vpop.f32.mrb[4].mxu1  ;;  %v2454_v9 = vpop.f32.mrb[5].mxu0 }
 0x100   :  { %v2455_v10 = vadd.f32 %v2454_v9, %v2453_v7  ;;  %v2512_v11 = vpop.f32.mrb[5].mxu1  ;;  %v2456_v12 = vpop.f32.mrb[6].mxu0 }
 0x101   :  { %v2513_v13 = vadd.f32 %v2512_v11, %v2511_v8  ;;  %v2514_v14 = vpop.f32.mrb[6].mxu1  ;;  %v2457_v15 = vpop.f32.mrb[7].mxu0 }
 0x102   :  { %v487_v16 = vadd.f32 %v2455_v10, %v3722_v1  ;;  %v2458_v17 = vadd.f32 %v2457_v15, %v2456_v12  ;;  %v2515_v18 = vpop.f32.mrb[7].mxu1 }
 0x103   :  { %v2516_v19 = vadd.f32 %v2515_v18, %v2514_v14 }
 0x104   :  { %v3731_v20 = vadd.f32 %v2513_v13, %v487_v16  ;;  %v490_v21 = vadd.f32 %v2458_v17, %v3722_v1 }
 0x106   :  { %v3734_v22 = vadd.f32 %v2516_v19, %v490_v21  ;;  %v2459_v23 = vpop.f32.mrb[8].mxu0 }
 0x107   :  { %v2517_v24 = vpop.f32.mrb[8].mxu1  ;;  %v2460_v25 = vpop.f32.mrb[9].mxu0 }
 0x108   :  { %v2461_v26 = vadd.f32 %v2460_v25, %v2459_v23  ;;  %v2518_v27 = vpop.f32.mrb[9].mxu1  ;;  %v2462_v28 = vpop.f32.mrb[10].mxu0 }
 0x109   :  { %v2519_v29 = vadd.f32 %v2518_v27, %v2517_v24  ;;  %v2520_v30 = vpop.f32.mrb[10].mxu1  ;;  %v2463_v31 = vpop.f32.mrb[11].mxu0 }
 0x10a   :  { %v495_v34 = vadd.f32 %v2461_v26, %v3722_v1  ;;  %v2464_v35 = vadd.f32 %v2463_v31, %v2462_v28  ;;  %v2521_v36 = vpop.f32.mrb[11].mxu1 }
 0x10b   :  { %v2522_v37 = vadd.f32 %v2521_v36, %v2520_v30 }
 0x10c   :  { %v3737_v38 = vadd.f32 %v2519_v29, %v495_v34  ;;  %v498_v39 = vadd.f32 %v2464_v35, %v3722_v1 }
 0x10e   :  { %v3740_v40 = vadd.f32 %v2522_v37, %v498_v39  ;;  %v2465_v41 = vpop.f32.mrb[12].mxu0 }
 0x10f   :  { %v2523_v42 = vpop.f32.mrb[12].mxu1  ;;  %v2466_v43 = vpop.f32.mrb[13].mxu0 }
 0x110   :  { %v2467_v44 = vadd.f32 %v2466_v43, %v2465_v41  ;;  %v2524_v45 = vpop.f32.mrb[13].mxu1  ;;  %v2468_v46 = vpop.f32.mrb[14].mxu0 }
 0x111   :  { %v2525_v47 = vadd.f32 %v2524_v45, %v2523_v42  ;;  %v2526_v48 = vpop.f32.mrb[14].mxu1  ;;  %v2469_v49 = vpop.f32.mrb[15].mxu0 }
 0x112   :  { %v503_v50 = vadd.f32 %v2467_v44, %v3722_v1  ;;  %v2470_v51 = vadd.f32 %v2469_v49, %v2468_v46  ;;  %v2527_v52 = vpop.f32.mrb[15].mxu1 }
 0x113   :  { %v2528_v53 = vadd.f32 %v2527_v52, %v2526_v48 }
 0x114   :  { %v3743_v54 = vadd.f32 %v2525_v47, %v503_v50  ;;  %v506_v0 = vadd.f32 %v2470_v51, %v3722_v1 }
 0x116   :  { %v3746_v55 = vadd.f32 %v2528_v53, %v506_v0  ;;  %v2471_v56 = vpop.f32.mrb[16].mxu0 }
 0x117   :  { %v2529_v57 = vpop.f32.mrb[16].mxu1  ;;  %v2472_v58 = vpop.f32.mrb[17].mxu0 }
 0x118   :  { %v2473_v59 = vadd.f32 %v2472_v58, %v2471_v56  ;;  %v2530_v60 = vpop.f32.mrb[17].mxu1  ;;  %v2474_v61 = vpop.f32.mrb[18].mxu0 }
 0x119   :  { %v2531_v62 = vadd.f32 %v2530_v60, %v2529_v57  ;;  %v2532_v63 = vpop.f32.mrb[18].mxu1  ;;  %v2475_v32 = vpop.f32.mrb[19].mxu0 }
 0x11a   :  { %v511_v33 = vadd.f32 %v2473_v59, %v3722_v1  ;;  %v2476_v2 = vadd.f32 %v2475_v32, %v2474_v61  ;;  %v2533_v3 = vpop.f32.mrb[19].mxu1 }
 0x11b   :  { %v2534_v5 = vadd.f32 %v2533_v3, %v2532_v63 }
 0x11c   :  { %v3749_v7 = vadd.f32 %v2531_v62, %v511_v33  ;;  %v514_v8 = vadd.f32 %v2476_v2, %v3722_v1 }
 0x11e   :  { %v3752_v9 = vadd.f32 %v2534_v5, %v514_v8  ;;  %v2477_v10 = vpop.f32.mrb[20].mxu0 }
 0x11f   :  { %v2535_v11 = vpop.f32.mrb[20].mxu1  ;;  %v2478_v12 = vpop.f32.mrb[21].mxu0 }
 0x120   :  { %v2479_v13 = vadd.f32 %v2478_v12, %v2477_v10  ;;  %v2536_v14 = vpop.f32.mrb[21].mxu1  ;;  %v2480_v15 = vpop.f32.mrb[22].mxu0 }
 0x121   :  { %v2537_v16 = vadd.f32 %v2536_v14, %v2535_v11  ;;  %v2538_v17 = vpop.f32.mrb[22].mxu1  ;;  %v2481_v18 = vpop.f32.mrb[23].mxu0 }
 0x122   :  { %v519_v19 = vadd.f32 %v2479_v13, %v3722_v1  ;;  %v2482_v21 = vadd.f32 %v2481_v18, %v2480_v15  ;;  %v2539_v23 = vpop.f32.mrb[23].mxu1 }
 0x123   :  { %v2540_v24 = vadd.f32 %v2539_v23, %v2538_v17 }
 0x124   :  { %v3755_v25 = vadd.f32 %v2537_v16, %v519_v19  ;;  %v522_v26 = vadd.f32 %v2482_v21, %v3722_v1 }
 0x126   :  { %v3758_v27 = vadd.f32 %v2540_v24, %v522_v26  ;;  %v2483_v28 = vpop.f32.mrb[24].mxu0 }
 0x127   :  { %v2541_v29 = vpop.f32.mrb[24].mxu1  ;;  %v2484_v30 = vpop.f32.mrb[25].mxu0 }
 0x128   :  { %v2485_v31 = vadd.f32 %v2484_v30, %v2483_v28  ;;  %v2542_v34 = vpop.f32.mrb[25].mxu1  ;;  %v2486_v35 = vpop.f32.mrb[26].mxu0 }
 0x129   :  { %v2543_v36 = vadd.f32 %v2542_v34, %v2541_v29  ;;  %v2544_v37 = vpop.f32.mrb[26].mxu1  ;;  %v2487_v39 = vpop.f32.mrb[27].mxu0 }
 0x12a   :  { %v527_v41 = vadd.f32 %v2485_v31, %v3722_v1  ;;  %v2545_v42 = vpop.f32.mrb[27].mxu1 }
 0x12c   :  { %v3761_v43 = vadd.f32 %v2543_v36, %v527_v41 }
 0x12e   :  { %v2563_v44 = vpop.f32.mrb[28].mxu0 }
 0x12f   :  { %v2621_v45 = vpop.f32.mrb[28].mxu1  ;;  %v2564_v46 = vpop.f32.mrb[29].mxu0 }
 0x130   :  { %v2565_v47 = vadd.f32 %v2564_v46, %v2563_v44  ;;  %v2622_v48 = vpop.f32.mrb[29].mxu1  ;;  %v2566_v49 = vpop.f32.mrb[30].mxu0 }
 0x131   :  { %v2623_v50 = vadd.f32 %v2622_v48, %v2621_v45  ;;  %v2624_v51 = vpop.f32.mrb[30].mxu1  ;;  %v2567_v52 = vpop.f32.mrb[31].mxu0 }
 0x132   :  { %v816_v53 = vadd.f32 %v2565_v47, %v3722_v1  ;;  %v2568_v0 = vadd.f32 %v2567_v52, %v2566_v49  ;;  %v2625_v56 = vpop.f32.mrb[31].mxu1 }
 0x133   :  { %v2626_v57 = vadd.f32 %v2625_v56, %v2624_v51 }
 0x134   :  { %v3764_v58 = vadd.f32 %v2623_v50, %v816_v53  ;;  %v819_v59 = vadd.f32 %v2568_v0, %v3722_v1 }
 0x136   :  { %v3767_v60 = vadd.f32 %v2626_v57, %v819_v59  ;;  %v2569_v61 = vpop.f32.mrb[32].mxu0 }
 0x137   :  { %v2627_v62 = vpop.f32.mrb[32].mxu1  ;;  %v2570_v63 = vpop.f32.mrb[33].mxu0 }
 0x138   :  { %v2571_v32 = vadd.f32 %v2570_v63, %v2569_v61  ;;  %v2628_v33 = vpop.f32.mrb[33].mxu1  ;;  %v2572_v2 = vpop.f32.mrb[34].mxu0 }
 0x139   :  { %v2629_v3 = vadd.f32 %v2628_v33, %v2627_v62  ;;  %v2630_v5 = vpop.f32.mrb[34].mxu1  ;;  %v2573_v8 = vpop.f32.mrb[35].mxu0 }
 0x13a   :  { %v824_v10 = vadd.f32 %v2571_v32, %v3722_v1  ;;  %v2574_v11 = vadd.f32 %v2573_v8, %v2572_v2  ;;  %v2631_v12 = vpop.f32.mrb[35].mxu1 }
 0x13b   :  { %v2632_v13 = vadd.f32 %v2631_v12, %v2630_v5 }
 0x13c   :  { %v3770_v14 = vadd.f32 %v2629_v3, %v824_v10  ;;  %v827_v15 = vadd.f32 %v2574_v11, %v3722_v1 }
 0x13e   :  { %v3773_v16 = vadd.f32 %v2632_v13, %v827_v15  ;;  %v2575_v17 = vpop.f32.mrb[36].mxu0 }
 0x13f   :  { %v2633_v18 = vpop.f32.mrb[36].mxu1  ;;  %v2576_v19 = vpop.f32.mrb[37].mxu0 }
 0x140   :  { %v2577_v21 = vadd.f32 %v2576_v19, %v2575_v17  ;;  %v2634_v23 = vpop.f32.mrb[37].mxu1  ;;  %v2578_v24 = vpop.f32.mrb[38].mxu0 }
 0x141   :  { %v2635_v26 = vadd.f32 %v2634_v23, %v2633_v18  ;;  %v2636_v28 = vpop.f32.mrb[38].mxu1  ;;  %v2579_v29 = vpop.f32.mrb[39].mxu0 }
 0x142   :  { %v832_v30 = vadd.f32 %v2577_v21, %v3722_v1  ;;  %v2580_v31 = vadd.f32 %v2579_v29, %v2578_v24  ;;  %v2637_v34 = vpop.f32.mrb[39].mxu1 }
 0x143   :  { %v2638_v35 = vadd.f32 %v2637_v34, %v2636_v28 }
 0x144   :  { %v3776_v36 = vadd.f32 %v2635_v26, %v832_v30  ;;  %v835_v37 = vadd.f32 %v2580_v31, %v3722_v1 }
 0x146   :  { %v3779_v39 = vadd.f32 %v2638_v35, %v835_v37  ;;  %v2581_v41 = vpop.f32.mrb[40].mxu0 }
 0x147   :  { %v2639_v42 = vpop.f32.mrb[40].mxu1  ;;  %v2582_v44 = vpop.f32.mrb[41].mxu0 }
 0x148   :  { %v2583_v45 = vadd.f32 %v2582_v44, %v2581_v41  ;;  %v2640_v46 = vpop.f32.mrb[41].mxu1  ;;  %v2584_v47 = vpop.f32.mrb[42].mxu0 }
 0x149   :  { %v2641_v48 = vadd.f32 %v2640_v46, %v2639_v42  ;;  %v2642_v49 = vpop.f32.mrb[42].mxu1  ;;  %v2585_v50 = vpop.f32.mrb[43].mxu0 }
 0x14a   :  { %v840_v51 = vadd.f32 %v2583_v45, %v3722_v1  ;;  %v2586_v52 = vadd.f32 %v2585_v50, %v2584_v47  ;;  %v2643_v53 = vpop.f32.mrb[43].mxu1 }
 0x14b   :  { %v2644_v0 = vadd.f32 %v2643_v53, %v2642_v49 }
 0x14c   :  { %v3782_v56 = vadd.f32 %v2641_v48, %v840_v51  ;;  %v843_v57 = vadd.f32 %v2586_v52, %v3722_v1 }
 0x14e   :  { %v3785_v59 = vadd.f32 %v2644_v0, %v843_v57  ;;  %v2587_v61 = vpop.f32.mrb[44].mxu0 }
 0x14f   :  { %v2645_v62 = vpop.f32.mrb[44].mxu1  ;;  %v2588_v63 = vpop.f32.mrb[45].mxu0 }
 0x150   :  { %v2589_v32 = vadd.f32 %v2588_v63, %v2587_v61  ;;  %v2646_v33 = vpop.f32.mrb[45].mxu1  ;;  %v2590_v2 = vpop.f32.mrb[46].mxu0 }
 0x151   :  { %v2647_v3 = vadd.f32 %v2646_v33, %v2645_v62  ;;  %v2648_v5 = vpop.f32.mrb[46].mxu1  ;;  %v2591_v8 = vpop.f32.mrb[47].mxu0 }
 0x152   :  { %v848_v10 = vadd.f32 %v2589_v32, %v3722_v1  ;;  %v2592_v11 = vadd.f32 %v2591_v8, %v2590_v2  ;;  %v2649_v12 = vpop.f32.mrb[47].mxu1 }
 0x153   :  { %v2650_v13 = vadd.f32 %v2649_v12, %v2648_v5 }
 0x154   :  { %v3788_v15 = vadd.f32 %v2647_v3, %v848_v10  ;;  %v851_v17 = vadd.f32 %v2592_v11, %v3722_v1 }
 0x156   :  { %v3791_v18 = vadd.f32 %v2650_v13, %v851_v17  ;;  %v2593_v19 = vpop.f32.mrb[48].mxu0 }
 0x157   :  { %v2651_v21 = vpop.f32.mrb[48].mxu1  ;;  %v2594_v23 = vpop.f32.mrb[49].mxu0 }
 0x158   :  { %v2595_v24 = vadd.f32 %v2594_v23, %v2593_v19  ;;  %v2652_v26 = vpop.f32.mrb[49].mxu1  ;;  %v2596_v28 = vpop.f32.mrb[50].mxu0 }
 0x159   :  { %v2653_v29 = vadd.f32 %v2652_v26, %v2651_v21  ;;  %v2654_v30 = vpop.f32.mrb[50].mxu1  ;;  %v2597_v31 = vpop.f32.mrb[51].mxu0 }
 0x15a   :  { %v856_v34 = vadd.f32 %v2595_v24, %v3722_v1  ;;  %v2598_v35 = vadd.f32 %v2597_v31, %v2596_v28  ;;  %v2655_v37 = vpop.f32.mrb[51].mxu1 }
 0x15b   :  { %v2656_v41 = vadd.f32 %v2655_v37, %v2654_v30 }
 0x15c   :  { %v3794_v42 = vadd.f32 %v2653_v29, %v856_v34  ;;  %v859_v44 = vadd.f32 %v2598_v35, %v3722_v1 }
 0x15e   :  { %v3797_v45 = vadd.f32 %v2656_v41, %v859_v44  ;;  %v2599_v46 = vpop.f32.mrb[52].mxu0 }
 0x15f   :  { %v2657_v47 = vpop.f32.mrb[52].mxu1  ;;  %v2600_v48 = vpop.f32.mrb[53].mxu0 }
 0x160   :  { %v2601_v49 = vadd.f32 %v2600_v48, %v2599_v46  ;;  %v2658_v50 = vpop.f32.mrb[53].mxu1  ;;  %v2602_v51 = vpop.f32.mrb[54].mxu0 }
 0x161   :  { %v2659_v52 = vadd.f32 %v2658_v50, %v2657_v47  ;;  %v2660_v53 = vpop.f32.mrb[54].mxu1  ;;  %v2603_v0 = vpop.f32.mrb[55].mxu0 }
 0x162   :  { %v864_v57 = vadd.f32 %v2601_v49, %v3722_v1  ;;  %v2661_v61 = vpop.f32.mrb[55].mxu1 }
 0x164   :  { %v3800_v62 = vadd.f32 %v2659_v52, %v864_v57 }
 0x166   :  { %4508 = vst [vmem:[#allocation2_spill] sm:$0xff] %v3800_v62  ;;  %v2679_v63 = vpop.f32.mrb[56].mxu0 }
 0x167   :  { %v2737_v32 = vpop.f32.mrb[56].mxu1  ;;  %v2680_v33 = vpop.f32.mrb[57].mxu0 }
 0x168   :  { %v2681_v2 = vadd.f32 %v2680_v33, %v2679_v63  ;;  %v2738_v3 = vpop.f32.mrb[57].mxu1  ;;  %v2682_v5 = vpop.f32.mrb[58].mxu0 }
 0x169   :  { %v2739_v8 = vadd.f32 %v2738_v3, %v2737_v32  ;;  %v2740_v10 = vpop.f32.mrb[58].mxu1  ;;  %v2683_v11 = vpop.f32.mrb[59].mxu0 }
 0x16a   :  { %v1153_v12 = vadd.f32 %v2681_v2, %v3722_v1  ;;  %v2684_v13 = vadd.f32 %v2683_v11, %v2682_v5  ;;  %v2741_v17 = vpop.f32.mrb[59].mxu1 }
 0x16b   :  { %v2742_v19 = vadd.f32 %v2741_v17, %v2740_v10 }
 0x16c   :  { %v3803_v21 = vadd.f32 %v2739_v8, %v1153_v12  ;;  %v1156_v23 = vadd.f32 %v2684_v13, %v3722_v1 }
 0x16e   :  { %4509 = vst [vmem:[#allocation3_spill] sm:$0xff] %v3803_v21  ;;  %v3806_v24 = vadd.f32 %v2742_v19, %v1156_v23  ;;  %v2685_v26 = vpop.f32.mrb[60].mxu0 }
 0x16f   :  { %v2743_v28 = vpop.f32.mrb[60].mxu1  ;;  %v2686_v29 = vpop.f32.mrb[61].mxu0 }
 0x170   :  { %4510 = vst [vmem:[#allocation4_spill] sm:$0xff] %v3806_v24  ;;  %v2687_v30 = vadd.f32 %v2686_v29, %v2685_v26  ;;  %v2744_v31 = vpop.f32.mrb[61].mxu1  ;;  %v2688_v34 = vpop.f32.mrb[62].mxu0 }
 0x171   :  { %v2745_v35 = vadd.f32 %v2744_v31, %v2743_v28  ;;  %v2746_v37 = vpop.f32.mrb[62].mxu1  ;;  %v2689_v41 = vpop.f32.mrb[63].mxu0 }
 0x172   :  { %v1161_v44 = vadd.f32 %v2687_v30, %v3722_v1  ;;  %v2690_v46 = vadd.f32 %v2689_v41, %v2688_v34  ;;  %v2747_v47 = vpop.f32.mrb[63].mxu1 }
 0x173   :  { %v2748_v48 = vadd.f32 %v2747_v47, %v2746_v37 }
 0x174   :  { %v3809_v49 = vadd.f32 %v2745_v35, %v1161_v44  ;;  %v1164_v50 = vadd.f32 %v2690_v46, %v3722_v1 }
 0x176   :  { %4511 = vst [vmem:[#allocation5_spill] sm:$0xff] %v3809_v49  ;;  %v3812_v51 = vadd.f32 %v2748_v48, %v1164_v50  ;;  %v2691_v52 = vpop.f32.mrb[64].mxu0 }
 0x177   :  { %v2749_v53 = vpop.f32.mrb[64].mxu1  ;;  %v2692_v0 = vpop.f32.mrb[65].mxu0 }
 0x178   :  { %4512 = vst [vmem:[#allocation6_spill] sm:$0xff] %v3812_v51  ;;  %v2693_v57 = vadd.f32 %v2692_v0, %v2691_v52  ;;  %v2750_v61 = vpop.f32.mrb[65].mxu1  ;;  %v2694_v63 = vpop.f32.mrb[66].mxu0 }
 0x179   :  { %v2751_v32 = vadd.f32 %v2750_v61, %v2749_v53  ;;  %v2752_v33 = vpop.f32.mrb[66].mxu1  ;;  %v2695_v2 = vpop.f32.mrb[67].mxu0 }
 0x17a   :  { %v1169_v3 = vadd.f32 %v2693_v57, %v3722_v1  ;;  %v2696_v5 = vadd.f32 %v2695_v2, %v2694_v63  ;;  %v2753_v8 = vpop.f32.mrb[67].mxu1 }
 0x17b   :  { %v2754_v10 = vadd.f32 %v2753_v8, %v2752_v33 }
 0x17c   :  { %v3815_v11 = vadd.f32 %v2751_v32, %v1169_v3  ;;  %v1172_v12 = vadd.f32 %v2696_v5, %v3722_v1 }
 0x17e   :  { %4513 = vst [vmem:[#allocation7_spill] sm:$0xff] %v3815_v11  ;;  %v3818_v13 = vadd.f32 %v2754_v10, %v1172_v12  ;;  %v2697_v17 = vpop.f32.mrb[68].mxu0 }
 0x17f   :  { %v2755_v19 = vpop.f32.mrb[68].mxu1  ;;  %v2698_v23 = vpop.f32.mrb[69].mxu0 }
 0x180   :  { %4514 = vst [vmem:[#allocation8_spill] sm:$0xff] %v3818_v13  ;;  %v2699_v26 = vadd.f32 %v2698_v23, %v2697_v17  ;;  %v2756_v28 = vpop.f32.mrb[69].mxu1  ;;  %v2700_v29 = vpop.f32.mrb[70].mxu0 }
 0x181   :  { %v2757_v30 = vadd.f32 %v2756_v28, %v2755_v19  ;;  %v2758_v31 = vpop.f32.mrb[70].mxu1  ;;  %v2701_v34 = vpop.f32.mrb[71].mxu0 }
 0x182   :  { %v1177_v35 = vadd.f32 %v2699_v26, %v3722_v1  ;;  %v2702_v37 = vadd.f32 %v2701_v34, %v2700_v29  ;;  %v2759_v41 = vpop.f32.mrb[71].mxu1 }
 0x183   :  { %v2760_v44 = vadd.f32 %v2759_v41, %v2758_v31 }
 0x184   :  { %v3821_v46 = vadd.f32 %v2757_v30, %v1177_v35  ;;  %v1180_v47 = vadd.f32 %v2702_v37, %v3722_v1 }
 0x186   :  { %4515 = vst [vmem:[#allocation9_spill] sm:$0xff] %v3821_v46  ;;  %v3824_v48 = vadd.f32 %v2760_v44, %v1180_v47  ;;  %v2703_v50 = vpop.f32.mrb[72].mxu0 }
 0x187   :  { %v2761_v52 = vpop.f32.mrb[72].mxu1  ;;  %v2704_v53 = vpop.f32.mrb[73].mxu0 }
 0x188   :  { %v2705_v0 = vadd.f32 %v2704_v53, %v2703_v50  ;;  %v2762_v57 = vpop.f32.mrb[73].mxu1  ;;  %v2706_v61 = vpop.f32.mrb[74].mxu0 }
 0x189   :  { %v2763_v63 = vadd.f32 %v2762_v57, %v2761_v52  ;;  %v2764_v32 = vpop.f32.mrb[74].mxu1  ;;  %v2707_v33 = vpop.f32.mrb[75].mxu0 }
 0x18a   :  { %v1185_v2 = vadd.f32 %v2705_v0, %v3722_v1  ;;  %v2708_v3 = vadd.f32 %v2707_v33, %v2706_v61  ;;  %v2765_v5 = vpop.f32.mrb[75].mxu1 }
 0x18b   :  { %v2766_v8 = vadd.f32 %v2765_v5, %v2764_v32 }
 0x18c   :  { %v3827_v10 = vadd.f32 %v2763_v63, %v1185_v2  ;;  %v1188_v12 = vadd.f32 %v2708_v3, %v3722_v1 }
 0x18e   :  { %4516 = vst [vmem:[#allocation10_spill] sm:$0xff] %v3827_v10  ;;  %v3830_v17 = vadd.f32 %v2766_v8, %v1188_v12  ;;  %v2709_v19 = vpop.f32.mrb[76].mxu0 }
 0x18f   :  { %v2767_v23 = vpop.f32.mrb[76].mxu1  ;;  %v2710_v26 = vpop.f32.mrb[77].mxu0 }
 0x190   :  { %4517 = vst [vmem:[#allocation11_spill] sm:$0xff] %v3830_v17  ;;  %v2711_v28 = vadd.f32 %v2710_v26, %v2709_v19  ;;  %v2768_v29 = vpop.f32.mrb[77].mxu1  ;;  %v2712_v30 = vpop.f32.mrb[78].mxu0 }
 0x191   :  { %v2769_v31 = vadd.f32 %v2768_v29, %v2767_v23  ;;  %v2770_v34 = vpop.f32.mrb[78].mxu1  ;;  %v2713_v35 = vpop.f32.mrb[79].mxu0 }
 0x192   :  { %v1193_v37 = vadd.f32 %v2711_v28, %v3722_v1  ;;  %v2714_v41 = vadd.f32 %v2713_v35, %v2712_v30  ;;  %v2771_v44 = vpop.f32.mrb[79].mxu1 }
 0x193   :  { %v2772_v47 = vadd.f32 %v2771_v44, %v2770_v34 }
 0x194   :  { %v3833_v50 = vadd.f32 %v2769_v31, %v1193_v37  ;;  %v1196_v52 = vadd.f32 %v2714_v41, %v3722_v1 }
 0x196   :  { %4518 = vst [vmem:[#allocation12_spill] sm:$0xff] %v3833_v50  ;;  %v3836_v53 = vadd.f32 %v2772_v47, %v1196_v52  ;;  %v2715_v0 = vpop.f32.mrb[80].mxu0 }
 0x197   :  { %v2773_v57 = vpop.f32.mrb[80].mxu1  ;;  %v2716_v61 = vpop.f32.mrb[81].mxu0 }
 0x198   :  { %4519 = vst [vmem:[#allocation13_spill] sm:$0xff] %v3836_v53  ;;  %v2717_v63 = vadd.f32 %v2716_v61, %v2715_v0  ;;  %v2774_v32 = vpop.f32.mrb[81].mxu1  ;;  %v2718_v33 = vpop.f32.mrb[82].mxu0  ;;  %v1651_v61 = vadd.f32 %v3767_v60, %v3764_v58 }
 0x199   :  { %v2775_v2 = vadd.f32 %v2774_v32, %v2773_v57  ;;  %v2776_v3 = vpop.f32.mrb[82].mxu1  ;;  %v2719_v5 = vpop.f32.mrb[83].mxu0 }
 0x19a   :  { %v1201_v8 = vadd.f32 %v2717_v63, %v3722_v1  ;;  %v2777_v12 = vpop.f32.mrb[83].mxu1  ;;  %v1631_v63 = vadd.f32 %v3728_v6, %v3725_v4  ;;  %v1671_v3 = vadd.f32 %v3806_v24, %v3803_v21 }
 0x19c   :  { %v3839_v19 = vadd.f32 %v2775_v2, %v1201_v8  ;;  %v1652_v2 = vadd.f32 %v1651_v61, %v3770_v14  ;;  %v1632_v12 = vadd.f32 %v1631_v63, %v3731_v20 }
 0x19e   :  { %4520 = vst [vmem:[#allocation14_spill] sm:$0xff] %v3839_v19  ;;  %v2795_v23 = vpop.f32.mrb[84].mxu0 }
 0x19f   :  { %v2853_v26 = vpop.f32.mrb[84].mxu1  ;;  %v2796_v28 = vpop.f32.mrb[85].mxu0 }
 0x1a0   :  { %v2797_v29 = vadd.f32 %v2796_v28, %v2795_v23  ;;  %v2854_v30 = vpop.f32.mrb[85].mxu1  ;;  %v2798_v31 = vpop.f32.mrb[86].mxu0 }
 0x1a1   :  { %v2855_v34 = vadd.f32 %v2854_v30, %v2853_v26  ;;  %v2856_v35 = vpop.f32.mrb[86].mxu1  ;;  %v2799_v37 = vpop.f32.mrb[87].mxu0 }
 0x1a2   :  { %v1490_v41 = vadd.f32 %v2797_v29, %v3722_v1  ;;  %v2800_v44 = vadd.f32 %v2799_v37, %v2798_v31  ;;  %v2857_v47 = vpop.f32.mrb[87].mxu1  ;;  %v1672_v29 = vadd.f32 %v1671_v3, %v3809_v49 }
 0x1a3   :  { %v2858_v52 = vadd.f32 %v2857_v47, %v2856_v35 }
 0x1a4   :  { %v3842_v0 = vadd.f32 %v2855_v34, %v1490_v41  ;;  %v1493_v57 = vadd.f32 %v2800_v44, %v3722_v1  ;;  %v1653_v44 = vadd.f32 %v1652_v2, %v3773_v16 }
 0x1a6   :  { %4521 = vst [vmem:[#allocation15_spill] sm:$0xff] %v3842_v0  ;;  %v3849_v32 = vadd.f32 %v2858_v52, %v1493_v57  ;;  %v2801_v33 = vpop.f32.mrb[88].mxu0  ;;  %v1633_v52 = vadd.f32 %v1632_v12, %v3734_v22  ;;  %v1654_v63 = vadd.f32 %v1653_v44, %v3776_v36 }
 0x1a7   :  { %v2859_v5 = vpop.f32.mrb[88].mxu1  ;;  %v2802_v8 = vpop.f32.mrb[89].mxu0 }
 0x1a8   :  { %4522 = vst [vmem:[#allocation16_spill] sm:$0xff] %v3849_v32  ;;  %v2803_v23 = vadd.f32 %v2802_v8, %v2801_v33  ;;  %v2860_v26 = vpop.f32.mrb[89].mxu1  ;;  %v2804_v28 = vpop.f32.mrb[90].mxu0  ;;  %v1673_v33 = vadd.f32 %v1672_v29, %v3812_v51  ;;  %v1634_v3 = vadd.f32 %v1633_v52, %v3737_v38 }
 0x1a9   :  { %v2861_v30 = vadd.f32 %v2860_v26, %v2859_v5  ;;  %v2862_v31 = vpop.f32.mrb[90].mxu1  ;;  %v2805_v34 = vpop.f32.mrb[91].mxu0 }
 0x1aa   :  { %v1498_v35 = vadd.f32 %v2803_v23, %v3722_v1  ;;  %v2806_v37 = vadd.f32 %v2805_v34, %v2804_v28  ;;  %v2863_v41 = vpop.f32.mrb[91].mxu1  ;;  %v1674_v23 = vadd.f32 %v1673_v33, %v3815_v11 }
 0x1ab   :  { %v2864_v47 = vadd.f32 %v2863_v41, %v2862_v31  ;;  %v1635_v41 = vadd.f32 %v1634_v3, %v3740_v40 }
 0x1ac   :  { %v3859_v57 = vadd.f32 %v2861_v30, %v1498_v35  ;;  %v1501_v61 = vadd.f32 %v2806_v37, %v3722_v1  ;;  %v1655_v30 = vadd.f32 %v1654_v63, %v3779_v39 }
 0x1ae   :  { %4523 = vst [vmem:[#allocation17_spill] sm:$0xff] %v3859_v57  ;;  %v3865_v5 = vadd.f32 %v2864_v47, %v1501_v61  ;;  %v2807_v8 = vpop.f32.mrb[92].mxu0  ;;  %v1656_v52 = vadd.f32 %v1655_v30, %v3782_v56  ;;  %v1675_v61 = vadd.f32 %v1674_v23, %v3818_v13 }
 0x1af   :  { %v2865_v26 = vpop.f32.mrb[92].mxu1  ;;  %v2808_v2 = vpop.f32.mrb[93].mxu0 }
 0x1b0   :  { %4524 = vst [vmem:[#allocation18_spill] sm:$0xff] %v3865_v5  ;;  %v2809_v28 = vadd.f32 %v2808_v2, %v2807_v8  ;;  %v2866_v31 = vpop.f32.mrb[93].mxu1  ;;  %v2810_v12 = vpop.f32.mrb[94].mxu0  ;;  %v1636_v8 = vadd.f32 %v1635_v41, %v3743_v54 }
 0x1b1   :  { %v2867_v34 = vadd.f32 %v2866_v31, %v2865_v26  ;;  %v2868_v35 = vpop.f32.mrb[94].mxu1  ;;  %v2811_v37 = vpop.f32.mrb[95].mxu0  ;;  %v1676_v26 = vadd.f32 %v1675_v61, %v3821_v46 }
 0x1b2   :  { %v1506_v29 = vadd.f32 %v2809_v28, %v3722_v1  ;;  %v2812_v44 = vadd.f32 %v2811_v37, %v2810_v12  ;;  %v2869_v47 = vpop.f32.mrb[95].mxu1  ;;  %v1657_v28 = vadd.f32 %v1656_v52, %v3785_v59  ;;  %v1691_v12 = vadd.f32 %v3849_v32, %v3842_v0 }
 0x1b3   :  { %v2870_v33 = vadd.f32 %v2869_v47, %v2868_v35  ;;  %v1637_v23 = vadd.f32 %v1636_v8, %v3746_v55 }
 0x1b4   :  { %v3874_v2 = vadd.f32 %v2867_v34, %v1506_v29  ;;  %v1509_v63 = vadd.f32 %v2812_v44, %v3722_v1  ;;  %v1658_v29 = vadd.f32 %v1657_v28, %v3788_v15  ;;  %v1677_v44 = vadd.f32 %v1676_v26, %v3824_v48 }
 0x1b5   :  { %v1692_v47 = vadd.f32 %v1691_v12, %v3859_v57  ;;  %v1638_v0 = vadd.f32 %v1637_v23, %v3749_v7 }
 0x1b6   :  { %4525 = vst [vmem:[#allocation19_spill] sm:$0xff] %v3874_v2  ;;  %v3878_v31 = vadd.f32 %v2870_v33, %v1509_v63  ;;  %v2813_v3 = vpop.f32.mrb[96].mxu0  ;;  %v1678_v8 = vadd.f32 %v1677_v44, %v3827_v10  ;;  %v1659_v26 = vadd.f32 %v1658_v29, %v3791_v18 }
 0x1b7   :  { %v2871_v30 = vpop.f32.mrb[96].mxu1  ;;  %v2814_v37 = vpop.f32.mrb[97].mxu0  ;;  %v1693_v12 = vadd.f32 %v1692_v47, %v3865_v5 }
 0x1b8   :  { %4526 = vst [vmem:[#allocation20_spill] sm:$0xff] %v3878_v31  ;;  %v2815_v35 = vadd.f32 %v2814_v37, %v2813_v3  ;;  %v2872_v41 = vpop.f32.mrb[97].mxu1  ;;  %v2816_v34 = vpop.f32.mrb[98].mxu0  ;;  %v1679_v23 = vadd.f32 %v1678_v8, %v3830_v17 }
 0x1b9   :  { %v2873_v61 = vadd.f32 %v2872_v41, %v2871_v30  ;;  %v2874_v33 = vpop.f32.mrb[98].mxu1  ;;  %v2817_v63 = vpop.f32.mrb[99].mxu0  ;;  %v1694_v44 = vadd.f32 %v1693_v12, %v3874_v2 }
 0x1ba   :  { %v1514_v52 = vadd.f32 %v2815_v35, %v3722_v1  ;;  %v2818_v46 = vadd.f32 %v2817_v63, %v2816_v34  ;;  %v2875_v32 = vpop.f32.mrb[99].mxu1  ;;  %v1639_v35 = vadd.f32 %v1638_v0, %v3752_v9  ;;  %v1660_v34 = vadd.f32 %v1659_v26, %v3794_v42 }
 0x1bb   :  { %v2876_v3 = vadd.f32 %v2875_v32, %v2874_v33  ;;  %v1680_v47 = vadd.f32 %v1679_v23, %v3833_v50  ;;  %v1662_v0 = vsel %vm1642_vm0, %v3800_v62, 0.0  ;;  %v1682_v23 = vsel %vm1642_vm0, %v3839_v19, 0.0 }
 0x1bc   :  { %v3890_v37 = vadd.f32 %v2873_v61, %v1514_v52  ;;  %v1517_v28 = vadd.f32 %v2818_v46, %v3722_v1  ;;  %v1640_v29 = vadd.f32 %v1639_v35, %v3755_v25  ;;  %v1661_v2 = vadd.f32 %v1660_v34, %v3797_v45 }
 0x1bd   :  { %v1643_v35 = vsel %vm1642_vm0, %v3761_v43, 0.0 }
 0x1be   :  { %4527 = vst [vmem:[#allocation21_spill] sm:$0xff] %v3890_v37  ;;  %v3895_v30 = vadd.f32 %v2876_v3, %v1517_v28  ;;  %v2819_v41 = vpop.f32.mrb[100].mxu0  ;;  %v1641_v50 = vadd.f32 %v1640_v29, %v3758_v27 }
 0x1bf   :  { %v2877_v32 = vpop.f32.mrb[100].mxu1  ;;  %v2820_v61 = vpop.f32.mrb[101].mxu0 }
 0x1c0   :  { %4528 = vst [vmem:[#allocation22_spill] sm:$0xff] %v3895_v30  ;;  %v2821_v33 = vadd.f32 %v2820_v61, %v2819_v41  ;;  %v2878_v63 = vpop.f32.mrb[101].mxu1  ;;  %v2822_v46 = vpop.f32.mrb[102].mxu0  ;;  %v1695_v41 = vadd.f32 %v1694_v44, %v3878_v31 }
 0x1c1   :  { %v2879_v52 = vadd.f32 %v2878_v63, %v2877_v32  ;;  %v2880_v3 = vpop.f32.mrb[102].mxu1  ;;  %v2823_v28 = vpop.f32.mrb[103].mxu0 }
 0x1c2   :  { %v1522_v8 = vadd.f32 %v2821_v33, %v3722_v1  ;;  %v2824_v26 = vadd.f32 %v2823_v28, %v2822_v46  ;;  %v2881_v12 = vpop.f32.mrb[103].mxu1  ;;  %v1663_v33 = vadd.f32 %v1662_v0, %v1661_v2  ;;  %v1681_v46 = vadd.f32 %v1680_v47, %v3836_v53 }
 0x1c3   :  { %v2882_v61 = vadd.f32 %v2881_v12, %v2880_v3  ;;  %v1696_v34 = vadd.f32 %v1695_v41, %v3890_v37  ;;  %v1644_v3 = vadd.f32 %v1643_v35, %v1641_v50 }
 0x1c4   :  { %v3912_v32 = vadd.f32 %v2879_v52, %v1522_v8  ;;  %v1525_v63 = vadd.f32 %v2824_v26, %v3722_v1  ;;  %v1683_v12 = vadd.f32 %v1682_v23, %v1681_v46  ;;  %v1664_v8 = vrot.slane %v1663_v33, 4 }
 0x1c5   :  { %v1697_v26 = vadd.f32 %v1696_v34, %v3895_v30 }
 0x1c6   :  { %v3918_v28 = vadd.f32 %v2882_v61, %v1525_v63  ;;  %v2825_v44 = vpop.f32.mrb[104].mxu0  ;;  %v1645_v61 = vrot.slane %v1644_v3, 4  ;;  %v1684_v63 = vrot.slane %v1683_v12, 4  ;;  %v1665_v46 = vadd.f32 %v1664_v8, %v1663_v33 }
 0x1c7   :  { %v2883_v31 = vpop.f32.mrb[104].mxu1  ;;  %v2826_v17 = vpop.f32.mrb[105].mxu0  ;;  %v1698_v50 = vadd.f32 %v1697_v26, %v3912_v32 }
 0x1c8   :  { %v2827_v5 = vadd.f32 %v2826_v17, %v2825_v44  ;;  %v2884_v19 = vpop.f32.mrb[105].mxu1  ;;  %v2828_v52 = vpop.f32.mrb[106].mxu0  ;;  %v1666_v57 = vrot.slane %v1665_v46, 2 }
 0x1c9   :  { %v2885_v10 = vadd.f32 %v2884_v19, %v2883_v31  ;;  %v2886_v29 = vpop.f32.mrb[106].mxu1  ;;  %v2829_v2 = vpop.f32.mrb[107].mxu0  ;;  %v1646_v19 = vadd.f32 %v1645_v61, %v1644_v3  ;;  %v1685_v31 = vadd.f32 %v1684_v63, %v1683_v12  ;;  %v1699_v30 = vadd.f32 %v1698_v50, %v3918_v28 }
 0x1ca   :  { %v1530_v47 = vadd.f32 %v2827_v5, %v3722_v1  ;;  %v2830_v0 = vadd.f32 %v2829_v2, %v2828_v52  ;;  %v2887_v41 = vpop.f32.mrb[107].mxu1  ;;  %v1667_v12 = vadd.f32 %v1666_v57, %v1665_v46 }
 0x1cb   :  { %v2888_v35 = vadd.f32 %v2887_v41, %v2886_v29  ;;  %v1686_v41 = vrot.slane %v1685_v31, 2 }
 0x1cc   :  { %v3923_v23 = vadd.f32 %v2885_v10, %v1530_v47  ;;  %v1533_v17 = vadd.f32 %v2830_v0, %v3722_v1  ;;  %v1647_v0 = vrot.slane %v1646_v19, 2 }
 0x1cd   :  { %v1687_v50 = vadd.f32 %v1686_v41, %v1685_v31 }
 0x1ce   :  { %v3926_v44 = vadd.f32 %v2888_v35, %v1533_v17  ;;  %v2831_v34 = vpop.f32.mrb[108].mxu0  ;;  %v1700_v26 = vadd.f32 %v1699_v30, %v3923_v23  ;;  %v1668_v30 = vrot.slane %v1667_v12, 1 }
 0x1cf   :  { %v2889_v5 = vpop.f32.mrb[108].mxu1  ;;  %v2832_v52 = vpop.f32.mrb[109].mxu0 }
 0x1d0   :  { %v2833_v2 = vadd.f32 %v2832_v52, %v2831_v34  ;;  %v2890_v37 = vpop.f32.mrb[109].mxu1  ;;  %v2834_v53 = vpop.f32.mrb[110].mxu0  ;;  %v1701_v61 = vadd.f32 %v1700_v26, %v3926_v44  ;;  %v1688_v34 = vrot.slane %v1687_v50, 1 }
 0x1d1   :  { %v2891_v10 = vadd.f32 %v2890_v37, %v2889_v5  ;;  %v2892_v29 = vpop.f32.mrb[110].mxu1  ;;  %v2835_v47 = vpop.f32.mrb[111].mxu0  ;;  %v1648_v53 = vadd.f32 %v1647_v0, %v1646_v19 }
 0x1d2   :  { %v1538_v33 = vadd.f32 %v2833_v2, %v3722_v1  ;;  %v2893_v8 = vpop.f32.mrb[111].mxu1  ;;  %v1669_v1 = vadd.f32 %v1668_v30, %v1667_v12  ;;  %v1689_v29 = vadd.f32 %v1688_v34, %v1687_v50 }
 0x1d3   :  { %v1649_v17 = vrot.slane %v1648_v53, 1 }
 0x1d4   :  { %v3931_v3 = vadd.f32 %v2891_v10, %v1538_v33 }
 0x1d5   :  { %v1650_v2 = vadd.f32 %v1649_v17, %v1648_v53 }
 0x1d6   :  { %4529 = vst [vmem:[#allocation23_spill] sm:$0xff] %v3931_v3  ;;  %v1702_v63 = vsel %vm1642_vm0, %v3931_v3, 0.0 }
 0x1d7   :  { %v1703_v35 = vadd.f32 %v1702_v63, %v1701_v61  ;;  %v1670_v47 = vadd.f32 %v1669_v1, %v1650_v2 }
 0x1d9   :  { %v1704_v37 = vrot.slane %v1703_v35, 4  ;;  %v1690_v46 = vadd.f32 %v1689_v29, %v1670_v47 }
 0x1db   :  { %v1705_v5 = vadd.f32 %v1704_v37, %v1703_v35 }
 0x1dd   :  { %v1706_v52 = vrot.slane %v1705_v5, 2 }
 0x1df   :  { %v1707_v10 = vadd.f32 %v1706_v52, %v1705_v5 }
 0x1e1   :  { %v1708_v57 = vrot.slane %v1707_v10, 1 }
 0x1e3   :  { %v1709_v26 = vadd.f32 %v1708_v57, %v1707_v10 }
 0x1e5   :  { %v1710_v33 = vadd.f32 %v1709_v26, %v1690_v46 }
 0x1e7   :  { %v3936_v8 = vmul.f32 0.0025510204, %v1710_v33 }
 0x1e9   :  { %v1712_v19 = vsub.f32 %v3725_v4, %v3936_v8  ;;  %v1713_v31 = vsub.f32 %v3728_v6, %v3936_v8  ;;  %v1714_v0 = vsub.f32 %v3731_v20, %v3936_v8  ;;  %v1715_v61 = vsub.f32 %v3734_v22, %v3936_v8 }
 0x1ea   :  { %v1716_v63 = vsub.f32 %v3737_v38, %v3936_v8  ;;  %v1757_v35 = vsub.f32 %v3764_v58, %v3936_v8  ;;  %v1758_v30 = vsub.f32 %v3767_v60, %v3936_v8  ;;  %v1717_v37 = vsub.f32 %v3740_v40, %v3936_v8 }
 0x1eb   :  { %v1725_v41 = vmul.f32 %v1712_v19, %v1712_v19  ;;  %v1726_v12 = vmul.f32 %v1713_v31, %v1713_v31  ;;  %v1727_v53 = vmul.f32 %v1714_v0, %v1714_v0  ;;  %v1728_v17 = vmul.f32 %v1715_v61, %v1715_v61 }
 0x1ec   :  { %v1718_v5 = vsub.f32 %v3743_v54, %v3936_v8  ;;  %v1729_v1 = vmul.f32 %v1716_v63, %v1716_v63  ;;  %v1759_v2 = vsub.f32 %v3770_v14, %v3936_v8  ;;  %v1770_v29 = vmul.f32 %v1757_v35, %v1757_v35 }
 0x1ed   :  { %v1738_v50 = vadd.f32 %v1726_v12, %v1725_v41  ;;  %v1719_v10 = vsub.f32 %v3746_v55, %v3936_v8  ;;  %v1771_v47 = vmul.f32 %v1758_v30, %v1758_v30  ;;  %v1730_v57 = vmul.f32 %v1717_v37, %v1717_v37 }
 0x1ee   :  { %v1760_v26 = vsub.f32 %v3773_v16, %v3936_v8  ;;  %v1720_v33 = vsub.f32 %v3749_v7, %v3936_v8  ;;  %v1731_v19 = vmul.f32 %v1718_v5, %v1718_v5  ;;  %v1761_v0 = vsub.f32 %v3776_v36, %v3936_v8 }
 0x1ef   :  { %v1739_v34 = vadd.f32 %v1738_v50, %v1727_v53  ;;  %v1772_v41 = vmul.f32 %v1759_v2, %v1759_v2  ;;  %v1783_v12 = vadd.f32 %v1771_v47, %v1770_v29  ;;  %v1721_v61 = vsub.f32 %v3752_v9, %v3936_v8 }
 0x1f0   :  { %v1732_v63 = vmul.f32 %v1719_v10, %v1719_v10  ;;  %v1803_v53 = vsub.f32 %v3803_v21, %v3936_v8  ;;  %v1804_v50 = vsub.f32 %v3806_v24, %v3936_v8  ;;  %v1762_v30 = vsub.f32 %v3779_v39, %v3936_v8 }
 0x1f1   :  { %v1740_v52 = vadd.f32 %v1739_v34, %v1728_v17  ;;  %v1773_v37 = vmul.f32 %v1760_v26, %v1760_v26  ;;  %v1784_v17 = vadd.f32 %v1783_v12, %v1772_v41  ;;  %v1722_v34 = vsub.f32 %v3755_v25, %v3936_v8 }
 0x1f2   :  { %v1723_v5 = vsub.f32 %v3758_v27, %v3936_v8  ;;  %v1763_v29 = vsub.f32 %v3782_v56, %v3936_v8  ;;  %v1774_v10 = vmul.f32 %v1761_v0, %v1761_v0  ;;  %v1816_v26 = vmul.f32 %v1803_v53, %v1803_v53 }
 0x1f3   :  { %v1741_v46 = vadd.f32 %v1740_v52, %v1729_v1  ;;  %v1724_v1 = vsub.f32 %v3761_v43, %v3936_v8  ;;  %v1733_v52 = vmul.f32 %v1720_v33, %v1720_v33  ;;  %v1785_v47 = vadd.f32 %v1784_v17, %v1773_v37 }
 0x1f4   :  { %v1764_v41 = vsub.f32 %v3785_v59, %v3936_v8  ;;  %v1775_v12 = vmul.f32 %v1762_v30, %v1762_v30  ;;  %v1735_v21 = vmul.f32 %v1722_v34, %v1722_v34  ;;  %v1736_v33 = vmul.f32 %v1723_v5, %v1723_v5 }
 0x1f5   :  { %v1742_v31 = vadd.f32 %v1741_v46, %v1730_v57  ;;  %v1734_v57 = vmul.f32 %v1721_v61, %v1721_v61  ;;  %v1805_v46 = vsub.f32 %v3809_v49, %v3936_v8  ;;  %v1786_v24 = vadd.f32 %v1785_v47, %v1774_v10 }
 0x1f6   :  { %v1806_v0 = vsub.f32 %v3812_v51, %v3936_v8  ;;  %v1737_v61 = vmul.f32 %v1724_v1, %v1724_v1  ;;  %v1776_v37 = vmul.f32 %v1763_v29, %v1763_v29  ;;  %v1766_v53 = vsub.f32 %v3791_v18, %v3936_v8 }
 0x1f7   :  { %v1743_v35 = vadd.f32 %v1742_v31, %v1731_v19  ;;  %v1817_v19 = vmul.f32 %v1804_v50, %v1804_v50  ;;  %v1787_v17 = vadd.f32 %v1786_v24, %v1775_v12  ;;  %v1807_v50 = vsub.f32 %v3815_v11, %v3936_v8  ;;  %v4530_v12 = vld [vmem:[#allocation15_spill] sm:$0xff] }
 0x1f8   :  { %v1818_v30 = vmul.f32 %v1805_v46, %v1805_v46  ;;  %v1767_v34 = vsub.f32 %v3794_v42, %v3936_v8  ;;  %v1769_v5 = vsub.f32 %v3800_v62, %v3936_v8  ;;  %v1808_v24 = vsub.f32 %v3818_v13, %v3936_v8 }
 0x1f9   :  { %v1744_v2 = vadd.f32 %v1743_v35, %v1732_v63  ;;  %v1765_v63 = vsub.f32 %v3788_v15, %v3936_v8  ;;  %v1788_v10 = vadd.f32 %v1787_v17, %v1776_v37  ;;  %v1819_v29 = vmul.f32 %v1806_v0, %v1806_v0 }
 0x1fa   :  { %v1849_v46 = vsub.f32 %v4530_v12, %v3936_v8  ;;  %v1768_v11 = vsub.f32 %v3797_v45, %v3936_v8  ;;  %v1779_v51 = vmul.f32 %v1766_v53, %v1766_v53  ;;  %v1780_v13 = vmul.f32 %v1767_v34, %v1767_v34 }
 0x1fb   :  { %v1745_v31 = vadd.f32 %v1744_v2, %v1733_v52  ;;  %v1829_v52 = vadd.f32 %v1817_v19, %v1816_v26  ;;  %v1777_v2 = vmul.f32 %v1764_v41, %v1764_v41  ;;  %v1778_v1 = vmul.f32 %v1765_v63, %v1765_v63  ;;  %v4531_v26 = vld [vmem:[#allocation16_spill] sm:$0xff]  ;;  %v4532_v41 = vld [vmem:[#allocation9_spill] sm:$0xff] }
 0x1fc   :  { %v1850_v19 = vsub.f32 %v4531_v26, %v3936_v8  ;;  %v1809_v37 = vsub.f32 %v4532_v41, %v3936_v8  ;;  %v1820_v63 = vmul.f32 %v1807_v50, %v1807_v50  ;;  %v1782_v0 = vmul.f32 %v1769_v5, %v1769_v5  ;;  %v4534_v50 = vld [vmem:[#allocation10_spill] sm:$0xff] }
 0x1fd   :  { %v1746_v35 = vadd.f32 %v1745_v31, %v1734_v57  ;;  %v1830_v47 = vadd.f32 %v1829_v52, %v1818_v30  ;;  %v1789_v31 = vadd.f32 %v1788_v10, %v1777_v2  ;;  %v4533_v2 = vld [vmem:[#allocation17_spill] sm:$0xff]  ;;  %v1862_v49 = vmul.f32 %v1849_v46, %v1849_v46  ;;  %v4537_v46 = vld [vmem:[#allocation19_spill] sm:$0xff] }
 0x1fe   :  { %v1851_v10 = vsub.f32 %v4533_v2, %v3936_v8  ;;  %v1863_v62 = vmul.f32 %v1850_v19, %v1850_v19  ;;  %v1749_v41 = vsel %vm1642_vm0, %v1737_v61, 0.0  ;;  %v1811_v53 = vsub.f32 %v4534_v50, %v3936_v8  ;;  %v4540_v2 = vld [vmem:[#allocation20_spill] sm:$0xff] }
 0x1ff   :  { %v1747_v57 = vadd.f32 %v1746_v35, %v1735_v21  ;;  %v1831_v17 = vadd.f32 %v1830_v47, %v1819_v29  ;;  %v1790_v30 = vadd.f32 %v1789_v31, %v1778_v1  ;;  %v1810_v21 = vsub.f32 %v3824_v48, %v3936_v8 }
 0x200   :  { %v1821_v35 = vmul.f32 %v1808_v24, %v1808_v24  ;;  %v1822_v34 = vmul.f32 %v1809_v37, %v1809_v37  ;;  %v1781_v1 = vmul.f32 %v1768_v11, %v1768_v11  ;;  %v1794_v47 = vsel %vm1642_vm0, %v1782_v0, 0.0  ;;  %v4535_v24 = vld [vmem:[#allocation18_spill] sm:$0xff]  ;;  %v4538_v11 = vld [vmem:[#allocation12_spill] sm:$0xff] }
 0x201   :  { %v1832_v52 = vadd.f32 %v1831_v17, %v1820_v63  ;;  %v1748_v26 = vadd.f32 %v1747_v57, %v1736_v33  ;;  %v1791_v12 = vadd.f32 %v1790_v30, %v1779_v51  ;;  %v1852_v31 = vsub.f32 %v4535_v24, %v3936_v8  ;;  %v4536_v63 = vld [vmem:[#allocation11_spill] sm:$0xff] }
 0x202   :  { %v1812_v33 = vsub.f32 %v4536_v63, %v3936_v8  ;;  %v1823_v51 = vmul.f32 %v1810_v21, %v1810_v21  ;;  %v1853_v61 = vsub.f32 %v4537_v46, %v3936_v8  ;;  %v1864_v30 = vmul.f32 %v1851_v10, %v1851_v10  ;;  %v4541_v46 = vld [vmem:[#allocation13_spill] sm:$0xff] }
 0x203   :  { %v1833_v5 = vadd.f32 %v1832_v52, %v1821_v35  ;;  %v1792_v29 = vadd.f32 %v1791_v12, %v1780_v13  ;;  %v1750_v19 = vadd.f32 %v1749_v41, %v1748_v26  ;;  %v1875_v37 = vadd.f32 %v1863_v62, %v1862_v49  ;;  %v4539_v12 = vld [vmem:[#allocation14_spill] sm:$0xff]  ;;  %v4542_v62 = vld [vmem:[#allocation21_spill] sm:$0xff] }
 0x204   :  { %v1813_v13 = vsub.f32 %v4538_v11, %v3936_v8  ;;  %v1815_v0 = vsub.f32 %v4539_v12, %v3936_v8  ;;  %v1824_v35 = vmul.f32 %v1811_v53, %v1811_v53  ;;  %v1854_v21 = vsub.f32 %v4540_v2, %v3936_v8 }
 0x205   :  { %v1834_v57 = vadd.f32 %v1833_v5, %v1822_v34  ;;  %v1793_v17 = vadd.f32 %v1792_v29, %v1781_v1  ;;  %v1865_v34 = vmul.f32 %v1852_v31, %v1852_v31  ;;  %v1876_v5 = vadd.f32 %v1875_v37, %v1864_v30 }
 0x206   :  { %v1814_v26 = vsub.f32 %v4541_v46, %v3936_v8  ;;  %v1825_v41 = vmul.f32 %v1812_v33, %v1812_v33  ;;  %v1855_v49 = vsub.f32 %v4542_v62, %v3936_v8  ;;  %v1751_v1 = vrot.slane %v1750_v19, 4 }
 0x207   :  { %v1835_v52 = vadd.f32 %v1834_v57, %v1823_v51  ;;  %v1795_v24 = vadd.f32 %v1794_v47, %v1793_v17  ;;  %v1866_v11 = vmul.f32 %v1853_v61, %v1853_v61  ;;  %v1877_v12 = vadd.f32 %v1876_v5, %v1865_v34  ;;  %v4543_v57 = vld [vmem:[#allocation22_spill] sm:$0xff] }
 0x208   :  { %v1826_v53 = vmul.f32 %v1813_v13, %v1813_v13  ;;  %v1828_v47 = vmul.f32 %v1815_v0, %v1815_v0  ;;  %v1856_v17 = vsub.f32 %v4543_v57, %v3936_v8  ;;  %v1867_v31 = vmul.f32 %v1854_v21, %v1854_v21 }
 0x209   :  { %v1836_v10 = vadd.f32 %v1835_v52, %v1824_v35  ;;  %v1796_v29 = vrot.slane %v1795_v24, 4  ;;  %v1878_v30 = vadd.f32 %v1877_v12, %v1866_v11  ;;  %v1827_v37 = vmul.f32 %v1814_v26, %v1814_v26 }
 0x20a   :  { %v1857_v33 = vsub.f32 %v3912_v32, %v3936_v8  ;;  %v1752_v35 = vadd.f32 %v1751_v1, %v1750_v19  ;;  %v1868_v62 = vmul.f32 %v1855_v49, %v1855_v49  ;;  %v1840_v61 = vsel %vm1642_vm0, %v1828_v47, 0.0 }
 0x20b   :  { %v1837_v51 = vadd.f32 %v1836_v10, %v1825_v41  ;;  %v1797_v52 = vadd.f32 %v1796_v29, %v1795_v24  ;;  %v1879_v46 = vadd.f32 %v1878_v30, %v1867_v31  ;;  %v1858_v13 = vsub.f32 %v3918_v28, %v3936_v8 }
 0x20c   :  { %v1869_v0 = vmul.f32 %v1856_v17, %v1856_v17  ;;  %v1859_v11 = vsub.f32 %v3923_v23, %v3936_v8  ;;  %v1753_v12 = vrot.slane %v1752_v35, 2  ;;  %v1870_v26 = vmul.f32 %v1857_v33, %v1857_v33 }
 0x20d   :  { %v1838_v2 = vadd.f32 %v1837_v51, %v1826_v53  ;;  %v1880_v34 = vadd.f32 %v1879_v46, %v1868_v62  ;;  %v1798_v21 = vrot.slane %v1797_v52, 2  ;;  %v1861_v24 = vsub.f32 %v3931_v3, %v3936_v8 }
 0x20e   :  { %v1871_v10 = vmul.f32 %v1858_v13, %v1858_v13  ;;  %v1754_v29 = vadd.f32 %v1753_v12, %v1752_v35 }
 0x20f   :  { %v1839_v63 = vadd.f32 %v1838_v2, %v1827_v37  ;;  %v1881_v41 = vadd.f32 %v1880_v34, %v1869_v0  ;;  %v1860_v2 = vsub.f32 %v3926_v44, %v3936_v8  ;;  %v1799_v46 = vadd.f32 %v1798_v21, %v1797_v52 }
 0x210   :  { %v1874_v53 = vmul.f32 %v1861_v24, %v1861_v24  ;;  %v1755_v31 = vrot.slane %v1754_v29, 1 }
 0x211   :  { %v1841_v5 = vadd.f32 %v1840_v61, %v1839_v63  ;;  %v1882_v49 = vadd.f32 %v1881_v41, %v1870_v26  ;;  %v1872_v63 = vmul.f32 %v1859_v11, %v1859_v11  ;;  %v1873_v47 = vmul.f32 %v1860_v2, %v1860_v2 }
 0x212   :  { %v1800_v30 = vrot.slane %v1799_v46, 1  ;;  %v1886_v33 = vsel %vm1642_vm0, %v1874_v53, 0.0  ;;  %v1756_v34 = vadd.f32 %v1755_v31, %v1754_v29 }
 0x213   :  { %v1842_v19 = vrot.slane %v1841_v5, 4  ;;  %v1883_v62 = vadd.f32 %v1882_v49, %v1871_v10  ;;  %v1904_v49 = vlaneseq }
 0x214   :  { %v1801_v3 = vadd.f32 %v1800_v30, %v1799_v46 }
 0x215   :  { %v1843_v1 = vadd.f32 %v1842_v19, %v1841_v5  ;;  %v1884_v17 = vadd.f32 %v1883_v62, %v1872_v63  ;;  %v1905_v63 = vshrl.u32 %v1904_v49, 7 }
 0x216   :  { %v1802_v35 = vadd.f32 %v1801_v3, %v1756_v34  ;;  %v1900_v3 = vld [vmem:[%s4464_s4] sm:$0x1] }
 0x217   :  { %v1844_v51 = vrot.slane %v1843_v1, 2  ;;  %v1885_v37 = vadd.f32 %v1884_v17, %v1873_v47  ;;  %v1906_v29 = vsub.s32 0, %v1905_v63  ;;  %v4548_v63 = vld [vmem:[#allocation6_spill] sm:$0xff] }
 0x219   :  { %v1845_v61 = vadd.f32 %v1844_v51, %v1843_v1  ;;  %v1887_v0 = vadd.f32 %v1886_v33, %v1885_v37  ;;  %v1896_v1 = vld [vmem:[%s4463_s3] sm:$0x1] }
 0x21b   :  { %v1888_v13 = vrot.slane %v1887_v0, 4  ;;  %v1846_v26 = vrot.slane %v1845_v61, 1 }
 0x21d   :  { %v1889_v5 = vadd.f32 %v1888_v13, %v1887_v0  ;;  %v1847_v11 = vadd.f32 %v1846_v26, %v1845_v61 }
 0x21f   :  { %v1890_v52 = vrot.slane %v1889_v5, 2  ;;  %v1848_v21 = vadd.f32 %v1847_v11, %v1802_v35 }
 0x221   :  { %v1891_v12 = vadd.f32 %v1890_v52, %v1889_v5 }
 0x223   :  { %v1892_v41 = vrot.slane %v1891_v12, 1 }
 0x225   :  { %v1893_v19 = vadd.f32 %v1892_v41, %v1891_v12  ;;  %v4562_v41 = vld [vmem:[#allocation15_spill] sm:$0xff] }
 0x226   :  { %v4569_v12 = vld [vmem:[#allocation23_spill] sm:$0xff] }
 0x227   :  { %v1894_v24 = vadd.f32 %v1893_v19, %v1848_v21  ;;  %v4566_v21 = vld [vmem:[#allocation19_spill] sm:$0xff] }
 0x229   :  { %v1895_v2 = vmul.f32 0.0025510204, %v1894_v24  ;;  %v4555_v24 = vld [vmem:[#allocation14_spill] sm:$0xff] }
 0x22b   :  { %v1897_v10 = vadd.f32 1e-05, %v1895_v2  ;;  %v4553_v2 = vld [vmem:[#allocation12_spill] sm:$0xff] }
 0x22d   :  { %3087 = vrsqrt.f32 %v1897_v10  ;;  %v4551_v10 = vld [vmem:[#allocation9_spill] sm:$0xff] }
 0x237   :  { %v3088_v46 = vpop.eup %3087 }
 0x238   :  { %v1899_v62 = vmul.f32 %v3088_v46, %v1896_v1 }
 0x23a   :  { %v1901_v53 = vmul.f32 %v1899_v62, %v3936_v8  ;;  %v4053_v51 = vrot.slane %v1899_v62, %v1906_v29 }
 0x23c   :  { %v1902_v47 = vsub.f32 %v1900_v3, %v1901_v53  ;;  %v1909_v17 = vmul.f32 %v4053_v51, %v3725_v4  ;;  %v1910_v31 = vmul.f32 %v4053_v51, %v3728_v6  ;;  %v1911_v30 = vmul.f32 %v4053_v51, %v3731_v20 }
 0x23d   :  { %v1912_v37 = vmul.f32 %v4053_v51, %v3734_v22  ;;  %v1913_v33 = vmul.f32 %v4053_v51, %v3737_v38  ;;  %v1914_v8 = vmul.f32 %v4053_v51, %v3740_v40  ;;  %v1915_v61 = vmul.f32 %v4053_v51, %v3743_v54 }
 0x23e   :  { %v1916_v4 = vmul.f32 %v4053_v51, %v3746_v55  ;;  %v1917_v6 = vmul.f32 %v4053_v51, %v3749_v7  ;;  %v1918_v20 = vmul.f32 %v4053_v51, %v3752_v9  ;;  %v1919_v22 = vmul.f32 %v4053_v51, %v3755_v25 }
 0x23f   :  { %v1920_v38 = vmul.f32 %v4053_v51, %v3758_v27  ;;  %v1921_v40 = vmul.f32 %v4053_v51, %v3761_v43  ;;  %v4081_v0 = vrot.slane %v1902_v47, %v1906_v29  ;;  %v1954_v54 = vmul.f32 %v4053_v51, %v3764_v58  ;;  %v4547_v29 = vld [vmem:[#allocation5_spill] sm:$0xff] }
 0x240   :  { %v1955_v55 = vmul.f32 %v4053_v51, %v3767_v60  ;;  %v1956_v7 = vmul.f32 %v4053_v51, %v3770_v14  ;;  %v1957_v9 = vmul.f32 %v4053_v51, %v3773_v16  ;;  %v1958_v25 = vmul.f32 %v4053_v51, %v3776_v36 }
 0x241   :  { %v4094_v27 = vadd.f32 %v4081_v0, %v1909_v17  ;;  %v4097_v43 = vadd.f32 %v4081_v0, %v1910_v31  ;;  %v4100_v58 = vadd.f32 %v4081_v0, %v1911_v30  ;;  %v4103_v60 = vadd.f32 %v4081_v0, %v1912_v37  ;;  %v4544_v37 = vld [vmem:[#allocation2_spill] sm:$0xff] }
 0x242   :  { %v4106_v14 = vadd.f32 %v4081_v0, %v1913_v33  ;;  %v4109_v16 = vadd.f32 %v4081_v0, %v1914_v8  ;;  %v4112_v36 = vadd.f32 %v4081_v0, %v1915_v61  ;;  %v4115_v34 = vadd.f32 %v4081_v0, %v1916_v4 }
 0x243   :  { %v4118_v13 = vadd.f32 %v4081_v0, %v1917_v6  ;;  %v4121_v26 = vadd.f32 %v4081_v0, %v1918_v20  ;;  %v4124_v5 = vadd.f32 %v4081_v0, %v1919_v22  ;;  %v4127_v35 = vadd.f32 %v4081_v0, %v1920_v38 }
 0x244   :  { %v4130_v52 = vadd.f32 %v4081_v0, %v1921_v40  ;;  %v1959_v62 = vmul.f32 %v4053_v51, %v3779_v39  ;;  %v1960_v3 = vmul.f32 %v4053_v51, %v3782_v56  ;;  %v1961_v53 = vmul.f32 %v4053_v51, %v3785_v59 }
 0x245   :  { %v1962_v47 = vmul.f32 %v4053_v51, %v3788_v15  ;;  %v1963_v17 = vmul.f32 %v4053_v51, %v3791_v18  ;;  %v1964_v31 = vmul.f32 %v4053_v51, %v3794_v42  ;;  %v1965_v30 = vmul.f32 %v4053_v51, %v3797_v45 }
 0x246   :  { %v1966_v39 = vmul.f32 %v4053_v51, %v4544_v37  ;;  %v4162_v56 = vadd.f32 %v1954_v54, %v4081_v0  ;;  %v4165_v59 = vadd.f32 %v1955_v55, %v4081_v0  ;;  %v4168_v15 = vadd.f32 %v1956_v7, %v4081_v0  ;;  %v4564_v55 = vld [vmem:[#allocation17_spill] sm:$0xff] }
 0x247   :  { %v4171_v18 = vadd.f32 %v1957_v9, %v4081_v0  ;;  %v4174_v42 = vadd.f32 %v1958_v25, %v4081_v0  ;;  %v4177_v45 = vadd.f32 %v1959_v62, %v4081_v0  ;;  %v4180_v33 = vadd.f32 %v1960_v3, %v4081_v0  ;;  %v4549_v3 = vld [vmem:[#allocation7_spill] sm:$0xff]  ;;  %v4554_v25 = vld [vmem:[#allocation13_spill] sm:$0xff] }
 0x248   :  { %v4183_v8 = vadd.f32 %v1961_v53, %v4081_v0  ;;  %v4186_v61 = vadd.f32 %v1962_v47, %v4081_v0  ;;  %v4189_v4 = vadd.f32 %v1963_v17, %v4081_v0  ;;  %v4192_v6 = vadd.f32 %v1964_v31, %v4081_v0  ;;  %v4550_v47 = vld [vmem:[#allocation8_spill] sm:$0xff]  ;;  %v4552_v62 = vld [vmem:[#allocation11_spill] sm:$0xff]  ;;  %v4568_v54 = vld [vmem:[#allocation21_spill] sm:$0xff] }
 0x249   :  { %v4195_v20 = vadd.f32 %v1965_v30, %v4081_v0  ;;  %v4198_v22 = vadd.f32 %v1966_v39, %v4081_v0  ;;  %v4545_v30 = vld [vmem:[#allocation3_spill] sm:$0xff]  ;;  %v4546_v39 = vld [vmem:[#allocation4_spill] sm:$0xff]  ;;  %v1995_v1 = vmul.f32 %v4053_v51, %v4547_v29  ;;  %v1996_v49 = vmul.f32 %v4053_v51, %v4548_v63 }
 0x24a   :  { %v1993_v37 = vmul.f32 %v4053_v51, %v4545_v30  ;;  %v1994_v46 = vmul.f32 %v4053_v51, %v4546_v39  ;;  %v1997_v53 = vmul.f32 %v4053_v51, %v4549_v3  ;;  %v1998_v17 = vmul.f32 %v4053_v51, %v4550_v47 }
 0x24b   :  { %v1999_v31 = vmul.f32 %v4053_v51, %v4551_v10  ;;  %v2000_v30 = vmul.f32 %v4053_v51, %v3824_v48  ;;  %v2001_v39 = vmul.f32 %v4053_v51, %v4534_v50  ;;  %v2002_v29 = vmul.f32 %v4053_v51, %v4552_v62 }
 0x24c   :  { %v2003_v63 = vmul.f32 %v4053_v51, %v4553_v2  ;;  %v2004_v3 = vmul.f32 %v4053_v51, %v4554_v25  ;;  %v2005_v47 = vmul.f32 %v4053_v51, %v4555_v24  ;;  %v4240_v10 = vadd.f32 %v1993_v37, %v4081_v0 }
 0x24d   :  { %v4243_v48 = vadd.f32 %v1994_v46, %v4081_v0  ;;  %v4246_v50 = vadd.f32 %v1995_v1, %v4081_v0  ;;  %v4249_v62 = vadd.f32 %v1996_v49, %v4081_v0  ;;  %v4252_v2 = vadd.f32 %v1997_v53, %v4081_v0 }
 0x24e   :  { %v4255_v25 = vadd.f32 %v1998_v17, %v4081_v0  ;;  %v4258_v24 = vadd.f32 %v1999_v31, %v4081_v0  ;;  %v4261_v37 = vadd.f32 %v2000_v30, %v4081_v0  ;;  %v4264_v46 = vadd.f32 %v2001_v39, %v4081_v0  ;;  %v4567_v31 = vld [vmem:[#allocation20_spill] sm:$0xff] }
 0x24f   :  { %v4267_v1 = vadd.f32 %v2002_v29, %v4081_v0  ;;  %v4270_v49 = vadd.f32 %v2003_v63, %v4081_v0  ;;  %v4273_v53 = vadd.f32 %v2004_v3, %v4081_v0  ;;  %v4276_v17 = vadd.f32 %v2005_v47, %v4081_v0  ;;  %v4563_v29 = vld [vmem:[#allocation16_spill] sm:$0xff]  ;;  %v4565_v3 = vld [vmem:[#allocation18_spill] sm:$0xff] }
 0x250   :  { %4556 = vst [vmem:[#allocation10_spill] sm:$0xff] %v4261_v37  ;;  %4557 = vst [vmem:[#allocation22_spill] sm:$0xff] %v4264_v46  ;;  %v2032_v39 = vmul.f32 %v4053_v51, %v4562_v41  ;;  %v2033_v19 = vmul.f32 %v4053_v51, %v4563_v29  ;;  %v2034_v63 = vmul.f32 %v4053_v51, %v4564_v55 }
 0x251   :  { %4558 = vst [vmem:[#allocation2_spill] sm:$0xff] %v4267_v1  ;;  %4559 = vst [vmem:[#allocation3_spill] sm:$0xff] %v4270_v49  ;;  %v2035_v7 = vmul.f32 %v4053_v51, %v4565_v3  ;;  %v2036_v47 = vmul.f32 %v4053_v51, %v4566_v21  ;;  %v2037_v30 = vmul.f32 %v4053_v51, %v4567_v31 }
 0x252   :  { %4560 = vst [vmem:[#allocation4_spill] sm:$0xff] %v4273_v53  ;;  %4561 = vst [vmem:[#allocation5_spill] sm:$0xff] %v4276_v17  ;;  %v2038_v9 = vmul.f32 %v4053_v51, %v4568_v54  ;;  %v2039_v41 = vmul.f32 %v4053_v51, %v4543_v57  ;;  %v2040_v29 = vmul.f32 %v4053_v51, %v3912_v32 }
 0x253   :  { %v2041_v55 = vmul.f32 %v4053_v51, %v3918_v28  ;;  %v2042_v3 = vmul.f32 %v4053_v51, %v3923_v23  ;;  %v2043_v21 = vmul.f32 %v4053_v51, %v3926_v44  ;;  %v2044_v31 = vmul.f32 %v4053_v51, %v4569_v12 }
 0x254   :  { %v2045_v54 = vadd.f32 %v2032_v39, %v4081_v0  ;;  %v2046_v40 = vadd.f32 %v2033_v19, %v4081_v0  ;;  %v2047_v57 = vadd.f32 %v2034_v63, %v4081_v0  ;;  %v2048_v32 = vadd.f32 %v2035_v7, %v4081_v0 }
 0x255   :  { %v2049_v11 = vadd.f32 %v2036_v47, %v4081_v0  ;;  %v2050_v28 = vadd.f32 %v2037_v30, %v4081_v0  ;;  %v2051_v23 = vadd.f32 %v2038_v9, %v4081_v0  ;;  %v2052_v38 = vadd.f32 %v2039_v41, %v4081_v0 }
 0x256   :  { %v2053_v44 = vadd.f32 %v2040_v29, %v4081_v0  ;;  %v2054_v51 = vadd.f32 %v2041_v55, %v4081_v0  ;;  %v2055_v12 = vadd.f32 %v2042_v3, %v4081_v0  ;;  %v2056_v19 = vadd.f32 %v2043_v21, %v4081_v0 }
 0x257   :  { %v2057_v39 = vadd.f32 %v2044_v31, %v4081_v0  ;;  %v2058_v63 = vmax.f32 %v2045_v54, 0.0  ;;  %v2059_v7 = vmax.f32 %v2046_v40, 0.0  ;;  %v2060_v17 = vmax.f32 %v2047_v57, 0.0 }
 0x258   :  { %v2061_v47 = vmax.f32 %v2048_v32, 0.0  ;;  %v2062_v53 = vmax.f32 %v2049_v11, 0.0  ;;  %v2063_v30 = vmax.f32 %v2050_v28, 0.0  ;;  %v2064_v49 = vmax.f32 %v2051_v23, 0.0 }
 0x259   :  { %v2065_v9 = vmax.f32 %v2052_v38, 0.0  ;;  %v2066_v1 = vmax.f32 %v2053_v44, 0.0  ;;  %v2067_v41 = vmax.f32 %v2054_v51, 0.0  ;;  %v2068_v46 = vmax.f32 %v2055_v12, 0.0 }
 0x25a   :  { %v2069_v29 = vmax.f32 %v2056_v19, 0.0  ;;  %v2070_v37 = vmax.f32 %v2057_v39, 0.0  ;;  %v4570_v55 = vmax.f32 %v4162_v56, 0.0  ;;  %v4571_v3 = vmax.f32 %v4094_v27, 0.0 }
 0x25b   :  { %v4572_v0 = vmax.f32 %v4165_v59, 0.0  ;;  %v4573_v40 = vmax.f32 %v4097_v43, 0.0  ;;  %v4574_v11 = vmax.f32 %v4168_v15, 0.0  ;;  %v4575_v54 = vmax.f32 %v4100_v58, 0.0 }
 0x25c   :  { %v2071_v21 = vmax.f32 %v4571_v3, %v4570_v55  ;;  %v4576_v57 = vmax.f32 %v4171_v18, 0.0  ;;  %v4577_v32 = vmax.f32 %v4103_v60, 0.0  ;;  %v4578_v56 = vmax.f32 %v4174_v42, 0.0 }
 0x25d   :  { %v2072_v31 = vmax.f32 %v4573_v40, %v4572_v0  ;;  %v2073_v38 = vmax.f32 %v4575_v54, %v4574_v11  ;;  %v4579_v27 = vmax.f32 %v4106_v14, 0.0  ;;  %v4580_v59 = vmax.f32 %v4177_v45, 0.0 }
 0x25e   :  { %v2074_v28 = vmax.f32 %v4577_v32, %v4576_v57  ;;  %v4581_v43 = vmax.f32 %v4109_v16, 0.0  ;;  %v4582_v15 = vmax.f32 %v4180_v33, 0.0  ;;  %v4583_v58 = vmax.f32 %v4112_v36, 0.0 }
 0x25f   :  { %v2075_v23 = vmax.f32 %v4579_v27, %v4578_v56  ;;  %v4584_v18 = vmax.f32 %v4183_v8, 0.0  ;;  %v4585_v60 = vmax.f32 %v4115_v34, 0.0  ;;  %v4586_v42 = vmax.f32 %v4186_v61, 0.0 }
 0x260   :  { %v2076_v44 = vmax.f32 %v4581_v43, %v4580_v59  ;;  %v2077_v51 = vmax.f32 %v4583_v58, %v4582_v15  ;;  %v4587_v14 = vmax.f32 %v4118_v13, 0.0  ;;  %v4588_v45 = vmax.f32 %v4189_v4, 0.0 }
 0x261   :  { %v2078_v12 = vmax.f32 %v4585_v60, %v4584_v18  ;;  %v4589_v16 = vmax.f32 %v4121_v26, 0.0  ;;  %v4590_v33 = vmax.f32 %v4192_v6, 0.0  ;;  %v4591_v36 = vmax.f32 %v4124_v5, 0.0 }
 0x262   :  { %v2079_v19 = vmax.f32 %v4587_v14, %v4586_v42  ;;  %v4592_v8 = vmax.f32 %v4195_v20, 0.0  ;;  %v4593_v34 = vmax.f32 %v4127_v35, 0.0  ;;  %v4594_v61 = vmax.f32 %v4198_v22, 0.0 }
 0x263   :  { %v2080_v39 = vmax.f32 %v4589_v16, %v4588_v45  ;;  %v2081_v55 = vmax.f32 %v4591_v36, %v4590_v33  ;;  %v4595_v13 = vmax.f32 %v4130_v52, 0.0  ;;  %v4596_v4 = vmax.f32 %v4240_v10, 0.0 }
 0x264   :  { %v2082_v3 = vmax.f32 %v4593_v34, %v4592_v8  ;;  %v4597_v26 = vmax.f32 %v4243_v48, 0.0  ;;  %v4598_v6 = vmax.f32 %v4246_v50, 0.0  ;;  %v4599_v54 = vmax.f32 %v4249_v62, 0.0 }
 0x265   :  { %v2083_v0 = vmax.f32 %v4595_v13, %v4594_v61  ;;  %v2084_v40 = vmax.f32 %v4596_v4, %v2058_v63  ;;  %v4600_v35 = vmax.f32 %v4252_v2, 0.0  ;;  %v4601_v22 = vmax.f32 %v4255_v25, 0.0  ;;  %v4603_v63 = vld [vmem:[#allocation10_spill] sm:$0xff]  ;;  %v4613_v25 = vld [vmem:[#allocation5_spill] sm:$0xff] }
 0x266   :  { %v2085_v11 = vmax.f32 %v4597_v26, %v2059_v7  ;;  %v2086_v5 = vmax.f32 %v4598_v6, %v2060_v17  ;;  %v2087_v20 = vmax.f32 %v4599_v54, %v2061_v47  ;;  %v4602_v32 = vmax.f32 %v4258_v24, 0.0  ;;  %v4605_v7 = vld [vmem:[#allocation22_spill] sm:$0xff]  ;;  %v4609_v47 = vld [vmem:[#allocation3_spill] sm:$0xff] }
 0x267   :  { %v2088_v57 = vmax.f32 %v4600_v35, %v2062_v53  ;;  %v2089_v52 = vmax.f32 %v4601_v22, %v2063_v30  ;;  %v4604_v56 = vmax.f32 %v4603_v63, 0.0  ;;  %v4606_v27 = vmax.f32 %v4605_v7, 0.0  ;;  %v4607_v17 = vld [vmem:[#allocation2_spill] sm:$0xff]  ;;  %v4611_v53 = vld [vmem:[#allocation4_spill] sm:$0xff] }
 0x268   :  { %v2090_v10 = vmax.f32 %v4602_v32, %v2064_v49  ;;  %v4608_v59 = vmax.f32 %v4607_v17, 0.0  ;;  %v4610_v43 = vmax.f32 %v4609_v47, 0.0  ;;  %v4612_v15 = vmax.f32 %v4611_v53, 0.0 }
 0x269   :  { %v2091_v48 = vmax.f32 %v4604_v56, %v2065_v9  ;;  %v2092_v50 = vmax.f32 %v4606_v27, %v2066_v1  ;;  %v4614_v30 = vmax.f32 %v4613_v25, 0.0  ;;  %v2097_v24 = vmax.f32 %v2071_v21, %v2084_v40 }
 0x26a   :  { %v2093_v62 = vmax.f32 %v4608_v59, %v2067_v41  ;;  %v2094_v2 = vmax.f32 %v4610_v43, %v2068_v46  ;;  %v2095_v58 = vmax.f32 %v4612_v15, %v2069_v29  ;;  %v2098_v49 = vmax.f32 %v2072_v31, %v2085_v11 }
 0x26b   :  { %v2096_v18 = vmax.f32 %v4614_v30, %v2070_v37  ;;  %v2099_v60 = vmax.f32 %v2073_v38, %v2086_v5  ;;  %v2100_v42 = vmax.f32 %v2074_v28, %v2087_v20  ;;  %v2101_v9 = vmax.f32 %v2075_v23, %v2088_v57 }
 0x26c   :  { %v2102_v14 = vmax.f32 %v2076_v44, %v2089_v52  ;;  %v2103_v45 = vmax.f32 %v2077_v51, %v2090_v10  ;;  %v2104_v1 = vmax.f32 %v2078_v12, %v2091_v48  ;;  %v2105_v16 = vmax.f32 %v2079_v19, %v2092_v50 }
 0x26d   :  { %v2106_v33 = vmax.f32 %v2080_v39, %v2093_v62  ;;  %v2107_v41 = vmax.f32 %v2081_v55, %v2094_v2  ;;  %v2108_v36 = vmax.f32 %v2082_v3, %v2095_v58  ;;  %v2109_v8 = vmax.f32 %v2083_v0, %v2096_v18 }
 0x26e   :  { %v2418_v46 = vpack.c.bf16 %v2097_v24, %v2097_v24  ;;  %v2419_v34 = vpack.c.bf16 %v2098_v49, %v2098_v49  ;;  %v2420_v61 = vpack.c.bf16 %v2099_v60, %v2099_v60  ;;  %v2421_v29 = vpack.c.bf16 %v2100_v42, %v2100_v42 }
 0x26f   :  { %v2422_v13 = vpack.c.bf16 %v2101_v9, %v2101_v9  ;;  %v2423_v4 = vpack.c.bf16 %v2102_v14, %v2102_v14  ;;  %v2424_v37 = vpack.c.bf16 %v2103_v45, %v2103_v45  ;;  %v2425_v21 = vpack.c.bf16 %v2104_v1, %v2104_v1 }
 0x270   :  { %v2426_v31 = vpack.c.bf16 %v2105_v16, %v2105_v16  ;;  %v2427_v38 = vpack.c.bf16 %v2106_v33, %v2106_v33  ;;  %v2428_v28 = vpack.c.bf16 %v2107_v41, %v2107_v41  ;;  %2164 = vst.msk [vmem:[%s4465_s5] sm:$0xf] %vm2163_vm1, %v2418_v46  ;;  %2165 = vst.msk [vmem:[%s4465_s5 + $0x4] sm:$0xf] %vm2163_vm1, %v2419_v34 }
 0x271   :  { %2166 = vst.msk [vmem:[%s4465_s5 + $0x8] sm:$0xf] %vm2163_vm1, %v2420_v61  ;;  %v2429_v23 = vpack.c.bf16 %v2108_v36, %v2108_v36  ;;  %v2430_v44 = vpack.c.bf16 %v2109_v8, %v2109_v8  ;;  %2167 = vst.msk [vmem:[%s4465_s5 + $0xc] sm:$0xf] %vm2163_vm1, %v2421_v29 }
 0x272   :  { %2168 = vst.msk [vmem:[%s4465_s5 + $0x10] sm:$0xf] %vm2163_vm1, %v2422_v13  ;;  %2169 = vst.msk [vmem:[%s4465_s5 + $0x14] sm:$0xf] %vm2163_vm1, %v2423_v4 }
 0x273   :  { %2170 = vst.msk [vmem:[%s4465_s5 + $0x18] sm:$0xf] %vm2163_vm1, %v2424_v37  ;;  %2171 = vst.msk [vmem:[%s4465_s5 + $0x1c] sm:$0xf] %vm2163_vm1, %v2425_v21 }
 0x274   :  { %2172 = vst.msk [vmem:[%s4465_s5 + $0x20] sm:$0xf] %vm2163_vm1, %v2426_v31  ;;  %2173 = vst.msk [vmem:[%s4465_s5 + $0x24] sm:$0xf] %vm2163_vm1, %v2427_v38 }
 0x275   :  { %2174 = vst.msk [vmem:[%s4465_s5 + $0x28] sm:$0xf] %vm2163_vm1, %v2428_v28  ;;  %2175 = vst.msk [vmem:[%s4465_s5 + $0x2c] sm:$0xf] %vm2163_vm1, %v2429_v23 }
 0x276   :  { %2177 = vst.msk [vmem:[%s4465_s5 + $0x30] sm:$0x1] %vm2176_vm2, %v2430_v44 }

// kernel: simple_convnet_forward.5
= control target key start
LH: loop header
LB: loop body
LE: loop exit
PB: predicated region body
PF: predicated region fallthrough
CT: control target
= control target key end

     0   :  { %v227_v29 = vlaneseq  ;;  %v1581_v35 = vmov 1966171168   ;;  %s1938_s0 = inlined_call_operand.vmem [shape: bf16[2,1568], index: 0, kind: input, shape index: {}]   ;;  %s1939_s1 = inlined_call_operand.vmem [shape: bf16[1568,128], index: 1, kind: input, shape index: {}]   ;;  %s1940_s2 = inlined_call_operand.vmem [shape: f32[1,128], index: 2, kind: input, shape index: {}]   ;;  %s1941_s3 = inlined_call_operand.hbm [shape: f32[2,128], index: 3, kind: output, shape index: {}]  }
   0x1   :  { %v1457_v0 = vld [vmem:[%s1939_s1 + $0x40] sm:$0xff]   ;;  %v1461_v4 = vld [vmem:[%s1939_s1 + $0x48] sm:$0xff]   ;;  %v1465_v8 = vld [vmem:[%s1939_s1 + $0x50] sm:$0xff]   ;;  %v225_v36 = vunpack.c.l.s4 %v1581_v35 }
   0x2   :  { %v1458_v1 = vld [vmem:[%s1939_s1] sm:$0xff]   ;;  %1310 = vmatprep.subr.bf16.mxu0 %v1457_v0  ;;  %v1462_v5 = vld [vmem:[%s1939_s1 + $0x8] sm:$0xff]   ;;  %v1466_v9 = vld [vmem:[%s1939_s1 + $0x10] sm:$0xff]   ;;  %v228_v33 = vshrl.u32 %v227_v29, 7 }
   0x3   :  { %v1459_v2 = vld [vmem:[%s1939_s1 + $0xc0] sm:$0xff]   ;;  %1311 = vmatpush3.bf16.msra.mxu0 %v1458_v1  ;;  %v1463_v6 = vld [vmem:[%s1939_s1 + $0xc8] sm:$0xff]   ;;  %v1467_v10 = vld [vmem:[%s1939_s1 + $0xd0] sm:$0xff]   ;;  %v226_v39 = vunpack.c.0.s8 %v225_v36 }
   0x4   :  { %v1460_v3 = vld [vmem:[%s1939_s1 + $0x80] sm:$0xff]   ;;  %1332 = vmatprep.subr.bf16.mxu1 %v1459_v2  ;;  %1312 = vmatprep.subr.bf16.mxu0 %v1461_v4  ;;  %v1464_v7 = vld [vmem:[%s1939_s1 + $0x88] sm:$0xff]   ;;  %v1468_v11 = vld [vmem:[%s1939_s1 + $0x90] sm:$0xff]  }
   0x5   :  { %1333 = vmatpush3.bf16.msra.mxu1 %v1460_v3  ;;  %v1469_v12 = vld [vmem:[%s1939_s1 + $0x58] sm:$0xff]   ;;  %v1473_v16 = vld [vmem:[%s1939_s1 + $0x60] sm:$0xff]   ;;  %v1477_v20 = vld [vmem:[%s1939_s1 + $0x68] sm:$0xff]   ;;  %v1710_v41 = vsub.s32 %v226_v39, %v228_v33 }
   0x6   :  { %1334 = vmatprep.subr.bf16.mxu1 %v1463_v6  ;;  %v1470_v13 = vld [vmem:[%s1939_s1 + $0x18] sm:$0xff]   ;;  %v1474_v17 = vld [vmem:[%s1939_s1 + $0x20] sm:$0xff]   ;;  %v1478_v21 = vld [vmem:[%s1939_s1 + $0x28] sm:$0xff]  }
   0x7   :  { %1313 = vmatpush3.bf16.msra.mxu0 %v1462_v5  ;;  %v1471_v14 = vld [vmem:[%s1939_s1 + $0xd8] sm:$0xff]   ;;  %v1475_v18 = vld [vmem:[%s1939_s1 + $0xe0] sm:$0xff]   ;;  %v1479_v22 = vld [vmem:[%s1939_s1 + $0xe8] sm:$0xff]  }
   0x8   :  { %1314 = vmatprep.subr.bf16.mxu0 %v1465_v8  ;;  %v1472_v15 = vld [vmem:[%s1939_s1 + $0x98] sm:$0xff]   ;;  %v1476_v19 = vld [vmem:[%s1939_s1 + $0xa0] sm:$0xff]   ;;  %v1480_v23 = vld [vmem:[%s1939_s1 + $0xa8] sm:$0xff]  }
   0x9   :  { %1335 = vmatpush3.bf16.msra.mxu1 %v1464_v7  ;;  %v1481_v24 = vld [vmem:[%s1939_s1 + $0x70] sm:$0xff]   ;;  %v1485_v28 = vld [vmem:[%s1939_s1 + $0x78] sm:$0xff]   ;;  %v1490_v34 = vld [vmem:[%s1939_s1 + $0x140] sm:$0xff]  }
   0xa   :  { %1336 = vmatprep.subr.bf16.mxu1 %v1467_v10  ;;  %v1482_v25 = vld [vmem:[%s1939_s1 + $0x30] sm:$0xff]   ;;  %v1486_v30 = vld [vmem:[%s1939_s1 + $0x38] sm:$0xff]   ;;  %v16_v37 = vld [vmem:[%s1938_s0] sm:$0xff] }
   0xb   :  { %1315 = vmatpush3.bf16.msra.mxu0 %v1466_v9  ;;  %v1483_v26 = vld [vmem:[%s1939_s1 + $0xf0] sm:$0xff]   ;;  %v1487_v31 = vld [vmem:[%s1939_s1 + $0xf8] sm:$0xff]   ;;  %v223_v38 = vcombine.high %v16_v37, %v16_v37  ;;  %v1492_v40 = vld [vmem:[%s1939_s1 + $0x1c0] sm:$0xff]   ;;  %v230_v42 = vrot.slane %v16_v37, %v1710_v41 }
   0xc   :  { %1316 = vmatprep.subr.bf16.mxu0 %v1469_v12  ;;  %v1484_v27 = vld [vmem:[%s1939_s1 + $0xb0] sm:$0xff]   ;;  %v1488_v32 = vld [vmem:[%s1939_s1 + $0xb8] sm:$0xff]   ;;  %v1491_v48 = vld [vmem:[%s1939_s1 + $0x100] sm:$0xff]  }
   0xd   :  { %1337 = vmatpush3.bf16.msra.mxu1 %v1468_v11  ;;  %v1714_v43 = vrot.slane %v223_v38, %v1710_v41  ;;  %v238_v44 = vcombine.high %v230_v42, %v230_v42  ;;  %v246_v45 = vrot.slane %v230_v42, %v1710_v41  ;;  %v1494_v51 = vld [vmem:[%s1939_s1 + $0x148] sm:$0xff]   ;;  %v1493_v53 = vld [vmem:[%s1939_s1 + $0x180] sm:$0xff]   ;;  %v1498_v57 = vld [vmem:[%s1939_s1 + $0x150] sm:$0xff]  }
   0xe   :  { %1338 = vmatprep.subr.bf16.mxu1 %v1471_v14  ;;  %v1496_v54 = vld [vmem:[%s1939_s1 + $0x1c8] sm:$0xff]   ;;  %v1500_v59 = vld [vmem:[%s1939_s1 + $0x1d0] sm:$0xff]   ;;  %v1502_v61 = vld [vmem:[%s1939_s1 + $0x158] sm:$0xff]  }
   0xf   :  { %1317 = vmatpush3.bf16.msra.mxu0 %v1470_v13  ;;  %v239_v46 = vcombine.high %v1714_v43, %v1714_v43  ;;  %v260_v47 = vrot.slane %v238_v44, %v1710_v41  ;;  %v268_v50 = vcombine.high %v246_v45, %v246_v45  ;;  %v1495_v56 = vld [vmem:[%s1939_s1 + $0x108] sm:$0xff]   ;;  %v1499_v60 = vld [vmem:[%s1939_s1 + $0x110] sm:$0xff]   ;;  %v1504_v63 = vld [vmem:[%s1939_s1 + $0x1d8] sm:$0xff]  }
  0x10   :  { %1318 = vmatprep.subr.bf16.mxu0 %v1473_v16  ;;  %v1497_v58 = vld [vmem:[%s1939_s1 + $0x188] sm:$0xff]   ;;  %v1501_v62 = vld [vmem:[%s1939_s1 + $0x190] sm:$0xff]   ;;  %v1503_v0 = vld [vmem:[%s1939_s1 + $0x118] sm:$0xff]  }
  0x11   :  { %1339 = vmatpush3.bf16.msra.mxu1 %v1472_v15  ;;  %v267_v49 = vrot.slane %v239_v46, %v1710_v41  ;;  %947 = vmatprep.mubr.bf16.mxu0 %v260_v47  ;;  %v270_v52 = vcombine.high %v260_v47, %v260_v47  ;;  %v1506_v1 = vld [vmem:[%s1939_s1 + $0x160] sm:$0xff]   ;;  %v1505_v2 = vld [vmem:[%s1939_s1 + $0x198] sm:$0xff]   ;;  %v1510_v5 = vld [vmem:[%s1939_s1 + $0x168] sm:$0xff]  }
  0x12   :  { %1340 = vmatprep.subr.bf16.mxu1 %v1475_v18  ;;  %v1508_v3 = vld [vmem:[%s1939_s1 + $0x1e0] sm:$0xff]   ;;  %v1512_v7 = vld [vmem:[%s1939_s1 + $0x1e8] sm:$0xff]   ;;  %v1514_v9 = vld [vmem:[%s1939_s1 + $0x170] sm:$0xff]  }
  0x13   :  { %1319 = vmatpush3.bf16.msra.mxu0 %v1474_v17  ;;  %v271_v55 = vcombine.high %v267_v49, %v267_v49  ;;  %987 = vmatprep.mubr.bf16.mxu1 %v270_v52  ;;  %v1507_v4 = vld [vmem:[%s1939_s1 + $0x120] sm:$0xff]   ;;  %v1511_v8 = vld [vmem:[%s1939_s1 + $0x128] sm:$0xff]   ;;  %v1516_v11 = vld [vmem:[%s1939_s1 + $0x1f0] sm:$0xff]   ;;  %v253_v17 = vrot.slane %v1714_v43, %v1710_v41 }
  0x14   :  { %1320 = vmatprep.subr.bf16.mxu0 %v1477_v20  ;;  %v1509_v6 = vld [vmem:[%s1939_s1 + $0x1a0] sm:$0xff]   ;;  %v1513_v10 = vld [vmem:[%s1939_s1 + $0x1a8] sm:$0xff]   ;;  %v1515_v12 = vld [vmem:[%s1939_s1 + $0x130] sm:$0xff]  }
  0x15   :  { %1341 = vmatpush3.bf16.msra.mxu1 %v1476_v19  ;;  %v1518_v13 = vld [vmem:[%s1939_s1 + $0x178] sm:$0xff]   ;;  %v1517_v14 = vld [vmem:[%s1939_s1 + $0x1b0] sm:$0xff]   ;;  %v1522_v18 = vld [vmem:[%s1939_s1 + $0x240] sm:$0xff]  }
  0x16   :  { %1342 = vmatprep.subr.bf16.mxu1 %v1479_v22  ;;  %v1520_v15 = vld [vmem:[%s1939_s1 + $0x1f8] sm:$0xff]   ;;  %v1524_v20 = vld [vmem:[%s1939_s1 + $0x2c0] sm:$0xff]   ;;  %v269_v22 = vcombine.high %v253_v17, %v253_v17  ;;  %v1532_v29 = vld [vmem:[%s1939_s1 + $0x2d0] sm:$0xff]  }
  0x17   :  { %1321 = vmatpush3.bf16.msra.mxu0 %v1478_v21  ;;  %v1519_v16 = vld [vmem:[%s1939_s1 + $0x138] sm:$0xff]   ;;  %v1523_v21 = vld [vmem:[%s1939_s1 + $0x200] sm:$0xff]   ;;  %v1542_v39 = vld [vmem:[%s1939_s1 + $0x268] sm:$0xff]  }
  0x18   :  { %1322 = vmatprep.subr.bf16.mxu0 %v1481_v24  ;;  %v1521_v19 = vld [vmem:[%s1939_s1 + $0x1b8] sm:$0xff]   ;;  %v1525_v24 = vld [vmem:[%s1939_s1 + $0x280] sm:$0xff]   ;;  %v1544_v42 = vld [vmem:[%s1939_s1 + $0x2e8] sm:$0xff]  }
  0x19   :  { %1343 = vmatpush3.bf16.msra.mxu1 %v1480_v23  ;;  %v1526_v23 = vld [vmem:[%s1939_s1 + $0x248] sm:$0xff]   ;;  %v1536_v33 = vld [vmem:[%s1939_s1 + $0x2d8] sm:$0xff]   ;;  %v1538_v35 = vld [vmem:[%s1939_s1 + $0x260] sm:$0xff]  }
  0x1a   :  { %1344 = vmatprep.subr.bf16.mxu1 %v1483_v26  ;;  %v1527_v26 = vld [vmem:[%s1939_s1 + $0x208] sm:$0xff]   ;;  %v1537_v36 = vld [vmem:[%s1939_s1 + $0x298] sm:$0xff]   ;;  %v1540_v37 = vld [vmem:[%s1939_s1 + $0x2e0] sm:$0xff]  }
  0x1b   :  { %1323 = vmatpush3.bf16.msra.mxu0 %v1482_v25  ;;  %v1528_v25 = vld [vmem:[%s1939_s1 + $0x2c8] sm:$0xff]   ;;  %v1539_v38 = vld [vmem:[%s1939_s1 + $0x220] sm:$0xff]   ;;  %v1546_v44 = vld [vmem:[%s1939_s1 + $0x270] sm:$0xff]  }
  0x1c   :  { %1324 = vmatprep.subr.bf16.mxu0 %v1485_v28  ;;  %v1529_v28 = vld [vmem:[%s1939_s1 + $0x288] sm:$0xff]  }
  0x1d   :  { %1345 = vmatpush3.bf16.msra.mxu1 %v1484_v27  ;;  %v1530_v27 = vld [vmem:[%s1939_s1 + $0x250] sm:$0xff]   ;;  %v1543_v43 = vld [vmem:[%s1939_s1 + $0x228] sm:$0xff]  }
  0x1e   :  { %1346 = vmatprep.subr.bf16.mxu1 %v1487_v31  ;;  %v1534_v31 = vld [vmem:[%s1939_s1 + $0x258] sm:$0xff]   ;;  %v1545_v46 = vld [vmem:[%s1939_s1 + $0x2a8] sm:$0xff]  }
  0x1f   :  { %1325 = vmatpush3.bf16.msra.mxu0 %v1486_v30  ;;  %v1531_v30 = vld [vmem:[%s1939_s1 + $0x210] sm:$0xff]  }
  0x20   :  { %1354 = vmatprep.subr.bf16.mxu0 %v1490_v34  ;;  %v1535_v34 = vld [vmem:[%s1939_s1 + $0x218] sm:$0xff]  }
  0x21   :  { %1347 = vmatpush3.bf16.msra.mxu1 %v1488_v32  ;;  %v1533_v32 = vld [vmem:[%s1939_s1 + $0x290] sm:$0xff]  }
  0x22   :  { %1376 = vmatprep.subr.bf16.mxu1 %v1492_v40  ;;  %948 = vmatmul.mubr.bf16.vlgmr.msra.gmra.mrb[0].mxu0 %v246_v45  ;;  %v1541_v40 = vld [vmem:[%s1939_s1 + $0x2a0] sm:$0xff]   ;;  %v17_v45 = vld [vmem:[%s1938_s0 + $0x8] sm:$0x1f] }
  0x23   :  { %1355 = vmatpush3.bf16.msra.mxu0 %v1491_v48  ;;  %1027 = vmatprep.mubr.bf16.mxu0 %v267_v49  ;;  %v279_v47 = vrot.slane %v17_v45, %v1710_v41  ;;  %v1548_v48 = vld [vmem:[%s1939_s1 + $0x2f0] sm:$0xff]  }
  0x24   :  { %988 = vmatmul.mubr.bf16.vlgmr.msra.gmra.mrb[0].mxu1 %v268_v50  ;;  %1356 = vmatprep.subr.bf16.mxu0 %v1494_v51 }
  0x25   :  { %1377 = vmatpush3.bf16.msra.mxu1 %v1493_v53  ;;  %1067 = vmatprep.mubr.bf16.mxu1 %v271_v55 }
  0x26   :  { %1378 = vmatprep.subr.bf16.mxu1 %v1496_v54 }
  0x27   :  { %1357 = vmatpush3.bf16.msra.mxu0 %v1495_v56 }
  0x28   :  { %1358 = vmatprep.subr.bf16.mxu0 %v1498_v57 }
  0x29   :  { %1379 = vmatpush3.bf16.msra.mxu1 %v1497_v58 }
  0x2a   :  { %1380 = vmatprep.subr.bf16.mxu1 %v1500_v59 }
  0x2b   :  { %1359 = vmatpush3.bf16.msra.mxu0 %v1499_v60 }
  0x2c   :  { %1360 = vmatprep.subr.bf16.mxu0 %v1502_v61 }
  0x2d   :  { %1381 = vmatpush3.bf16.msra.mxu1 %v1501_v62 }
  0x2e   :  { %1382 = vmatprep.subr.bf16.mxu1 %v1504_v63 }
  0x2f   :  { %1361 = vmatpush3.bf16.msra.mxu0 %v1503_v0 }
  0x30   :  { %1362 = vmatprep.subr.bf16.mxu0 %v1506_v1 }
  0x31   :  { %1383 = vmatpush3.bf16.msra.mxu1 %v1505_v2 }
  0x32   :  { %1384 = vmatprep.subr.bf16.mxu1 %v1508_v3 }
  0x33   :  { %1363 = vmatpush3.bf16.msra.mxu0 %v1507_v4 }
  0x34   :  { %1364 = vmatprep.subr.bf16.mxu0 %v1510_v5 }
  0x35   :  { %1385 = vmatpush3.bf16.msra.mxu1 %v1509_v6 }
  0x36   :  { %1386 = vmatprep.subr.bf16.mxu1 %v1512_v7 }
  0x37   :  { %1365 = vmatpush3.bf16.msra.mxu0 %v1511_v8 }
  0x38   :  { %1366 = vmatprep.subr.bf16.mxu0 %v1514_v9 }
  0x39   :  { %1387 = vmatpush3.bf16.msra.mxu1 %v1513_v10 }
  0x3a   :  { %1388 = vmatprep.subr.bf16.mxu1 %v1516_v11 }
  0x3b   :  { %1367 = vmatpush3.bf16.msra.mxu0 %v1515_v12 }
  0x3c   :  { %1368 = vmatprep.subr.bf16.mxu0 %v1518_v13 }
  0x3d   :  { %1389 = vmatpush3.bf16.msra.mxu1 %v1517_v14 }
  0x3e   :  { %1390 = vmatprep.subr.bf16.mxu1 %v1520_v15 }
  0x3f   :  { %1369 = vmatpush3.bf16.msra.mxu0 %v1519_v16 }
  0x40   :  { %1398 = vmatprep.subr.bf16.mxu0 %v1522_v18 }
  0x41   :  { %1391 = vmatpush3.bf16.msra.mxu1 %v1521_v19 }
  0x42   :  { %1028 = vmatmul.mubr.bf16.vlgmr.msra.gmra.mrb[4].mxu0 %v253_v17  ;;  %1420 = vmatprep.subr.bf16.mxu1 %v1524_v20 }
  0x43   :  { %1399 = vmatpush3.bf16.msra.mxu0 %v1523_v21 }
  0x44   :  { %1068 = vmatmul.mubr.bf16.vlgmr.msra.gmra.mrb[4].mxu1 %v269_v22  ;;  %1400 = vmatprep.subr.bf16.mxu0 %v1526_v23 }
  0x45   :  { %1421 = vmatpush3.bf16.msra.mxu1 %v1525_v24 }
  0x46   :  { %1422 = vmatprep.subr.bf16.mxu1 %v1528_v25 }
  0x47   :  { %1401 = vmatpush3.bf16.msra.mxu0 %v1527_v26 }
  0x48   :  { %1402 = vmatprep.subr.bf16.mxu0 %v1530_v27 }
  0x49   :  { %1423 = vmatpush3.bf16.msra.mxu1 %v1529_v28 }
  0x4a   :  { %1424 = vmatprep.subr.bf16.mxu1 %v1532_v29 }
  0x4b   :  { %1403 = vmatpush3.bf16.msra.mxu0 %v1531_v30 }
  0x4c   :  { %1404 = vmatprep.subr.bf16.mxu0 %v1534_v31 }
  0x4d   :  { %1425 = vmatpush3.bf16.msra.mxu1 %v1533_v32 }
  0x4e   :  { %1426 = vmatprep.subr.bf16.mxu1 %v1536_v33 }
  0x4f   :  { %1405 = vmatpush3.bf16.msra.mxu0 %v1535_v34 }
  0x50   :  { %1406 = vmatprep.subr.bf16.mxu0 %v1538_v35 }
  0x51   :  { %1427 = vmatpush3.bf16.msra.mxu1 %v1537_v36 }
  0x52   :  { %1428 = vmatprep.subr.bf16.mxu1 %v1540_v37 }
  0x53   :  { %1407 = vmatpush3.bf16.msra.mxu0 %v1539_v38 }
  0x54   :  { %1408 = vmatprep.subr.bf16.mxu0 %v1542_v39 }
  0x55   :  { %1429 = vmatpush3.bf16.msra.mxu1 %v1541_v40 }
  0x56   :  { %1430 = vmatprep.subr.bf16.mxu1 %v1544_v42 }
  0x57   :  { %8 = vsyncpa [#allocation3], 0  ;;  %1409 = vmatpush3.bf16.msra.mxu0 %v1543_v43  ;;  %v1547_v49 = vld [vmem:[%s1939_s1 + $0x230] sm:$0xff]   ;;  %v287_v50 = vcombine.high %v279_v47, %v279_v47  ;;  %v1550_v51 = vld [vmem:[%s1939_s1 + $0x278] sm:$0xff]   ;;  %v294_v57 = vrot.slane %v279_v47, %v1710_v41  ;;  %v272_v59 = vcombine.high %v17_v45, %v17_v45  ;;  %v1582_v61 = vmov 0.0  }
  0x58   :  { %1410 = vmatprep.subr.bf16.mxu0 %v1546_v44  ;;  %v1549_v52 = vld [vmem:[%s1939_s1 + $0x2b0] sm:$0xff]   ;;  %v1552_v54 = vld [vmem:[%s1939_s1 + $0x2f8] sm:$0xff]   ;;  %v1555_v60 = vld [vmem:[%s1939_s1 + $0x300] sm:$0xff]   ;;  %vm1583_vm0 = vmmov 0   ;;  %vm911_vm1 = vcmask 261120  }
  0x59   :  { %1431 = vmatpush3.bf16.msra.mxu1 %v1545_v46  ;;  %v308_v53 = vrot.slane %v287_v50, %v1710_v41  ;;  %v1551_v55 = vld [vmem:[%s1939_s1 + $0x238] sm:$0xff]   ;;  %v309_v62 = vcombine.high %v294_v57, %v294_v57  ;;  %v286_v63 = vrot.slane %v272_v59, %v1710_v41  ;;  %v1556_v0 = vld [vmem:[%s1939_s1 + $0x308] sm:$0xff]   ;;  %v1210_v3 = vld [vmem:[%s1940_s2] ss:$0 sm:$0xff] }
  0x5a   :  { %1432 = vmatprep.subr.bf16.mxu1 %v1548_v48  ;;  %v1553_v58 = vld [vmem:[%s1939_s1 + $0x2b8] sm:$0xff]   ;;  %s1584_s1 = smov [#allocation2]  }
  0x5b   :  { %1411 = vmatpush3.bf16.msra.mxu0 %v1547_v49  ;;  %1107 = vmatprep.mubr.bf16.mxu0 %v308_v53  ;;  %v310_v56 = vcombine.high %v308_v53, %v308_v53  ;;  %v301_v1 = vrot.slane %v286_v63, %v1710_v41  ;;  %s1202_s2 = sshll.u32 %s1584_s1, 4  ;;  %s1203_s2 = int_to_ptr.vmem [resolvable:$true] %s1202_s2 }
  0x5c   :  { %1412 = vmatprep.subr.bf16.mxu0 %v1550_v51  ;;  %s1557_s24 = scalar_lea.vmem %s1203_s2, 32  ;;  %p1562_p1 = scmp.lt.s32.totalorder %s1203_s2, %s1203_s2 }
  0x5d   :  { %1433 = vmatpush3.bf16.msra.mxu1 %v1549_v52  ;;  %1147 = vmatprep.mubr.bf16.mxu1 %v310_v56  ;;  %p1558_p0 = scmp.ne.s32.totalorder %s1203_s2, %s1557_s24  ;;  %p1563_p2 = scmp.lt.s32.totalorder %s1557_s24, %s1557_s24 }
  0x5e   :  { %1434 = vmatprep.subr.bf16.mxu1 %v1552_v54 }
  0x5f   :  { %1413 = vmatpush3.bf16.msra.mxu0 %v1551_v55  ;;  %p1564_p3 = por %p1563_p2, %p1562_p1 }
  0x60   :  { %1445 = vmatprep.subr.bf16.mxu0 %v1582_v61 }
  0x61   :  { %1435 = vmatpush3.bf16.msra.mxu1 %v1553_v58  ;;  %p1565_p4 = pnand %p1564_p3, %p1558_p0 }
  0x62   :  { %1108 = vmatmul.mubr.bf16.vlgmr.msra.gmra.mrb[8].mxu0 %v294_v57 }
  0x63   :  { %1446 = vmatpush3.bf16.msra.mxu0 %v1555_v60  ;;  %1449 = vmatprep.mubr.msk.bf16.mxu0 %vm1583_vm0, %v1582_v61 }
  0x64   :  { %1148 = vmatmul.mubr.bf16.vlgmr.msra.gmra.mrb[8].mxu1 %v309_v62  ;;  %1447 = vmatprep.subr.bf16.mxu0 %v1582_v61 }
  0x67   :  { %1448 = vmatpush3.bf16.msra.mxu0 %v1556_v0 }
  0x6a   :  { %1450 = vmatmul.mubr.msk.bf16.vlgmr.msra.gmra.mrb[12].mxu0 %vm911_vm1, %v301_v1 }
  0xf5   :  { %v1326_v2 = vpop.f32.mrb[0].mxu0 }
  0xf6   :  { %v1327_v4 = vpop.f32.mrb[1].mxu0 }
  0xf7   :  { %v1328_v5 = vadd.f32 %v1327_v4, %v1326_v2  ;;  %v1329_v6 = vpop.f32.mrb[2].mxu0  ;;  %v1348_v7 = vpop.f32.mrb[0].mxu1 }
  0xf8   :  { %v1330_v8 = vpop.f32.mrb[3].mxu0  ;;  %v1349_v9 = vpop.f32.mrb[1].mxu1 }
  0xf9   :  { %v950_v10 = vadd.f32 %v1328_v5, %v1210_v3  ;;  %v1350_v11 = vadd.f32 %v1349_v9, %v1348_v7  ;;  %v1351_v12 = vpop.f32.mrb[2].mxu1 }
  0xfa   :  { %v1352_v13 = vpop.f32.mrb[3].mxu1 }
  0xfb   :  { %v990_v14 = vadd.f32 %v1350_v11, %v950_v10 }
 0x115   :  { %v1370_v41 = vpop.f32.mrb[4].mxu0 }
 0x116   :  { %v1371_v15 = vpop.f32.mrb[5].mxu0 }
 0x117   :  { %v1372_v16 = vadd.f32 %v1371_v15, %v1370_v41  ;;  %v1373_v17 = vpop.f32.mrb[6].mxu0  ;;  %v1392_v18 = vpop.f32.mrb[4].mxu1 }
 0x118   :  { %v1374_v19 = vpop.f32.mrb[7].mxu0  ;;  %v1393_v20 = vpop.f32.mrb[5].mxu1 }
 0x119   :  { %v1030_v21 = vadd.f32 %v1372_v16, %v990_v14  ;;  %v1394_v22 = vadd.f32 %v1393_v20, %v1392_v18  ;;  %v1395_v23 = vpop.f32.mrb[6].mxu1 }
 0x11a   :  { %v1396_v24 = vpop.f32.mrb[7].mxu1 }
 0x11b   :  { %v1070_v25 = vadd.f32 %v1394_v22, %v1030_v21 }
 0x135   :  { %v1414_v26 = vpop.f32.mrb[8].mxu0 }
 0x136   :  { %v1415_v27 = vpop.f32.mrb[9].mxu0 }
 0x137   :  { %v1416_v28 = vadd.f32 %v1415_v27, %v1414_v26  ;;  %v1436_v29 = vpop.f32.mrb[8].mxu1  ;;  %v1417_v30 = vpop.f32.mrb[10].mxu0 }
 0x138   :  { %v1437_v31 = vpop.f32.mrb[9].mxu1  ;;  %v1418_v32 = vpop.f32.mrb[11].mxu0 }
 0x139   :  { %v1110_v33 = vadd.f32 %v1416_v28, %v1070_v25  ;;  %v1438_v34 = vadd.f32 %v1437_v31, %v1436_v29  ;;  %v1439_v35 = vpop.f32.mrb[10].mxu1 }
 0x13a   :  { %v1440_v36 = vpop.f32.mrb[11].mxu1 }
 0x13b   :  { %v1150_v37 = vadd.f32 %v1438_v34, %v1110_v33 }
 0x13d   :  { %v1189_v38 = vpop.f32.mrb[12].mxu0 }
 0x13e   :  { %v1190_v39 = vadd.f32 %v1189_v38, %v1150_v37  ;;  %v1451_v40 = vpop.f32.mrb[13].mxu0 }
 0x13f   :  { %v1192_v42 = vpop.f32.mrb[14].mxu0 }
 0x140   :  { %1195 = vst [vmem:[#allocation2] sm:$0x3] %v1190_v39  ;;  %v1452_v43 = vpop.f32.mrb[15].mxu0 }
 0x141   :  { %1568 = shalt.err (!%p1565_p4)
}
 0x142   :  { %s1569_s27 = scalar_lea.hbm %s1941_s3, 32 }
 0x143   :  { %p1570_p5 = scmp.ne.s32.totalorder %s1941_s3, %s1569_s27  ;;  %p1573_p6 = scmp.lt.u32.totalorder %s1569_s27, %s1941_s3 }
 0x145   :  { %p1575_p7 = pnand %p1573_p6, %p1570_p5 }
 0x147   :  { %1578 = shalt.err (!%p1575_p7)
}
 0x148   :  { %1205 = dma.vmem_to_hbm [thread:$0]  %s1203_s2, 32, %s1941_s3, [#allocation3]  }
 0x149   :  { %1579 = dma.done.wait [#allocation3], 32  }
 0x14a   :  { %1580 = vsyncadd [#allocation3], 4294967264 }
 0x14b   :  { %1209 = vsyncpa [#allocation3], 1 }

</bundles_post_ra>
